<compile_context>
chip_gen: v7x
topology: tpu7x:2x2x1
jax: 0.10.0
libtpu: 0.0.40
codegen_flags: <defaults>
</compile_context>

<pallas_src>
import functools

import jax
import jax.numpy as jnp
import numpy as np
from jax.experimental import pallas as pl
from jax.experimental.pallas import tpu as pltpu

EPS = 1e-5
LANE = 128
_FALLBACK_VMEM = 64 * 1024 * 1024


def _round_up(x, m):
    return (x + m - 1) // m * m


def _vmem_limit_bytes():
    """Generation-aware scoped-VMEM limit (leave headroom below physical)."""
    cap = _FALLBACK_VMEM
    try:
        info = pltpu.get_tpu_info()
        cap = int(getattr(info, "vmem_capacity_bytes", cap) or cap)
    except Exception:
        pass
    # v5e/v6e (128 MiB) -> 96 MiB; v7x (64 MiB) -> 48 MiB.
    return max(32 * 1024 * 1024, min(cap * 3 // 4, 100 * 1024 * 1024))


# ------------------- single-buffering support probe ------------------------ #

_BUFFERED_SINGLE_OK = None


def _probe_kernel(x_ref, o_ref):
    o_ref[...] = x_ref[...] + 1.0


def _buffered_single_ok():
    """Probe once whether pipeline_mode=pl.Buffered(1) works end-to-end."""
    global _BUFFERED_SINGLE_OK
    if _BUFFERED_SINGLE_OK is None:
        ok = False
        if hasattr(pl, "Buffered"):
            try:
                spec = pl.BlockSpec((8, 128), lambda i: (0, 0),
                                    pipeline_mode=pl.Buffered(1))
                probe = pl.pallas_call(
                    _probe_kernel,
                    out_shape=jax.ShapeDtypeStruct((16, 128), jnp.float32),
                    grid=(2,),
                    in_specs=[spec],
                    out_specs=pl.BlockSpec((8, 128), lambda i: (i, 0)),
                )
                jax.block_until_ready(probe(jnp.zeros((8, 128), jnp.float32)))
                ok = True
            except Exception:
                ok = False
        _BUFFERED_SINGLE_OK = ok
    return _BUFFERED_SINGLE_OK


def _resident_spec(block_shape, index_map):
    """BlockSpec for grid-invariant operands; single-buffered when supported."""
    if _buffered_single_ok():
        return pl.BlockSpec(block_shape, index_map, pipeline_mode=pl.Buffered(1))
    return pl.BlockSpec(block_shape, index_map)


# ----------------------------- in-kernel helpers ---------------------------- #

def _col_masks(W, HW):
    """Per-tap column-validity masks, generated in-kernel (no HBM mask input)."""
    col = jax.lax.broadcasted_iota(jnp.int32, (HW, 1), 0) % W
    return {-1: col > 0, 0: None, 1: col < (W - 1)}


def _conv3x3_accumulate(load_tap, w_ref, masks, *, W, HW, E):
    """3x3 'same' conv as 9 shifted, masked bf16 matmuls accumulated in f32.

    load_tap(start) returns the (HW, C) bf16 window of the zero-row-extended
    flat activation starting at row `start`.  Row (H) boundaries are handled by
    the zero extension; column (W) boundaries by the per-tap select mask.
    """
    acc = None
    for dy in range(3):
        for dx in range(3):
            oy, ox = dy - 1, dx - 1
            start = E + oy * W + ox                       # static offset
            lhs = load_tap(start)                         # (HW, C) bf16
            m = masks[ox]
            if m is not None:
                lhs = jnp.where(m, lhs, jnp.zeros_like(lhs))
            contrib = jnp.dot(lhs, w_ref[dy * 3 + dx],
                              preferred_element_type=jnp.float32)
            acc = contrib if acc is None else acc + contrib
    return acc
    # TODO(synk): pack conv1's 9 tiny-K (Cin) taps into one (HW, 9*Cin) matmul
    #   (and pair conv2 taps to K=256 for v6e/v7x's 256-wide MXU) once the
    #   lane-concat layout cost is verified in a bundle dump.


# ------------------------------ Pallas kernels ------------------------------ #

def _conv1_stats_kernel(xe_ref, w1_ref, h1_ref, s1_ref, q1_ref, *, W, HW, E):
    masks = _col_masks(W, HW)
    acc = _conv3x3_accumulate(lambda st: xe_ref[0, pl.ds(st, HW), :],
                              w1_ref, masks, W=W, HW=HW, E=E)
    h1_ref[...] = acc.astype(h1_ref.dtype)                # bf16 HBM intermediate
    # Per-image partial sums (f32); reduced in the wrapper.
    s1_ref[0] = jnp.sum(acc, axis=0, keepdims=True)
    q1_ref[0] = jnp.sum(acc * acc, axis=0, keepdims=True)


def _bn1_relu_conv2_stats_kernel(h1_ref, sc_ref, sh_ref, w2_ref,
                                 h2_ref, s2_ref, q2_ref, ext_ref,
                                 *, W, HW, E):
    F = ext_ref.shape[-1]
    # Zero the halo bands unconditionally (cheap; safe under megacore sharding).
    band = jnp.zeros((E, F), ext_ref.dtype)
    ext_ref[pl.ds(0, E), :] = band
    ext_ref[pl.ds(E + HW, E), :] = band

    # bn1 (folded affine, f32) + ReLU, staged into the bf16 VMEM slab.
    a1 = jnp.maximum(h1_ref[...].astype(jnp.float32) * sc_ref[...] + sh_ref[...],
                     0.0)
    ext_ref[pl.ds(E, HW), :] = a1.astype(ext_ref.dtype)   # aligned bf16 store

    masks = _col_masks(W, HW)
    acc = _conv3x3_accumulate(lambda st: ext_ref[pl.ds(st, HW), :],
                              w2_ref, masks, W=W, HW=HW, E=E)
    h2_ref[...] = acc.astype(h2_ref.dtype)                # bf16 HBM intermediate
    s2_ref[0] = jnp.sum(acc, axis=0, keepdims=True)
    q2_ref[0] = jnp.sum(acc * acc, axis=0, keepdims=True)


def _bn2_shortcut_relu_kernel(h2_ref, x_ref, ws_ref, sc_ref, sh_ref, out_ref):
    # 1x1 shortcut conv (bias folded into sh_ref) + bn2 affine + add + ReLU.
    idn = jnp.dot(x_ref[0], ws_ref[...], preferred_element_type=jnp.float32)
    out_ref[...] = jnp.maximum(
        h2_ref[...].astype(jnp.float32) * sc_ref[...] + sh_ref[...] + idn, 0.0)


# ------------------------------ JAX wrapper --------------------------------- #

def residual_block_forward(x_nchw, params):
    """Pallas implementation of ResidualBlock.forward (NCHW in, NCHW out)."""
    N, Cin, H, W = x_nchw.shape
    Cout = params["w1"].shape[0]
    F = _round_up(Cout, LANE)                 # lane-dense channel padding
    HW = H * W
    assert HW % 16 == 0, "H*W must be a multiple of 16 (bf16 sublane tile)"
    E = _round_up(W + 1, 16)                  # zero-row halo (>= W+1, aligned)
    M = N * HW
    f32, bf16 = jnp.float32, jnp.bfloat16
    vmem_limit = _vmem_limit_bytes()

    # --- layout / parameter prep (cheap XLA ops on small tensors) --- #
    x_nhwc = jnp.transpose(x_nchw, (0, 2, 3, 1))
    x_flat = x_nhwc.reshape(N, HW, Cin).astype(bf16)       # compact, for kernel 3
    zpad = jnp.zeros((N, E, Cin), bf16)
    xe = jnp.concatenate([zpad, x_flat, zpad], axis=1)     # (N, HW+2E, Cin) bf16

    pad_c = F - Cout
    w1m = jnp.transpose(params["w1"], (2, 3, 1, 0)).reshape(9, Cin, Cout)
    w1m = jnp.pad(w1m, ((0, 0), (0, 0), (0, pad_c))).astype(bf16)
    w2m = jnp.transpose(params["w2"], (2, 3, 1, 0)).reshape(9, Cout, Cout)
    w2m = jnp.pad(w2m, ((0, 0), (0, pad_c), (0, pad_c))).astype(bf16)
    wsm = jnp.pad(params["ws"][:, :, 0, 0].T, ((0, 0), (0, pad_c))).astype(bf16)
    bsp = jnp.pad(params["bs"], (0, pad_c)).astype(f32)
    g1 = jnp.pad(params["g1"], (0, pad_c)).astype(f32)
    b1 = jnp.pad(params["b1"], (0, pad_c)).astype(f32)
    g2 = jnp.pad(params["g2"], (0, pad_c)).astype(f32)
    b2 = jnp.pad(params["b2"], (0, pad_c)).astype(f32)

    # --- shared BlockSpecs --- #
    row_spec = pl.BlockSpec((HW, F), lambda n: (n, 0))            # per-image rows
    stat_spec = pl.BlockSpec((1, 1, F), lambda n: (n, 0, 0))      # per-image stats
    xe_spec = pl.BlockSpec((1, HW + 2 * E, Cin), lambda n: (n, 0, 0))
    x_spec = pl.BlockSpec((1, HW, Cin), lambda n: (n, 0, 0))

    # --- kernel 1: conv1 (+ per-image channel sum / sumsq) --- #
    conv1 = pl.pallas_call(
        functools.partial(_conv1_stats_kernel, W=W, HW=HW, E=E),
        out_shape=(jax.ShapeDtypeStruct((M, F), bf16),
                   jax.ShapeDtypeStruct((N, 1, F), f32),
                   jax.ShapeDtypeStruct((N, 1, F), f32)),
        grid=(N,),
        in_specs=[xe_spec,
                  _resident_spec((9, Cin, F), lambda n: (0, 0, 0))],
        out_specs=(row_spec, stat_spec, stat_spec),
        compiler_params=pltpu.CompilerParams(
            dimension_semantics=("parallel",),
            vmem_limit_bytes=vmem_limit),
        cost_estimate=pl.CostEstimate(
            flops=2 * M * 9 * Cin * F, transcendentals=0,
            bytes_accessed=int(xe.size * 2 + M * F * 2 + 9 * Cin * F * 2)),
    )
    h1, s1p, q1p = conv1(xe, w1m)

    # Fold bn1 batch stats into a single scale/shift FMA (f32 reduction).
    cnt = float(M)
    s1 = jnp.sum(s1p, axis=0)                               # (1, F)
    q1 = jnp.sum(q1p, axis=0)
    mean1 = s1 / cnt
    var1 = jnp.maximum(q1 / cnt - mean1 * mean1, 0.0)
    scale1 = g1[None, :] * jax.lax.rsqrt(var1 + EPS)
    shift1 = b1[None, :] - mean1 * scale1

    # --- kernel 2: bn1 -> ReLU -> conv2 (+ stats), a1 never leaves VMEM --- #
    conv2 = pl.pallas_call(
        functools.partial(_bn1_relu_conv2_stats_kernel, W=W, HW=HW, E=E),
        out_shape=(jax.ShapeDtypeStruct((M, F), bf16),
                   jax.ShapeDtypeStruct((N, 1, F), f32),
                   jax.ShapeDtypeStruct((N, 1, F), f32)),
        grid=(N,),
        in_specs=[row_spec,
                  _resident_spec((1, F), lambda n: (0, 0)),
                  _resident_spec((1, F), lambda n: (0, 0)),
                  _resident_spec((9, F, F), lambda n: (0, 0, 0))],
        out_specs=(row_spec, stat_spec, stat_spec),
        scratch_shapes=[pltpu.VMEM((HW + 2 * E, F), bf16)],
        compiler_params=pltpu.CompilerParams(
            dimension_semantics=("parallel",),
            vmem_limit_bytes=vmem_limit),
        cost_estimate=pl.CostEstimate(
            flops=2 * M * 9 * F * F, transcendentals=0,
            bytes_accessed=int(2 * M * F * 2 + 9 * F * F * 2)),
    )
    h2, s2p, q2p = conv2(h1, scale1, shift1, w2m)

    # Fold bn2 batch stats + shortcut bias into scale/shift.
    s2 = jnp.sum(s2p, axis=0)
    q2 = jnp.sum(q2p, axis=0)
    mean2 = s2 / cnt
    var2 = jnp.maximum(q2 / cnt - mean2 * mean2, 0.0)
    scale2 = g2[None, :] * jax.lax.rsqrt(var2 + EPS)
    shift2 = b2[None, :] - mean2 * scale2 + bsp[None, :]

    # --- kernel 3: bn2 + 1x1 shortcut + residual add + ReLU --- #
    final = pl.pallas_call(
        _bn2_shortcut_relu_kernel,
        out_shape=jax.ShapeDtypeStruct((M, F), f32),
        grid=(N,),
        in_specs=[row_spec, x_spec,
                  _resident_spec((Cin, F), lambda n: (0, 0)),
                  _resident_spec((1, F), lambda n: (0, 0)),
                  _resident_spec((1, F), lambda n: (0, 0))],
        out_specs=row_spec,
        compiler_params=pltpu.CompilerParams(
            dimension_semantics=("parallel",),
            vmem_limit_bytes=vmem_limit),
        cost_estimate=pl.CostEstimate(
            flops=2 * M * Cin * F, transcendentals=0,
            bytes_accessed=int(M * F * 2 + M * Cin * 2 + M * F * 4)),
    )
    out = final(h2, x_flat, wsm, scale2, shift2)

    out = out.reshape(N, H, W, F)[:, :, :, :Cout]
    return jnp.transpose(out, (0, 3, 1, 2))                # -> NCHW
    # TODO(synk): resample='up'/'down' and instance_norm module variants are
    #   not implemented (this config: resample=None, batch_norm, in!=out chans).
    # TODO(synk): for large images add a second grid axis tiling HW (with a
    #   +/-W-row halo) so per-image blocks fit v7x's 64 MiB VMEM.


# ------------------------- pure-JAX reference ------------------------------ #

def residual_block_reference(x_nchw, params):
    dn = ("NCHW", "OIHW", "NCHW")
    conv = lambda x, w: jax.lax.conv_general_dilated(
        x, w, (1, 1), "SAME", dimension_numbers=dn,
        precision=jax.lax.Precision.HIGHEST)

    def bn(h, g, b):
        mean = h.mean(axis=(0, 2, 3), keepdims=True)
        var = ((h - mean) ** 2).mean(axis=(0, 2, 3), keepdims=True)
        return ((h - mean) * jax.lax.rsqrt(var + EPS)
                * g[None, :, None, None] + b[None, :, None, None])

    idn = conv(x_nchw, params["ws"]) + params["bs"][None, :, None, None]
    h = conv(x_nchw, params["w1"])
    h = jnp.maximum(bn(h, params["g1"], params["b1"]), 0.0)
    h = conv(h, params["w2"])
    h = bn(h, params["g2"], params["b2"])
    return jnp.maximum(h + idn, 0.0)


# --------------------------------- main ------------------------------------ #

if __name__ == "__main__":
    N, Cin, Cout, H, W = 2, 4, 8, 16, 16
    key = jax.random.PRNGKey(0)
    k = jax.random.split(key, 8)

    x = jax.random.normal(k[0], (N, Cin, H, W), jnp.float32)
    params = {
        # conv1: Conv2d(Cin, Cout, 3, padding=1, bias=False)
        "w1": jax.random.normal(k[1], (Cout, Cin, 3, 3), jnp.float32) * 0.1,
        # conv2: Conv2d(Cout, Cout, 3, padding=1, bias=False)
        "w2": jax.random.normal(k[2], (Cout, Cout, 3, 3), jnp.float32) * 0.1,
        # shortcut: Conv2d(Cin, Cout, 1) with bias
        "ws": jax.random.normal(k[3], (Cout, Cin, 1, 1), jnp.float32) * 0.1,
        "bs": jax.random.normal(k[4], (Cout,), jnp.float32) * 0.1,
        # BatchNorm affine params
        "g1": 1.0 + 0.1 * jax.random.normal(k[5], (Cout,), jnp.float32),
        "b1": 0.1 * jax.random.normal(k[6], (Cout,), jnp.float32),
        "g2": 1.0 + 0.1 * jax.random.normal(k[7], (Cout,), jnp.float32),
        "b2": jnp.zeros((Cout,), jnp.float32),
    }

    out = jax.block_until_ready(jax.jit(residual_block_forward)(x, params))
    ref = jax.block_until_ready(jax.jit(residual_block_reference)(x, params))

    # bf16 inputs / intermediates (f32 accumulation + f32 BN stats) vs an
    # f32 HIGHEST-precision reference -> loosened tolerance.
    np.testing.assert_allclose(np.asarray(out), np.asarray(ref),
                               rtol=4e-2, atol=4e-2)
    assert out.shape == (N, Cout, H, W)

    print("KERNEL_OK")
</pallas_src>

<mosaic_0001>
module attributes {stable_mosaic.version = 11 : i64} {
  func.func @_conv1_stats_kernel(%arg0: i32, %arg1: memref<1x320x4xbf16, #tpu.memory_space<vmem>>, %arg2: memref<9x4x128xbf16, #tpu.memory_space<vmem>>, %arg3: memref<256x128xbf16, #tpu.memory_space<vmem>>, %arg4: memref<1x1x128xf32, #tpu.memory_space<vmem>>, %arg5: memref<1x1x128xf32, #tpu.memory_space<vmem>>) attributes {dimension_semantics = [#tpu.dimension_semantics<parallel>], iteration_bounds = array<i64: 2>, scalar_prefetch = 0 : i64, scratch_operands = 0 : i64, tpu.core_type = #tpu.core_type<tc>, window_params = [{transform_indices = @transform_0, window_bounds = array<i64: 1, 320, 4>}, {pipeline_mode = #tpu.pipeline_mode<synchronous>, transform_indices = @transform_1, window_bounds = array<i64: 9, 4, 128>}, {transform_indices = @transform_2, window_bounds = array<i64: 256, 128>}, {transform_indices = @transform_3, window_bounds = array<i64: 1, 1, 128>}, {transform_indices = @transform_4, window_bounds = array<i64: 1, 1, 128>}]} {
    %0 = tpu.iota {dimensions = array<i32: 0>} : vector<256x1xi32>
    %c16_i32 = arith.constant 16 : i32
    %c0_i32 = arith.constant 0 : i32
    %1 = arith.cmpi eq, %c16_i32, %c0_i32 : i32
    %c1_i32 = arith.constant 1 : i32
    %2 = arith.select %1, %c1_i32, %c16_i32 : i32
    %3 = vector.broadcast %2 : i32 to vector<256x1xi32>
    %4 = arith.remsi %0, %3 : vector<256x1xi32>
    %c0_i32_0 = arith.constant 0 : i32
    %5 = vector.broadcast %c0_i32_0 : i32 to vector<256x1xi32>
    %6 = arith.cmpi ne, %4, %5 : vector<256x1xi32>
    %c0_i32_1 = arith.constant 0 : i32
    %7 = vector.broadcast %c0_i32_1 : i32 to vector<256x1xi32>
    %8 = arith.cmpi slt, %4, %7 : vector<256x1xi32>
    %c0_i32_2 = arith.constant 0 : i32
    %9 = arith.cmpi slt, %2, %c0_i32_2 : i32
    %10 = vector.broadcast %9 : i1 to vector<256x1xi1>
    %11 = vector.broadcast %10 : vector<256x1xi1> to vector<256x1xi1>
    %12 = arith.xori %8, %11 : vector<256x1xi1>
    %13 = arith.andi %12, %6 : vector<256x1xi1>
    %14 = vector.broadcast %2 : i32 to vector<256x1xi32>
    %15 = arith.addi %4, %14 : vector<256x1xi32>
    %16 = arith.select %13, %15, %4 : vector<256x1xi1>, vector<256x1xi32>
    %c0_i32_3 = arith.constant 0 : i32
    %17 = vector.broadcast %c0_i32_3 : i32 to vector<256x1xi32>
    %18 = arith.cmpi sgt, %16, %17 : vector<256x1xi32>
    %c15_i32 = arith.constant 15 : i32
    %19 = vector.broadcast %c15_i32 : i32 to vector<256x1xi32>
    %20 = arith.cmpi slt, %16, %19 : vector<256x1xi32>
    %c0 = arith.constant 0 : index
    %c15 = arith.constant 15 : index
    %c0_4 = arith.constant 0 : index
    %21 = vector.load %arg1[%c0, %c15, %c0_4] : memref<1x320x4xbf16, #tpu.memory_space<vmem>>, vector<1x256x4xbf16>
    %22 = vector.shape_cast %21 : vector<1x256x4xbf16> to vector<256x4xbf16>
    %cst = arith.constant 0.000000e+00 : bf16
    %23 = vector.broadcast %cst : bf16 to vector<256x4xbf16>
    %24 = vector.shape_cast %18 : vector<256x1xi1> to vector<256x1xi1>
    %25 = vector.broadcast %24 : vector<256x1xi1> to vector<256x4xi1>
    %26 = arith.select %25, %22, %23 : vector<256x4xi1>, vector<256x4xbf16>
    %c0_5 = arith.constant 0 : index
    %c0_6 = arith.constant 0 : index
    %c0_7 = arith.constant 0 : index
    %27 = vector.load %arg2[%c0_5, %c0_6, %c0_7] : memref<9x4x128xbf16, #tpu.memory_space<vmem>>, vector<1x4x128xbf16>
    %28 = vector.shape_cast %27 : vector<1x4x128xbf16> to vector<4x128xbf16>
    %cst_8 = arith.constant dense<0.000000e+00> : vector<256x128xf32>
    %29 = tpu.matmul %26, %28, %cst_8 {dimension_numbers = #tpu.dot_dimension_numbers<[1], [0], [0], [1], [0, 0, 1, 1], [], []>} : vector<256x4xbf16>, vector<4x128xbf16>, vector<256x128xf32> -> vector<256x128xf32>
    %c0_9 = arith.constant 0 : index
    %c16 = arith.constant 16 : index
    %c0_10 = arith.constant 0 : index
    %30 = vector.load %arg1[%c0_9, %c16, %c0_10] : memref<1x320x4xbf16, #tpu.memory_space<vmem>>, vector<1x256x4xbf16>
    %31 = vector.shape_cast %30 : vector<1x256x4xbf16> to vector<256x4xbf16>
    %c1 = arith.constant 1 : index
    %c0_11 = arith.constant 0 : index
    %c0_12 = arith.constant 0 : index
    %32 = vector.load %arg2[%c1, %c0_11, %c0_12] : memref<9x4x128xbf16, #tpu.memory_space<vmem>>, vector<1x4x128xbf16>
    %33 = vector.shape_cast %32 : vector<1x4x128xbf16> to vector<4x128xbf16>
    %cst_13 = arith.constant dense<0.000000e+00> : vector<256x128xf32>
    %34 = tpu.matmul %31, %33, %cst_13 {dimension_numbers = #tpu.dot_dimension_numbers<[1], [0], [0], [1], [0, 0, 1, 1], [], []>} : vector<256x4xbf16>, vector<4x128xbf16>, vector<256x128xf32> -> vector<256x128xf32>
    %35 = arith.addf %29, %34 : vector<256x128xf32>
    %c0_14 = arith.constant 0 : index
    %c17 = arith.constant 17 : index
    %c0_15 = arith.constant 0 : index
    %36 = vector.load %arg1[%c0_14, %c17, %c0_15] : memref<1x320x4xbf16, #tpu.memory_space<vmem>>, vector<1x256x4xbf16>
    %37 = vector.shape_cast %36 : vector<1x256x4xbf16> to vector<256x4xbf16>
    %cst_16 = arith.constant 0.000000e+00 : bf16
    %38 = vector.broadcast %cst_16 : bf16 to vector<256x4xbf16>
    %39 = vector.shape_cast %20 : vector<256x1xi1> to vector<256x1xi1>
    %40 = vector.broadcast %39 : vector<256x1xi1> to vector<256x4xi1>
    %41 = arith.select %40, %37, %38 : vector<256x4xi1>, vector<256x4xbf16>
    %c2 = arith.constant 2 : index
    %c0_17 = arith.constant 0 : index
    %c0_18 = arith.constant 0 : index
    %42 = vector.load %arg2[%c2, %c0_17, %c0_18] : memref<9x4x128xbf16, #tpu.memory_space<vmem>>, vector<1x4x128xbf16>
    %43 = vector.shape_cast %42 : vector<1x4x128xbf16> to vector<4x128xbf16>
    %cst_19 = arith.constant dense<0.000000e+00> : vector<256x128xf32>
    %44 = tpu.matmul %41, %43, %cst_19 {dimension_numbers = #tpu.dot_dimension_numbers<[1], [0], [0], [1], [0, 0, 1, 1], [], []>} : vector<256x4xbf16>, vector<4x128xbf16>, vector<256x128xf32> -> vector<256x128xf32>
    %45 = arith.addf %35, %44 : vector<256x128xf32>
    %c0_20 = arith.constant 0 : index
    %c31 = arith.constant 31 : index
    %c0_21 = arith.constant 0 : index
    %46 = vector.load %arg1[%c0_20, %c31, %c0_21] : memref<1x320x4xbf16, #tpu.memory_space<vmem>>, vector<1x256x4xbf16>
    %47 = vector.shape_cast %46 : vector<1x256x4xbf16> to vector<256x4xbf16>
    %cst_22 = arith.constant 0.000000e+00 : bf16
    %48 = vector.broadcast %cst_22 : bf16 to vector<256x4xbf16>
    %49 = vector.shape_cast %18 : vector<256x1xi1> to vector<256x1xi1>
    %50 = vector.broadcast %49 : vector<256x1xi1> to vector<256x4xi1>
    %51 = arith.select %50, %47, %48 : vector<256x4xi1>, vector<256x4xbf16>
    %c3 = arith.constant 3 : index
    %c0_23 = arith.constant 0 : index
    %c0_24 = arith.constant 0 : index
    %52 = vector.load %arg2[%c3, %c0_23, %c0_24] : memref<9x4x128xbf16, #tpu.memory_space<vmem>>, vector<1x4x128xbf16>
    %53 = vector.shape_cast %52 : vector<1x4x128xbf16> to vector<4x128xbf16>
    %cst_25 = arith.constant dense<0.000000e+00> : vector<256x128xf32>
    %54 = tpu.matmul %51, %53, %cst_25 {dimension_numbers = #tpu.dot_dimension_numbers<[1], [0], [0], [1], [0, 0, 1, 1], [], []>} : vector<256x4xbf16>, vector<4x128xbf16>, vector<256x128xf32> -> vector<256x128xf32>
    %55 = arith.addf %45, %54 : vector<256x128xf32>
    %c0_26 = arith.constant 0 : index
    %c32 = arith.constant 32 : index
    %c0_27 = arith.constant 0 : index
    %56 = vector.load %arg1[%c0_26, %c32, %c0_27] : memref<1x320x4xbf16, #tpu.memory_space<vmem>>, vector<1x256x4xbf16>
    %57 = vector.shape_cast %56 : vector<1x256x4xbf16> to vector<256x4xbf16>
    %c4 = arith.constant 4 : index
    %c0_28 = arith.constant 0 : index
    %c0_29 = arith.constant 0 : index
    %58 = vector.load %arg2[%c4, %c0_28, %c0_29] : memref<9x4x128xbf16, #tpu.memory_space<vmem>>, vector<1x4x128xbf16>
    %59 = vector.shape_cast %58 : vector<1x4x128xbf16> to vector<4x128xbf16>
    %cst_30 = arith.constant dense<0.000000e+00> : vector<256x128xf32>
    %60 = tpu.matmul %57, %59, %cst_30 {dimension_numbers = #tpu.dot_dimension_numbers<[1], [0], [0], [1], [0, 0, 1, 1], [], []>} : vector<256x4xbf16>, vector<4x128xbf16>, vector<256x128xf32> -> vector<256x128xf32>
    %61 = arith.addf %55, %60 : vector<256x128xf32>
    %c0_31 = arith.constant 0 : index
    %c33 = arith.constant 33 : index
    %c0_32 = arith.constant 0 : index
    %62 = vector.load %arg1[%c0_31, %c33, %c0_32] : memref<1x320x4xbf16, #tpu.memory_space<vmem>>, vector<1x256x4xbf16>
    %63 = vector.shape_cast %62 : vector<1x256x4xbf16> to vector<256x4xbf16>
    %cst_33 = arith.constant 0.000000e+00 : bf16
    %64 = vector.broadcast %cst_33 : bf16 to vector<256x4xbf16>
    %65 = vector.shape_cast %20 : vector<256x1xi1> to vector<256x1xi1>
    %66 = vector.broadcast %65 : vector<256x1xi1> to vector<256x4xi1>
    %67 = arith.select %66, %63, %64 : vector<256x4xi1>, vector<256x4xbf16>
    %c5 = arith.constant 5 : index
    %c0_34 = arith.constant 0 : index
    %c0_35 = arith.constant 0 : index
    %68 = vector.load %arg2[%c5, %c0_34, %c0_35] : memref<9x4x128xbf16, #tpu.memory_space<vmem>>, vector<1x4x128xbf16>
    %69 = vector.shape_cast %68 : vector<1x4x128xbf16> to vector<4x128xbf16>
    %cst_36 = arith.constant dense<0.000000e+00> : vector<256x128xf32>
    %70 = tpu.matmul %67, %69, %cst_36 {dimension_numbers = #tpu.dot_dimension_numbers<[1], [0], [0], [1], [0, 0, 1, 1], [], []>} : vector<256x4xbf16>, vector<4x128xbf16>, vector<256x128xf32> -> vector<256x128xf32>
    %71 = arith.addf %61, %70 : vector<256x128xf32>
    %c0_37 = arith.constant 0 : index
    %c47 = arith.constant 47 : index
    %c0_38 = arith.constant 0 : index
    %72 = vector.load %arg1[%c0_37, %c47, %c0_38] : memref<1x320x4xbf16, #tpu.memory_space<vmem>>, vector<1x256x4xbf16>
    %73 = vector.shape_cast %72 : vector<1x256x4xbf16> to vector<256x4xbf16>
    %cst_39 = arith.constant 0.000000e+00 : bf16
    %74 = vector.broadcast %cst_39 : bf16 to vector<256x4xbf16>
    %75 = vector.shape_cast %18 : vector<256x1xi1> to vector<256x1xi1>
    %76 = vector.broadcast %75 : vector<256x1xi1> to vector<256x4xi1>
    %77 = arith.select %76, %73, %74 : vector<256x4xi1>, vector<256x4xbf16>
    %c6 = arith.constant 6 : index
    %c0_40 = arith.constant 0 : index
    %c0_41 = arith.constant 0 : index
    %78 = vector.load %arg2[%c6, %c0_40, %c0_41] : memref<9x4x128xbf16, #tpu.memory_space<vmem>>, vector<1x4x128xbf16>
    %79 = vector.shape_cast %78 : vector<1x4x128xbf16> to vector<4x128xbf16>
    %cst_42 = arith.constant dense<0.000000e+00> : vector<256x128xf32>
    %80 = tpu.matmul %77, %79, %cst_42 {dimension_numbers = #tpu.dot_dimension_numbers<[1], [0], [0], [1], [0, 0, 1, 1], [], []>} : vector<256x4xbf16>, vector<4x128xbf16>, vector<256x128xf32> -> vector<256x128xf32>
    %81 = arith.addf %71, %80 : vector<256x128xf32>
    %c0_43 = arith.constant 0 : index
    %c48 = arith.constant 48 : index
    %c0_44 = arith.constant 0 : index
    %82 = vector.load %arg1[%c0_43, %c48, %c0_44] : memref<1x320x4xbf16, #tpu.memory_space<vmem>>, vector<1x256x4xbf16>
    %83 = vector.shape_cast %82 : vector<1x256x4xbf16> to vector<256x4xbf16>
    %c7 = arith.constant 7 : index
    %c0_45 = arith.constant 0 : index
    %c0_46 = arith.constant 0 : index
    %84 = vector.load %arg2[%c7, %c0_45, %c0_46] : memref<9x4x128xbf16, #tpu.memory_space<vmem>>, vector<1x4x128xbf16>
    %85 = vector.shape_cast %84 : vector<1x4x128xbf16> to vector<4x128xbf16>
    %cst_47 = arith.constant dense<0.000000e+00> : vector<256x128xf32>
    %86 = tpu.matmul %83, %85, %cst_47 {dimension_numbers = #tpu.dot_dimension_numbers<[1], [0], [0], [1], [0, 0, 1, 1], [], []>} : vector<256x4xbf16>, vector<4x128xbf16>, vector<256x128xf32> -> vector<256x128xf32>
    %87 = arith.addf %81, %86 : vector<256x128xf32>
    %c0_48 = arith.constant 0 : index
    %c49 = arith.constant 49 : index
    %c0_49 = arith.constant 0 : index
    %88 = vector.load %arg1[%c0_48, %c49, %c0_49] : memref<1x320x4xbf16, #tpu.memory_space<vmem>>, vector<1x256x4xbf16>
    %89 = vector.shape_cast %88 : vector<1x256x4xbf16> to vector<256x4xbf16>
    %cst_50 = arith.constant 0.000000e+00 : bf16
    %90 = vector.broadcast %cst_50 : bf16 to vector<256x4xbf16>
    %91 = vector.shape_cast %20 : vector<256x1xi1> to vector<256x1xi1>
    %92 = vector.broadcast %91 : vector<256x1xi1> to vector<256x4xi1>
    %93 = arith.select %92, %89, %90 : vector<256x4xi1>, vector<256x4xbf16>
    %c8 = arith.constant 8 : index
    %c0_51 = arith.constant 0 : index
    %c0_52 = arith.constant 0 : index
    %94 = vector.load %arg2[%c8, %c0_51, %c0_52] : memref<9x4x128xbf16, #tpu.memory_space<vmem>>, vector<1x4x128xbf16>
    %95 = vector.shape_cast %94 : vector<1x4x128xbf16> to vector<4x128xbf16>
    %cst_53 = arith.constant dense<0.000000e+00> : vector<256x128xf32>
    %96 = tpu.matmul %93, %95, %cst_53 {dimension_numbers = #tpu.dot_dimension_numbers<[1], [0], [0], [1], [0, 0, 1, 1], [], []>} : vector<256x4xbf16>, vector<4x128xbf16>, vector<256x128xf32> -> vector<256x128xf32>
    %97 = arith.addf %87, %96 : vector<256x128xf32>
    %98 = arith.truncf %97 : vector<256x128xf32> to vector<256x128xbf16>
    %c0_54 = arith.constant 0 : index
    %c0_55 = arith.constant 0 : index
    %99 = vector.load %arg3[%c0_54, %c0_55] : memref<256x128xbf16, #tpu.memory_space<vmem>>, vector<256x128xbf16>
    tpu.vector_store %arg3[%c0_54, %c0_55], %98 {strides = array<i32>} : memref<256x128xbf16, #tpu.memory_space<vmem>>, vector<256x128xbf16>,
    %cst_56 = arith.constant dense<0.000000e+00> : vector<128xf32>
    %100 = vector.multi_reduction <add>, %97, %cst_56 [0] : vector<256x128xf32> to vector<128xf32>
    %101 = vector.shape_cast %100 : vector<128xf32> to vector<1x128xf32>
    %c0_57 = arith.constant 0 : index
    %c0_58 = arith.constant 0 : index
    %c0_59 = arith.constant 0 : index
    %102 = vector.load %arg4[%c0_57, %c0_58, %c0_59] : memref<1x1x128xf32, #tpu.memory_space<vmem>>, vector<1x1x128xf32>
    %103 = vector.shape_cast %102 : vector<1x1x128xf32> to vector<1x128xf32>
    %104 = vector.shape_cast %101 : vector<1x128xf32> to vector<1x1x128xf32>
    tpu.vector_store %arg4[%c0_57, %c0_58, %c0_59], %104 {strides = array<i32>} : memref<1x1x128xf32, #tpu.memory_space<vmem>>, vector<1x1x128xf32>,
    %105 = arith.mulf %97, %97 : vector<256x128xf32>
    %cst_60 = arith.constant dense<0.000000e+00> : vector<128xf32>
    %106 = vector.multi_reduction <add>, %105, %cst_60 [0] : vector<256x128xf32> to vector<128xf32>
    %107 = vector.shape_cast %106 : vector<128xf32> to vector<1x128xf32>
    %c0_61 = arith.constant 0 : index
    %c0_62 = arith.constant 0 : index
    %c0_63 = arith.constant 0 : index
    %108 = vector.load %arg5[%c0_61, %c0_62, %c0_63] : memref<1x1x128xf32, #tpu.memory_space<vmem>>, vector<1x1x128xf32>
    %109 = vector.shape_cast %108 : vector<1x1x128xf32> to vector<1x128xf32>
    %110 = vector.shape_cast %107 : vector<1x128xf32> to vector<1x1x128xf32>
    tpu.vector_store %arg5[%c0_61, %c0_62, %c0_63], %110 {strides = array<i32>} : memref<1x1x128xf32, #tpu.memory_space<vmem>>, vector<1x1x128xf32>,
    return
  }
  func.func @transform_0(%arg0: i32) -> (i32, i32, i32) {
    %c0_i32 = arith.constant 0 : i32
    %c0_i32_0 = arith.constant 0 : i32
    %c0_i32_1 = arith.constant 0 : i32
    return %arg0, %c0_i32, %c0_i32_0 : i32, i32, i32
  }
  func.func @transform_1(%arg0: i32) -> (i32, i32, i32) {
    %c0_i32 = arith.constant 0 : i32
    %c0_i32_0 = arith.constant 0 : i32
    %c0_i32_1 = arith.constant 0 : i32
    %c0_i32_2 = arith.constant 0 : i32
    return %c0_i32, %c0_i32_0, %c0_i32_1 : i32, i32, i32
  }
  func.func @transform_2(%arg0: i32) -> (i32, i32) {
    %c0_i32 = arith.constant 0 : i32
    %c0_i32_0 = arith.constant 0 : i32
    return %arg0, %c0_i32 : i32, i32
  }
  func.func @transform_3(%arg0: i32) -> (i32, i32, i32) {
    %c0_i32 = arith.constant 0 : i32
    %c0_i32_0 = arith.constant 0 : i32
    %c0_i32_1 = arith.constant 0 : i32
    return %arg0, %c0_i32, %c0_i32_0 : i32, i32, i32
  }
  func.func @transform_4(%arg0: i32) -> (i32, i32, i32) {
    %c0_i32 = arith.constant 0 : i32
    %c0_i32_0 = arith.constant 0 : i32
    %c0_i32_1 = arith.constant 0 : i32
    return %arg0, %c0_i32, %c0_i32_0 : i32, i32, i32
  }
}

module attributes {stable_mosaic.version = 11 : i64} {
  func.func @_bn1_relu_conv2_stats_kernel(%arg0: i32, %arg1: memref<256x128xbf16, #tpu.memory_space<vmem>>, %arg2: memref<1x128xf32, #tpu.memory_space<vmem>>, %arg3: memref<1x128xf32, #tpu.memory_space<vmem>>, %arg4: memref<9x128x128xbf16, #tpu.memory_space<vmem>>, %arg5: memref<256x128xbf16, #tpu.memory_space<vmem>>, %arg6: memref<1x1x128xf32, #tpu.memory_space<vmem>>, %arg7: memref<1x1x128xf32, #tpu.memory_space<vmem>>, %arg8: memref<320x128xbf16, #tpu.memory_space<vmem>>) attributes {dimension_semantics = [#tpu.dimension_semantics<parallel>], iteration_bounds = array<i64: 2>, scalar_prefetch = 0 : i64, scratch_operands = 1 : i64, tpu.core_type = #tpu.core_type<tc>, window_params = [{transform_indices = @transform_0, window_bounds = array<i64: 256, 128>}, {pipeline_mode = #tpu.pipeline_mode<synchronous>, transform_indices = @transform_1, window_bounds = array<i64: 1, 128>}, {pipeline_mode = #tpu.pipeline_mode<synchronous>, transform_indices = @transform_2, window_bounds = array<i64: 1, 128>}, {pipeline_mode = #tpu.pipeline_mode<synchronous>, transform_indices = @transform_3, window_bounds = array<i64: 9, 128, 128>}, {transform_indices = @transform_4, window_bounds = array<i64: 256, 128>}, {transform_indices = @transform_5, window_bounds = array<i64: 1, 1, 128>}, {transform_indices = @transform_6, window_bounds = array<i64: 1, 1, 128>}]} {
    %cst = arith.constant 0.000000e+00 : bf16
    %0 = vector.broadcast %cst : bf16 to vector<32x128xbf16>
    %c0 = arith.constant 0 : index
    %c0_0 = arith.constant 0 : index
    %1 = vector.load %arg8[%c0, %c0_0] : memref<320x128xbf16, #tpu.memory_space<vmem>>, vector<32x128xbf16>
    tpu.vector_store %arg8[%c0, %c0_0], %0 {strides = array<i32>} : memref<320x128xbf16, #tpu.memory_space<vmem>>, vector<32x128xbf16>,
    %c288 = arith.constant 288 : index
    %c0_1 = arith.constant 0 : index
    %2 = vector.load %arg8[%c288, %c0_1] : memref<320x128xbf16, #tpu.memory_space<vmem>>, vector<32x128xbf16>
    tpu.vector_store %arg8[%c288, %c0_1], %0 {strides = array<i32>} : memref<320x128xbf16, #tpu.memory_space<vmem>>, vector<32x128xbf16>,
    %c0_2 = arith.constant 0 : index
    %c0_3 = arith.constant 0 : index
    %3 = vector.load %arg1[%c0_2, %c0_3] : memref<256x128xbf16, #tpu.memory_space<vmem>>, vector<256x128xbf16>
    %4 = arith.extf %3 : vector<256x128xbf16> to vector<256x128xf32>
    %c0_4 = arith.constant 0 : index
    %c0_5 = arith.constant 0 : index
    %5 = vector.load %arg2[%c0_4, %c0_5] : memref<1x128xf32, #tpu.memory_space<vmem>>, vector<1x128xf32>
    %6 = vector.broadcast %5 : vector<1x128xf32> to vector<256x128xf32>
    %7 = arith.mulf %4, %6 : vector<256x128xf32>
    %c0_6 = arith.constant 0 : index
    %c0_7 = arith.constant 0 : index
    %8 = vector.load %arg3[%c0_6, %c0_7] : memref<1x128xf32, #tpu.memory_space<vmem>>, vector<1x128xf32>
    %9 = vector.broadcast %8 : vector<1x128xf32> to vector<256x128xf32>
    %10 = arith.addf %7, %9 : vector<256x128xf32>
    %cst_8 = arith.constant 0.000000e+00 : f32
    %11 = vector.broadcast %cst_8 : f32 to vector<256x128xf32>
    %12 = arith.maximumf %10, %11 : vector<256x128xf32>
    %13 = arith.truncf %12 : vector<256x128xf32> to vector<256x128xbf16>
    %c32 = arith.constant 32 : index
    %c0_9 = arith.constant 0 : index
    %14 = vector.load %arg8[%c32, %c0_9] : memref<320x128xbf16, #tpu.memory_space<vmem>>, vector<256x128xbf16>
    tpu.vector_store %arg8[%c32, %c0_9], %13 {strides = array<i32>} : memref<320x128xbf16, #tpu.memory_space<vmem>>, vector<256x128xbf16>,
    %15 = tpu.iota {dimensions = array<i32: 0>} : vector<256x1xi32>
    %c16_i32 = arith.constant 16 : i32
    %c0_i32 = arith.constant 0 : i32
    %16 = arith.cmpi eq, %c16_i32, %c0_i32 : i32
    %c1_i32 = arith.constant 1 : i32
    %17 = arith.select %16, %c1_i32, %c16_i32 : i32
    %18 = vector.broadcast %17 : i32 to vector<256x1xi32>
    %19 = arith.remsi %15, %18 : vector<256x1xi32>
    %c0_i32_10 = arith.constant 0 : i32
    %20 = vector.broadcast %c0_i32_10 : i32 to vector<256x1xi32>
    %21 = arith.cmpi ne, %19, %20 : vector<256x1xi32>
    %c0_i32_11 = arith.constant 0 : i32
    %22 = vector.broadcast %c0_i32_11 : i32 to vector<256x1xi32>
    %23 = arith.cmpi slt, %19, %22 : vector<256x1xi32>
    %c0_i32_12 = arith.constant 0 : i32
    %24 = arith.cmpi slt, %17, %c0_i32_12 : i32
    %25 = vector.broadcast %24 : i1 to vector<256x1xi1>
    %26 = vector.broadcast %25 : vector<256x1xi1> to vector<256x1xi1>
    %27 = arith.xori %23, %26 : vector<256x1xi1>
    %28 = arith.andi %27, %21 : vector<256x1xi1>
    %29 = vector.broadcast %17 : i32 to vector<256x1xi32>
    %30 = arith.addi %19, %29 : vector<256x1xi32>
    %31 = arith.select %28, %30, %19 : vector<256x1xi1>, vector<256x1xi32>
    %c0_i32_13 = arith.constant 0 : i32
    %32 = vector.broadcast %c0_i32_13 : i32 to vector<256x1xi32>
    %33 = arith.cmpi sgt, %31, %32 : vector<256x1xi32>
    %c15_i32 = arith.constant 15 : i32
    %34 = vector.broadcast %c15_i32 : i32 to vector<256x1xi32>
    %35 = arith.cmpi slt, %31, %34 : vector<256x1xi32>
    %c15 = arith.constant 15 : index
    %c0_14 = arith.constant 0 : index
    %36 = vector.load %arg8[%c15, %c0_14] : memref<320x128xbf16, #tpu.memory_space<vmem>>, vector<256x128xbf16>
    %cst_15 = arith.constant 0.000000e+00 : bf16
    %37 = vector.broadcast %cst_15 : bf16 to vector<256x128xbf16>
    %38 = vector.shape_cast %33 : vector<256x1xi1> to vector<256x1xi1>
    %39 = vector.broadcast %38 : vector<256x1xi1> to vector<256x128xi1>
    %40 = arith.select %39, %36, %37 : vector<256x128xi1>, vector<256x128xbf16>
    %c0_16 = arith.constant 0 : index
    %c0_17 = arith.constant 0 : index
    %c0_18 = arith.constant 0 : index
    %41 = vector.load %arg4[%c0_16, %c0_17, %c0_18] : memref<9x128x128xbf16, #tpu.memory_space<vmem>>, vector<1x128x128xbf16>
    %42 = vector.shape_cast %41 : vector<1x128x128xbf16> to vector<128x128xbf16>
    %cst_19 = arith.constant dense<0.000000e+00> : vector<256x128xf32>
    %43 = tpu.matmul %40, %42, %cst_19 {dimension_numbers = #tpu.dot_dimension_numbers<[1], [0], [0], [1], [0, 0, 1, 1], [], []>} : vector<256x128xbf16>, vector<128x128xbf16>, vector<256x128xf32> -> vector<256x128xf32>
    %c16 = arith.constant 16 : index
    %c0_20 = arith.constant 0 : index
    %44 = vector.load %arg8[%c16, %c0_20] : memref<320x128xbf16, #tpu.memory_space<vmem>>, vector<256x128xbf16>
    %c1 = arith.constant 1 : index
    %c0_21 = arith.constant 0 : index
    %c0_22 = arith.constant 0 : index
    %45 = vector.load %arg4[%c1, %c0_21, %c0_22] : memref<9x128x128xbf16, #tpu.memory_space<vmem>>, vector<1x128x128xbf16>
    %46 = vector.shape_cast %45 : vector<1x128x128xbf16> to vector<128x128xbf16>
    %cst_23 = arith.constant dense<0.000000e+00> : vector<256x128xf32>
    %47 = tpu.matmul %44, %46, %cst_23 {dimension_numbers = #tpu.dot_dimension_numbers<[1], [0], [0], [1], [0, 0, 1, 1], [], []>} : vector<256x128xbf16>, vector<128x128xbf16>, vector<256x128xf32> -> vector<256x128xf32>
    %48 = arith.addf %43, %47 : vector<256x128xf32>
    %c17 = arith.constant 17 : index
    %c0_24 = arith.constant 0 : index
    %49 = vector.load %arg8[%c17, %c0_24] : memref<320x128xbf16, #tpu.memory_space<vmem>>, vector<256x128xbf16>
    %cst_25 = arith.constant 0.000000e+00 : bf16
    %50 = vector.broadcast %cst_25 : bf16 to vector<256x128xbf16>
    %51 = vector.shape_cast %35 : vector<256x1xi1> to vector<256x1xi1>
    %52 = vector.broadcast %51 : vector<256x1xi1> to vector<256x128xi1>
    %53 = arith.select %52, %49, %50 : vector<256x128xi1>, vector<256x128xbf16>
    %c2 = arith.constant 2 : index
    %c0_26 = arith.constant 0 : index
    %c0_27 = arith.constant 0 : index
    %54 = vector.load %arg4[%c2, %c0_26, %c0_27] : memref<9x128x128xbf16, #tpu.memory_space<vmem>>, vector<1x128x128xbf16>
    %55 = vector.shape_cast %54 : vector<1x128x128xbf16> to vector<128x128xbf16>
    %cst_28 = arith.constant dense<0.000000e+00> : vector<256x128xf32>
    %56 = tpu.matmul %53, %55, %cst_28 {dimension_numbers = #tpu.dot_dimension_numbers<[1], [0], [0], [1], [0, 0, 1, 1], [], []>} : vector<256x128xbf16>, vector<128x128xbf16>, vector<256x128xf32> -> vector<256x128xf32>
    %57 = arith.addf %48, %56 : vector<256x128xf32>
    %c31 = arith.constant 31 : index
    %c0_29 = arith.constant 0 : index
    %58 = vector.load %arg8[%c31, %c0_29] : memref<320x128xbf16, #tpu.memory_space<vmem>>, vector<256x128xbf16>
    %cst_30 = arith.constant 0.000000e+00 : bf16
    %59 = vector.broadcast %cst_30 : bf16 to vector<256x128xbf16>
    %60 = vector.shape_cast %33 : vector<256x1xi1> to vector<256x1xi1>
    %61 = vector.broadcast %60 : vector<256x1xi1> to vector<256x128xi1>
    %62 = arith.select %61, %58, %59 : vector<256x128xi1>, vector<256x128xbf16>
    %c3 = arith.constant 3 : index
    %c0_31 = arith.constant 0 : index
    %c0_32 = arith.constant 0 : index
    %63 = vector.load %arg4[%c3, %c0_31, %c0_32] : memref<9x128x128xbf16, #tpu.memory_space<vmem>>, vector<1x128x128xbf16>
    %64 = vector.shape_cast %63 : vector<1x128x128xbf16> to vector<128x128xbf16>
    %cst_33 = arith.constant dense<0.000000e+00> : vector<256x128xf32>
    %65 = tpu.matmul %62, %64, %cst_33 {dimension_numbers = #tpu.dot_dimension_numbers<[1], [0], [0], [1], [0, 0, 1, 1], [], []>} : vector<256x128xbf16>, vector<128x128xbf16>, vector<256x128xf32> -> vector<256x128xf32>
    %66 = arith.addf %57, %65 : vector<256x128xf32>
    %c32_34 = arith.constant 32 : index
    %c0_35 = arith.constant 0 : index
    %67 = vector.load %arg8[%c32_34, %c0_35] : memref<320x128xbf16, #tpu.memory_space<vmem>>, vector<256x128xbf16>
    %c4 = arith.constant 4 : index
    %c0_36 = arith.constant 0 : index
    %c0_37 = arith.constant 0 : index
    %68 = vector.load %arg4[%c4, %c0_36, %c0_37] : memref<9x128x128xbf16, #tpu.memory_space<vmem>>, vector<1x128x128xbf16>
    %69 = vector.shape_cast %68 : vector<1x128x128xbf16> to vector<128x128xbf16>
    %cst_38 = arith.constant dense<0.000000e+00> : vector<256x128xf32>
    %70 = tpu.matmul %67, %69, %cst_38 {dimension_numbers = #tpu.dot_dimension_numbers<[1], [0], [0], [1], [0, 0, 1, 1], [], []>} : vector<256x128xbf16>, vector<128x128xbf16>, vector<256x128xf32> -> vector<256x128xf32>
    %71 = arith.addf %66, %70 : vector<256x128xf32>
    %c33 = arith.constant 33 : index
    %c0_39 = arith.constant 0 : index
    %72 = vector.load %arg8[%c33, %c0_39] : memref<320x128xbf16, #tpu.memory_space<vmem>>, vector<256x128xbf16>
    %cst_40 = arith.constant 0.000000e+00 : bf16
    %73 = vector.broadcast %cst_40 : bf16 to vector<256x128xbf16>
    %74 = vector.shape_cast %35 : vector<256x1xi1> to vector<256x1xi1>
    %75 = vector.broadcast %74 : vector<256x1xi1> to vector<256x128xi1>
    %76 = arith.select %75, %72, %73 : vector<256x128xi1>, vector<256x128xbf16>
    %c5 = arith.constant 5 : index
    %c0_41 = arith.constant 0 : index
    %c0_42 = arith.constant 0 : index
    %77 = vector.load %arg4[%c5, %c0_41, %c0_42] : memref<9x128x128xbf16, #tpu.memory_space<vmem>>, vector<1x128x128xbf16>
    %78 = vector.shape_cast %77 : vector<1x128x128xbf16> to vector<128x128xbf16>
    %cst_43 = arith.constant dense<0.000000e+00> : vector<256x128xf32>
    %79 = tpu.matmul %76, %78, %cst_43 {dimension_numbers = #tpu.dot_dimension_numbers<[1], [0], [0], [1], [0, 0, 1, 1], [], []>} : vector<256x128xbf16>, vector<128x128xbf16>, vector<256x128xf32> -> vector<256x128xf32>
    %80 = arith.addf %71, %79 : vector<256x128xf32>
    %c47 = arith.constant 47 : index
    %c0_44 = arith.constant 0 : index
    %81 = vector.load %arg8[%c47, %c0_44] : memref<320x128xbf16, #tpu.memory_space<vmem>>, vector<256x128xbf16>
    %cst_45 = arith.constant 0.000000e+00 : bf16
    %82 = vector.broadcast %cst_45 : bf16 to vector<256x128xbf16>
    %83 = vector.shape_cast %33 : vector<256x1xi1> to vector<256x1xi1>
    %84 = vector.broadcast %83 : vector<256x1xi1> to vector<256x128xi1>
    %85 = arith.select %84, %81, %82 : vector<256x128xi1>, vector<256x128xbf16>
    %c6 = arith.constant 6 : index
    %c0_46 = arith.constant 0 : index
    %c0_47 = arith.constant 0 : index
    %86 = vector.load %arg4[%c6, %c0_46, %c0_47] : memref<9x128x128xbf16, #tpu.memory_space<vmem>>, vector<1x128x128xbf16>
    %87 = vector.shape_cast %86 : vector<1x128x128xbf16> to vector<128x128xbf16>
    %cst_48 = arith.constant dense<0.000000e+00> : vector<256x128xf32>
    %88 = tpu.matmul %85, %87, %cst_48 {dimension_numbers = #tpu.dot_dimension_numbers<[1], [0], [0], [1], [0, 0, 1, 1], [], []>} : vector<256x128xbf16>, vector<128x128xbf16>, vector<256x128xf32> -> vector<256x128xf32>
    %89 = arith.addf %80, %88 : vector<256x128xf32>
    %c48 = arith.constant 48 : index
    %c0_49 = arith.constant 0 : index
    %90 = vector.load %arg8[%c48, %c0_49] : memref<320x128xbf16, #tpu.memory_space<vmem>>, vector<256x128xbf16>
    %c7 = arith.constant 7 : index
    %c0_50 = arith.constant 0 : index
    %c0_51 = arith.constant 0 : index
    %91 = vector.load %arg4[%c7, %c0_50, %c0_51] : memref<9x128x128xbf16, #tpu.memory_space<vmem>>, vector<1x128x128xbf16>
    %92 = vector.shape_cast %91 : vector<1x128x128xbf16> to vector<128x128xbf16>
    %cst_52 = arith.constant dense<0.000000e+00> : vector<256x128xf32>
    %93 = tpu.matmul %90, %92, %cst_52 {dimension_numbers = #tpu.dot_dimension_numbers<[1], [0], [0], [1], [0, 0, 1, 1], [], []>} : vector<256x128xbf16>, vector<128x128xbf16>, vector<256x128xf32> -> vector<256x128xf32>
    %94 = arith.addf %89, %93 : vector<256x128xf32>
    %c49 = arith.constant 49 : index
    %c0_53 = arith.constant 0 : index
    %95 = vector.load %arg8[%c49, %c0_53] : memref<320x128xbf16, #tpu.memory_space<vmem>>, vector<256x128xbf16>
    %cst_54 = arith.constant 0.000000e+00 : bf16
    %96 = vector.broadcast %cst_54 : bf16 to vector<256x128xbf16>
    %97 = vector.shape_cast %35 : vector<256x1xi1> to vector<256x1xi1>
    %98 = vector.broadcast %97 : vector<256x1xi1> to vector<256x128xi1>
    %99 = arith.select %98, %95, %96 : vector<256x128xi1>, vector<256x128xbf16>
    %c8 = arith.constant 8 : index
    %c0_55 = arith.constant 0 : index
    %c0_56 = arith.constant 0 : index
    %100 = vector.load %arg4[%c8, %c0_55, %c0_56] : memref<9x128x128xbf16, #tpu.memory_space<vmem>>, vector<1x128x128xbf16>
    %101 = vector.shape_cast %100 : vector<1x128x128xbf16> to vector<128x128xbf16>
    %cst_57 = arith.constant dense<0.000000e+00> : vector<256x128xf32>
    %102 = tpu.matmul %99, %101, %cst_57 {dimension_numbers = #tpu.dot_dimension_numbers<[1], [0], [0], [1], [0, 0, 1, 1], [], []>} : vector<256x128xbf16>, vector<128x128xbf16>, vector<256x128xf32> -> vector<256x128xf32>
    %103 = arith.addf %94, %102 : vector<256x128xf32>
    %104 = arith.truncf %103 : vector<256x128xf32> to vector<256x128xbf16>
    %c0_58 = arith.constant 0 : index
    %c0_59 = arith.constant 0 : index
    %105 = vector.load %arg5[%c0_58, %c0_59] : memref<256x128xbf16, #tpu.memory_space<vmem>>, vector<256x128xbf16>
    tpu.vector_store %arg5[%c0_58, %c0_59], %104 {strides = array<i32>} : memref<256x128xbf16, #tpu.memory_space<vmem>>, vector<256x128xbf16>,
    %cst_60 = arith.constant dense<0.000000e+00> : vector<128xf32>
    %106 = vector.multi_reduction <add>, %103, %cst_60 [0] : vector<256x128xf32> to vector<128xf32>
    %107 = vector.shape_cast %106 : vector<128xf32> to vector<1x128xf32>
    %c0_61 = arith.constant 0 : index
    %c0_62 = arith.constant 0 : index
    %c0_63 = arith.constant 0 : index
    %108 = vector.load %arg6[%c0_61, %c0_62, %c0_63] : memref<1x1x128xf32, #tpu.memory_space<vmem>>, vector<1x1x128xf32>
    %109 = vector.shape_cast %108 : vector<1x1x128xf32> to vector<1x128xf32>
    %110 = vector.shape_cast %107 : vector<1x128xf32> to vector<1x1x128xf32>
    tpu.vector_store %arg6[%c0_61, %c0_62, %c0_63], %110 {strides = array<i32>} : memref<1x1x128xf32, #tpu.memory_space<vmem>>, vector<1x1x128xf32>,
    %111 = arith.mulf %103, %103 : vector<256x128xf32>
    %cst_64 = arith.constant dense<0.000000e+00> : vector<128xf32>
    %112 = vector.multi_reduction <add>, %111, %cst_64 [0] : vector<256x128xf32> to vector<128xf32>
    %113 = vector.shape_cast %112 : vector<128xf32> to vector<1x128xf32>
    %c0_65 = arith.constant 0 : index
    %c0_66 = arith.constant 0 : index
    %c0_67 = arith.constant 0 : index
    %114 = vector.load %arg7[%c0_65, %c0_66, %c0_67] : memref<1x1x128xf32, #tpu.memory_space<vmem>>, vector<1x1x128xf32>
    %115 = vector.shape_cast %114 : vector<1x1x128xf32> to vector<1x128xf32>
    %116 = vector.shape_cast %113 : vector<1x128xf32> to vector<1x1x128xf32>
    tpu.vector_store %arg7[%c0_65, %c0_66, %c0_67], %116 {strides = array<i32>} : memref<1x1x128xf32, #tpu.memory_space<vmem>>, vector<1x1x128xf32>,
    return
  }
  func.func @transform_0(%arg0: i32) -> (i32, i32) {
    %c0_i32 = arith.constant 0 : i32
    %c0_i32_0 = arith.constant 0 : i32
    return %arg0, %c0_i32 : i32, i32
  }
  func.func @transform_1(%arg0: i32) -> (i32, i32) {
    %c0_i32 = arith.constant 0 : i32
    %c0_i32_0 = arith.constant 0 : i32
    %c0_i32_1 = arith.constant 0 : i32
    return %c0_i32, %c0_i32_0 : i32, i32
  }
  func.func @transform_2(%arg0: i32) -> (i32, i32) {
    %c0_i32 = arith.constant 0 : i32
    %c0_i32_0 = arith.constant 0 : i32
    %c0_i32_1 = arith.constant 0 : i32
    return %c0_i32, %c0_i32_0 : i32, i32
  }
  func.func @transform_3(%arg0: i32) -> (i32, i32, i32) {
    %c0_i32 = arith.constant 0 : i32
    %c0_i32_0 = arith.constant 0 : i32
    %c0_i32_1 = arith.constant 0 : i32
    %c0_i32_2 = arith.constant 0 : i32
    return %c0_i32, %c0_i32_0, %c0_i32_1 : i32, i32, i32
  }
  func.func @transform_4(%arg0: i32) -> (i32, i32) {
    %c0_i32 = arith.constant 0 : i32
    %c0_i32_0 = arith.constant 0 : i32
    return %arg0, %c0_i32 : i32, i32
  }
  func.func @transform_5(%arg0: i32) -> (i32, i32, i32) {
    %c0_i32 = arith.constant 0 : i32
    %c0_i32_0 = arith.constant 0 : i32
    %c0_i32_1 = arith.constant 0 : i32
    return %arg0, %c0_i32, %c0_i32_0 : i32, i32, i32
  }
  func.func @transform_6(%arg0: i32) -> (i32, i32, i32) {
    %c0_i32 = arith.constant 0 : i32
    %c0_i32_0 = arith.constant 0 : i32
    %c0_i32_1 = arith.constant 0 : i32
    return %arg0, %c0_i32, %c0_i32_0 : i32, i32, i32
  }
}

module attributes {stable_mosaic.version = 11 : i64} {
  func.func @_bn2_shortcut_relu_kernel(%arg0: i32, %arg1: memref<256x128xbf16, #tpu.memory_space<vmem>>, %arg2: memref<1x256x4xbf16, #tpu.memory_space<vmem>>, %arg3: memref<4x128xbf16, #tpu.memory_space<vmem>>, %arg4: memref<1x128xf32, #tpu.memory_space<vmem>>, %arg5: memref<1x128xf32, #tpu.memory_space<vmem>>, %arg6: memref<256x128xf32, #tpu.memory_space<vmem>>) attributes {dimension_semantics = [#tpu.dimension_semantics<parallel>], iteration_bounds = array<i64: 2>, scalar_prefetch = 0 : i64, scratch_operands = 0 : i64, tpu.core_type = #tpu.core_type<tc>, window_params = [{transform_indices = @transform_0, window_bounds = array<i64: 256, 128>}, {transform_indices = @transform_1, window_bounds = array<i64: 1, 256, 4>}, {pipeline_mode = #tpu.pipeline_mode<synchronous>, transform_indices = @transform_2, window_bounds = array<i64: 4, 128>}, {pipeline_mode = #tpu.pipeline_mode<synchronous>, transform_indices = @transform_3, window_bounds = array<i64: 1, 128>}, {pipeline_mode = #tpu.pipeline_mode<synchronous>, transform_indices = @transform_4, window_bounds = array<i64: 1, 128>}, {transform_indices = @transform_5, window_bounds = array<i64: 256, 128>}]} {
    %c0 = arith.constant 0 : index
    %c0_0 = arith.constant 0 : index
    %c0_1 = arith.constant 0 : index
    %0 = vector.load %arg2[%c0, %c0_0, %c0_1] : memref<1x256x4xbf16, #tpu.memory_space<vmem>>, vector<1x256x4xbf16>
    %1 = vector.shape_cast %0 : vector<1x256x4xbf16> to vector<256x4xbf16>
    %c0_2 = arith.constant 0 : index
    %c0_3 = arith.constant 0 : index
    %2 = vector.load %arg3[%c0_2, %c0_3] : memref<4x128xbf16, #tpu.memory_space<vmem>>, vector<4x128xbf16>
    %cst = arith.constant dense<0.000000e+00> : vector<256x128xf32>
    %3 = tpu.matmul %1, %2, %cst {dimension_numbers = #tpu.dot_dimension_numbers<[1], [0], [0], [1], [0, 0, 1, 1], [], []>} : vector<256x4xbf16>, vector<4x128xbf16>, vector<256x128xf32> -> vector<256x128xf32>
    %c0_4 = arith.constant 0 : index
    %c0_5 = arith.constant 0 : index
    %4 = vector.load %arg1[%c0_4, %c0_5] : memref<256x128xbf16, #tpu.memory_space<vmem>>, vector<256x128xbf16>
    %5 = arith.extf %4 : vector<256x128xbf16> to vector<256x128xf32>
    %c0_6 = arith.constant 0 : index
    %c0_7 = arith.constant 0 : index
    %6 = vector.load %arg4[%c0_6, %c0_7] : memref<1x128xf32, #tpu.memory_space<vmem>>, vector<1x128xf32>
    %7 = vector.broadcast %6 : vector<1x128xf32> to vector<256x128xf32>
    %8 = arith.mulf %5, %7 : vector<256x128xf32>
    %c0_8 = arith.constant 0 : index
    %c0_9 = arith.constant 0 : index
    %9 = vector.load %arg5[%c0_8, %c0_9] : memref<1x128xf32, #tpu.memory_space<vmem>>, vector<1x128xf32>
    %10 = vector.broadcast %9 : vector<1x128xf32> to vector<256x128xf32>
    %11 = arith.addf %8, %10 : vector<256x128xf32>
    %12 = arith.addf %11, %3 : vector<256x128xf32>
    %cst_10 = arith.constant 0.000000e+00 : f32
    %13 = vector.broadcast %cst_10 : f32 to vector<256x128xf32>
    %14 = arith.maximumf %12, %13 : vector<256x128xf32>
    %c0_11 = arith.constant 0 : index
    %c0_12 = arith.constant 0 : index
    %15 = vector.load %arg6[%c0_11, %c0_12] : memref<256x128xf32, #tpu.memory_space<vmem>>, vector<256x128xf32>
    tpu.vector_store %arg6[%c0_11, %c0_12], %14 {strides = array<i32>} : memref<256x128xf32, #tpu.memory_space<vmem>>, vector<256x128xf32>,
    return
  }
  func.func @transform_0(%arg0: i32) -> (i32, i32) {
    %c0_i32 = arith.constant 0 : i32
    %c0_i32_0 = arith.constant 0 : i32
    return %arg0, %c0_i32 : i32, i32
  }
  func.func @transform_1(%arg0: i32) -> (i32, i32, i32) {
    %c0_i32 = arith.constant 0 : i32
    %c0_i32_0 = arith.constant 0 : i32
    %c0_i32_1 = arith.constant 0 : i32
    return %arg0, %c0_i32, %c0_i32_0 : i32, i32, i32
  }
  func.func @transform_2(%arg0: i32) -> (i32, i32) {
    %c0_i32 = arith.constant 0 : i32
    %c0_i32_0 = arith.constant 0 : i32
    %c0_i32_1 = arith.constant 0 : i32
    return %c0_i32, %c0_i32_0 : i32, i32
  }
  func.func @transform_3(%arg0: i32) -> (i32, i32) {
    %c0_i32 = arith.constant 0 : i32
    %c0_i32_0 = arith.constant 0 : i32
    %c0_i32_1 = arith.constant 0 : i32
    return %c0_i32, %c0_i32_0 : i32, i32
  }
  func.func @transform_4(%arg0: i32) -> (i32, i32) {
    %c0_i32 = arith.constant 0 : i32
    %c0_i32_0 = arith.constant 0 : i32
    %c0_i32_1 = arith.constant 0 : i32
    return %c0_i32, %c0_i32_0 : i32, i32
  }
  func.func @transform_5(%arg0: i32) -> (i32, i32) {
    %c0_i32 = arith.constant 0 : i32
    %c0_i32_0 = arith.constant 0 : i32
    return %arg0, %c0_i32 : i32, i32
  }
}

</mosaic_0001>

<bundles_post_ra>
// kernel: residual_block_forward.5
= control target key start
LH: loop header
LB: loop body
LE: loop exit
PB: predicated region body
PF: predicated region fallthrough
CT: control target
= control target key end

     0   :  { %s1126_s18 = smov 0   ;;  %s1371_s0 = inlined_call_operand.vmem [shape: bf16[512,128], index: 0, kind: input, shape index: {}]   ;;  %s1372_s1 = inlined_call_operand.vmem [shape: bf16[2,256,4], index: 1, kind: input, shape index: {}]   ;;  %s1373_s2 = inlined_call_operand.vmem [shape: bf16[4,128], index: 2, kind: input, shape index: {}]   ;;  %s1374_s3 = inlined_call_operand.vmem [shape: f32[1,128], index: 3, kind: input, shape index: {}]   ;;  %s1375_s4 = inlined_call_operand.vmem [shape: f32[1,128], index: 4, kind: input, shape index: {}]   ;;  %s1376_s5 = inlined_call_operand.vmem [shape: f32[512,128], index: 5, kind: output, shape index: {}]  }
   0x1 LB: > { %s1132_s19 = sadd.s32 4294967295, %s1094_s18   ;;  %p886_p0 = scmp.ge.s32.totalorder %s1094_s18, 1  ;;  %s1094_s18 = sphi %s1126_s18, %s15_s18  }
   0x2   : > { %p198_p1 = scmp.lt.s32.totalorder %s1094_s18, 3 }
   0x4   : > { %p199_p2 = pnand %p886_p0, %p198_p1 }
   0x5   : > { %v281_v0 = vld [vmem:[%s1373_s2] sm:$0x3] (!%p199_p2)  ;;  %vm411_vm0 = vcmask (!%p199_p2), 1041408   ;;  %p237_p3 = scmp.lt.s32.totalorder (!%p199_p2), %s1132_s19, 1  ;;  %vm362_vm1 = vcmask (!%p199_p2), 31744   ;;  %s887_s27 = sshll.u32 (!%p199_p2), %s1132_s19, 5 }
   0x6   : > { %202 = sbr.rel (%p199_p2) target bundleno = 264 (0x108), region = 40  ;;  %1062 = vmatprep.subr.msk.bf16.mxu0 (!%p199_p2), %vm411_vm0, %v281_v0  ;;  %1063 = vmatprep.subr.msk.bf16.mxu1 (!%p199_p2), %vm411_vm0, %v281_v0  ;;  %v413_v1 = vsel (!%p199_p2), %vm411_vm0, %v281_v0, 0  ;;  %p232_p4 = scmp.lt.s32.totalorder (!%p199_p2), %s887_s27, 63  ;;  %v1194_v23 = vld [vmem:[%s1374_s3] ss:$0 sm:$0xff] (!%p199_p2) }
   0x7   : > { %1027 = vmatpush3.bf16.msra.mxu0 (!%p199_p2), %v413_v1  ;;  %1061 = vmatpush3.bf16.msra.mxu1 (!%p199_p2), %v413_v1  ;;  %v1204_v32 = vld [vmem:[%s1375_s4] ss:$0 sm:$0xff] (!%p199_p2) }
   0xd   : > { %s238_s22 = scalar_select %p237_p3, %s1132_s19, 1 }
   0xe   : > { %s1378_s27 = smov (!%p232_p4, %s887_s27), 63 }
   0xf   : > { %s929_s23 = sshll.u32 %s238_s22, 7  ;;  %s888_s28 = sshll.u32 %s1378_s27, 2 }
  0x10   : > { %s1144_s26 = scalar_lea.vmem %s1372_s1, %s929_s23  ;;  %s1185_s6 = scalar_lea.vmem %s1371_s0, %s888_s28 }
  0x11   : > { %v1072_v2 = vld [vmem:[%s1144_s26] sm:$0xff]   ;;  %v1074_v4 = vld [vmem:[%s1144_s26 + $0x8] sm:$0xff]   ;;  %v1076_v6 = vld [vmem:[%s1144_s26 + $0x10] sm:$0xff]   ;;  %s892_s11 = sshll.u32 %s1378_s27, 3 }
  0x12   : > { %v1073_v3 = vld [vmem:[%s1144_s26 + $0x40] sm:$0xff]   ;;  %1028 = vmatprep.mubr.msk.bf16.mxu0 %vm362_vm1, %v1072_v2  ;;  %v1075_v5 = vld [vmem:[%s1144_s26 + $0x48] sm:$0xff]   ;;  %v1077_v7 = vld [vmem:[%s1144_s26 + $0x50] sm:$0xff]   ;;  %s1268_s14 = scalar_lea.vmem %s1376_s5, %s892_s11 }
  0x13   : > { %1044 = vmatprep.mubr.msk.bf16.mxu1 %vm362_vm1, %v1073_v3  ;;  %1029 = vmatmul.mubr.msk.bf16.vlgmr.msra.gmra.mrb[0].mxu0 %vm362_vm1, %v1074_v4  ;;  %v1078_v8 = vld [vmem:[%s1144_s26 + $0x18] sm:$0xff]   ;;  %v1080_v10 = vld [vmem:[%s1144_s26 + $0x20] sm:$0xff]   ;;  %v1082_v12 = vld [vmem:[%s1144_s26 + $0x28] sm:$0xff]  }
  0x14   : > { %1045 = vmatmul.mubr.msk.bf16.vlgmr.msra.gmra.mrb[0].mxu1 %vm362_vm1, %v1075_v5  ;;  %1032 = vmatprep.mubr.msk.bf16.mxu0 %vm362_vm1, %v1076_v6  ;;  %v1079_v9 = vld [vmem:[%s1144_s26 + $0x58] sm:$0xff]   ;;  %v1081_v11 = vld [vmem:[%s1144_s26 + $0x60] sm:$0xff]   ;;  %v1083_v13 = vld [vmem:[%s1144_s26 + $0x68] sm:$0xff]  }
  0x15   : > { %1048 = vmatprep.mubr.msk.bf16.mxu1 %vm362_vm1, %v1077_v7  ;;  %v1084_v14 = vld [vmem:[%s1144_s26 + $0x30] sm:$0xff]   ;;  %v1086_v16 = vld [vmem:[%s1144_s26 + $0x38] sm:$0xff]   ;;  %v994_v18 = vld [vmem:[%s1185_s6 + $0x8] sm:$0xff]  }
  0x16   : > { %v1085_v15 = vld [vmem:[%s1144_s26 + $0x70] sm:$0xff]   ;;  %v1087_v17 = vld [vmem:[%s1144_s26 + $0x78] sm:$0xff]   ;;  %v1002_v19 = vld [vmem:[%s1185_s6 + $0x48] sm:$0xff]   ;;  %v936_v22 = vunpack.c.l.bf16 %v994_v18  ;;  %v937_v34 = vunpack.c.h.bf16 %v994_v18 }
  0x17   : > { %v931_v20 = vld [vmem:[%s1185_s6] sm:$0xff]   ;;  %v968_v24 = vunpack.c.l.bf16 %v1002_v19  ;;  %v996_v27 = vld [vmem:[%s1185_s6 + $0x18] sm:$0xff]   ;;  %v995_v30 = vld [vmem:[%s1185_s6 + $0x10] sm:$0xff]   ;;  %v969_v35 = vunpack.c.h.bf16 %v1002_v19 }
  0x18   : > { %v1001_v21 = vld [vmem:[%s1185_s6 + $0x40] sm:$0xff]   ;;  %v932_v25 = vunpack.c.l.bf16 %v931_v20  ;;  %v649_v28 = vmul.f32 %v936_v22, %v1194_v23  ;;  %v1004_v29 = vld [vmem:[%s1185_s6 + $0x58] sm:$0xff]   ;;  %v1003_v31 = vld [vmem:[%s1185_s6 + $0x50] sm:$0xff]   ;;  %v933_v36 = vunpack.c.h.bf16 %v931_v20  ;;  %v944_v40 = vunpack.c.l.bf16 %v996_v27 }
  0x19   : > { %v964_v26 = vunpack.c.l.bf16 %v1001_v21  ;;  %v665_v33 = vmul.f32 %v968_v24, %v1194_v23  ;;  %v965_v39 = vunpack.c.h.bf16 %v1001_v21  ;;  %v976_v41 = vunpack.c.l.bf16 %v1004_v29  ;;  %v1215_v50 = vld [vmem:[%s1185_s6 + $0x28] sm:$0xff]   ;;  %v1228_v60 = vld [vmem:[%s1185_s6 + $0x20] sm:$0xff]  }
  0x1a   : > { %v647_v37 = vmul.f32 %v932_v25, %v1194_v23  ;;  %v940_v42 = vunpack.c.l.bf16 %v995_v30  ;;  %v972_v43 = vunpack.c.l.bf16 %v1003_v31  ;;  %v688_v44 = vadd.f32 %v1204_v32, %v649_v28  ;;  %v1222_v55 = vld [vmem:[%s1185_s6 + $0x68] sm:$0xff]   ;;  %v1231_v61 = vld [vmem:[%s1185_s6 + $0x60] sm:$0xff]  }
  0x1b   : > { %1033 = vmatmul.mubr.msk.bf16.gmra.mrb[4].mxu0 %vm362_vm1, %v1078_v8  ;;  %v663_v38 = vmul.f32 %v964_v26, %v1194_v23  ;;  %v945_v45 = vunpack.c.h.bf16 %v996_v27  ;;  %v704_v46 = vadd.f32 %v1204_v32, %v665_v33  ;;  %v650_v47 = vmul.f32 %v937_v34, %v1194_v23 }
  0x1c   : > { %1049 = vmatmul.mubr.msk.bf16.gmra.mrb[4].mxu1 %vm362_vm1, %v1079_v9  ;;  %1036 = vmatprep.mubr.msk.bf16.mxu0 %vm362_vm1, %v1080_v10  ;;  %v666_v48 = vmul.f32 %v969_v35, %v1194_v23  ;;  %v648_v49 = vmul.f32 %v933_v36, %v1194_v23  ;;  %v686_v51 = vadd.f32 %v1204_v32, %v647_v37  ;;  %v977_v59 = vunpack.c.h.bf16 %v1004_v29 }
  0x1d   : > { %1052 = vmatprep.mubr.msk.bf16.mxu1 %vm362_vm1, %v1081_v11  ;;  %v702_v52 = vadd.f32 %v1204_v32, %v663_v38  ;;  %v664_v53 = vmul.f32 %v965_v39, %v1194_v23  ;;  %v653_v54 = vmul.f32 %v944_v40, %v1194_v23  ;;  %v669_v56 = vmul.f32 %v976_v41, %v1194_v23 }
  0x1e   : > { %v651_v57 = vmul.f32 %v940_v42, %v1194_v23  ;;  %v667_v58 = vmul.f32 %v972_v43, %v1194_v23  ;;  %v654_v62 = vmul.f32 %v945_v45, %v1194_v23  ;;  %v941_v63 = vunpack.c.h.bf16 %v995_v30 }
  0x1f   : > { %v973_v0 = vunpack.c.h.bf16 %v1003_v31  ;;  %v952_v1 = vunpack.c.l.bf16 %v1215_v50  ;;  %v689_v2 = vadd.f32 %v1204_v32, %v650_v47  ;;  %v705_v3 = vadd.f32 %v1204_v32, %v666_v48 }
  0x20   : > { %v687_v4 = vadd.f32 %v1204_v32, %v648_v49  ;;  %v984_v5 = vunpack.c.l.bf16 %v1222_v55  ;;  %v703_v6 = vadd.f32 %v1204_v32, %v664_v53  ;;  %v1241_v7 = vadd.f32 %v1204_v32, %v653_v54 }
  0x21   : > { %v948_v8 = vunpack.c.l.bf16 %v1228_v60  ;;  %v980_v9 = vunpack.c.l.bf16 %v1231_v61  ;;  %v1247_v10 = vadd.f32 %v1204_v32, %v669_v56  ;;  %v1250_v11 = vadd.f32 %v1204_v32, %v651_v57  ;;  %v1290_v57 = vld [vmem:[%s1185_s6 + $0x78] sm:$0xff]  }
  0x22   : > { %v657_v18 = vmul.f32 %v952_v1, %v1194_v23  ;;  %v673_v22 = vmul.f32 %v984_v5, %v1194_v23  ;;  %v953_v24 = vunpack.c.h.bf16 %v1215_v50  ;;  %v985_v25 = vunpack.c.h.bf16 %v1222_v55 }
  0x23   : > { %1037 = vmatmul.mubr.msk.bf16.gmra.mrb[8].mxu0 %vm362_vm1, %v1082_v12  ;;  %v1253_v12 = vadd.f32 %v1204_v32, %v667_v58  ;;  %v655_v30 = vmul.f32 %v948_v8, %v1194_v23  ;;  %v671_v31 = vmul.f32 %v980_v9, %v1194_v23  ;;  %v949_v38 = vunpack.c.h.bf16 %v1228_v60  ;;  %v1293_v58 = vld [vmem:[%s1185_s6 + $0x30] sm:$0xff]  }
  0x24   : > { %1053 = vmatmul.mubr.msk.bf16.gmra.mrb[8].mxu1 %vm362_vm1, %v1083_v13  ;;  %1040 = vmatprep.mubr.msk.bf16.mxu0 %vm362_vm1, %v1084_v14  ;;  %v670_v13 = vmul.f32 %v977_v59, %v1194_v23  ;;  %v981_v47 = vunpack.c.h.bf16 %v1231_v61  ;;  %v696_v55 = vadd.f32 %v1204_v32, %v657_v18  ;;  %v1287_v56 = vadd.f32 %v1204_v32, %v673_v22 }
  0x25   : > { %1056 = vmatprep.mubr.msk.bf16.mxu1 %vm362_vm1, %v1085_v15  ;;  %v1257_v15 = vadd.f32 %v1204_v32, %v654_v62  ;;  %v694_v60 = vadd.f32 %v1204_v32, %v655_v30  ;;  %v1299_v61 = vadd.f32 %v1204_v32, %v671_v31  ;;  %v658_v62 = vmul.f32 %v953_v24, %v1194_v23 }
  0x26   : > { %v709_v50 = vadd.f32 %v1204_v32, %v670_v13  ;;  %v672_v5 = vmul.f32 %v981_v47, %v1194_v23 }
  0x2b   : > { %1041 = vmatmul.mubr.msk.bf16.gmra.mrb[12].mxu0 %vm362_vm1, %v1086_v16  ;;  %v652_v16 = vmul.f32 %v941_v63, %v1194_v23  ;;  %v674_v63 = vmul.f32 %v985_v25, %v1194_v23 }
  0x2c   : > { %1057 = vmatmul.mubr.msk.bf16.gmra.mrb[12].mxu1 %vm362_vm1, %v1087_v17  ;;  %v668_v17 = vmul.f32 %v973_v0, %v1194_v23  ;;  %v1304_v0 = vld [vmem:[%s1185_s6 + $0x70] sm:$0xff]  }
  0x2e   : > { %v707_v54 = vadd.f32 %v1204_v32, %v668_v17  ;;  %v956_v17 = vunpack.c.l.bf16 %v1293_v58 }
  0xe6   : > { %v1030_v14 = vpop.f32.mrb[0].mxu0 }
  0xe7   : > { %v720_v19 = vadd.f32 %v1030_v14, %v688_v44  ;;  %v1046_v20 = vpop.f32.mrb[0].mxu1  ;;  %v449_v21 = vpop.f32.mrb[1].mxu0 }
  0xe8   : > { %v736_v26 = vadd.f32 %v1046_v20, %v704_v46  ;;  %v718_v27 = vadd.f32 %v686_v51, %v449_v21  ;;  %v513_v28 = vpop.f32.mrb[1].mxu1  ;;  %v1031_v29 = vpop.f32.mrb[2].mxu0  ;;  %v691_v51 = vadd.f32 %v1204_v32, %v652_v16  ;;  %v992_v16 = vunpack.c.l.bf16 %v1290_v57 }
  0xe9   : > { %v752_v33 = vmax.f32 %v720_v19, 0.0  ;;  %v734_v34 = vadd.f32 %v702_v52, %v513_v28  ;;  %v721_v35 = vadd.f32 %v1031_v29, %v689_v2  ;;  %v1047_v36 = vpop.f32.mrb[2].mxu1  ;;  %v452_v37 = vpop.f32.mrb[3].mxu0  ;;  %v1280_v52 = vld [vmem:[%s1185_s6 + $0x38] sm:$0xff]  }
  0xea   : > { %v768_v39 = vmax.f32 %v736_v26, 0.0  ;;  %v750_v40 = vmax.f32 %v718_v27, 0.0  ;;  %v737_v41 = vadd.f32 %v1047_v36, %v705_v3  ;;  %v719_v42 = vadd.f32 %v687_v4, %v452_v37  ;;  %v516_v43 = vpop.f32.mrb[3].mxu1 }
  0xeb   : > { %784 = vst [vmem:[%s1268_s14 + $0x10] sm:$0xff] %v752_v33  ;;  %v766_v44 = vmax.f32 %v734_v34, 0.0  ;;  %v753_v45 = vmax.f32 %v721_v35, 0.0  ;;  %v735_v46 = vadd.f32 %v703_v6, %v516_v43  ;;  %v656_v4 = vmul.f32 %v949_v38, %v1194_v23 }
  0xec   : > { %800 = vst [vmem:[%s1268_s14 + $0x90] sm:$0xff] %v768_v39  ;;  %782 = vst [vmem:[%s1268_s14] sm:$0xff] %v750_v40  ;;  %v769_v48 = vmax.f32 %v737_v41, 0.0  ;;  %v751_v49 = vmax.f32 %v719_v42, 0.0  ;;  %v960_v6 = vunpack.c.l.bf16 %v1280_v52  ;;  %v961_v31 = vunpack.c.h.bf16 %v1280_v52 }
  0xed   : > { %798 = vst [vmem:[%s1268_s14 + $0x80] sm:$0xff] %v766_v44  ;;  %785 = vst [vmem:[%s1268_s14 + $0x18] sm:$0xff] %v753_v45  ;;  %v767_v53 = vmax.f32 %v735_v46, 0.0  ;;  %v993_v33 = vunpack.c.h.bf16 %v1290_v57  ;;  %v697_v35 = vadd.f32 %v1204_v32, %v658_v62  ;;  %v713_v36 = vadd.f32 %v1204_v32, %v674_v63 }
  0xee   : > { %801 = vst [vmem:[%s1268_s14 + $0x98] sm:$0xff] %v769_v48  ;;  %783 = vst [vmem:[%s1268_s14 + $0x8] sm:$0xff] %v751_v49  ;;  %v1034_v59 = vpop.f32.mrb[4].mxu0  ;;  %v661_v29 = vmul.f32 %v960_v6, %v1194_v23  ;;  %v957_v37 = vunpack.c.h.bf16 %v1293_v58  ;;  %v695_v39 = vadd.f32 %v1204_v32, %v656_v4  ;;  %v711_v40 = vadd.f32 %v1204_v32, %v672_v5 }
  0xef   : > { %799 = vst [vmem:[%s1268_s14 + $0x88] sm:$0xff] %v767_v53  ;;  %v724_v1 = vadd.f32 %v1034_v59, %v1241_v7  ;;  %v1050_v2 = vpop.f32.mrb[4].mxu1  ;;  %v465_v3 = vpop.f32.mrb[5].mxu0  ;;  %v677_v41 = vmul.f32 %v992_v16, %v1194_v23  ;;  %v659_v42 = vmul.f32 %v956_v17, %v1194_v23  ;;  %v989_v48 = vunpack.c.h.bf16 %v1304_v0 }
  0xf0   : > { %v740_v8 = vadd.f32 %v1050_v2, %v1247_v10  ;;  %v722_v9 = vadd.f32 %v1250_v11, %v465_v3  ;;  %v529_v13 = vpop.f32.mrb[5].mxu1  ;;  %v1035_v14 = vpop.f32.mrb[6].mxu0  ;;  %v988_v10 = vunpack.c.l.bf16 %v1304_v0  ;;  %v700_v46 = vadd.f32 %v1204_v32, %v661_v29 }
  0xf1   : > { %v756_v7 = vmax.f32 %v724_v1, 0.0  ;;  %v738_v18 = vadd.f32 %v1253_v12, %v529_v13  ;;  %v725_v19 = vadd.f32 %v1035_v14, %v1257_v15  ;;  %v1051_v20 = vpop.f32.mrb[6].mxu1  ;;  %v468_v21 = vpop.f32.mrb[7].mxu0  ;;  %v662_v53 = vmul.f32 %v961_v31, %v1194_v23 }
  0xf2   : > { %v772_v22 = vmax.f32 %v740_v8, 0.0  ;;  %v754_v11 = vmax.f32 %v722_v9, 0.0  ;;  %v741_v24 = vadd.f32 %v1051_v20, %v709_v50  ;;  %v723_v25 = vadd.f32 %v691_v51, %v468_v21  ;;  %v532_v26 = vpop.f32.mrb[7].mxu1 }
  0xf3   : > { %788 = vst [vmem:[%s1268_s14 + $0x30] sm:$0xff] %v756_v7  ;;  %v770_v27 = vmax.f32 %v738_v18, 0.0  ;;  %v757_v28 = vmax.f32 %v725_v19, 0.0  ;;  %v739_v12 = vadd.f32 %v707_v54, %v532_v26  ;;  %v675_v47 = vmul.f32 %v988_v10, %v1194_v23 }
  0xf4   : > { %804 = vst [vmem:[%s1268_s14 + $0xb0] sm:$0xff] %v772_v22  ;;  %786 = vst [vmem:[%s1268_s14 + $0x20] sm:$0xff] %v754_v11  ;;  %v773_v15 = vmax.f32 %v741_v24, 0.0  ;;  %v755_v30 = vmax.f32 %v723_v25, 0.0  ;;  %v678_v54 = vmul.f32 %v993_v33, %v1194_v23  ;;  %v660_v63 = vmul.f32 %v957_v37, %v1194_v23 }
  0xf5   : > { %802 = vst [vmem:[%s1268_s14 + $0xa0] sm:$0xff] %v770_v27  ;;  %789 = vst [vmem:[%s1268_s14 + $0x38] sm:$0xff] %v757_v28  ;;  %v771_v34 = vmax.f32 %v739_v12, 0.0  ;;  %v716_v9 = vadd.f32 %v1204_v32, %v677_v41  ;;  %v698_v13 = vadd.f32 %v1204_v32, %v659_v42  ;;  %v714_v16 = vadd.f32 %v1204_v32, %v675_v47 }
  0xf6   : > { %805 = vst [vmem:[%s1268_s14 + $0xb8] sm:$0xff] %v773_v15  ;;  %787 = vst [vmem:[%s1268_s14 + $0x28] sm:$0xff] %v755_v30  ;;  %v1038_v38 = vpop.f32.mrb[8].mxu0  ;;  %v701_v17 = vadd.f32 %v1204_v32, %v662_v53  ;;  %v699_v18 = vadd.f32 %v1204_v32, %v660_v63 }
  0xf7   : > { %803 = vst [vmem:[%s1268_s14 + $0xa8] sm:$0xff] %v771_v34  ;;  %v728_v43 = vadd.f32 %v1038_v38, %v696_v55  ;;  %v1054_v44 = vpop.f32.mrb[8].mxu1  ;;  %v481_v45 = vpop.f32.mrb[9].mxu0 }
  0xf8   : > { %v744_v49 = vadd.f32 %v1054_v44, %v1287_v56  ;;  %v726_v50 = vadd.f32 %v694_v60, %v481_v45  ;;  %v545_v51 = vpop.f32.mrb[9].mxu1  ;;  %v1039_v52 = vpop.f32.mrb[10].mxu0 }
  0xf9   : > { %v760_v57 = vmax.f32 %v728_v43, 0.0  ;;  %v742_v55 = vadd.f32 %v1299_v61, %v545_v51  ;;  %v729_v58 = vadd.f32 %v1039_v52, %v697_v35  ;;  %v1055_v59 = vpop.f32.mrb[10].mxu1  ;;  %v484_v62 = vpop.f32.mrb[11].mxu0  ;;  %v676_v61 = vmul.f32 %v989_v48, %v1194_v23 }
  0xfa   : > { %v776_v0 = vmax.f32 %v744_v49, 0.0  ;;  %v758_v56 = vmax.f32 %v726_v50, 0.0  ;;  %v745_v60 = vadd.f32 %v1055_v59, %v713_v36  ;;  %v727_v1 = vadd.f32 %v695_v39, %v484_v62  ;;  %v548_v2 = vpop.f32.mrb[11].mxu1 }
  0xfb   : > { %792 = vst [vmem:[%s1268_s14 + $0x50] sm:$0xff] %v760_v57  ;;  %v774_v3 = vmax.f32 %v742_v55, 0.0  ;;  %v761_v4 = vmax.f32 %v729_v58, 0.0  ;;  %v743_v5 = vadd.f32 %v711_v40, %v548_v2  ;;  %v717_v23 = vadd.f32 %v1204_v32, %v678_v54 }
  0xfc   : > { %808 = vst [vmem:[%s1268_s14 + $0xd0] sm:$0xff] %v776_v0  ;;  %790 = vst [vmem:[%s1268_s14 + $0x40] sm:$0xff] %v758_v56  ;;  %v777_v6 = vmax.f32 %v745_v60, 0.0  ;;  %v759_v8 = vmax.f32 %v727_v1, 0.0  ;;  %v715_v10 = vadd.f32 %v1204_v32, %v676_v61 }
  0xfd   : > { %806 = vst [vmem:[%s1268_s14 + $0xc0] sm:$0xff] %v774_v3  ;;  %793 = vst [vmem:[%s1268_s14 + $0x58] sm:$0xff] %v761_v4  ;;  %v775_v14 = vmax.f32 %v743_v5, 0.0 }
  0xfe   : > { %809 = vst [vmem:[%s1268_s14 + $0xd8] sm:$0xff] %v777_v6  ;;  %791 = vst [vmem:[%s1268_s14 + $0x48] sm:$0xff] %v759_v8  ;;  %v1042_v7 = vpop.f32.mrb[12].mxu0 }
  0xff   : > { %807 = vst [vmem:[%s1268_s14 + $0xc8] sm:$0xff] %v775_v14  ;;  %v732_v19 = vadd.f32 %v1042_v7, %v700_v46  ;;  %v1058_v20 = vpop.f32.mrb[12].mxu1  ;;  %v497_v21 = vpop.f32.mrb[13].mxu0 }
 0x100   : > { %v748_v22 = vadd.f32 %v1058_v20, %v716_v9  ;;  %v730_v11 = vadd.f32 %v698_v13, %v497_v21  ;;  %v561_v24 = vpop.f32.mrb[13].mxu1  ;;  %v1043_v25 = vpop.f32.mrb[14].mxu0 }
 0x101   : > { %v764_v26 = vmax.f32 %v732_v19, 0.0  ;;  %v746_v27 = vadd.f32 %v714_v16, %v561_v24  ;;  %v733_v28 = vadd.f32 %v1043_v25, %v701_v17  ;;  %v1059_v12 = vpop.f32.mrb[14].mxu1  ;;  %v500_v29 = vpop.f32.mrb[15].mxu0 }
 0x102   : > { %v780_v15 = vmax.f32 %v748_v22, 0.0  ;;  %v762_v30 = vmax.f32 %v730_v11, 0.0  ;;  %v749_v31 = vadd.f32 %v1059_v12, %v717_v23  ;;  %v731_v32 = vadd.f32 %v699_v18, %v500_v29  ;;  %v564_v33 = vpop.f32.mrb[15].mxu1 }
 0x103   : > { %796 = vst [vmem:[%s1268_s14 + $0x70] sm:$0xff] %v764_v26  ;;  %v778_v34 = vmax.f32 %v746_v27, 0.0  ;;  %v765_v35 = vmax.f32 %v733_v28, 0.0  ;;  %v747_v36 = vadd.f32 %v715_v10, %v564_v33 }
 0x104   : > { %812 = vst [vmem:[%s1268_s14 + $0xf0] sm:$0xff] %v780_v15  ;;  %794 = vst [vmem:[%s1268_s14 + $0x60] sm:$0xff] %v762_v30  ;;  %v781_v37 = vmax.f32 %v749_v31, 0.0  ;;  %v763_v38 = vmax.f32 %v731_v32, 0.0 }
 0x105   : > { %810 = vst [vmem:[%s1268_s14 + $0xe0] sm:$0xff] %v778_v34  ;;  %797 = vst [vmem:[%s1268_s14 + $0x78] sm:$0xff] %v765_v35  ;;  %v779_v39 = vmax.f32 %v747_v36, 0.0 }
 0x106   : > { %813 = vst [vmem:[%s1268_s14 + $0xf8] sm:$0xff] %v781_v37  ;;  %795 = vst [vmem:[%s1268_s14 + $0x68] sm:$0xff] %v763_v38 }
 0x107   : > { %811 = vst [vmem:[%s1268_s14 + $0xe8] sm:$0xff] %v779_v39 }
 0x108 PF: > { %s15_s18 = sadd.s32 1, %s1094_s18  }
 0x109   : > { %p12_p5 = scmp.ge.s32.totalorder %s15_s18, 4  }
 0x10b   :  { %14 = sbr.rel (!%p12_p5) target bundleno = 1 (0x1), region = 73 }

// kernel: residual_block_forward.4
= control target key start
LH: loop header
LB: loop body
LE: loop exit
PB: predicated region body
PF: predicated region fallthrough
CT: control target
= control target key end

     0   :  { %s6860_s21 = smov 0   ;;  %s8930_s0 = inlined_call_operand.vmem [shape: bf16[512,128], index: 0, kind: input, shape index: {}]   ;;  %s8931_s1 = inlined_call_operand.vmem [shape: f32[1,128], index: 1, kind: input, shape index: {}]   ;;  %s8932_s2 = inlined_call_operand.vmem [shape: f32[1,128], index: 2, kind: input, shape index: {}]   ;;  %s8933_s3 = inlined_call_operand.vmem [shape: bf16[9,128,128], index: 3, kind: input, shape index: {}]   ;;  %s8934_s4 = inlined_call_operand.vmem [shape: bf16[512,128], index: 4, kind: output, shape index: {0}]   ;;  %s8935_s5 = inlined_call_operand.vmem [shape: f32[2,1,128], index: 5, kind: output, shape index: {1}]   ;;  %s8936_s6 = inlined_call_operand.vmem [shape: f32[2,1,128], index: 6, kind: output, shape index: {2}]  }
   0x1 LB: > { %s6866_s22 = sadd.s32 4294967295, %s6821_s21   ;;  %p5305_p0 = scmp.ge.s32.totalorder %s6821_s21, 1  ;;  %s6821_s21 = sphi %s6860_s21, %s17_s21  }
   0x2   : > { %p218_p1 = scmp.lt.s32.totalorder %s6821_s21, 3 }
   0x4   : > { %p219_p2 = pnand %p5305_p0, %p218_p1 }
   0x6   : > { %222 = sbr.rel (%p219_p2) target bundleno = 649 (0x289), region = 36 }
   0xd   : > { %v6714_v0 = vld [vmem:[%s8933_s3 + $0x40] sm:$0xff]   ;;  %s5306_s25 = sshll.u32 %s6866_s22, 5  ;;  %v6716_v2 = vld [vmem:[%s8933_s3 + $0x48] sm:$0xff]   ;;  %v485_v3 = vlaneseq  ;;  %v6823_v5 = vmov 0   ;;  %v6718_v6 = vld [vmem:[%s8933_s3 + $0x50] sm:$0xff]   ;;  %vm6824_vm3 = vmmov 1  }
   0xe   : > { %v6715_v1 = vld [vmem:[%s8933_s3 + $0x100] sm:$0xff]   ;;  %p6877_p3 = scmp.lt.s32.totalorder %s5306_s25, 63  ;;  %6000 = vmatprep.subr.bf16.mxu1 %v6714_v0  ;;  %v6717_v4 = vld [vmem:[%s8933_s3 + $0x108] sm:$0xff]   ;;  %276 = vst [vmem:[#allocation2 + $0x8] sm:$0xff] %v6823_v5  ;;  %275 = vst [vmem:[#allocation2] sm:$0xff] %v6823_v5  ;;  %6016 = vmatprep.mubr.bf16.mxu1 %v6823_v5  ;;  %p266_p4 = scmp.lt.s32.totalorder %s6866_s22, 1 }
   0xf   : > { %6192 = vmatprep.subr.bf16.mxu0 %v6715_v1  ;;  %6001 = vmatpush3.bf16.msra.mxu1 %v6714_v0  ;;  %277 = vst [vmem:[#allocation2 + $0x90] sm:$0xff] %v6823_v5  ;;  %278 = vst [vmem:[#allocation2 + $0x98] sm:$0xff] %v6823_v5  ;;  %v6719_v7 = vld [vmem:[%s8933_s3 + $0x110] sm:$0xff]   ;;  %v6902_v8 = vshrl.u32 %v485_v3, 7  ;;  %v6720_v9 = vld [vmem:[%s8933_s3 + $0x58] sm:$0xff]  }
  0x10   : > { %6193 = vmatpush3.bf16.msra.mxu0 %v6715_v1  ;;  %6002 = vmatprep.subr.bf16.mxu1 %v6716_v2  ;;  %s9245_s25 = smov (!%p6877_p3, %s5306_s25), 63  ;;  %v6721_v11 = vld [vmem:[%s8933_s3 + $0x118] sm:$0xff]   ;;  %v6722_v13 = vld [vmem:[%s8933_s3 + $0x60] sm:$0xff]   ;;  %v6724_v17 = vld [vmem:[%s8933_s3 + $0x68] sm:$0xff]   ;;  %vm1159_vm6 = vsmask.f32 7424 }
  0x11   : > { %6194 = vmatprep.subr.bf16.mxu0 %v6717_v4  ;;  %v488_v10 = vadd.s32 16, %v6902_v8  ;;  %s5307_s17 = sshll.u32 %s9245_s25, 2  ;;  %v522_v12 = vand.u32 15, %v6902_v8  ;;  %v6723_v15 = vld [vmem:[%s8933_s3 + $0x120] sm:$0xff]   ;;  %v6725_v18 = vld [vmem:[%s8933_s3 + $0x128] sm:$0xff]   ;;  %vm1048_vm4 = vmpackc.low %vm6824_vm3, %vm6824_vm3  ;;  %v489_v3 = vadd.s32 24, %v6902_v8 }
  0x12   : > { %s6924_s27 = scalar_lea.vmem %s8930_s0, %s5307_s17  ;;  %v6940_v20 = vld [vmem:[%s8931_s1] ss:$0 sm:$0xff]  ;;  %v6963_v32 = vsel %vm1048_vm4, 65537, %v6823_v5  ;;  %v6726_v33 = vld [vmem:[%s8933_s3 + $0x70] sm:$0xff]   ;;  %v6728_v50 = vld [vmem:[%s8933_s3 + $0x78] sm:$0xff]   ;;  %v487_v16 = vadd.s32 8, %v6902_v8 }
  0x13   : > { %6003 = vmatpush3.bf16.msra.mxu1 %v6716_v2  ;;  %v536_v14 = vand.u32 15, %v488_v10  ;;  %vm6926_vm0 = vcmp.gt.s32.totalorder %v522_v12, 0  ;;  %v5754_v19 = vld [vmem:[%s6924_s27 + $0x8] sm:$0xff]   ;;  %v6949_v24 = vld [vmem:[%s8932_s2] ss:$0 sm:$0xff]  ;;  %v5755_v29 = vld [vmem:[%s6924_s27 + $0x10] sm:$0xff]  }
  0x14   : > { %6195 = vmatpush3.bf16.msra.mxu0 %v6717_v4  ;;  %6004 = vmatprep.subr.bf16.mxu1 %v6718_v6  ;;  %v5616_v22 = vunpack.c.l.bf16 %v5754_v19  ;;  %v5617_v23 = vunpack.c.h.bf16 %v5754_v19  ;;  %vm1047_vm2 = vmpackc.low %vm6926_vm0, %vm6926_vm0  ;;  %v5611_v25 = vld [vmem:[%s6924_s27] sm:$0xff]   ;;  %v6727_v38 = vld [vmem:[%s8933_s3 + $0x130] sm:$0xff]   ;;  %v5620_v42 = vunpack.c.l.bf16 %v5755_v29  ;;  %v5621_v57 = vunpack.c.h.bf16 %v5755_v29  ;;  %s9247_s22 = smov (!%p266_p4, %s6866_s22), 1 }
  0x15   : > { %6196 = vmatprep.subr.bf16.mxu0 %v6719_v7  ;;  %vm6942_vm1 = vcmp.gt.s32.totalorder %v536_v14, 0  ;;  %v1079_v26 = vsel %vm1047_vm2, 65537, %v6823_v5  ;;  %v5612_v27 = vunpack.c.l.bf16 %v5611_v25  ;;  %v5613_v28 = vunpack.c.h.bf16 %v5611_v25  ;;  %v6729_v54 = vld [vmem:[%s8933_s3 + $0x138] sm:$0xff]   ;;  %v6730_v0 = vld [vmem:[%s8933_s3] sm:$0xff]   ;;  %v6732_v10 = vld [vmem:[%s8933_s3 + $0x148] sm:$0xff]   ;;  %s268_s20 = scalar_lea.vmem %s8935_s5, %s9247_s22  ;;  %s271_s26 = scalar_lea.vmem %s8936_s6, %s9247_s22 }
  0x16   : > { %v352_v30 = vmul.f32 %v5616_v22, %v6940_v20  ;;  %v353_v31 = vmul.f32 %v5617_v23, %v6940_v20  ;;  %vm1049_vm5 = vmpackc.low %vm6942_vm1, %vm6942_vm1  ;;  %v5312_v35 = vcombine.low %v1079_v26, %v6963_v32  ;;  %v354_v60 = vmul.f32 %v5620_v42, %v6940_v20  ;;  %v6731_v2 = vld [vmem:[%s8933_s3 + $0x140] sm:$0xff]   ;;  %v6733_v14 = vld [vmem:[%s8933_s3 + $0x8] sm:$0xff]  }
  0x17   : > { %6005 = vmatpush3.bf16.msra.mxu1 %v6718_v6  ;;  %v1081_v34 = vsel %vm1049_vm5, 65537, %v6823_v5  ;;  %v350_v36 = vmul.f32 %v5612_v27, %v6940_v20  ;;  %v351_v37 = vmul.f32 %v5613_v28, %v6940_v20  ;;  %v355_v61 = vmul.f32 %v5621_v57, %v6940_v20  ;;  %v6734_v21 = vld [vmem:[%s8933_s3 + $0x150] sm:$0xff]   ;;  %v6739_v29 = vld [vmem:[%s8933_s3 + $0x18] sm:$0xff]  }
  0x18   : > { %6197 = vmatpush3.bf16.msra.mxu0 %v6719_v7  ;;  %6006 = vmatprep.subr.bf16.mxu1 %v6720_v9  ;;  %v391_v39 = vadd.f32 %v6949_v24, %v352_v30  ;;  %v392_v40 = vadd.f32 %v6949_v24, %v353_v31  ;;  %v6978_v41 = vcombine.low %v1081_v34, %v6963_v32  ;;  %v1161_v43 = vshll.u32 %v5312_v35, 16  ;;  %v5756_v7 = vld [vmem:[%s6924_s27 + $0x18] sm:$0xff]   ;;  %v6746_v57 = vld [vmem:[%s8933_s3 + $0x30] sm:$0xff]  }
  0x19   : > { %6198 = vmatprep.subr.bf16.mxu0 %v6721_v11  ;;  %v1164_v44 = vshrl.u32 %v5312_v35, 16  ;;  %v389_v45 = vadd.f32 %v6949_v24, %v350_v36  ;;  %v390_v46 = vadd.f32 %v6949_v24, %v351_v37  ;;  %v393_v63 = vadd.f32 %v6949_v24, %v354_v60  ;;  %v6735_v31 = vld [vmem:[%s8933_s3 + $0x158] sm:$0xff]   ;;  %v5757_v35 = vld [vmem:[%s6924_s27 + $0x20] sm:$0xff]  }
  0x1a   : > { %v423_v47 = vmax.f32 %v391_v39, 0.0  ;;  %v424_v48 = vmax.f32 %v392_v40, 0.0  ;;  %v1168_v49 = vshll.u32 %v6978_v41, 16  ;;  %v6986_v51 = vrot.slane %v1161_v43, 1  ;;  %v6737_v39 = vld [vmem:[%s8933_s3 + $0x160] sm:$0xff]  }
  0x1b   : > { %6007 = vmatpush3.bf16.msra.mxu1 %v6720_v9  ;;  %v421_v52 = vmax.f32 %v389_v45, 0.0  ;;  %v422_v53 = vmax.f32 %v390_v46, 0.0  ;;  %v394_v1 = vadd.f32 %v6949_v24, %v355_v61  ;;  %v425_v6 = vmax.f32 %v393_v63, 0.0  ;;  %v6744_v46 = vld [vmem:[%s8933_s3 + $0x28] sm:$0xff]   ;;  %v6740_v61 = vld [vmem:[%s8933_s3 + $0x170] sm:$0xff]  }
  0x1c   : > { %6199 = vmatpush3.bf16.msra.mxu0 %v6721_v11  ;;  %6008 = vmatprep.subr.bf16.mxu1 %v6722_v13  ;;  %9029 = vst [vmem:[#allocation3_spill] sm:$0xff] %v6986_v51  ;;  %v6991_v55 = vpack.c.bf16 %v424_v48, %v423_v47  ;;  %v6993_v56 = vrot.slane %v1168_v49, 1  ;;  %v1166_v58 = vor.u32 %v1164_v44, %v6986_v51  ;;  %v543_v11 = vand.u32 15, %v489_v3  ;;  %v6738_v47 = vld [vmem:[%s8933_s3 + $0x168] sm:$0xff]  }
  0x1d   : > { %6200 = vmatprep.subr.bf16.mxu0 %v6723_v15  ;;  %v6996_v59 = vpack.c.bf16 %v422_v53, %v421_v52  ;;  %v426_v9 = vmax.f32 %v394_v1, 0.0  ;;  %v490_v25 = vadd.s32 32, %v6902_v8  ;;  %v529_v27 = vand.u32 15, %v487_v16 }
  0x1e   : > { %470 = vst [vmem:[#allocation2 + $0x18] sm:$0xff] %v6991_v55  ;;  %v7003_v62 = vsel %vm1159_vm6, %v1166_v58, %v6993_v56  ;;  %vm7045_vm8 = vcmp.lt.s32.totalorder %v543_v11, 15  ;;  %v491_v40 = vadd.s32 40, %v6902_v8  ;;  %v5628_v42 = vunpack.c.l.bf16 %v5757_v35 }
  0x1f   : > { %6009 = vmatpush3.bf16.msra.mxu1 %v6722_v13  ;;  %469 = vst [vmem:[#allocation2 + $0x10] sm:$0xff] %v6996_v59  ;;  %vm1288_vm7 = vcmp.ne.s16.totalorder %v7003_v62, 0  ;;  %6208 = vmatprep.mubr.bf16.mxu0 %v6996_v59  ;;  %v7026_v12 = vpack.c.bf16 %v426_v9, %v425_v6  ;;  %v5624_v13 = vunpack.c.l.bf16 %v5756_v7  ;;  %vm2005_vm9 = vmpackc.low %vm7045_vm8, %vm7045_vm8  ;;  %vm7065_vm10 = vcmp.lt.s32.totalorder %v529_v27, 15  ;;  %v5758_v9 = vld [vmem:[%s6924_s27 + $0x28] sm:$0xff]  }
  0x20   : > { %6201 = vmatpush3.bf16.msra.mxu0 %v6723_v15  ;;  %6010 = vmatprep.subr.bf16.mxu1 %v6724_v17  ;;  %v7020_v4 = vsel %vm1288_vm7, %v6996_v59, 0  ;;  %v5625_v15 = vunpack.c.h.bf16 %v5756_v7  ;;  %v2037_v37 = vsel %vm2005_vm9, 65537, %v6823_v5  ;;  %vm2003_vm11 = vmpackc.low %vm7065_vm10, %vm7065_vm10  ;;  %v5629_v45 = vunpack.c.h.bf16 %v5757_v35 }
  0x21   : > { %6202 = vmatprep.subr.bf16.mxu0 %v6725_v18  ;;  %9030 = vst [vmem:[#allocation4_spill] sm:$0xff] %v7020_v4  ;;  %471 = vst [vmem:[#allocation2 + $0x20] sm:$0xff] %v7026_v12  ;;  %v5361_v43 = vcombine.low %v6963_v32, %v2037_v37  ;;  %v2035_v48 = vsel %vm2003_vm11, 65537, %v6823_v5  ;;  %v557_v49 = vand.u32 15, %v491_v40  ;;  %v358_v52 = vmul.f32 %v5628_v42, %v6940_v20 }
  0x22   : > { %v357_v19 = vmul.f32 %v5625_v15, %v6940_v20  ;;  %v7105_v58 = vcombine.low %v6963_v32, %v2035_v48  ;;  %vm1563_vm1 = vsmask.f32 256  ;;  %v494_v40 = vadd.s32 64, %v6902_v8  ;;  %v6750_v15 = vld [vmem:[%s8933_s3 + $0x80] sm:$0xff]  }
  0x23   : > { %6011 = vmatpush3.bf16.msra.mxu1 %v6724_v17  ;;  %v356_v17 = vmul.f32 %v5624_v13, %v6940_v20  ;;  %v2122_v53 = vshrl.u32 %v5361_v43, 16  ;;  %vm7111_vm14 = vcmp.lt.s32.totalorder %v557_v49, 15  ;;  %v397_v1 = vadd.f32 %v6949_v24, %v358_v52 }
  0x24   : > { %6203 = vmatpush3.bf16.msra.mxu0 %v6725_v18  ;;  %6012 = vmatprep.subr.bf16.mxu1 %v6726_v33  ;;  %v6736_v18 = vld [vmem:[%s8933_s3 + $0x10] sm:$0xff]   ;;  %v396_v26 = vadd.f32 %v6949_v24, %v357_v19  ;;  %v2125_v3 = vshll.u32 %v5361_v43, 16  ;;  %v2115_v11 = vshrl.u32 %v7105_v58, 16  ;;  %vm2007_vm15 = vmpackc.low %vm7111_vm14, %vm7111_vm14  ;;  %v493_v13 = vadd.s32 56, %v6902_v8 }
  0x25   : > { %6204 = vmatprep.subr.bf16.mxu0 %v6727_v38  ;;  %v395_v23 = vadd.f32 %v6949_v24, %v356_v17  ;;  %v429_v16 = vmax.f32 %v397_v1, 0.0  ;;  %v2039_v22 = vsel %vm2007_vm15, 65537, %v6823_v5 }
  0x26   : > { %v428_v30 = vmax.f32 %v396_v26, 0.0  ;;  %v7142_v26 = vrot.slane %v2115_v11, 7 }
  0x27   : > { %6013 = vmatpush3.bf16.msra.mxu1 %v6726_v33  ;;  %v427_v28 = vmax.f32 %v395_v23, 0.0  ;;  %v550_v33 = vand.u32 15, %v490_v25  ;;  %v5632_v23 = vunpack.c.l.bf16 %v5758_v9  ;;  %v5633_v25 = vunpack.c.h.bf16 %v5758_v9 }
  0x28   : > { %6205 = vmatpush3.bf16.msra.mxu0 %v6727_v38  ;;  %6014 = vmatprep.subr.bf16.mxu1 %v6728_v50  ;;  %v6742_v38 = vld [vmem:[%s8933_s3 + $0x20] sm:$0xff]  }
  0x29   : > { %6206 = vmatprep.subr.bf16.mxu0 %v6729_v54  ;;  %v7062_v34 = vpack.c.bf16 %v428_v30, %v427_v28  ;;  %vm7084_vm12 = vcmp.gt.s32.totalorder %v550_v33, 0  ;;  %v571_v28 = vand.u32 15, %v493_v13  ;;  %v361_v33 = vmul.f32 %v5633_v25, %v6940_v20 }
  0x2a   : > { %vm1051_vm13 = vmpackc.low %vm7084_vm12, %vm7084_vm12 }
  0x2b   : > { %6015 = vmatpush3.bf16.msra.mxu1 %v6728_v50  ;;  %472 = vst [vmem:[#allocation2 + $0x28] sm:$0xff] %v7062_v34  ;;  %v492_v50 = vadd.s32 48, %v6902_v8  ;;  %v1083_v60 = vsel %vm1051_vm13, 65537, %v6823_v5  ;;  %v400_v42 = vadd.f32 %v6949_v24, %v361_v33  ;;  %vm7176_vm4 = vcmp.lt.s32.totalorder %v571_v28, 15 }
  0x2c   : > { %6207 = vmatpush3.bf16.msra.mxu0 %v6729_v54  ;;  %6048 = vmatprep.subr.bf16.mxu1 %v6730_v0  ;;  %v359_v54 = vmul.f32 %v5629_v45, %v6940_v20  ;;  %v7120_v7 = vcombine.low %v1083_v60, %v6963_v32  ;;  %vm2009_vm5 = vmpackc.low %vm7176_vm4, %vm7176_vm4  ;;  %v2722_v60 = vshrl.u32 %v7020_v4, 16 }
  0x2d   : > { %6240 = vmatprep.subr.bf16.mxu0 %v6731_v2 }
  0x2e   : > { %6017 = vmatmul.mubr.bf16.vlgmr.msra.gmra.mrb[0].mxu1 %v6996_v59  ;;  %v398_v6 = vadd.f32 %v6949_v24, %v359_v54 }
  0x2f   : > { %6209 = vmatmul.mubr.bf16.vlgmr.msra.gmra.mrb[0].mxu0 %v6991_v55  ;;  %6049 = vmatpush3.bf16.msra.mxu1 %v6730_v0  ;;  %v564_v0 = vand.u32 15, %v492_v50  ;;  %v578_v50 = vand.u32 15, %v494_v40 }
  0x30   : > { %6241 = vmatpush3.bf16.msra.mxu0 %v6731_v2  ;;  %6020 = vmatprep.mubr.bf16.mxu1 %v6991_v55  ;;  %v7116_v2 = vrot.slane %v2122_v53, 7  ;;  %v430_v19 = vmax.f32 %v398_v6, 0.0  ;;  %v7195_v53 = vrot.slane %v6823_v5, 7  ;;  %v2041_v6 = vsel %vm2009_vm5, 65537, %v6823_v5 }
  0x31   : > { %6242 = vmatprep.subr.bf16.mxu0 %v6732_v10  ;;  %6212 = vmatprep.mubr.bf16.mxu0 %v7026_v12  ;;  %vm7134_vm0 = vcmp.gt.s32.totalorder %v564_v0, 0  ;;  %vm7211_vm8 = vcmp.gt.s32.totalorder %v578_v50, 0 }
  0x32   : > { %6050 = vmatprep.subr.bf16.mxu1 %v6733_v14  ;;  %v2127_v17 = vor.u32 %v2125_v3, %v7116_v2  ;;  %vm1053_vm2 = vmpackc.low %vm7134_vm0, %vm7134_vm0  ;;  %v7147_v27 = vpack.c.bf16 %v430_v19, %v429_v16 }
  0x33   : > { %6051 = vmatpush3.bf16.msra.mxu1 %v6733_v14  ;;  %v6741_v14 = vld [vmem:[%s8933_s3 + $0x178] sm:$0xff]   ;;  %v1085_v37 = vsel %vm1053_vm2, 65537, %v6823_v5  ;;  %vm1055_vm9 = vmpackc.low %vm7211_vm8, %vm7211_vm8 }
  0x34   : > { %6243 = vmatpush3.bf16.msra.mxu0 %v6732_v10  ;;  %6052 = vmatprep.subr.bf16.mxu1 %v6736_v18  ;;  %v6748_v10 = vld [vmem:[%s8933_s3 + $0x38] sm:$0xff]   ;;  %v7157_v30 = vsel %vm1563_vm1, %v7142_v26, %v2127_v17  ;;  %473 = vst [vmem:[#allocation2 + $0x30] sm:$0xff] %v7147_v27  ;;  %v7184_v45 = vcombine.low %v1085_v37, %v6963_v32  ;;  %v1087_v40 = vsel %vm1055_vm9, 65537, %v6823_v5 }
  0x35   : > { %6244 = vmatprep.subr.bf16.mxu0 %v6734_v21  ;;  %9041 = vst [vmem:[#allocation5_spill] sm:$0xff] %v7157_v30  ;;  %vm8973_vm3 = vcmp.ne.s16.totalorder %v7157_v30, 0 }
  0x36   : > { %6021 = vmatmul.mubr.bf16.gmra.mrb[4].mxu1 %v7026_v12  ;;  %v2259_v44 = vsel %vm8973_vm3, %v6996_v59, 0  ;;  %v1184_v63 = vshll.u32 %v7184_v45, 16 }
  0x37   : > { %6053 = vmatpush3.bf16.msra.mxu1 %v6736_v18  ;;  %6213 = vmatmul.mubr.bf16.gmra.mrb[4].mxu0 %v7062_v34  ;;  %v1172_v18 = vshrl.u32 %v6978_v41, 16  ;;  %v7152_v41 = vld [vmem:[%s8933_s3 + $0x180] sm:$0xff]   ;;  %v2300_v54 = vshll.u32 %v2259_v44, 16 }
  0x38   : > { %6245 = vmatpush3.bf16.msra.mxu0 %v6734_v21  ;;  %6054 = vmatprep.subr.bf16.mxu1 %v6739_v29  ;;  %v1176_v21 = vshll.u32 %v7120_v7, 16  ;;  %v7224_v17 = vrot.slane %v1184_v63, 1 }
  0x39   : > { %6246 = vmatprep.subr.bf16.mxu0 %v6735_v31  ;;  %6024 = vmatprep.mubr.bf16.mxu1 %v7062_v34  ;;  %v1174_v35 = vor.u32 %v1172_v18, %v6993_v56  ;;  %v7216_v11 = vrot.slane %v2300_v54, 1  ;;  %v5363_v18 = vcombine.low %v6963_v32, %v2041_v6  ;;  %v7268_v54 = vcombine.low %v1087_v40, %v6963_v32 }
  0x3a   : > { %6216 = vmatprep.mubr.bf16.mxu0 %v7147_v27  ;;  %v1178_v36 = vrot.slane %v1176_v21, 1 }
  0x3b   : > { %6055 = vmatpush3.bf16.msra.mxu1 %v6739_v29  ;;  %v360_v29 = vmul.f32 %v5632_v23, %v6940_v20  ;;  %9047 = vst [vmem:[#allocation7_spill] sm:$0xff] %v7216_v11  ;;  %v2141_v63 = vshll.u32 %v5363_v18, 16 }
  0x3c   : > { %6247 = vmatpush3.bf16.msra.mxu0 %v6735_v31  ;;  %6056 = vmatprep.subr.bf16.mxu1 %v6742_v38  ;;  %v5362_v31 = vcombine.low %v6963_v32, %v2039_v22  ;;  %v1179_v48 = vsel %vm1159_vm6, %v1174_v35, %v1178_v36  ;;  %v7247_v35 = vrot.slane %v2722_v60, 7 }
  0x3d   : > { %6248 = vmatprep.subr.bf16.mxu0 %v6737_v39 }
  0x3e   : > { %6025 = vmatmul.mubr.bf16.gmra.mrb[8].mxu1 %v7147_v27  ;;  %v2130_v62 = vshrl.u32 %v5362_v31, 16  ;;  %v2133_v3 = vshll.u32 %v5362_v31, 16  ;;  %9050 = vst [vmem:[#allocation10_spill] sm:$0xff] %v7247_v35  ;;  %v3364_v35 = vld [vmem:[#allocation2 + $0x10] sm:$0xff] }
  0x3f   : > { %6057 = vmatpush3.bf16.msra.mxu1 %v6742_v38  ;;  %v399_v38 = vadd.f32 %v6949_v24, %v360_v29 }
  0x40   : > { %6249 = vmatpush3.bf16.msra.mxu0 %v6737_v39  ;;  %6058 = vmatprep.subr.bf16.mxu1 %v6744_v46  ;;  %v7170_v39 = vsel %vm1288_vm7, %v6991_v55, 0  ;;  %vm1289_vm7 = vcmp.ne.s16.totalorder %v1179_v48, 0  ;;  %v7203_v1 = vrot.slane %v2130_v62, 7 }
  0x41   : > { %6250 = vmatprep.subr.bf16.mxu0 %v6738_v47  ;;  %9042 = vst [vmem:[#allocation6_spill] sm:$0xff] %v7170_v39  ;;  %v431_v43 = vmax.f32 %v399_v38, 0.0  ;;  %v3845_v49 = vshrl.u32 %v7170_v39, 16  ;;  %v1306_v13 = vsel %vm1289_vm7, %v6996_v59, 0  ;;  %v7233_v59 = vsel %vm1289_vm7, %v7026_v12, 0 }
  0x42   : > { %9048 = vst [vmem:[#allocation8_spill] sm:$0xff] %v7233_v59  ;;  %v1577_v25 = vshrl.u32 %v1306_v13, 16  ;;  %v2135_v28 = vor.u32 %v2133_v3, %v7203_v1  ;;  %v7242_v29 = vsel %vm1289_vm7, %v6991_v55, 0  ;;  %v2138_v38 = vshrl.u32 %v5363_v18, 16 }
  0x43   : > { %6059 = vmatpush3.bf16.msra.mxu1 %v6744_v46  ;;  %v432_v46 = vmax.f32 %v400_v42, 0.0  ;;  %v7228_v21 = vrot.slane %v3845_v49, 7  ;;  %v1580_v56 = vshll.u32 %v1306_v13, 16  ;;  %v1188_v13 = vshrl.u32 %v7184_v45, 16 }
  0x44   : > { %6251 = vmatpush3.bf16.msra.mxu0 %v6738_v47  ;;  %6060 = vmatprep.subr.bf16.mxu1 %v6746_v57  ;;  %v5759_v47 = vld [vmem:[%s6924_s27 + $0x30] sm:$0xff]   ;;  %v7261_v48 = vsel %vm1563_vm1, %v7116_v2, %v2135_v28 }
  0x45   : > { %6252 = vmatprep.subr.bf16.mxu0 %v6740_v61  ;;  %v7192_v52 = vpack.c.bf16 %v432_v46, %v431_v43  ;;  %v5636_v0 = vunpack.c.l.bf16 %v5759_v47  ;;  %v3853_v43 = vshrl.u32 %v7233_v59, 16  ;;  %v5760_v46 = vld [vmem:[%s6924_s27 + $0x38] sm:$0xff]   ;;  %9051 = vst [vmem:[#allocation11_spill] sm:$0xff] %v7261_v48  ;;  %vm8972_vm15 = vcmp.ne.s16.totalorder %v7261_v48, 0 }
  0x46   : > { %v5641_v2 = vunpack.c.h.bf16 %v5760_v46  ;;  %v7328_v40 = vsel %vm8972_vm15, %v7026_v12, 0 }
  0x47   : > { %6061 = vmatpush3.bf16.msra.mxu1 %v6746_v57  ;;  %v2304_v57 = vshrl.u32 %v2259_v44, 16  ;;  %474 = vst [vmem:[#allocation2 + $0x38] sm:$0xff] %v7192_v52  ;;  %6217 = vmatmul.mubr.bf16.gmra.mrb[8].mxu0 %v7192_v52  ;;  %v362_v19 = vmul.f32 %v5636_v0, %v6940_v20  ;;  %v2730_v44 = vshrl.u32 %v7242_v29, 16  ;;  %v5640_v0 = vunpack.c.l.bf16 %v5760_v46 }
  0x48   : > { %6253 = vmatpush3.bf16.msra.mxu0 %v6740_v61  ;;  %6062 = vmatprep.subr.bf16.mxu1 %v6748_v10  ;;  %v1180_v61 = vshrl.u32 %v7120_v7, 16  ;;  %v5637_v7 = vunpack.c.h.bf16 %v5759_v47  ;;  %v7257_v47 = vrot.slane %v1577_v25, 7  ;;  %v7276_v3 = vrot.slane %v3853_v43, 7 }
  0x49   : > { %6254 = vmatprep.subr.bf16.mxu0 %v6741_v14  ;;  %6028 = vmatprep.mubr.bf16.mxu1 %v7192_v52  ;;  %v7245_v33 = vor.u32 %v2304_v57, %v7216_v11  ;;  %v401_v42 = vadd.f32 %v6949_v24, %v362_v19  ;;  %v1192_v19 = vshll.u32 %v7268_v54, 16  ;;  %v498_v25 = vadd.s32 96, %v6902_v8 }
  0x4a   : > { %v1182_v16 = vor.u32 %v1180_v61, %v1178_v36  ;;  %v363_v23 = vmul.f32 %v5637_v7, %v6940_v20  ;;  %v7274_v61 = vrot.slane %v2138_v38, 7  ;;  %9056 = vst [vmem:[#allocation12_spill] sm:$0xff] %v7276_v3  ;;  %v2733_v7 = vshll.u32 %v7242_v29, 16 }
  0x4b   : > { %6063 = vmatpush3.bf16.msra.mxu1 %v6748_v10  ;;  %v495_v10 = vadd.s32 72, %v6902_v8  ;;  %9049 = vst [vmem:[#allocation9_spill] sm:$0xff] %v7245_v33  ;;  %v433_v50 = vmax.f32 %v401_v42, 0.0  ;;  %v7312_v29 = vsel %vm8972_vm15, %v6991_v55, 0  ;;  %v497_v46 = vadd.s32 88, %v6902_v8 }
  0x4c   : > { %6255 = vmatpush3.bf16.msra.mxu0 %v6741_v14  ;;  %v496_v14 = vadd.s32 80, %v6902_v8  ;;  %6096 = vmatprep.subr.bf16.mxu1 %v6750_v15  ;;  %v1187_v37 = vsel %vm1159_vm6, %v1182_v16, %v7224_v17  ;;  %v402_v62 = vadd.f32 %v6949_v24, %v363_v23  ;;  %v365_v15 = vmul.f32 %v5641_v2, %v6940_v20 }
  0x4d   : > { %6288 = vmatprep.subr.bf16.mxu0 %v7152_v41  ;;  %v585_v31 = vand.u32 15, %v495_v10  ;;  %vm1290_vm11 = vcmp.ne.s16.totalorder %v1187_v37, 0  ;;  %v7285_v10 = vrot.slane %v2730_v44, 7  ;;  %v7294_v16 = vor.u32 %v1580_v56, %v7257_v47  ;;  %9058 = vst [vmem:[#allocation14_spill] sm:$0xff] %v7312_v29 }
  0x4e   : > { %v592_v36 = vand.u32 15, %v496_v14  ;;  %v434_v60 = vmax.f32 %v402_v62, 0.0  ;;  %v364_v14 = vmul.f32 %v5640_v0, %v6940_v20  ;;  %v7299_v18 = vsel %vm1290_vm11, %v6991_v55, 0 }
  0x4f   : > { %vm7263_vm10 = vcmp.lt.s32.totalorder %v585_v31, 15  ;;  %9057 = vst [vmem:[#allocation13_spill] sm:$0xff] %v7285_v10  ;;  %v2143_v45 = vor.u32 %v2141_v63, %v7274_v61  ;;  %v7316_v31 = vsel %vm1290_vm11, %v7062_v34, 0  ;;  %v404_v38 = vadd.f32 %v6949_v24, %v365_v15 }
  0x50   : > { %vm7270_vm12 = vcmp.gt.s32.totalorder %v592_v36, 0  ;;  %vm2011_vm13 = vmpackc.low %vm7263_vm10, %vm7263_vm10  ;;  %v7283_v9 = vpack.c.bf16 %v434_v60, %v433_v50  ;;  %v403_v28 = vadd.f32 %v6949_v24, %v364_v14  ;;  %9059 = vst [vmem:[#allocation15_spill] sm:$0xff] %v7316_v31  ;;  %v1585_v42 = vshrl.u32 %v7299_v18, 16  ;;  %v5761_v50 = vld [vmem:[%s6924_s27 + $0x40] sm:$0xff]  }
  0x51   : > { %vm1057_vm14 = vmpackc.low %vm7270_vm12, %vm7270_vm12  ;;  %v2043_v23 = vsel %vm2011_vm13, 65537, %v6823_v5  ;;  %v1190_v56 = vor.u32 %v1188_v13, %v7224_v17  ;;  %v1194_v44 = vrot.slane %v1192_v19, 1  ;;  %v436_v49 = vmax.f32 %v404_v38, 0.0 }
  0x52   : > { %475 = vst [vmem:[#allocation2 + $0x40] sm:$0xff] %v7283_v9  ;;  %6220 = vmatprep.mubr.bf16.mxu0 %v7283_v9  ;;  %6029 = vmatmul.mubr.bf16.gmra.mrb[12].mxu1 %v7283_v9  ;;  %v1089_v36 = vsel %vm1057_vm14, 65537, %v6823_v5  ;;  %v435_v43 = vmax.f32 %v403_v28, 0.0  ;;  %v5364_v62 = vcombine.low %v6963_v32, %v2043_v23  ;;  %v7337_v5 = vsel %vm1563_vm1, %v7203_v1, %v2143_v45 }
  0x53   : > { %9060 = vst [vmem:[#allocation16_spill] sm:$0xff] %v7337_v5  ;;  %v7341_v57 = vsel %vm1290_vm11, %v7026_v12, 0  ;;  %v7344_v60 = vcombine.low %v1089_v36, %v6963_v32  ;;  %v606_v17 = vand.u32 15, %v498_v25  ;;  %v2308_v63 = vshll.u32 %v7312_v29, 16 }
  0x54   : > { %9061 = vst [vmem:[#allocation17_spill] sm:$0xff] %v7341_v57  ;;  %v3431_v2 = vshll.u32 %v7328_v40, 16  ;;  %v7349_v13 = vpack.c.bf16 %v436_v49, %v435_v43  ;;  %v7351_v14 = vrot.slane %v1585_v42, 7  ;;  %v1588_v1 = vshll.u32 %v7299_v18, 16 }
  0x55   : > { %v5644_v15 = vunpack.c.l.bf16 %v5761_v50  ;;  %vm8971_vm0 = vcmp.ne.s16.totalorder %v7337_v5, 0  ;;  %v1195_v19 = vsel %vm1159_vm6, %v1190_v56, %v1194_v44  ;;  %v2146_v45 = vshrl.u32 %v5364_v62, 16 }
  0x56   : > { %v599_v23 = vand.u32 15, %v497_v46  ;;  %476 = vst [vmem:[#allocation2 + $0x48] sm:$0xff] %v7349_v13  ;;  %6221 = vmatmul.mubr.bf16.gmra.mrb[12].mxu0 %v7349_v13  ;;  %6032 = vmatprep.mubr.bf16.mxu1 %v7349_v13  ;;  %v7363_v25 = vsel %vm8971_vm0, %v7026_v12, 0  ;;  %v1196_v18 = vshrl.u32 %v7268_v54, 16  ;;  %v1200_v28 = vshll.u32 %v7344_v60, 16 }
  0x57   : > { %9062 = vst [vmem:[#allocation18_spill] sm:$0xff] %v7363_v25  ;;  %vm7367_vm2 = vcmp.gt.s32.totalorder %v606_v17, 0  ;;  %v7371_v38 = vrot.slane %v2308_v63, 1  ;;  %v2738_v42 = vshrl.u32 %v7341_v57, 16  ;;  %v500_v56 = vadd.s32 112, %v6902_v8 }
  0x58   : > { %v5645_v43 = vunpack.c.h.bf16 %v5761_v50  ;;  %v7376_v46 = vor.u32 %v2733_v7, %v7285_v10  ;;  %vm1291_vm4 = vcmp.ne.s16.totalorder %v1195_v19, 0  ;;  %v499_v49 = vadd.s32 104, %v6902_v8  ;;  %vm1059_vm7 = vmpackc.low %vm7367_vm2, %vm7367_vm2 }
  0x59   : > { %9065 = vst [vmem:[#allocation19_spill] sm:$0xff] %v7371_v38  ;;  %v366_v54 = vmul.f32 %v5644_v15, %v6940_v20  ;;  %v2316_v17 = vshll.u32 %v7363_v25, 16  ;;  %v7381_v0 = vrot.slane %v2146_v45, 7  ;;  %v2149_v6 = vshll.u32 %v5364_v62, 16  ;;  %v6749_v38 = vld [vmem:[%s8933_s3 + $0x198] sm:$0xff]  }
  0x5a   : > { %9066 = vst [vmem:[#allocation20_spill] sm:$0xff] %v7376_v46  ;;  %vm7383_vm5 = vcmp.lt.s32.totalorder %v599_v23, 15  ;;  %v1198_v7 = vor.u32 %v1196_v18, %v1194_v44  ;;  %v1202_v50 = vrot.slane %v1200_v28, 1  ;;  %v367_v37 = vmul.f32 %v5645_v43, %v6940_v20  ;;  %v7404_v44 = vld [vmem:[#allocation2 + $0x8] sm:$0xff] }
  0x5b   : > { %v405_v15 = vadd.f32 %v6949_v24, %v366_v54  ;;  %v7392_v22 = vrot.slane %v3431_v2, 1  ;;  %v7397_v62 = vsel %vm1291_vm4, %v7026_v12, 0  ;;  %v620_v23 = vand.u32 15, %v500_v56  ;;  %vm2013_vm8 = vmpackc.low %vm7383_vm5, %vm7383_vm5  ;;  %v5762_v56 = vld [vmem:[%s6924_s27 + $0x48] sm:$0xff]  }
  0x5c   : > { %v7399_v48 = vrot.slane %v2738_v42, 7  ;;  %v1091_v18 = vsel %vm1059_vm7, 65537, %v7404_v44  ;;  %v613_v28 = vand.u32 15, %v499_v49  ;;  %v406_v2 = vadd.f32 %v6949_v24, %v367_v37 }
  0x5d   : > { %v7408_v36 = vrot.slane %v2316_v17, 1  ;;  %v2151_v12 = vor.u32 %v2149_v6, %v7381_v0  ;;  %v7414_v42 = vsel %vm1291_vm4, %v7062_v34, 0  ;;  %v1593_v54 = vshrl.u32 %v7397_v62, 16 }
  0x5e   : > { %9069 = vst [vmem:[#allocation21_spill] sm:$0xff] %v7399_v48  ;;  %9071 = vst [vmem:[#allocation23_spill] sm:$0xff] %v7414_v42  ;;  %v7420_v63 = vsel %vm1291_vm4, %v7147_v27, 0  ;;  %v1203_v49 = vsel %vm1159_vm6, %v1198_v7, %v1202_v50  ;;  %v437_v37 = vmax.f32 %v405_v15, 0.0  ;;  %v2045_v17 = vsel %vm2013_vm8, 65537, %v7404_v44 }
  0x5f   : > { %9070 = vst [vmem:[#allocation22_spill] sm:$0xff] %v7408_v36  ;;  %9072 = vst [vmem:[#allocation24_spill] sm:$0xff] %v7420_v63  ;;  %v7425_v45 = vcombine.low %v1091_v18, %v6963_v32  ;;  %vm7427_vm9 = vcmp.gt.s32.totalorder %v620_v23, 0  ;;  %v438_v43 = vmax.f32 %v406_v2, 0.0  ;;  %v7432_v4 = vor.u32 %v1588_v1, %v7351_v14 }
  0x60   : > { %v2746_v19 = vshrl.u32 %v7414_v42, 16  ;;  %vm7435_vm10 = vcmp.lt.s32.totalorder %v613_v28, 15  ;;  %v5648_v7 = vunpack.c.l.bf16 %v5762_v56  ;;  %v1596_v15 = vshll.u32 %v7397_v62, 16  ;;  %vm1061_vm12 = vmpackc.low %vm7427_vm9, %vm7427_vm9 }
  0x61   : > { %v7443_v23 = vsel %vm1563_vm1, %v7274_v61, %v2151_v12  ;;  %v7445_v57 = vpack.c.bf16 %v438_v43, %v437_v37  ;;  %vm1292_vm11 = vcmp.ne.s16.totalorder %v1203_v49, 0  ;;  %v7449_v2 = vcombine.low %v6963_v32, %v2045_v17  ;;  %vm2015_vm13 = vmpackc.low %vm7435_vm10, %vm7435_vm10 }
  0x62   : > { %9077 = vst [vmem:[#allocation25_spill] sm:$0xff] %v7443_v23  ;;  %v5649_v28 = vunpack.c.h.bf16 %v5762_v56  ;;  %v7454_v62 = vrot.slane %v1593_v54, 7  ;;  %v1204_v18 = vshrl.u32 %v7344_v60, 16  ;;  %v1208_v61 = vshll.u32 %v7425_v45, 16 }
  0x63   : > { %477 = vst [vmem:[#allocation2 + $0x50] sm:$0xff] %v7445_v57  ;;  %v368_v43 = vmul.f32 %v5648_v7, %v6940_v20  ;;  %6033 = vmatmul.mubr.bf16.gmra.mrb[16].mxu1 %v7445_v57  ;;  %vm8970_vm14 = vcmp.ne.s16.totalorder %v7443_v23, 0  ;;  %v7465_v12 = vrot.slane %v2746_v19, 7  ;;  %v501_v56 = vadd.s32 120, %v6902_v8 }
  0x64   : > { %v369_v60 = vmul.f32 %v5649_v28, %v6940_v20  ;;  %v7471_v54 = vsel %vm1292_vm11, %v7062_v34, 0  ;;  %v1093_v10 = vsel %vm1061_vm12, 65537, %v7404_v44  ;;  %v2118_v17 = vshll.u32 %v7105_v58, 16 }
  0x65   : > { %9078 = vst [vmem:[#allocation26_spill] sm:$0xff] %v7465_v12  ;;  %v407_v37 = vadd.f32 %v6949_v24, %v368_v43  ;;  %v7478_v6 = vsel %vm1292_vm11, %v7192_v52, 0  ;;  %v2154_v19 = vshrl.u32 %v7449_v2, 16  ;;  %v2047_v7 = vsel %vm2015_vm13, 65537, %v7404_v44 }
  0x66   : > { %9079 = vst [vmem:[#allocation27_spill] sm:$0xff] %v7478_v6  ;;  %v408_v20 = vadd.f32 %v6949_v24, %v369_v60  ;;  %v1206_v28 = vor.u32 %v1204_v18, %v1202_v50  ;;  %v1210_v1 = vrot.slane %v1208_v61, 1  ;;  %v7484_v12 = vor.u32 %v2118_v17, %v7142_v26 }
  0x67   : > { %v439_v42 = vmax.f32 %v407_v37, 0.0  ;;  %v7487_v43 = vcombine.low %v1093_v10, %v6963_v32  ;;  %v627_v58 = vand.u32 15, %v501_v56  ;;  %v3382_v46 = vsel %vm8973_vm3, %v6991_v55, 0 }
  0x68   : > { %9080 = vst [vmem:[#allocation28_spill] sm:$0xff] %v7484_v12  ;;  %v440_v48 = vmax.f32 %v408_v20, 0.0  ;;  %v1601_v25 = vshrl.u32 %v7471_v54, 16  ;;  %v7495_v24 = vsel %vm1292_vm11, %v7147_v27, 0  ;;  %v5366_v26 = vcombine.low %v6963_v32, %v2047_v7 }
  0x69   : > { %vm2241_vm2 = vcmp.ne.s16.totalorder %v7484_v12, 0  ;;  %v7500_v50 = vor.u32 %v1596_v15, %v7454_v62  ;;  %v7505_v18 = vsel %vm8970_vm14, %v7062_v34, 0  ;;  %v502_v55 = vadd.s32 128, %v6902_v8 }
  0x6a   : > { %v7508_v61 = vpack.c.bf16 %v440_v48, %v439_v42  ;;  %v2157_v49 = vshll.u32 %v7449_v2, 16  ;;  %v7512_v56 = vsel %vm1159_vm6, %v1206_v28, %v1210_v1  ;;  %v3381_v60 = vsel %vm2241_vm2, %v3364_v35, 0  ;;  %v5763_v48 = vld [vmem:[%s6924_s27 + $0x50] sm:$0xff]  }
  0x6b   : > { %9081 = vst [vmem:[#allocation29_spill] sm:$0xff] %v7512_v56  ;;  %v3423_v10 = vshll.u32 %v3382_v46, 16  ;;  %v7516_v15 = vrot.slane %v2154_v19, 7  ;;  %v1212_v37 = vshrl.u32 %v7425_v45, 16  ;;  %v1216_v17 = vshll.u32 %v7487_v43, 16 }
  0x6c   : > { %vm7520_vm4 = vcmp.lt.s32.totalorder %v627_v58, 15  ;;  %478 = vst [vmem:[#allocation2 + $0x58] sm:$0xff] %v7508_v61  ;;  %6036 = vmatprep.mubr.bf16.mxu1 %v7508_v61  ;;  %v7527_v42 = vrot.slane %v1601_v25, 7  ;;  %v1604_v35 = vshll.u32 %v7471_v54, 16  ;;  %v2162_v19 = vshrl.u32 %v5366_v26, 16 }
  0x6d   : > { %vm1293_vm5 = vcmp.ne.s16.totalorder %v7512_v56, 0  ;;  %v634_v45 = vand.u32 15, %v502_v55  ;;  %v3416_v20 = vshrl.u32 %v3381_v60, 16  ;;  %v3418_v28 = vshll.u32 %v3381_v60, 16  ;;  %vm2017_vm7 = vmpackc.low %vm7520_vm4, %vm7520_vm4 }
  0x6e   : > { %v504_v58 = vadd.s32 144, %v6902_v8  ;;  %v3425_v30 = vrot.slane %v3423_v10, 1  ;;  %v3427_v36 = vshrl.u32 %v3382_v46, 16  ;;  %v5652_v25 = vunpack.c.l.bf16 %v5763_v48 }
  0x6f   : > { %v2159_v29 = vor.u32 %v2157_v49, %v7516_v15  ;;  %v1214_v54 = vor.u32 %v1212_v37, %v1210_v1  ;;  %v7537_v11 = vrot.slane %v1216_v17, 1  ;;  %v3420_v2 = vrot.slane %v3418_v28, 1  ;;  %v6745_v49 = vld [vmem:[%s8933_s3 + $0x188] sm:$0xff]  }
  0x70   : > { %v7539_v6 = vrot.slane %v2162_v19, 7  ;;  %v2165_v55 = vshll.u32 %v5366_v26, 16  ;;  %v503_v60 = vadd.s32 136, %v6902_v8  ;;  %v5653_v7 = vunpack.c.h.bf16 %v5763_v48  ;;  %v7555_v26 = vld [vmem:[%s8931_s1] ss:$0 sm:$0xff] }
  0x71   : > { %v7545_v63 = vsel %vm1293_vm5, %v7147_v27, 0  ;;  %v2049_v46 = vsel %vm2017_vm7, 65537, %v7404_v44  ;;  %vm7548_vm8 = vcmp.gt.s32.totalorder %v634_v45, 0  ;;  %v3421_v1 = vor.u32 %v3420_v2, %v3416_v20  ;;  %v5764_v2 = vld [vmem:[%s6924_s27 + $0x58] sm:$0xff]  }
  0x72   : > { %v648_v10 = vand.u32 15, %v504_v58  ;;  %v3429_v37 = vor.u32 %v3427_v36, %v3425_v30  ;;  %v370_v17 = vmul.f32 %v7555_v26, %v5652_v25  ;;  %v371_v48 = vmul.f32 %v7555_v26, %v5653_v7  ;;  %vm1063_vm9 = vmpackc.low %vm7548_vm8, %vm7548_vm8 }
  0x73   : > { %v7561_v28 = vor.u32 %v1604_v35, %v7527_v42  ;;  %v7565_v45 = vsel %vm1563_vm1, %v7381_v0, %v2159_v29  ;;  %v7569_v36 = vsel %vm1159_vm6, %v1214_v54, %v7537_v11  ;;  %v1609_v20 = vshrl.u32 %v7545_v63, 16  ;;  %v7587_v54 = vld [vmem:[%s8932_s2] ss:$0 sm:$0xff] }
  0x74   : > { %9086 = vst [vmem:[#allocation30_spill] sm:$0xff] %v7565_v45  ;;  %9087 = vst [vmem:[#allocation31_spill] sm:$0xff] %v7569_v36  ;;  %v7575_v25 = vor.u32 %v2165_v55, %v7539_v6  ;;  %v641_v35 = vand.u32 15, %v503_v60  ;;  %v7581_v29 = vcombine.low %v6963_v32, %v2049_v46  ;;  %v3426_v0 = vsel %vm1159_vm6, %v3421_v1, %v3425_v30 }
  0x75   : > { %v409_v7 = vadd.f32 %v7587_v54, %v370_v17  ;;  %v410_v55 = vadd.f32 %v7587_v54, %v371_v48  ;;  %vm1294_vm10 = vcmp.ne.s16.totalorder %v7569_v36, 0  ;;  %vm7595_vm11 = vcmp.gt.s32.totalorder %v648_v10, 0  ;;  %6256 = vmatprep.mubr.bf16.mxu0 %v3426_v0 }
  0x76   : > { %v3434_v30 = vsel %vm1159_vm6, %v3429_v37, %v7392_v22  ;;  %v5656_v46 = vunpack.c.l.bf16 %v5764_v2  ;;  %v1095_v1 = vsel %vm1063_vm9, 65537, %v7404_v44  ;;  %v5657_v19 = vunpack.c.h.bf16 %v5764_v2  ;;  %v5765_v37 = vld [vmem:[%s6924_s27 + $0x60] sm:$0xff]   ;;  %vm1065_vm13 = vmpackc.low %vm7595_vm11, %vm7595_vm11 }
  0x77   : > { %v441_v17 = vmax.f32 %v409_v7, 0.0  ;;  %v442_v48 = vmax.f32 %v410_v55, 0.0  ;;  %6257 = vmatmul.mubr.bf16.vlgmr.msra.gmra.mrb[0].mxu0 %v3434_v30  ;;  %v7602_v58 = vrot.slane %v1609_v20, 7  ;;  %vm7604_vm12 = vcmp.lt.s32.totalorder %v641_v35, 15 }
  0x78   : > { %v506_v10 = vadd.s32 160, %v6902_v8  ;;  %6289 = vmatpush3.bf16.msra.mxu0 %v7152_v41  ;;  %v372_v0 = vmul.f32 %v7555_v26, %v5656_v46  ;;  %v2170_v3 = vshrl.u32 %v7581_v29, 16  ;;  %v373_v20 = vmul.f32 %v7555_v26, %v5657_v19  ;;  %v6747_v41 = vld [vmem:[%s8933_s3 + $0x190] sm:$0xff]   ;;  %vm2019_vm4 = vmpackc.low %vm7604_vm12, %vm7604_vm12 }
  0x79   : > { %v7616_v2 = vpack.c.bf16 %v442_v48, %v441_v17  ;;  %v7622_v35 = vsel %vm8971_vm0, %v7062_v34, 0  ;;  %6290 = vmatprep.subr.bf16.mxu0 %v6745_v49  ;;  %v7630_v7 = vsel %vm1294_vm10, %v7192_v52, 0  ;;  %v7633_v55 = vcombine.low %v1095_v1, %v6963_v32 }
  0x7a   : > { %v411_v19 = vadd.f32 %v7587_v54, %v372_v0  ;;  %v3435_v30 = vshrl.u32 %v7328_v40, 16  ;;  %v412_v34 = vadd.f32 %v7587_v54, %v373_v20  ;;  %v3439_v46 = vshll.u32 %v7622_v35, 16 }
  0x7b   : > { %479 = vst [vmem:[#allocation2 + $0x60] sm:$0xff] %v7616_v2  ;;  %v5660_v17 = vunpack.c.l.bf16 %v5765_v37  ;;  %v5661_v48 = vunpack.c.h.bf16 %v5765_v37  ;;  %6037 = vmatmul.mubr.bf16.gmra.mrb[20].mxu1 %v7616_v2  ;;  %v1097_v40 = vsel %vm1065_vm13, 65537, %v7404_v44  ;;  %v662_v1 = vand.u32 15, %v506_v10 }
  0x7c   : > { %v443_v0 = vmax.f32 %v411_v19, 0.0  ;;  %v508_v5 = vadd.s32 176, %v6902_v8  ;;  %6291 = vmatpush3.bf16.msra.mxu0 %v6745_v49  ;;  %v444_v36 = vmax.f32 %v412_v34, 0.0  ;;  %v3437_v20 = vor.u32 %v3435_v30, %v7392_v22 }
  0x7d   : > { %v3441_v33 = vrot.slane %v3439_v46, 1  ;;  %v374_v37 = vmul.f32 %v7555_v26, %v5660_v17  ;;  %6292 = vmatprep.subr.bf16.mxu0 %v6747_v41  ;;  %v1220_v60 = vshrl.u32 %v7487_v43, 16  ;;  %v1224_v31 = vshll.u32 %v7633_v55, 16 }
  0x7e   : > { %v2051_v49 = vsel %vm2019_vm4, 65537, %v7404_v44  ;;  %v375_v22 = vmul.f32 %v7555_v26, %v5661_v48  ;;  %v7665_v10 = vpack.c.bf16 %v444_v36, %v443_v0  ;;  %v510_v34 = vadd.s32 192, %v6902_v8 }
  0x7f   : > { %v3442_v19 = vsel %vm1159_vm6, %v3437_v20, %v3441_v33  ;;  %v413_v30 = vadd.f32 %v7587_v54, %v374_v37  ;;  %v7671_v43 = vcombine.low %v1097_v40, %v6963_v32  ;;  %vm7673_vm7 = vcmp.gt.s32.totalorder %v662_v1, 0 }
  0x80   : > { %v676_v59 = vand.u32 15, %v508_v5  ;;  %6260 = vmatprep.mubr.bf16.mxu0 %v3442_v19  ;;  %v414_v17 = vadd.f32 %v7587_v54, %v375_v22  ;;  %6293 = vmatpush3.bf16.msra.mxu0 %v6747_v41  ;;  %v1617_v36 = vshrl.u32 %v7630_v7, 16  ;;  %v7679_v48 = vrot.slane %v2170_v3, 7  ;;  %480 = vst [vmem:[#allocation2 + $0x68] sm:$0xff] %v7665_v10  ;;  %v6751_v5 = vld [vmem:[%s8933_s3 + $0x1a0] sm:$0xff]   ;;  %vm1067_vm8 = vmpackc.low %vm7673_vm7, %vm7673_vm7 }
  0x81   : > { %v2173_v0 = vshll.u32 %v7581_v29, 16  ;;  %v445_v40 = vmax.f32 %v413_v30, 0.0  ;;  %6040 = vmatprep.mubr.bf16.mxu1 %v7665_v10  ;;  %6294 = vmatprep.subr.bf16.mxu0 %v6749_v38  ;;  %v7690_v41 = vsel %vm1563_vm1, %v7516_v15, %v7575_v25  ;;  %v1620_v3 = vshll.u32 %v7630_v7, 16  ;;  %v5766_v30 = vld [vmem:[%s6924_s27 + $0x68] sm:$0xff]  }
  0x82   : > { %9094 = vst [vmem:[#allocation32_spill] sm:$0xff] %v7690_v41  ;;  %v1222_v1 = vor.u32 %v1220_v60, %v7537_v11  ;;  %v446_v29 = vmax.f32 %v414_v17, 0.0  ;;  %v1226_v20 = vrot.slane %v1224_v31, 1  ;;  %v7695_v37 = vcombine.low %v6963_v32, %v2051_v49 }
  0x83   : > { %v1228_v22 = vshrl.u32 %v7633_v55, 16  ;;  %v690_v19 = vand.u32 15, %v510_v34  ;;  %v1232_v15 = vshll.u32 %v7671_v43, 16  ;;  %vm7703_vm9 = vcmp.gt.s32.totalorder %v676_v59, 0  ;;  %v6753_v34 = vld [vmem:[%s8933_s3 + $0x1a8] sm:$0xff]  }
  0x84   : > { %v7707_v11 = vpack.c.bf16 %v446_v29, %v445_v40  ;;  %v3385_v31 = vsel %vm8970_vm14, %v7147_v27, 0  ;;  %6295 = vmatpush3.bf16.msra.mxu0 %v6749_v38  ;;  %v7712_v7 = vrot.slane %v1617_v36, 7  ;;  %v2175_v55 = vor.u32 %v2173_v0, %v7679_v48  ;;  %vm1069_vm12 = vmpackc.low %vm7703_vm9, %vm7703_vm9 }
  0x85   : > { %v3443_v60 = vshrl.u32 %v7622_v35, 16  ;;  %v3447_v49 = vshll.u32 %v3385_v31, 16  ;;  %6296 = vmatprep.subr.bf16.mxu0 %v6751_v5  ;;  %vm2246_vm11 = vcmp.ne.s16.totalorder %v7565_v45, 0  ;;  %v1099_v46 = vsel %vm1067_vm8, 65537, %v7404_v44 }
  0x86   : > { %481 = vst [vmem:[#allocation2 + $0x70] sm:$0xff] %v7707_v11  ;;  %v5664_v27 = vunpack.c.l.bf16 %v5766_v30  ;;  %v5665_v38 = vunpack.c.h.bf16 %v5766_v30  ;;  %6041 = vmatmul.mubr.bf16.gmra.mrb[24].mxu1 %v7707_v11  ;;  %v9097_v59 = vshll.u32 %v7545_v63, 16  ;;  %v2178_v17 = vshrl.u32 %v7695_v37, 16 }
  0x87   : > { %vm7732_vm13 = vcmp.gt.s32.totalorder %v690_v19, 0  ;;  %v3445_v0 = vor.u32 %v3443_v60, %v3441_v33  ;;  %vm2247_vm4 = vcmp.ne.s16.totalorder %v7690_v41, 0  ;;  %v7738_v40 = vsel %vm1159_vm6, %v1222_v1, %v1226_v20  ;;  %v6755_v1 = vld [vmem:[%s8933_s3 + $0x1b0] sm:$0xff]  }
  0x88   : > { %v7726_v35 = vor.u32 %v9097_v59, %v7602_v58  ;;  %9100 = vst [vmem:[#allocation33_spill] sm:$0xff] %v7738_v40  ;;  %v1230_v29 = vor.u32 %v1228_v22, %v1226_v20  ;;  %v1234_v63 = vrot.slane %v1232_v15, 1  ;;  %v3449_v30 = vrot.slane %v3447_v49, 1  ;;  %6297 = vmatpush3.bf16.msra.mxu0 %v6751_v5  ;;  %vm1071_vm7 = vmpackc.low %vm7732_vm13, %vm7732_vm13 }
  0x89   : > { %v7741_v59 = vor.u32 %v1620_v3, %v7712_v7  ;;  %v7745_v19 = vsel %vm1563_vm1, %v7539_v6, %v2175_v55  ;;  %v2181_v25 = vshll.u32 %v7695_v37, 16  ;;  %v5322_v33 = vcombine.low %v1099_v46, %v6963_v32  ;;  %6298 = vmatprep.subr.bf16.mxu0 %v6753_v34  ;;  %v5767_v55 = vld [vmem:[%s6924_s27 + $0x70] sm:$0xff]  }
  0x8a   : > { %9101 = vst [vmem:[#allocation34_spill] sm:$0xff] %v7745_v19  ;;  %v1101_v20 = vsel %vm1069_vm12, 65537, %v7404_v44  ;;  %v3450_v5 = vsel %vm1159_vm6, %v3445_v0, %v3449_v30  ;;  %v376_v6 = vmul.f32 %v7555_v26, %v5664_v27  ;;  %v377_v3 = vmul.f32 %v7555_v26, %v5665_v38 }
  0x8b   : > { %vm1295_vm8 = vcmp.ne.s16.totalorder %v7738_v40, 0  ;;  %v7760_v37 = vrot.slane %v2178_v17, 7  ;;  %6261 = vmatmul.mubr.bf16.gmra.mrb[4].mxu0 %v3450_v5  ;;  %v512_v22 = vadd.s32 208, %v6902_v8  ;;  %v3386_v15 = vsel %vm2246_vm11, %v7192_v52, 0 }
  0x8c   : > { %v7768_v60 = vsel %vm1159_vm6, %v1230_v29, %v1234_v63  ;;  %v415_v49 = vadd.f32 %v7587_v54, %v376_v6  ;;  %v416_v46 = vadd.f32 %v7587_v54, %v377_v3  ;;  %v3451_v27 = vshrl.u32 %v3385_v31, 16  ;;  %6299 = vmatpush3.bf16.msra.mxu0 %v6753_v34  ;;  %v6757_v29 = vld [vmem:[%s8933_s3 + $0x1b8] sm:$0xff]  }
  0x8d   : > { %9102 = vst [vmem:[#allocation35_spill] sm:$0xff] %v7768_v60  ;;  %v1240_v38 = vshll.u32 %v5322_v33, 16  ;;  %v7773_v17 = vcombine.low %v1101_v20, %v6963_v32  ;;  %v1103_v52 = vsel %vm1071_vm7, 65537, %v7404_v44  ;;  %v3455_v0 = vshll.u32 %v3386_v15, 16  ;;  %6300 = vmatprep.subr.bf16.mxu0 %v6755_v1 }
  0x8e   : > { %v447_v5 = vmax.f32 %v415_v49, 0.0  ;;  %v448_v31 = vmax.f32 %v416_v46, 0.0  ;;  %v704_v34 = vand.u32 15, %v512_v22  ;;  %v5668_v6 = vunpack.c.l.bf16 %v5767_v55 }
  0x8f   : > { %v1236_v20 = vshrl.u32 %v7671_v43, 16  ;;  %v1244_v3 = vshrl.u32 %v5322_v33, 16  ;;  %v3453_v23 = vor.u32 %v3451_v27, %v3449_v30  ;;  %v3457_v12 = vrot.slane %v3455_v0, 1  ;;  %v7802_v33 = vld [vmem:[%s8933_s3 + $0x1c0] sm:$0xff]  }
  0x90   : > { %vm2248_vm9 = vcmp.ne.s16.totalorder %v7745_v19, 0  ;;  %v7789_v36 = vsel %vm1295_vm8, %v7283_v9, 0  ;;  %v2183_v56 = vor.u32 %v2181_v25, %v7760_v37  ;;  %v7792_v39 = vpack.c.bf16 %v448_v31, %v447_v5  ;;  %6301 = vmatpush3.bf16.msra.mxu0 %v6755_v1  ;;  %9103 = vst [vmem:[#allocation36_spill] sm:$0xff] %v7802_v33 }
  0x91   : > { %vm8988_vm12 = vcmp.ne.s16.totalorder %v7768_v60, 0  ;;  %v1242_v22 = vrot.slane %v1240_v38, 1  ;;  %v1248_v43 = vshll.u32 %v7773_v17, 16  ;;  %v7797_v30 = vcombine.low %v1103_v52, %v6963_v32  ;;  %6302 = vmatprep.subr.bf16.mxu0 %v6757_v29 }
  0x92   : > { %482 = vst [vmem:[#allocation2 + $0x78] sm:$0xff] %v7792_v39  ;;  %vm7805_vm13 = vcmp.gt.s32.totalorder %v704_v34, 0  ;;  %v3458_v1 = vsel %vm1159_vm6, %v3453_v23, %v3457_v12  ;;  %v5669_v49 = vunpack.c.h.bf16 %v5767_v55  ;;  %v378_v46 = vmul.f32 %v7555_v26, %v5668_v6  ;;  %6044 = vmatprep.mubr.bf16.mxu1 %v7792_v39  ;;  %v5768_v55 = vld [vmem:[%s6924_s27 + $0x78] sm:$0xff]   ;;  %s8860_s27 = scalar_lea.vmem %s8934_s4, %s5307_s17 }
  0x93   : > { %v1238_v27 = vor.u32 %v1236_v20, %v1234_v63  ;;  %v1246_v38 = vor.u32 %v1244_v3, %v1242_v22  ;;  %6264 = vmatprep.mubr.bf16.mxu0 %v3458_v1  ;;  %v514_v52 = vadd.s32 224, %v6902_v8  ;;  %v3387_v0 = vsel %vm2247_vm4, %v7283_v9, 0  ;;  %vm1073_vm7 = vmpackc.low %vm7805_vm13, %vm7805_vm13 }
  0x94   : > { %v379_v5 = vmul.f32 %v7555_v26, %v5669_v49  ;;  %v417_v31 = vadd.f32 %v7587_v54, %v378_v46  ;;  %v3459_v34 = vshrl.u32 %v3386_v15, 16  ;;  %v3463_v23 = vshll.u32 %v3387_v0, 16  ;;  %6303 = vmatpush3.bf16.msra.mxu0 %v6757_v29 }
  0x95   : > { %v1250_v6 = vrot.slane %v1248_v43, 1  ;;  %v1252_v40 = vshrl.u32 %v7773_v17, 16  ;;  %v1256_v63 = vshll.u32 %v7797_v30, 16  ;;  %v718_v20 = vand.u32 15, %v514_v52  ;;  %6336 = vmatprep.subr.bf16.mxu0 %v7802_v33 }
  0x96   : > { %v418_v9 = vadd.f32 %v7587_v54, %v379_v5  ;;  %v449_v3 = vmax.f32 %v417_v31, 0.0  ;;  %v3461_v1 = vor.u32 %v3459_v34, %v3457_v12  ;;  %v3465_v15 = vrot.slane %v3463_v23, 1 }
  0x97   : > { %v7828_v29 = vsel %vm1563_vm1, %v7679_v48, %v2183_v56  ;;  %v7833_v17 = vsel %vm8988_vm12, %v7349_v13, 0  ;;  %v5672_v43 = vunpack.c.l.bf16 %v5768_v55  ;;  %v5673_v25 = vunpack.c.h.bf16 %v5768_v55 }
  0x98   : > { %9106 = vst [vmem:[#allocation37_spill] sm:$0xff] %v7828_v29  ;;  %v7836_v49 = vsel %vm1159_vm6, %v1238_v27, %v1242_v22  ;;  %v1105_v46 = vsel %vm1073_vm7, 65537, %v7404_v44  ;;  %v450_v52 = vmax.f32 %v418_v9, 0.0  ;;  %v3466_v12 = vsel %vm1159_vm6, %v3461_v1, %v3465_v15 }
  0x99   : > { %9107 = vst [vmem:[#allocation38_spill] sm:$0xff] %v7836_v49  ;;  %v7841_v5 = vsel %vm1159_vm6, %v1246_v38, %v1250_v6  ;;  %vm7843_vm13 = vcmp.gt.s32.totalorder %v718_v20, 0  ;;  %6265 = vmatmul.mubr.bf16.gmra.mrb[8].mxu0 %v3466_v12  ;;  %v380_v48 = vmul.f32 %v7555_v26, %v5672_v43  ;;  %v516_v31 = vadd.s32 240, %v6902_v8 }
  0x9a   : > { %9108 = vst [vmem:[#allocation39_spill] sm:$0xff] %v7841_v5  ;;  %v1254_v34 = vor.u32 %v1252_v40, %v1250_v6  ;;  %v1258_v22 = vrot.slane %v1256_v63, 1  ;;  %v7849_v27 = vpack.c.bf16 %v450_v52, %v449_v3  ;;  %v381_v23 = vmul.f32 %v7555_v26, %v5673_v25  ;;  %vm1075_vm0 = vmpackc.low %vm7843_vm13, %vm7843_vm13 }
  0x9b   : > { %v1625_v55 = vshrl.u32 %v7789_v36, 16  ;;  %v7854_v38 = vcombine.low %v1105_v46, %v6963_v32  ;;  %v419_v20 = vadd.f32 %v7587_v54, %v380_v48  ;;  %v3388_v9 = vsel %vm2248_vm9, %v7349_v13, 0 }
  0x9c   : > { %vm9009_vm7 = vcmp.ne.s16.totalorder %v7828_v29, 0  ;;  %v1633_v40 = vshrl.u32 %v7833_v17, 16  ;;  %vm8986_vm14 = vcmp.ne.s16.totalorder %v7836_v49, 0  ;;  %483 = vst [vmem:[#allocation2 + $0x80] sm:$0xff] %v7849_v27  ;;  %6045 = vmatmul.mubr.bf16.gmra.mrb[28].mxu1 %v7849_v27  ;;  %vm8984_vm15 = vcmp.ne.s16.totalorder %v7841_v5, 0  ;;  %v9145_v29 = vld [vmem:[#allocation27_spill] sm:$0xff] }
  0x9d   : > { %v420_v13 = vadd.f32 %v7587_v54, %v381_v23  ;;  %v451_v26 = vmax.f32 %v419_v20, 0.0  ;;  %v732_v6 = vand.u32 15, %v516_v31  ;;  %v7872_v63 = vsel %vm1159_vm6, %v1254_v34, %v1258_v22 }
  0x9e   : > { %9111 = vst [vmem:[#allocation40_spill] sm:$0xff] %v7872_v63  ;;  %v1260_v3 = vshrl.u32 %v7797_v30, 16  ;;  %v3467_v43 = vshrl.u32 %v3387_v0, 16  ;;  %v3471_v25 = vshll.u32 %v3388_v9, 16  ;;  %v1264_v46 = vshll.u32 %v7854_v38, 16 }
  0x9f   : > { %v1107_v52 = vsel %vm1075_vm0, 65537, %v7404_v44  ;;  %v452_v12 = vmax.f32 %v420_v13, 0.0  ;;  %vm932_vm13 = vcmp.gt.s32.totalorder %v732_v6, 0  ;;  %v7880_v54 = vsel %vm9009_vm7, %v7445_v57, 0 }
  0xa0   : > { %vm1077_vm3 = vmpackc.low %vm932_vm13, %vm932_vm13  ;;  %v3469_v56 = vor.u32 %v3467_v43, %v3465_v15  ;;  %v3473_v48 = vrot.slane %v3471_v25, 1  ;;  %v3475_v31 = vshrl.u32 %v3388_v9, 16  ;;  %v7882_v34 = vrot.slane %v1625_v55, 7 }
  0xa1   : > { %v1314_v30 = vsel %vm8986_vm14, %v7445_v57, 0  ;;  %v7887_v0 = vpack.c.bf16 %v452_v12, %v451_v26  ;;  %v1109_v23 = vsel %vm1077_vm3, 65537, %v7404_v44  ;;  %v1315_v15 = vsel %vm8984_vm15, %v7508_v61, 0  ;;  %v966_v26 = vld [vmem:[#allocation2] sm:$0x80] }
  0xa2   : > { %v1262_v20 = vor.u32 %v1260_v3, %v1258_v22  ;;  %v5326_v13 = vcombine.low %v1107_v52, %v6963_v32  ;;  %v3474_v6 = vsel %vm1159_vm6, %v3469_v56, %v3473_v48  ;;  %vm8983_vm0 = vcmp.ne.s16.totalorder %v7872_v63, 0 }
  0xa3   : > { %v1266_v55 = vrot.slane %v1264_v46, 1  ;;  %484 = vst [vmem:[#allocation2 + $0x88] sm:$0xff] %v7887_v0  ;;  %6268 = vmatprep.mubr.bf16.mxu0 %v3474_v6  ;;  %v3477_v57 = vor.u32 %v3475_v31, %v3473_v48  ;;  %v3479_v9 = vshll.u32 %v7880_v54, 16  ;;  %v7898_v43 = vrot.slane %v1633_v40, 7 }
  0xa4   : > { %v1636_v25 = vshll.u32 %v7833_v17, 16  ;;  %v1641_v12 = vshrl.u32 %v1314_v30, 16  ;;  %v7902_v22 = vcombine.low %v1109_v23, %v6963_v32  ;;  %v1644_v3 = vshll.u32 %v1314_v30, 16 }
  0xa5   : > { %v1649_v52 = vshrl.u32 %v1315_v15, 16  ;;  %v3481_v56 = vrot.slane %v3479_v9, 1  ;;  %vm8992_vm3 = vcmp.ne.s16.totalorder %v6986_v51, 0  ;;  %v7908_v46 = vsel %vm8983_vm0, %v7616_v2, 0  ;;  %v8326_v51 = vld [vmem:[#allocation2 + $0x58] sm:$0xff] }
  0xa6   : > { %v1272_v48 = vshll.u32 %v5326_v13, 16  ;;  %v1304_v40 = vsel %vm8992_vm3, %v966_v26, 0  ;;  %v505_v17 = vadd.s32 152, %v6902_v8  ;;  %v7914_v31 = vsel %vm1159_vm6, %v1262_v20, %v1266_v55 }
  0xa7   : > { %v1268_v30 = vshrl.u32 %v7854_v38, 16  ;;  %v3482_v23 = vsel %vm1159_vm6, %v3477_v57, %v3481_v56  ;;  %v1565_v6 = vshrl.u32 %v1304_v40, 16  ;;  %v1276_v9 = vshrl.u32 %v5326_v13, 16 }
  0xa8   : > { %v1280_v1 = vshll.u32 %v7902_v22, 16  ;;  %6269 = vmatmul.mubr.bf16.gmra.mrb[12].mxu0 %v3482_v23  ;;  %v655_v63 = vand.u32 15, %v505_v17  ;;  %v507_v5 = vadd.s32 168, %v6902_v8  ;;  %v7920_v49 = vrot.slane %v1641_v12, 7 }
  0xa9   : > { %v7922_v26 = vrot.slane %v1649_v52, 7  ;;  %v1652_v60 = vshll.u32 %v1315_v15, 16  ;;  %v1567_v33 = vrot.slane %v1565_v6, 7  ;;  %v1657_v20 = vshrl.u32 %v7908_v46, 16 }
  0xaa   : > { %vm8985_vm13 = vcmp.ne.s16.totalorder %v7914_v31, 0  ;;  %v1274_v38 = vrot.slane %v1272_v48, 1  ;;  %vm7926_vm0 = vcmp.lt.s32.totalorder %v655_v63, 15  ;;  %v9114_v13 = vshll.u32 %v7789_v36, 16 }
  0xab   : > { %v1270_v12 = vor.u32 %v1268_v30, %v1266_v55  ;;  %v669_v17 = vand.u32 15, %v507_v5  ;;  %v509_v52 = vadd.s32 184, %v6902_v8  ;;  %v7936_v23 = vrot.slane %v1280_v1, 1  ;;  %vm2021_vm15 = vmpackc.low %vm7926_vm0, %vm7926_vm0 }
  0xac   : > { %v7933_v40 = vor.u32 %v9114_v13, %v7882_v34  ;;  %v1278_v15 = vor.u32 %v1276_v9, %v1274_v38  ;;  %v3483_v63 = vshrl.u32 %v7880_v54, 16  ;;  %v1583_v48 = vsel %vm1563_vm1, %v7195_v53, %v7294_v16  ;;  %v6752_v54 = vld [vmem:[%s8933_s3 + $0x88] sm:$0xff]  }
  0xad   : > { %v7946_v36 = vor.u32 %v1636_v25, %v7898_v43  ;;  %v7951_v5 = vsel %vm8985_vm13, %v7665_v10, 0  ;;  %v1575_v1 = vsel %vm1563_vm1, %v1567_v33, %v7195_v53  ;;  %v1591_v55 = vsel %vm1563_vm1, %v7257_v47, %v7432_v4 }
  0xae   : > { %v7962_v16 = vor.u32 %v1644_v3, %v7920_v49  ;;  %v7965_v25 = vor.u32 %v1652_v60, %v7922_v26  ;;  %v7967_v30 = vrot.slane %v1657_v20, 7  ;;  %v1660_v6 = vshll.u32 %v7908_v46, 16  ;;  %6064 = vmatprep.mubr.bf16.mxu1 %v1575_v1  ;;  %v6789_v20 = vld [vmem:[%s8933_s3 + $0x80] sm:$0xff]  }
  0xaf   : > { %v7971_v53 = vsel %vm1159_vm6, %v1270_v12, %v1274_v38  ;;  %v2053_v4 = vsel %vm2021_vm15, 65537, %v7404_v44  ;;  %6065 = vmatmul.mubr.bf16.vlgmr.msra.gmra.mrb[0].mxu1 %v1583_v48  ;;  %vm955_vm0 = vcmp.lt.s32.totalorder %v669_v17, 15  ;;  %v683_v47 = vand.u32 15, %v509_v52 }
  0xb0   : > { %v1665_v33 = vshrl.u32 %v7951_v5, 16  ;;  %v7977_v3 = vsel %vm1159_vm6, %v1278_v15, %v7936_v23  ;;  %v5369_v60 = vcombine.low %v6963_v32, %v2053_v4  ;;  %v7980_v9 = vor.u32 %v3483_v63, %v3481_v56  ;;  %vm2023_vm13 = vmpackc.low %vm955_vm0, %vm955_vm0  ;;  %6097 = vmatpush3.bf16.msra.mxu1 %v6789_v20  ;;  %6068 = vmatprep.mubr.bf16.mxu1 %v1591_v55  ;;  %v6754_v56 = vld [vmem:[%s8933_s3 + $0x90] sm:$0xff]  }
  0xb1   : > { %v2055_v38 = vsel %vm2023_vm13, 65537, %v7404_v44  ;;  %vm957_vm15 = vcmp.lt.s32.totalorder %v683_v47, 15  ;;  %v1599_v57 = vsel %vm1563_vm1, %v7351_v14, %v7500_v50  ;;  %6098 = vmatprep.subr.bf16.mxu1 %v6752_v54  ;;  %v511_v13 = vadd.s32 200, %v6902_v8 }
  0xb2   : > { %v2186_v12 = vshrl.u32 %v5369_v60, 16  ;;  %v2189_v17 = vshll.u32 %v5369_v60, 16  ;;  %v5370_v52 = vcombine.low %v6963_v32, %v2055_v38  ;;  %vm2025_vm0 = vmpackc.low %vm957_vm15, %vm957_vm15  ;;  %v1607_v15 = vsel %vm1563_vm1, %v7454_v62, %v7561_v28 }
  0xb3   : > { %v2057_v63 = vsel %vm2025_vm0, 65537, %v7404_v44  ;;  %v697_v48 = vand.u32 15, %v511_v13  ;;  %v513_v14 = vadd.s32 216, %v6902_v8  ;;  %v8002_v50 = vsel %vm1563_vm1, %v7527_v42, %v7726_v35  ;;  %v6756_v42 = vld [vmem:[%s8933_s3 + $0x98] sm:$0xff]  }
  0xb4   : > { %v2188_v1 = vrot.slane %v2186_v12, 7  ;;  %v2194_v55 = vshrl.u32 %v5370_v52, 16  ;;  %v2197_v4 = vshll.u32 %v5370_v52, 16  ;;  %v5371_v47 = vcombine.low %v6963_v32, %v2057_v63  ;;  %6099 = vmatpush3.bf16.msra.mxu1 %v6752_v54 }
  0xb5   : > { %vm959_vm13 = vcmp.lt.s32.totalorder %v697_v48, 15  ;;  %v711_v60 = vand.u32 15, %v513_v14  ;;  %6100 = vmatprep.subr.bf16.mxu1 %v6754_v56  ;;  %v515_v62 = vadd.s32 232, %v6902_v8  ;;  %v1623_v28 = vsel %vm1563_vm1, %v7602_v58, %v7741_v59 }
  0xb6   : > { %v2191_v35 = vor.u32 %v2189_v17, %v2188_v1  ;;  %v2196_v20 = vrot.slane %v2194_v55, 7  ;;  %v2202_v38 = vshrl.u32 %v5371_v47, 16  ;;  %v2205_v13 = vshll.u32 %v5371_v47, 16  ;;  %vm2027_vm15 = vmpackc.low %vm959_vm13, %vm959_vm13 }
  0xb7   : > { %6069 = vmatmul.mubr.bf16.gmra.mrb[4].mxu1 %v1599_v57  ;;  %v2059_v54 = vsel %vm2027_vm15, 65537, %v7404_v44  ;;  %vm961_vm0 = vcmp.lt.s32.totalorder %v711_v60, 15  ;;  %v725_v12 = vand.u32 15, %v515_v62  ;;  %v517_v52 = vadd.s32 248, %v6902_v8 }
  0xb8   : > { %v8016_v63 = vsel %vm1563_vm1, %v7760_v37, %v2191_v35  ;;  %v2199_v58 = vor.u32 %v2197_v4, %v2196_v20  ;;  %v2204_v59 = vrot.slane %v2202_v38, 7  ;;  %v5372_v48 = vcombine.low %v6963_v32, %v2059_v54  ;;  %6072 = vmatprep.mubr.bf16.mxu1 %v1607_v15  ;;  %vm2029_vm14 = vmpackc.low %vm961_vm0, %vm961_vm0  ;;  %6101 = vmatpush3.bf16.msra.mxu1 %v6754_v56  ;;  %v6758_v37 = vld [vmem:[%s8933_s3 + $0xa0] sm:$0xff]  }
  0xb9   : > { %vm8987_vm13 = vcmp.ne.s16.totalorder %v8016_v63, 0  ;;  %v2061_v57 = vsel %vm2029_vm14, 65537, %v7404_v44  ;;  %vm8021_vm15 = vcmp.lt.s32.totalorder %v725_v12, 15  ;;  %v739_v8 = vand.u32 15, %v517_v52  ;;  %6102 = vmatprep.subr.bf16.mxu1 %v6756_v42 }
  0xba   : > { %v3390_v15 = vsel %vm8987_vm13, %v7508_v61, 0  ;;  %v8032_v56 = vsel %vm1563_vm1, %v2188_v1, %v2199_v58  ;;  %v2207_v14 = vor.u32 %v2205_v13, %v2204_v59  ;;  %v2210_v55 = vshrl.u32 %v5372_v48, 16  ;;  %vm2031_vm13 = vmpackc.low %vm8021_vm15, %vm8021_vm15 }
  0xbb   : > { %v3487_v44 = vshll.u32 %v3390_v15, 16  ;;  %vm8990_vm14 = vcmp.ne.s16.totalorder %v8032_v56, 0  ;;  %v3491_v4 = vshrl.u32 %v3390_v15, 16  ;;  %v2213_v47 = vshll.u32 %v5372_v48, 16 }
  0xbc   : > { %v3391_v60 = vsel %vm8990_vm14, %v7616_v2, 0  ;;  %v8039_v62 = vsel %vm1563_vm1, %v2196_v20, %v2207_v14  ;;  %v2212_v35 = vrot.slane %v2210_v55, 7  ;;  %v5373_v61 = vcombine.low %v6963_v32, %v2061_v57  ;;  %6103 = vmatpush3.bf16.msra.mxu1 %v6756_v42  ;;  %v6760_v42 = vld [vmem:[%s8933_s3 + $0xa8] sm:$0xff]  }
  0xbd   : > { %9117 = vst [vmem:[#allocation41_spill] sm:$0xff] %v8039_v62  ;;  %v3489_v1 = vrot.slane %v3487_v44, 1  ;;  %v3495_v38 = vshll.u32 %v3391_v60, 16  ;;  %vm8989_vm0 = vcmp.ne.s16.totalorder %v8039_v62, 0  ;;  %v3499_v13 = vshrl.u32 %v3391_v60, 16  ;;  %6104 = vmatprep.subr.bf16.mxu1 %v6758_v37  ;;  %v8059_v55 = vld [vmem:[#allocation2 + $0x8] sm:$0xff] }
  0xbe   : > { %vm1301_vm12 = vcmp.ne.s16.totalorder %v7971_v53, 0  ;;  %v3392_v2 = vsel %vm8989_vm0, %v7665_v10, 0  ;;  %v2215_v20 = vor.u32 %v2213_v47, %v2212_v35  ;;  %v2218_v54 = vshrl.u32 %v5373_v61, 16  ;;  %9119 = vst [vmem:[#allocation43_spill] sm:$0xff] %v8059_v55  ;;  %v6768_v53 = vld [vmem:[%s8933_s3 + $0xc8] sm:$0xff]  }
  0xbf   : > { %v2221_v12 = vshll.u32 %v5373_v61, 16  ;;  %v3490_v52 = vsel %vm1159_vm6, %v7980_v9, %v3489_v1  ;;  %v3493_v58 = vor.u32 %v3491_v4, %v3489_v1  ;;  %v3497_v48 = vrot.slane %v3495_v38, 1  ;;  %6073 = vmatmul.mubr.bf16.gmra.mrb[8].mxu1 %v8002_v50 }
  0xc0   : > { %v3503_v57 = vshll.u32 %v3392_v2, 16  ;;  %6272 = vmatprep.mubr.bf16.mxu0 %v3490_v52  ;;  %v8057_v15 = vsel %vm1563_vm1, %v2204_v59, %v2215_v20  ;;  %v3507_v10 = vshrl.u32 %v3392_v2, 16  ;;  %v2220_v14 = vrot.slane %v2218_v54, 7  ;;  %6076 = vmatprep.mubr.bf16.mxu1 %v1623_v28  ;;  %v6762_v28 = vld [vmem:[%s8933_s3 + $0xb0] sm:$0xff]  }
  0xc1   : > { %9118 = vst [vmem:[#allocation42_spill] sm:$0xff] %v8057_v15  ;;  %v2063_v9 = vsel %vm2031_vm13, 65537, %v8059_v55  ;;  %v3498_v44 = vsel %vm1159_vm6, %v3493_v58, %v3497_v48  ;;  %v3501_v4 = vor.u32 %v3499_v13, %v3497_v48  ;;  %vm2253_vm0 = vcmp.ne.s16.totalorder %v8057_v15, 0  ;;  %6105 = vmatpush3.bf16.msra.mxu1 %v6758_v37 }
  0xc2   : > { %v3505_v50 = vrot.slane %v3503_v57, 1  ;;  %6273 = vmatmul.mubr.bf16.gmra.mrb[16].mxu0 %v3498_v44  ;;  %v3393_v59 = vsel %vm2253_vm0, %v7707_v11, 0  ;;  %v2223_v47 = vor.u32 %v2221_v12, %v2220_v14  ;;  %v5374_v60 = vcombine.low %v6963_v32, %v2063_v9  ;;  %6106 = vmatprep.subr.bf16.mxu1 %v6760_v42  ;;  %v3804_v44 = vld [vmem:[#allocation2 + $0x10] sm:$0x80] }
  0xc3   : > { %vm965_vm14 = vcmp.lt.s32.totalorder %v739_v8, 15  ;;  %v3511_v1 = vshll.u32 %v3393_v59, 16  ;;  %v3515_v38 = vshrl.u32 %v3393_v59, 16  ;;  %v1631_v12 = vsel %vm1563_vm1, %v7712_v7, %v7933_v40 }
  0xc4   : > { %v3506_v17 = vsel %vm1159_vm6, %v3501_v4, %v3505_v50  ;;  %v3509_v61 = vor.u32 %v3507_v10, %v3505_v50  ;;  %vm2033_vm13 = vmpackc.low %vm965_vm14, %vm965_vm14  ;;  %v8078_v37 = vsel %vm1563_vm1, %v2212_v35, %v2223_v47  ;;  %v2226_v13 = vshrl.u32 %v5374_v60, 16 }
  0xc5   : > { %6276 = vmatprep.mubr.bf16.mxu0 %v3506_v17  ;;  %9120 = vst [vmem:[#allocation44_spill] sm:$0xff] %v8078_v37  ;;  %v2229_v2 = vshll.u32 %v5374_v60, 16  ;;  %v2065_v20 = vsel %vm2033_vm13, 65537, %v8059_v55  ;;  %v3513_v8 = vrot.slane %v3511_v1, 1  ;;  %vm8991_vm15 = vcmp.ne.s16.totalorder %v8078_v37, 0  ;;  %6107 = vmatpush3.bf16.msra.mxu1 %v6760_v42 }
  0xc6   : > { %v5375_v54 = vcombine.low %v6963_v32, %v2065_v20  ;;  %v1284_v52 = vshrl.u32 %v7902_v22, 16  ;;  %v3394_v35 = vsel %vm8991_vm15, %v7792_v39, 0  ;;  %v2228_v58 = vrot.slane %v2226_v13, 7  ;;  %6108 = vmatprep.subr.bf16.mxu1 %v6762_v28  ;;  %v6764_v32 = vld [vmem:[%s8933_s3 + $0xb8] sm:$0xff]   ;;  %v3380_v60 = vld [vmem:[#allocation2 + $0x90] sm:$0x1] }
  0xc7   : > { %v1639_v48 = vsel %vm1563_vm1, %v7882_v34, %v7946_v36  ;;  %vm1302_vm14 = vcmp.ne.s16.totalorder %v7977_v3, 0  ;;  %v3514_v7 = vsel %vm1159_vm6, %v3509_v61, %v3513_v8  ;;  %v3517_v40 = vor.u32 %v3515_v38, %v3513_v8  ;;  %6077 = vmatmul.mubr.bf16.gmra.mrb[12].mxu1 %v1631_v12 }
  0xc8   : > { %v3519_v22 = vshll.u32 %v3394_v35, 16  ;;  %v1668_v42 = vshll.u32 %v7951_v5, 16  ;;  %v2231_v57 = vor.u32 %v2229_v2, %v2228_v58  ;;  %v2234_v10 = vshrl.u32 %v5375_v54, 16  ;;  %6080 = vmatprep.mubr.bf16.mxu1 %v1639_v48 }
  0xc9   : > { %v2237_v9 = vshll.u32 %v5375_v54, 16  ;;  %v8101_v34 = vrot.slane %v1665_v33, 7  ;;  %v8106_v36 = vsel %vm1301_vm12, %v7707_v11, 0  ;;  %v3523_v50 = vshrl.u32 %v3394_v35, 16  ;;  %6109 = vmatpush3.bf16.msra.mxu1 %v6762_v28  ;;  %v8124_v28 = vld [vmem:[%s8933_s3 + $0xc0] sm:$0xff]  }
  0xca   : > { %v3521_v4 = vrot.slane %v3519_v22, 1  ;;  %v8111_v59 = vsel %vm1302_vm14, %v7792_v39, 0  ;;  %v8114_v47 = vor.u32 %v1284_v52, %v7936_v23  ;;  %6277 = vmatmul.mubr.bf16.gmra.mrb[20].mxu0 %v3514_v7  ;;  %v8117_v5 = vsel %vm1563_vm1, %v2220_v14, %v2231_v57  ;;  %6110 = vmatprep.subr.bf16.mxu1 %v6764_v32 }
  0xcb   : > { %9122 = vst [vmem:[#allocation46_spill] sm:$0xff] %v8117_v5  ;;  %v8119_v33 = vrot.slane %v2234_v10, 7  ;;  %vm2255_vm13 = vcmp.ne.s16.totalorder %v8117_v5, 0  ;;  %v3806_v23 = vsel %vm8992_vm3, %v3804_v44, 0  ;;  %v1647_v14 = vsel %vm1563_vm1, %v7898_v43, %v7962_v16 }
  0xcc   : > { %9121 = vst [vmem:[#allocation45_spill] sm:$0xff] %v8114_v47  ;;  %v3522_v17 = vsel %vm1159_vm6, %v3517_v40, %v3521_v4  ;;  %v3395_v61 = vsel %vm2255_vm13, %v7849_v27, 0  ;;  %v1655_v38 = vsel %vm1563_vm1, %v7920_v49, %v7965_v25  ;;  %v3525_v13 = vor.u32 %v3523_v50, %v3521_v4  ;;  %v8160_v40 = vld [vmem:[#allocation2 + $0x30] sm:$0xff] }
  0xcd   : > { %9123 = vst [vmem:[#allocation47_spill] sm:$0xff] %v8119_v33  ;;  %6280 = vmatprep.mubr.bf16.mxu0 %v3522_v17  ;;  %v2239_v1 = vor.u32 %v2237_v9, %v8119_v33  ;;  %vm8993_vm15 = vcmp.ne.s16.totalorder %v8119_v33, 0  ;;  %v3527_v2 = vshll.u32 %v3395_v61, 16  ;;  %v3531_v20 = vshrl.u32 %v3395_v61, 16  ;;  %6111 = vmatpush3.bf16.msra.mxu1 %v6764_v32  ;;  %9125 = vst [vmem:[#allocation49_spill] sm:$0xff] %v8160_v40 }
  0xce   : > { %v3397_v8 = vsel %vm8993_vm15, %v3380_v60, 0  ;;  %v1662_v16 = vor.u32 %v1660_v6, %v7967_v30  ;;  %v1670_v54 = vor.u32 %v1668_v42, %v8101_v34  ;;  %6144 = vmatprep.subr.bf16.mxu1 %v8124_v28  ;;  %v1673_v49 = vshrl.u32 %v8106_v36, 16 }
  0xcf   : > { %v8149_v12 = vsel %vm1563_vm1, %v2228_v58, %v2239_v1  ;;  %v3529_v25 = vrot.slane %v3527_v2, 1  ;;  %v3543_v52 = vshll.u32 %v3397_v8, 16  ;;  %6081 = vmatmul.mubr.bf16.gmra.mrb[16].mxu1 %v1647_v14  ;;  %v1681_v35 = vshrl.u32 %v8111_v59, 16 }
  0xd0   : > { %9124 = vst [vmem:[#allocation48_spill] sm:$0xff] %v8149_v12  ;;  %vm2256_vm3 = vcmp.ne.s16.totalorder %v8149_v12, 0  ;;  %vm1303_vm15 = vcmp.ne.s16.totalorder %v8114_v47, 0  ;;  %v3841_v6 = vshrl.u32 %v3806_v23, 16  ;;  %6084 = vmatprep.mubr.bf16.mxu1 %v1655_v38  ;;  %v8165_v22 = vsel %vm2246_vm11, %v8160_v40, 0  ;;  %v9126_v23 = vld [vmem:[#allocation6_spill] sm:$0xff] }
  0xd1   : > { %v3396_v46 = vsel %vm2256_vm3, %v7887_v0, 0  ;;  %v3530_v58 = vsel %vm1159_vm6, %v3525_v13, %v3529_v25  ;;  %v3533_v48 = vor.u32 %v3531_v20, %v3529_v25  ;;  %v2754_v42 = vshrl.u32 %v7495_v24, 16  ;;  %v8191_v25 = vld [vmem:[#allocation2 + $0x40] sm:$0xff] }
  0xd2   : > { %v3535_v32 = vshll.u32 %v3396_v46, 16  ;;  %v3539_v7 = vshrl.u32 %v3396_v46, 16  ;;  %v1676_v10 = vshll.u32 %v8106_v36, 16  ;;  %6281 = vmatmul.mubr.bf16.gmra.mrb[24].mxu0 %v3530_v58  ;;  %v1675_v9 = vrot.slane %v1673_v49, 7  ;;  %9129 = vst [vmem:[#allocation6_spill] sm:$0xff] %v8191_v25  ;;  %v8250_v46 = vld [vmem:[#allocation2 + $0x48] sm:$0xff] }
  0xd3   : > { %v1684_v44 = vshll.u32 %v8111_v59, 16  ;;  %v3545_v50 = vrot.slane %v3543_v52, 1  ;;  %v1320_v60 = vsel %vm1303_vm15, %v7849_v27, 0  ;;  %v3843_v17 = vrot.slane %v3841_v6, 7  ;;  %v8198_v52 = vld [vmem:[#allocation2 + $0x38] sm:$0xff] }
  0xd4   : > { %v3537_v4 = vrot.slane %v3535_v32, 1  ;;  %v9127_v14 = vshll.u32 %v9126_v23, 16  ;;  %v1663_v1 = vsel %vm1563_vm1, %v7922_v26, %v1662_v16  ;;  %v8179_v38 = vrot.slane %v1681_v35, 7  ;;  %9131 = vst [vmem:[#allocation29_spill] sm:$0xff] %v8198_v52  ;;  %v9133_v32 = vld [vmem:[#allocation15_spill] sm:$0xff] }
  0xd5   : > { %v1671_v59 = vsel %vm1563_vm1, %v7967_v30, %v1670_v54  ;;  %v9128_v2 = vshll.u32 %v7505_v18, 16  ;;  %v2332_v8 = vshll.u32 %v8165_v22, 16  ;;  %v8189_v49 = vrot.slane %v2754_v42, 7  ;;  %9141 = vst [vmem:[#allocation15_spill] sm:$0xff] %v8250_v46 }
  0xd6   : > { %v3850_v61 = vor.u32 %v9127_v14, %v7228_v21  ;;  %v3538_v36 = vsel %vm1159_vm6, %v3533_v48, %v3537_v4  ;;  %v3541_v13 = vor.u32 %v3539_v7, %v3537_v4  ;;  %v8196_v16 = vsel %vm1293_vm5, %v8191_v25, 0  ;;  %v9135_v14 = vld [vmem:[#allocation19_spill] sm:$0xff] }
  0xd7   : > { %v8186_v20 = vrot.slane %v9128_v2, 1  ;;  %6284 = vmatprep.mubr.bf16.mxu0 %v3538_v36  ;;  %v8203_v30 = vsel %vm1293_vm5, %v8198_v52, 0  ;;  %v1678_v54 = vor.u32 %v1676_v10, %v1675_v9  ;;  %6085 = vmatmul.mubr.bf16.gmra.mrb[20].mxu1 %v1663_v1  ;;  %v2258_v6 = vsel %vm2241_vm2, %v8059_v55, 0  ;;  %v9136_v1 = vld [vmem:[#allocation9_spill] sm:$0xff]  ;;  %v9169_v55 = vld [vmem:[#allocation22_spill] sm:$0xff] }
  0xd8   : > { %v3546_v35 = vsel %vm1159_vm6, %v3541_v13, %v3545_v50  ;;  %v1689_v58 = vshrl.u32 %v1320_v60, 16  ;;  %v3851_v48 = vsel %vm1563_vm1, %v3843_v17, %v3850_v61  ;;  %v9134_v7 = vshrl.u32 %v9133_v32, 16  ;;  %6088 = vmatprep.mubr.bf16.mxu1 %v1671_v59 }
  0xd9   : > { %v3864_v4 = vshll.u32 %v9133_v32, 16  ;;  %v1686_v10 = vor.u32 %v1684_v44, %v8179_v38  ;;  %v2295_v50 = vshll.u32 %v2258_v6, 16  ;;  %v8220_v36 = vsel %vm1159_vm6, %v9136_v1, %v9135_v14  ;;  %v9138_v32 = vld [vmem:[#allocation12_spill] sm:$0xff] }
  0xda   : > { %v8212_v42 = vrot.slane %v9134_v7, 7  ;;  %v8222_v13 = vrot.slane %v2332_v8, 1  ;;  %v8228_v61 = vsel %vm2247_vm4, %v8198_v52, 0  ;;  %v2762_v59 = vshrl.u32 %v8203_v30, 16  ;;  %6285 = vmatmul.mubr.bf16.gmra.mrb[28].mxu0 %v3546_v35  ;;  %v9139_v7 = vld [vmem:[#allocation8_spill] sm:$0xff] }
  0xdb   : > { %v8235_v2 = vsel %vm2248_vm9, %v8191_v25, 0  ;;  %v8240_v26 = vsel %vm1294_vm10, %v8191_v25, 0  ;;  %6304 = vmatprep.mubr.bf16.mxu0 %v3851_v48  ;;  %v9140_v1 = vshll.u32 %v9139_v7, 16  ;;  %v1691_v57 = vrot.slane %v1689_v58, 7  ;;  %v6761_v25 = vld [vmem:[%s8933_s3 + $0x1c8] sm:$0xff]  }
  0xdc   : > { %v1692_v43 = vshll.u32 %v1320_v60, 16  ;;  %v3866_v35 = vor.u32 %v3864_v4, %v8212_v42  ;;  %v1679_v44 = vsel %vm1563_vm1, %v8101_v34, %v1678_v54  ;;  %v2340_v17 = vshll.u32 %v8228_v61, 16 }
  0xdd   : > { %v3858_v23 = vor.u32 %v9140_v1, %v9138_v32  ;;  %v1687_v19 = vsel %vm1563_vm1, %v1675_v9, %v1686_v10  ;;  %v2293_v41 = vshrl.u32 %v2258_v6, 16  ;;  %v2297_v45 = vrot.slane %v2295_v50, 1  ;;  %v9143_v6 = vld [vmem:[#allocation24_spill] sm:$0xff] }
  0xde   : > { %v8255_v48 = vsel %vm1294_vm10, %v8250_v46, 0  ;;  %v2348_v60 = vshll.u32 %v8235_v2, 16  ;;  %v2770_v58 = vshrl.u32 %v8240_v26, 16  ;;  %v8262_v34 = vsel %vm1295_vm8, %v8250_v46, 0 }
  0xdf   : > { %v8267_v9 = vsel %vm9009_vm7, %v8250_v46, 0  ;;  %v3859_v54 = vsel %vm1563_vm1, %v7228_v21, %v3858_v23  ;;  %v9144_v10 = vshrl.u32 %v9143_v6, 16  ;;  %v3872_v8 = vshll.u32 %v9143_v6, 16  ;;  %6089 = vmatmul.mubr.bf16.gmra.mrb[24].mxu1 %v1679_v44  ;;  %v9147_v6 = vld [vmem:[#allocation36_spill] sm:$0xff] }
  0xe0   : > { %v1694_v7 = vor.u32 %v1692_v43, %v1691_v57  ;;  %v3867_v1 = vsel %vm1563_vm1, %v9138_v32, %v3866_v35  ;;  %v9146_v46 = vshrl.u32 %v9145_v29, 16  ;;  %v3880_v21 = vshll.u32 %v9145_v29, 16  ;;  %6092 = vmatprep.mubr.bf16.mxu1 %v1687_v19 }
  0xe1   : > { %v3871_v50 = vrot.slane %v9144_v10, 7  ;;  %v8284_v23 = vrot.slane %v2762_v59, 7  ;;  %v8286_v10 = vld [vmem:[#allocation2 + $0x50] sm:$0xff]  ;;  %v2778_v57 = vshrl.u32 %v8262_v34, 16  ;;  %v2298_v44 = vor.u32 %v2297_v45, %v2293_v41 }
  0xe2   : > { %v8281_v52 = vrot.slane %v9146_v46, 7  ;;  %v8291_v43 = vsel %vm1295_vm8, %v8286_v10, 0  ;;  %v8294_v32 = vrot.slane %v2340_v17, 1  ;;  %v3893_v35 = vshrl.u32 %v8255_v48, 16  ;;  %6305 = vmatmul.mubr.bf16.vlgmr.msra.gmra.mrb[0].mxu0 %v3859_v54  ;;  %v6763_v54 = vld [vmem:[%s8933_s3 + $0x1d0] sm:$0xff]  }
  0xe3   : > { %v2356_v19 = vshll.u32 %v8267_v9, 16  ;;  %v8300_v59 = vrot.slane %v2770_v58, 7  ;;  %6337 = vmatpush3.bf16.msra.mxu0 %v9147_v6  ;;  %6308 = vmatprep.mubr.bf16.mxu0 %v3867_v1  ;;  %v3874_v40 = vor.u32 %v3872_v8, %v3871_v50  ;;  %v8304_v45 = vrot.slane %v2348_v60, 1  ;;  %v9148_v8 = vld [vmem:[#allocation35_spill] sm:$0xff] }
  0xe4   : > { %v3901_v41 = vshrl.u32 %v8291_v43, 16  ;;  %6338 = vmatprep.subr.bf16.mxu0 %v6761_v25  ;;  %v3882_v17 = vor.u32 %v3880_v21, %v8281_v52  ;;  %v1695_v58 = vsel %vm1563_vm1, %v8179_v38, %v1694_v7  ;;  %v8313_v29 = vrot.slane %v2778_v57, 7  ;;  %v9150_v1 = vld [vmem:[#allocation7_spill] sm:$0xff]  ;;  %v9152_v7 = vld [vmem:[#allocation38_spill] sm:$0xff] }
  0xe5   : > { %vm9149_vm5 = vcmp.ne.s16.totalorder %v9148_v8, 0  ;;  %v2303_v46 = vsel %vm1159_vm6, %v2298_v44, %v9150_v1  ;;  %v8323_v21 = vrot.slane %v2356_v19, 1  ;;  %vm9153_vm8 = vcmp.ne.s16.totalorder %v9152_v7, 0  ;;  %v8338_v6 = vld [vmem:[#allocation2 + $0x60] sm:$0xff] }
  0xe6   : > { %v8319_v60 = vsel %vm9149_vm5, %v8286_v10, 0  ;;  %vm9151_vm10 = vmmov %vm9149_vm5  ;;  %v8336_v57 = vsel %vm9153_vm8, %v8326_v51, 0  ;;  %9154 = vst [vmem:[#allocation19_spill] sm:$0xff] %v8338_v6  ;;  %v3875_v19 = vsel %vm1563_vm1, %v8212_v42, %v3874_v40  ;;  %v9156_v8 = vshrl.u32 %v8196_v16, 16  ;;  %v6765_v40 = vld [vmem:[%s8933_s3 + $0x1d8] sm:$0xff]  }
  0xe7   : > { %v8331_v38 = vsel %vm9151_vm10, %v8326_v51, 0  ;;  %vm9155_vm5 = vmmov %vm9153_vm8  ;;  %6339 = vmatpush3.bf16.msra.mxu0 %v6761_v25  ;;  %v3888_v4 = vshll.u32 %v8196_v16, 16  ;;  %6093 = vmatmul.mubr.bf16.gmra.mrb[28].mxu1 %v1695_v58  ;;  %v3883_v12 = vsel %vm1563_vm1, %v3871_v50, %v3882_v17  ;;  %v8352_v5 = vrot.slane %v3893_v35, 7  ;;  %v9157_v16 = vld [vmem:[#allocation39_spill] sm:$0xff]  ;;  %v8365_v50 = vld [vmem:[#allocation2 + $0x68] sm:$0xff] }
  0xe8   : > { %v8343_v44 = vsel %vm9155_vm5, %v8338_v6, 0  ;;  %v3887_v1 = vrot.slane %v9156_v8, 7  ;;  %6340 = vmatprep.subr.bf16.mxu0 %v6763_v54  ;;  %v3896_v7 = vshll.u32 %v8255_v48, 16  ;;  %6112 = vmatprep.mubr.bf16.mxu1 %v2303_v46  ;;  %v3909_v25 = vshrl.u32 %v8331_v38, 16  ;;  %9159 = vst [vmem:[#allocation9_spill] sm:$0xff] %v8365_v50  ;;  %v9161_v46 = vld [vmem:[#allocation40_spill] sm:$0xff] }
  0xe9   : > { %vm9158_vm10 = vcmp.ne.s16.totalorder %v9157_v16, 0  ;;  %v3917_v35 = vshrl.u32 %v8343_v44, 16  ;;  %vm9162_vm5 = vcmp.ne.s16.totalorder %v9161_v46, 0  ;;  %v9164_v42 = vld [vmem:[#allocation14_spill] sm:$0xff]  ;;  %v8399_v46 = vsel %vm1301_vm12, %v7792_v39, 0 }
  0xea   : > { %v8363_v58 = vsel %vm9158_vm10, %v8338_v6, 0  ;;  %vm9160_vm8 = vmmov %vm9158_vm10  ;;  %v8376_v17 = vsel %vm9162_vm5, %v8365_v50, 0  ;;  %6309 = vmatmul.mubr.bf16.gmra.mrb[4].mxu0 %v3875_v19  ;;  %v9165_v33 = vshrl.u32 %v9164_v42, 16  ;;  %vm9166_vm10 = vcmp.ne.s16.totalorder %v7914_v31, 0 }
  0xeb   : > { %v8370_v48 = vsel %vm9160_vm8, %v8365_v50, 0  ;;  %vm9163_vm7 = vmmov %vm9162_vm5  ;;  %v8389_v16 = vsel %vm9166_vm10, %v7707_v11, 0  ;;  %6312 = vmatprep.mubr.bf16.mxu0 %v3883_v12  ;;  %v3890_v19 = vor.u32 %v3888_v4, %v3887_v1  ;;  %6341 = vmatpush3.bf16.msra.mxu0 %v6763_v54  ;;  %v3898_v31 = vor.u32 %v3896_v7, %v8352_v5 }
  0xec   : > { %v8381_v8 = vsel %vm9163_vm7, %v7707_v11, 0  ;;  %v2314_v37 = vor.u32 %v9165_v33, %v9135_v14  ;;  %vm9167_vm8 = vmmov %vm9166_vm10  ;;  %v3925_v14 = vshrl.u32 %v8370_v48, 16  ;;  %v8406_v11 = vsel %vm1301_vm12, %v7849_v27, 0  ;;  %6342 = vmatprep.subr.bf16.mxu0 %v6765_v40 }
  0xed   : > { %v8394_v15 = vsel %vm9167_vm8, %v7792_v39, 0  ;;  %9168 = vst [vmem:[#allocation31_spill] sm:$0xff] %v8406_v11  ;;  %v6767_v39 = vld [vmem:[%s8933_s3 + $0x1e0] sm:$0xff]   ;;  %v3903_v54 = vrot.slane %v3901_v41, 7  ;;  %v3904_v42 = vshll.u32 %v8291_v43, 16  ;;  %v3891_v41 = vsel %vm1563_vm1, %v8281_v52, %v3890_v19 }
  0xee   : > { %v2319_v62 = vsel %vm1159_vm6, %v2314_v37, %v9169_v55  ;;  %v8426_v43 = vrot.slane %v3909_v25, 7  ;;  %v3912_v4 = vshll.u32 %v8331_v38, 16  ;;  %v8433_v33 = vsel %vm1302_vm14, %v7849_v27, 0  ;;  %v9170_v37 = vld [vmem:[#allocation18_spill] sm:$0xff]  ;;  %v6769_v38 = vld [vmem:[%s8933_s3 + $0x1e8] sm:$0xff]  }
  0xef   : > { %6343 = vmatpush3.bf16.msra.mxu0 %v6765_v40  ;;  %6113 = vmatmul.mubr.bf16.vlgmr.msra.gmra.mrb[0].mxu1 %v8220_v36  ;;  %v3899_v50 = vsel %vm1563_vm1, %v3887_v1, %v3898_v31  ;;  %v9171_v52 = vshrl.u32 %v9170_v37, 16  ;;  %v9172_v25 = vld [vmem:[#allocation20_spill] sm:$0xff]  ;;  %v9173_v36 = vld [vmem:[#allocation10_spill] sm:$0xff]  ;;  %v8451_v27 = vsel %vm1303_vm15, %v7887_v0, 0  ;;  %v3906_v1 = vor.u32 %v3904_v42, %v3903_v54  ;;  %v6770_v31 = vld [vmem:[%s8933_s3 + $0xd0] sm:$0xff]  }
  0xf0   : > { %6344 = vmatprep.subr.bf16.mxu0 %v6767_v39  ;;  %6145 = vmatpush3.bf16.msra.mxu1 %v8124_v28  ;;  %v8446_v19 = vsel %vm1563_vm1, %v9173_v36, %v9172_v25  ;;  %v9176_v37 = vld [vmem:[#allocation21_spill] sm:$0xff]  ;;  %v8462_v7 = vrot.slane %v3917_v35, 7  ;;  %v9180_v36 = vld [vmem:[#allocation23_spill] sm:$0xff]  ;;  %v9182_v11 = vshll.u32 %v7495_v24, 16  ;;  %v3914_v6 = vor.u32 %v3912_v4, %v8426_v43 }
  0xf1   : > { %v2322_v40 = vor.u32 %v9171_v52, %v9169_v55  ;;  %9174 = vst [vmem:[#allocation12_spill] sm:$0xff] %v8446_v19  ;;  %6116 = vmatprep.mubr.bf16.mxu1 %v2319_v62  ;;  %6146 = vmatprep.subr.bf16.mxu1 %v6768_v53  ;;  %v9175_v55 = vshrl.u32 %v7505_v18, 16  ;;  %v9177_v52 = vld [vmem:[#allocation17_spill] sm:$0xff]  ;;  %v9179_v19 = vld [vmem:[#allocation26_spill] sm:$0xff]  ;;  %v9181_v42 = vshll.u32 %v9180_v36, 16  ;;  %vm9192_vm12 = vcmp.ne.s16.totalorder %v8016_v63, 0 }
  0xf2   : > { %v9178_v25 = vshll.u32 %v9177_v52, 16  ;;  %6313 = vmatmul.mubr.bf16.gmra.mrb[8].mxu0 %v3891_v41  ;;  %v2759_v18 = vor.u32 %v9182_v11, %v8189_v49  ;;  %v9184_v52 = vld [vmem:[#allocation13_spill] sm:$0xff]  ;;  %v9185_v41 = vshll.u32 %v8240_v26, 16  ;;  %vm9199_vm7 = vcmp.ne.s16.totalorder %v8032_v56, 0 }
  0xf3   : > { %v2330_v28 = vor.u32 %v9175_v55, %v8186_v20  ;;  %v2751_v62 = vor.u32 %v9181_v42, %v9179_v19  ;;  %v9183_v55 = vshll.u32 %v8203_v30, 16  ;;  %6316 = vmatprep.mubr.bf16.mxu0 %v3899_v50  ;;  %6345 = vmatpush3.bf16.msra.mxu0 %v6767_v39  ;;  %v2327_v11 = vsel %vm1159_vm6, %v2322_v40, %v8186_v20  ;;  %v6771_v30 = vld [vmem:[%s8933_s3 + $0x1f0] sm:$0xff]  }
  0xf4   : > { %v2743_v12 = vor.u32 %v9178_v25, %v9176_v37  ;;  %v2775_v36 = vor.u32 %v9185_v41, %v8300_v59  ;;  %v9186_v25 = vshrl.u32 %v8319_v60, 16  ;;  %6346 = vmatprep.subr.bf16.mxu0 %v6769_v38  ;;  %6147 = vmatpush3.bf16.msra.mxu1 %v6768_v53  ;;  %v8494_v26 = vsel %vm1563_vm1, %v9179_v19, %v2759_v18 }
  0xf5   : > { %v2767_v47 = vor.u32 %v9183_v55, %v8284_v23  ;;  %v8490_v50 = vsel %vm1563_vm1, %v9176_v37, %v2751_v62  ;;  %v2789_v39 = vshll.u32 %v8319_v60, 16  ;;  %6148 = vmatprep.subr.bf16.mxu1 %v6770_v31  ;;  %v9187_v53 = vshll.u32 %v8262_v34, 16 }
  0xf6   : > { %v8476_v35 = vsel %vm1563_vm1, %v9184_v52, %v2743_v12  ;;  %v2788_v24 = vrot.slane %v9186_v25, 7  ;;  %v2335_v12 = vsel %vm1159_vm6, %v2330_v28, %v8222_v13  ;;  %v8505_v4 = vsel %vm1563_vm1, %v8284_v23, %v2775_v36 }
  0xf7   : > { %v8501_v20 = vsel %vm1563_vm1, %v8189_v49, %v2767_v47  ;;  %v2783_v40 = vor.u32 %v9187_v53, %v8313_v29  ;;  %v3907_v19 = vsel %vm1563_vm1, %v8352_v5, %v3906_v1  ;;  %v3920_v60 = vshll.u32 %v8343_v44, 16  ;;  %v6772_v47 = vld [vmem:[%s8933_s3 + $0xd8] sm:$0xff]   ;;  %6117 = vmatmul.mubr.bf16.gmra.mrb[4].mxu1 %v2327_v11  ;;  %6347 = vmatpush3.bf16.msra.mxu0 %v6769_v38 }
  0xf8   : > { %v8513_v37 = vrot.slane %v3925_v14, 7  ;;  %v2791_v49 = vor.u32 %v2789_v39, %v2788_v24  ;;  %v3915_v28 = vsel %vm1563_vm1, %v3903_v54, %v3914_v6  ;;  %v3928_v23 = vshll.u32 %v8370_v48, 16  ;;  %6120 = vmatprep.mubr.bf16.mxu1 %v2335_v12  ;;  %6348 = vmatprep.subr.bf16.mxu0 %v6771_v30  ;;  %v6773_v6 = vld [vmem:[%s8933_s3 + $0x1f8] sm:$0xff]   ;;  %v8573_v12 = vld [vmem:[%s8933_s3 + $0x200] sm:$0xff]  }
  0xf9   : > { %v8522_v34 = vsel %vm1563_vm1, %v8300_v59, %v2783_v40  ;;  %v9188_v5 = vshrl.u32 %v8336_v57, 16  ;;  %v9189_v14 = vshrl.u32 %v8165_v22, 16  ;;  %v2797_v59 = vshll.u32 %v8336_v57, 16  ;;  %6149 = vmatpush3.bf16.msra.mxu1 %v6770_v31 }
  0xfa   : > { %v8534_v48 = vsel %vm1563_vm1, %v8313_v29, %v2791_v49  ;;  %v9190_v54 = vshrl.u32 %v8363_v58, 16  ;;  %v2834_v42 = vshrl.u32 %v8433_v33, 16  ;;  %v8543_v22 = vsel %vm1302_vm14, %v7887_v0, 0  ;;  %6317 = vmatmul.mubr.bf16.gmra.mrb[12].mxu0 %v3907_v19  ;;  %6150 = vmatprep.subr.bf16.mxu1 %v6772_v47  ;;  %v6774_v0 = vld [vmem:[%s8933_s3 + $0xe0] sm:$0xff]  }
  0xfb   : > { %v2796_v44 = vrot.slane %v9188_v5, 7  ;;  %v2338_v1 = vor.u32 %v9189_v14, %v8222_v13  ;;  %v9191_v13 = vshrl.u32 %v8228_v61, 16  ;;  %v2805_v29 = vshll.u32 %v8363_v58, 16  ;;  %6320 = vmatprep.mubr.bf16.mxu0 %v3915_v28  ;;  %6349 = vmatpush3.bf16.msra.mxu0 %v6771_v30 }
  0xfc   : > { %v2804_v38 = vrot.slane %v9190_v54, 7  ;;  %v3922_v57 = vor.u32 %v3920_v60, %v8462_v7  ;;  %v8553_v18 = vsel %vm9192_vm12, %v8286_v10, 0  ;;  %v9193_v31 = vshrl.u32 %v8376_v17, 16  ;;  %6350 = vmatprep.subr.bf16.mxu0 %v6773_v6  ;;  %v9202_v54 = vld [vmem:[#allocation41_spill] sm:$0xff] }
  0xfd   : > { %v2346_v62 = vor.u32 %v9191_v13, %v8294_v32  ;;  %v2799_v3 = vor.u32 %v2797_v59, %v2796_v44  ;;  %v2842_v55 = vshrl.u32 %v8451_v27, 16  ;;  %v3930_v58 = vor.u32 %v3928_v23, %v8513_v37  ;;  %6151 = vmatpush3.bf16.msra.mxu1 %v6772_v47 }
  0xfe   : > { %v2812_v61 = vrot.slane %v9193_v31, 7  ;;  %v2807_v52 = vor.u32 %v2805_v29, %v2804_v38  ;;  %v2813_v41 = vshll.u32 %v8376_v17, 16  ;;  %v9194_v36 = vshrl.u32 %v8381_v8, 16  ;;  %6152 = vmatprep.subr.bf16.mxu1 %v6774_v0  ;;  %v9204_v29 = vld [vmem:[#allocation43_spill] sm:$0xff] }
  0xff   : > { %v3936_v11 = vshll.u32 %v8381_v8, 16  ;;  %v2343_v39 = vsel %vm1159_vm6, %v2338_v1, %v8294_v32  ;;  %v8576_v30 = vsel %vm1563_vm1, %v2788_v24, %v2799_v3  ;;  %v2351_v17 = vsel %vm1159_vm6, %v2346_v62, %v8304_v45  ;;  %v6776_v24 = vld [vmem:[%s8933_s3 + $0xe8] sm:$0xff]   ;;  %6351 = vmatpush3.bf16.msra.mxu0 %v6773_v6  ;;  %v9201_v6 = vld [vmem:[#allocation19_spill] sm:$0xff] }
 0x100   : > { %v8565_v25 = vrot.slane %v9194_v36, 7  ;;  %v2364_v53 = vshll.u32 %v8553_v18, 16  ;;  %v8582_v8 = vsel %vm1563_vm1, %v2796_v44, %v2807_v52  ;;  %v2815_v40 = vor.u32 %v2813_v41, %v2812_v61  ;;  %6121 = vmatmul.mubr.bf16.gmra.mrb[8].mxu1 %v2343_v39  ;;  %6384 = vmatprep.subr.bf16.mxu0 %v8573_v12 }
 0x101   : > { %v3923_v32 = vsel %vm1563_vm1, %v8426_v43, %v3922_v57  ;;  %v9195_v19 = vshrl.u32 %v8394_v15, 16  ;;  %v9196_v47 = vshrl.u32 %v8389_v16, 16  ;;  %v2821_v28 = vshll.u32 %v8389_v16, 16  ;;  %6124 = vmatprep.mubr.bf16.mxu1 %v2351_v17  ;;  %6153 = vmatpush3.bf16.msra.mxu1 %v6774_v0  ;;  %v6778_v0 = vld [vmem:[%s8933_s3 + $0xf0] sm:$0xff]  }
 0x102   : > { %v3931_v23 = vsel %vm1563_vm1, %v8462_v7, %v3930_v58  ;;  %v3944_v5 = vshll.u32 %v8394_v15, 16  ;;  %v9197_v43 = vshrl.u32 %v8235_v2, 16  ;;  %v8603_v14 = vsel %vm1563_vm1, %v2804_v38, %v2815_v40  ;;  %6321 = vmatmul.mubr.bf16.gmra.mrb[16].mxu0 %v3923_v32  ;;  %6154 = vmatprep.subr.bf16.mxu1 %v6776_v24 }
 0x103   : > { %v8588_v60 = vrot.slane %v9195_v19, 7  ;;  %v2820_v49 = vrot.slane %v9196_v47, 7  ;;  %v9198_v1 = vshrl.u32 %v8267_v9, 16  ;;  %v2268_v16 = vsel %vm9199_vm7, %v8326_v51, 0  ;;  %6324 = vmatprep.mubr.bf16.mxu0 %v3931_v23 }
 0x104   : > { %v2354_v44 = vor.u32 %v9197_v43, %v8304_v45  ;;  %v9200_v7 = vshrl.u32 %v8399_v46, 16  ;;  %v2366_v45 = vrot.slane %v2364_v53, 1  ;;  %vm9203_vm14 = vcmp.ne.s16.totalorder %v9202_v54, 0 }
 0x105   : > { %v2362_v59 = vor.u32 %v9198_v1, %v8323_v21  ;;  %v2823_v15 = vor.u32 %v2821_v28, %v2820_v49  ;;  %v8617_v38 = vsel %vm9203_vm14, %v9201_v6, 0  ;;  %v2829_v9 = vshll.u32 %v8399_v46, 16  ;;  %6155 = vmatpush3.bf16.msra.mxu1 %v6776_v24 }
 0x106   : > { %v2828_v2 = vrot.slane %v9200_v7, 7  ;;  %v2836_v13 = vrot.slane %v2834_v42, 7  ;;  %v3957_v62 = vshrl.u32 %v8543_v22, 16  ;;  %v8624_v3 = vsel %vm1303_vm15, %v9204_v29, 0  ;;  %6156 = vmatprep.subr.bf16.mxu1 %v6778_v0  ;;  %v9210_v7 = vld [vmem:[#allocation44_spill] sm:$0xff] }
 0x107   : > { %v3938_v31 = vor.u32 %v3936_v11, %v8565_v25  ;;  %v8631_v58 = vsel %vm1563_vm1, %v2812_v61, %v2823_v15  ;;  %v3946_v46 = vor.u32 %v3944_v5, %v8588_v60  ;;  %v2372_v42 = vshll.u32 %v2268_v16, 16 }
 0x108   : > { %v2831_v52 = vor.u32 %v2829_v9, %v2828_v2  ;;  %v2837_v41 = vshll.u32 %v8433_v33, 16  ;;  %v2359_v36 = vsel %vm1159_vm6, %v2354_v44, %v8323_v21  ;;  %v2368_v11 = vshrl.u32 %v8553_v18, 16  ;;  %v9206_v33 = vld [vmem:[#allocation31_spill] sm:$0xff]  ;;  %v6780_v18 = vld [vmem:[%s8933_s3 + $0xf8] sm:$0xff]   ;;  %v9208_v44 = vld [vmem:[#allocation9_spill] sm:$0xff] }
 0x109   : > { %v2376_v39 = vshrl.u32 %v2268_v16, 16  ;;  %v2380_v17 = vshll.u32 %v8617_v38, 16  ;;  %v2367_v53 = vsel %vm1159_vm6, %v2362_v59, %v2366_v45  ;;  %v2844_v32 = vrot.slane %v2842_v55, 7  ;;  %6125 = vmatmul.mubr.bf16.gmra.mrb[12].mxu1 %v2359_v36 }
 0x10a   : > { %v8641_v61 = vsel %vm1563_vm1, %v2820_v49, %v2831_v52  ;;  %v2839_v40 = vor.u32 %v2837_v41, %v2836_v13  ;;  %v3939_v19 = vsel %vm1563_vm1, %v8513_v37, %v3938_v31  ;;  %v9207_v47 = vshrl.u32 %v9206_v33, 16  ;;  %6128 = vmatprep.mubr.bf16.mxu1 %v2367_v53  ;;  %6157 = vmatpush3.bf16.msra.mxu1 %v6778_v0 }
 0x10b   : > { %v3952_v21 = vshll.u32 %v9206_v33, 16  ;;  %v2845_v24 = vshll.u32 %v8451_v27, 16  ;;  %v3959_v23 = vrot.slane %v3957_v62, 7  ;;  %v3960_v49 = vshll.u32 %v8543_v22, 16  ;;  %6325 = vmatmul.mubr.bf16.gmra.mrb[20].mxu0 %v3939_v19  ;;  %v8661_v22 = vld [vmem:[#allocation2 + $0x70] sm:$0xff]  ;;  %6158 = vmatprep.subr.bf16.mxu1 %v6780_v18  ;;  %v8688_v33 = vld [vmem:[#allocation2 + $0x80] sm:$0xff] }
 0x10c   : > { %v3951_v28 = vrot.slane %v9207_v47, 7  ;;  %v2374_v55 = vrot.slane %v2372_v42, 1  ;;  %v8654_v5 = vsel %vm1563_vm1, %v2828_v2, %v2839_v40  ;;  %v3947_v37 = vsel %vm1563_vm1, %v8565_v25, %v3946_v46 }
 0x10d   : > { %v2370_v43 = vor.u32 %v2368_v11, %v2366_v45  ;;  %v2270_v59 = vsel %vm2253_vm0, %v9208_v44, 0  ;;  %v2847_v16 = vor.u32 %v2845_v24, %v2844_v32  ;;  %v2382_v27 = vrot.slane %v2380_v17, 1  ;;  %6328 = vmatprep.mubr.bf16.mxu0 %v3947_v37  ;;  %v8683_v17 = vld [vmem:[#allocation2 + $0x78] sm:$0xff]  ;;  %v1937_v37 = vld [vmem:[#allocation2 + $0x88] sm:$0x1] }
 0x10e   : > { %v2378_v15 = vor.u32 %v2376_v39, %v2374_v55  ;;  %vm9211_vm15 = vcmp.ne.s16.totalorder %v9210_v7, 0  ;;  %v3965_v45 = vshrl.u32 %v8624_v3, 16  ;;  %v3954_v9 = vor.u32 %v3952_v21, %v3951_v28  ;;  %6159 = vmatpush3.bf16.msra.mxu1 %v6780_v18 }
 0x10f   : > { %v2271_v2 = vsel %vm9211_vm15, %v8661_v22, 0  ;;  %v8667_v25 = vsel %vm1563_vm1, %v2836_v13, %v2847_v16  ;;  %v2388_v62 = vshll.u32 %v2270_v59, 16  ;;  %v3962_v29 = vor.u32 %v3960_v49, %v3959_v23  ;;  %v8676_v13 = vld [vmem:[%s8933_s3 + $0x100] sm:$0xff]   ;;  %v2681_v16 = vld [vmem:[#allocation2 + $0x8] sm:$0x80] }
 0x110   : > { %v2375_v57 = vsel %vm1159_vm6, %v2370_v43, %v2374_v55  ;;  %v2384_v31 = vshrl.u32 %v8617_v38, 16  ;;  %v2383_v0 = vsel %vm1159_vm6, %v2378_v15, %v2382_v27  ;;  %v2392_v46 = vshrl.u32 %v2270_v59, 16  ;;  %6432 = vmatprep.subr.bf16.mxu1 %v8676_v13 }
 0x111   : > { %v2396_v42 = vshll.u32 %v2271_v2, 16  ;;  %v3955_v52 = vsel %vm1563_vm1, %v8588_v60, %v3954_v9  ;;  %v3967_v41 = vrot.slane %v3965_v45, 7  ;;  %v3968_v36 = vshll.u32 %v8624_v3, 16  ;;  %6129 = vmatmul.mubr.bf16.gmra.mrb[16].mxu1 %v2375_v57  ;;  %v9214_v9 = vld [vmem:[#allocation47_spill] sm:$0xff]  ;;  %v6803_v57 = vld [vmem:[#allocation2 + $0x18] sm:$0xff] }
 0x112   : > { %v2390_v38 = vrot.slane %v2388_v62, 1  ;;  %v3963_v11 = vsel %vm1563_vm1, %v3951_v28, %v3962_v29  ;;  %6132 = vmatprep.mubr.bf16.mxu1 %v2383_v0  ;;  %v2386_v39 = vor.u32 %v2384_v31, %v2382_v27  ;;  %v2272_v40 = vsel %vm2255_vm13, %v8683_v17, 0  ;;  %v9216_v29 = vld [vmem:[#allocation3_spill] sm:$0xff] }
 0x113   : > { %v2398_v19 = vrot.slane %v2396_v42, 1  ;;  %6329 = vmatmul.mubr.bf16.gmra.mrb[24].mxu0 %v3955_v52  ;;  %v2273_v3 = vsel %vm2256_vm3, %v8688_v33, 0  ;;  %v3970_v47 = vor.u32 %v3968_v36, %v3967_v41  ;;  %v2404_v28 = vshll.u32 %v2272_v40, 16  ;;  %v6777_v36 = vld [vmem:[%s8933_s3 + $0x208] sm:$0xff]  }
 0x114   : > { %v2394_v32 = vor.u32 %v2392_v46, %v2390_v38  ;;  %6332 = vmatprep.mubr.bf16.mxu0 %v3963_v11  ;;  %v2391_v21 = vsel %vm1159_vm6, %v2386_v39, %v2390_v38  ;;  %v2400_v18 = vshrl.u32 %v2271_v2, 16  ;;  %v2408_v49 = vshrl.u32 %v2272_v40, 16  ;;  %v9218_v46 = vld [vmem:[#allocation4_spill] sm:$0xff]  ;;  %v9219_v40 = vld [vmem:[#allocation10_spill] sm:$0xff] }
 0x115   : > { %v2412_v55 = vshll.u32 %v2273_v3, 16  ;;  %v3971_v43 = vsel %vm1563_vm1, %v3959_v23, %v3970_v47  ;;  %v2406_v59 = vrot.slane %v2404_v28, 1  ;;  %vm9215_vm5 = vcmp.ne.s16.totalorder %v9214_v9, 0  ;;  %v6779_v47 = vld [vmem:[%s8933_s3 + $0x210] sm:$0xff]  }
 0x116   : > { %v2399_v24 = vsel %vm1159_vm6, %v2394_v32, %v2398_v19  ;;  %v2402_v15 = vor.u32 %v2400_v18, %v2398_v19  ;;  %v2274_v62 = vsel %vm9215_vm5, %v1937_v37, 0  ;;  %vm9217_vm10 = vcmp.ne.s16.totalorder %v9216_v29, 0  ;;  %v6804_v19 = vld [vmem:[#allocation2 + $0x20] sm:$0xff]  ;;  %v9220_v18 = vld [vmem:[#allocation49_spill] sm:$0xff]  ;;  %v6783_v37 = vld [vmem:[%s8933_s3 + $0x228] sm:$0xff]  }
 0x117   : > { %v2410_v27 = vor.u32 %v2408_v49, %v2406_v59  ;;  %v2414_v45 = vrot.slane %v2412_v55, 1  ;;  %v2683_v2 = vsel %vm9217_vm10, %v2681_v16, 0  ;;  %v2416_v0 = vshrl.u32 %v2273_v3, 16  ;;  %v8708_v3 = vld [vmem:[#allocation2 + $0x28] sm:$0xff]  ;;  %v6782_v49 = vld [vmem:[%s8933_s3 + $0x220] sm:$0xff]  }
 0x118   : > { %v2407_v31 = vsel %vm1159_vm6, %v2402_v15, %v2406_v59  ;;  %v2420_v23 = vshll.u32 %v2274_v62, 16  ;;  %v2725_v42 = vshll.u32 %v9218_v46, 16  ;;  %v2718_v41 = vshrl.u32 %v2683_v2, 16  ;;  %v9222_v55 = vld [vmem:[#allocation12_spill] sm:$0xff]  ;;  %v9223_v59 = vld [vmem:[#allocation6_spill] sm:$0xff]  ;;  %v9224_v16 = vld [vmem:[#allocation15_spill] sm:$0xff] }
 0x119   : > { %6133 = vmatmul.mubr.bf16.gmra.mrb[20].mxu1 %v2391_v21  ;;  %v2415_v52 = vsel %vm1159_vm6, %v2410_v27, %v2414_v45  ;;  %v2418_v38 = vor.u32 %v2416_v0, %v2414_v45  ;;  %v6785_v15 = vld [vmem:[%s8933_s3 + $0x238] sm:$0xff]   ;;  %v6811_v62 = vld [vmem:[%s8933_s3 + $0x130] sm:$0xff]   ;;  %v4488_v29 = vld [vmem:[#allocation2 + $0x20] sm:$0xff] }
 0x11a   : > { %6136 = vmatprep.mubr.bf16.mxu1 %v2399_v24  ;;  %v2422_v11 = vrot.slane %v2420_v23, 1  ;;  %v2720_v39 = vrot.slane %v2718_v41, 7  ;;  %v2727_v32 = vor.u32 %v2725_v42, %v9219_v40  ;;  %v9221_v24 = vld [vmem:[#allocation29_spill] sm:$0xff]  ;;  %v6808_v27 = vld [vmem:[%s8933_s3 + $0x118] sm:$0xff]   ;;  %v9228_v42 = vld [vmem:[#allocation11_spill] sm:$0xff] }
 0x11b   : > { %6333 = vmatmul.mubr.bf16.gmra.mrb[28].mxu0 %v3971_v43  ;;  %v6806_v43 = vld [vmem:[%s8933_s3 + $0x108] sm:$0xff]   ;;  %v4487_v45 = vld [vmem:[#allocation2 + $0x18] sm:$0xff]  ;;  %v4490_v46 = vld [vmem:[#allocation2 + $0x30] sm:$0xff] }
 0x11c   : > { %6352 = vmatprep.mubr.bf16.mxu0 %v6803_v57  ;;  %v2423_v28 = vsel %vm1159_vm6, %v2418_v38, %v2422_v11  ;;  %v2728_v21 = vsel %vm1563_vm1, %v2720_v39, %v2727_v32  ;;  %v6812_v2 = vld [vmem:[%s8933_s3 + $0x138] sm:$0xff]   ;;  %v8781_v41 = vld [vmem:[#allocation2 + $0x88] sm:$0xff] }
 0x11d   : > { %v9230_v11 = vld [vmem:[#allocation16_spill] sm:$0xff] }
 0x11e   : > { %vm9231_vm8 = vcmp.ne.s16.totalorder %v9230_v11, 0 }
 0x121   : > { %6137 = vmatmul.mubr.bf16.gmra.mrb[24].mxu1 %v2407_v31  ;;  %v9226_v31 = vld [vmem:[#allocation5_spill] sm:$0xff] }
 0x122   : > { %6140 = vmatprep.mubr.bf16.mxu1 %v2415_v52  ;;  %vm9227_vm1 = vcmp.ne.s16.totalorder %v9226_v31, 0 }
 0x123   : > { %6353 = vmatmul.mubr.bf16.vlgmr.msra.gmra.mrb[0].mxu0 %v6804_v19 }
 0x124   : > { %6385 = vmatpush3.bf16.msra.mxu0 %v8573_v12  ;;  %6356 = vmatprep.mubr.bf16.mxu0 %v8708_v3  ;;  %v6781_v12 = vld [vmem:[%s8933_s3 + $0x218] sm:$0xff]  }
 0x125   : > { %6386 = vmatprep.subr.bf16.mxu0 %v6777_v36 }
 0x128   : > { %6387 = vmatpush3.bf16.msra.mxu0 %v6777_v36 }
 0x129   : > { %6141 = vmatmul.mubr.bf16.gmra.mrb[28].mxu1 %v2423_v28  ;;  %6388 = vmatprep.subr.bf16.mxu0 %v6779_v47  ;;  %v8789_v28 = vld [vmem:[#allocation2 + $0x8] sm:$0xff] }
 0x12a   : > { %6160 = vmatprep.mubr.bf16.mxu1 %v2728_v21  ;;  %v4492_v21 = vld [vmem:[#allocation2 + $0x40] sm:$0xff] }
 0x12b   : > { %6357 = vmatmul.mubr.bf16.gmra.mrb[4].mxu0 %v9220_v18  ;;  %v9232_v18 = vld [vmem:[#allocation25_spill] sm:$0xff] }
 0x12c   : > { %6360 = vmatprep.mubr.bf16.mxu0 %v9221_v24  ;;  %6389 = vmatpush3.bf16.msra.mxu0 %v6779_v47  ;;  %v4491_v47 = vld [vmem:[#allocation2 + $0x38] sm:$0xff]  ;;  %vm9233_vm12 = vcmp.ne.s16.totalorder %v9232_v18, 0 }
 0x12d   : > { %6390 = vmatprep.subr.bf16.mxu0 %v6781_v12  ;;  %v4508_v24 = vsel %vm9233_vm12, %v4491_v47, 0 }
 0x130   : > { %6391 = vmatpush3.bf16.msra.mxu0 %v6781_v12 }
 0x131   : > { %6161 = vmatmul.mubr.bf16.vlgmr.msra.gmra.mrb[0].mxu1 %v9222_v55  ;;  %6392 = vmatprep.subr.bf16.mxu0 %v6782_v49 }
 0x132   : > { %6440 = vmatpush3.bf16.msra.mxu1 %v8676_v13  ;;  %6164 = vmatprep.mubr.bf16.mxu1 %v8476_v35  ;;  %v6784_v13 = vld [vmem:[%s8933_s3 + $0x230] sm:$0xff]  }
 0x133   : > { %6433 = vmatprep.subr.bf16.mxu1 %v6806_v43  ;;  %6361 = vmatmul.mubr.bf16.gmra.mrb[8].mxu0 %v9223_v59  ;;  %v6807_v35 = vld [vmem:[%s8933_s3 + $0x110] sm:$0xff]  }
 0x134   : > { %6364 = vmatprep.mubr.bf16.mxu0 %v9224_v16  ;;  %6393 = vmatpush3.bf16.msra.mxu0 %v6782_v49 }
 0x135   : > { %6394 = vmatprep.subr.bf16.mxu0 %v6783_v37 }
 0x136   : > { %6441 = vmatpush3.bf16.msra.mxu1 %v6806_v43  ;;  %v4570_v43 = vshll.u32 %v4508_v24, 16 }
 0x137   : > { %6434 = vmatprep.subr.bf16.mxu1 %v6807_v35 }
 0x138   : > { %6395 = vmatpush3.bf16.msra.mxu0 %v6783_v37  ;;  %v4509_v37 = vsel %vm2246_vm11, %v4492_v21, 0 }
 0x139   : > { %6165 = vmatmul.mubr.bf16.gmra.mrb[4].mxu1 %v8490_v50  ;;  %6396 = vmatprep.subr.bf16.mxu0 %v6784_v13  ;;  %v6809_v50 = vld [vmem:[%s8933_s3 + $0x120] sm:$0xff]   ;;  %v4582_v31 = vshrl.u32 %v4509_v37, 16 }
 0x13a   : > { %6168 = vmatprep.mubr.bf16.mxu1 %v8494_v26  ;;  %6442 = vmatpush3.bf16.msra.mxu1 %v6807_v35  ;;  %v6810_v26 = vld [vmem:[%s8933_s3 + $0x128] sm:$0xff]   ;;  %v4578_v35 = vshll.u32 %v4509_v37, 16 }
 0x13b   : > { %6365 = vmatmul.mubr.bf16.gmra.mrb[12].mxu0 %v8286_v10  ;;  %6435 = vmatprep.subr.bf16.mxu1 %v6808_v27 }
 0x13c   : > { %6368 = vmatprep.mubr.bf16.mxu0 %v8326_v51  ;;  %6397 = vmatpush3.bf16.msra.mxu0 %v6784_v13  ;;  %v4574_v13 = vshrl.u32 %v4508_v24, 16 }
 0x13d   : > { %6398 = vmatprep.subr.bf16.mxu0 %v6785_v15 }
 0x13e   : > { %6443 = vmatpush3.bf16.msra.mxu1 %v6808_v27  ;;  %v4572_v27 = vrot.slane %v4570_v43, 1  ;;  %v4499_v43 = vld [vmem:[#allocation2 + $0x78] sm:$0xff] }
 0x13f   : > { %6436 = vmatprep.subr.bf16.mxu1 %v6809_v50  ;;  %v4516_v54 = vsel %vm2253_vm0, %v4499_v43, 0  ;;  %vm9243_vm0 = vmmov %vm9215_vm5 }
 0x140   : > { %6399 = vmatpush3.bf16.msra.mxu0 %v6785_v15  ;;  %v4493_v15 = vld [vmem:[#allocation2 + $0x48] sm:$0xff] }
 0x141   : > { %6169 = vmatmul.mubr.bf16.gmra.mrb[8].mxu1 %v8501_v20  ;;  %v4576_v20 = vor.u32 %v4574_v13, %v4572_v27 }
 0x142   : > { %6172 = vmatprep.mubr.bf16.mxu1 %v8505_v4  ;;  %6444 = vmatpush3.bf16.msra.mxu1 %v6809_v50  ;;  %v4504_v4 = vsel %vm2241_vm2, %v4487_v45, 0  ;;  %vm9229_vm2 = vcmp.ne.s16.totalorder %v9228_v42, 0  ;;  %v4494_v50 = vld [vmem:[#allocation2 + $0x50] sm:$0xff]  ;;  %v4501_v45 = vld [vmem:[#allocation2 + $0x88] sm:$0xff] }
 0x143   : > { %6369 = vmatmul.mubr.bf16.gmra.mrb[16].mxu0 %v9201_v6  ;;  %6437 = vmatprep.subr.bf16.mxu1 %v6810_v26  ;;  %v4541_v57 = vshll.u32 %v4504_v4, 16  ;;  %v4506_v52 = vsel %vm9229_vm2, %v8708_v3, 0  ;;  %v4518_v7 = vsel %vm2255_vm13, %v4501_v45, 0 }
 0x144   : > { %6372 = vmatprep.mubr.bf16.mxu0 %v9208_v44  ;;  %v4554_v39 = vshll.u32 %v4506_v52, 16  ;;  %v4558_v32 = vshrl.u32 %v4506_v52, 16  ;;  %v9237_v52 = vld [vmem:[#allocation37_spill] sm:$0xff] }
 0x145   : > { %v4543_v0 = vrot.slane %v4541_v57, 1  ;;  %vm9238_vm11 = vcmp.ne.s16.totalorder %v9237_v52, 0 }
 0x146   : > { %6445 = vmatpush3.bf16.msra.mxu1 %v6810_v26  ;;  %v4556_v3 = vrot.slane %v4554_v39, 1 }
 0x147   : > { %6438 = vmatprep.subr.bf16.mxu1 %v6811_v62 }
 0x148   : > { %v4560_v49 = vor.u32 %v4558_v32, %v4556_v3 }
 0x149   : > { %6173 = vmatmul.mubr.bf16.gmra.mrb[12].mxu1 %v8522_v34  ;;  %v4505_v34 = vsel %vm9227_vm1, %v4488_v29, 0  ;;  %v4650_v29 = vshll.u32 %v4518_v7, 16 }
 0x14a   : > { %6176 = vmatprep.mubr.bf16.mxu1 %v8534_v48  ;;  %6446 = vmatpush3.bf16.msra.mxu1 %v6811_v62  ;;  %v4539_v48 = vshrl.u32 %v4504_v4, 16  ;;  %v4546_v23 = vshll.u32 %v4505_v34, 16  ;;  %v4550_v40 = vshrl.u32 %v4505_v34, 16  ;;  %v4510_v62 = vsel %vm2247_vm4, %v4493_v15, 0 }
 0x14b   : > { %6373 = vmatmul.mubr.bf16.gmra.mrb[20].mxu0 %v8661_v22  ;;  %6439 = vmatprep.subr.bf16.mxu1 %v6812_v2  ;;  %v4580_v4 = vrot.slane %v4578_v35, 1  ;;  %v4590_v34 = vshrl.u32 %v4510_v62, 16  ;;  %vm9239_vm4 = vcmp.ne.s16.totalorder %v8016_v63, 0  ;;  %v4634_v35 = vshll.u32 %v4516_v54, 16 }
 0x14c   : > { %6376 = vmatprep.mubr.bf16.mxu0 %v8683_v17  ;;  %v4544_v36 = vor.u32 %v4543_v0, %v4539_v48  ;;  %v4548_v38 = vrot.slane %v4546_v23, 1  ;;  %v4495_v0 = vld [vmem:[#allocation2 + $0x58] sm:$0xff]  ;;  %v4652_v53 = vrot.slane %v4650_v29, 1 }
 0x14d   : > { %v4584_v42 = vor.u32 %v4582_v31, %v4580_v4  ;;  %v4636_v1 = vrot.slane %v4634_v35, 1 }
 0x14e   : > { %6447 = vmatpush3.bf16.msra.mxu1 %v6812_v2  ;;  %v4552_v12 = vor.u32 %v4550_v40, %v4548_v38  ;;  %v4586_v2 = vshll.u32 %v4510_v62, 16 }
 0x150   : > { %v4557_v59 = vsel %vm1159_vm6, %v4552_v12, %v4556_v3  ;;  %v4588_v23 = vrot.slane %v4586_v2, 1  ;;  %v4498_v3 = vld [vmem:[#allocation2 + $0x70] sm:$0xff] }
 0x151   : > { %6177 = vmatmul.mubr.bf16.gmra.mrb[16].mxu1 %v8576_v30  ;;  %v4507_v30 = vsel %vm9231_vm8, %v4490_v46, 0  ;;  %v4496_v46 = vld [vmem:[#allocation2 + $0x60] sm:$0xff] }
 0x152   : > { %6180 = vmatprep.mubr.bf16.mxu1 %v8582_v8  ;;  %v4549_v8 = vsel %vm1159_vm6, %v4544_v36, %v4548_v38  ;;  %v4562_v19 = vshll.u32 %v4507_v30, 16  ;;  %v4512_v36 = vsel %vm9238_vm11, %v4495_v0, 0  ;;  %v4592_v38 = vor.u32 %v4590_v34, %v4588_v23 }
 0x153   : > { %6377 = vmatmul.mubr.bf16.gmra.mrb[24].mxu0 %v8688_v33  ;;  %v4589_v39 = vsel %vm1159_vm6, %v4584_v42, %v4588_v23 }
 0x154   : > { %6380 = vmatprep.mubr.bf16.mxu0 %v8781_v41 }
 0x159   : > { %6181 = vmatmul.mubr.bf16.gmra.mrb[20].mxu1 %v8603_v14  ;;  %v4564_v14 = vrot.slane %v4562_v19, 1  ;;  %v4497_v19 = vld [vmem:[#allocation2 + $0x68] sm:$0xff] }
 0x15a   : > { %6184 = vmatprep.mubr.bf16.mxu1 %v8631_v58  ;;  %v4566_v58 = vshrl.u32 %v4507_v30, 16  ;;  %v4602_v30 = vshll.u32 %v4512_v36, 16 }
 0x15b   : > { %6381 = vmatmul.mubr.bf16.gmra.mrb[28].mxu0 %v8789_v28  ;;  %v4565_v16 = vsel %vm1159_vm6, %v4560_v49, %v4564_v14 }
 0x15c   : > { %6400 = vmatprep.mubr.bf16.mxu0 %v4549_v8  ;;  %v4568_v26 = vor.u32 %v4566_v58, %v4564_v14  ;;  %v4606_v8 = vshrl.u32 %v4512_v36, 16  ;;  %v4604_v47 = vrot.slane %v4602_v30, 1 }
 0x15e   : > { %v4573_v57 = vsel %vm1159_vm6, %v4568_v26, %v4572_v27  ;;  %v4608_v12 = vor.u32 %v4606_v8, %v4604_v47 }
 0x161   : > { %6185 = vmatmul.mubr.bf16.gmra.mrb[24].mxu1 %v8641_v61  ;;  %v4511_v61 = vsel %vm2248_vm9, %v4494_v50, 0  ;;  %vm9240_vm9 = vmmov %vm9199_vm7  ;;  %v4638_v50 = vshrl.u32 %v4516_v54, 16 }
 0x162   : > { %6188 = vmatprep.mubr.bf16.mxu1 %v8654_v5  ;;  %v4581_v5 = vsel %vm1159_vm6, %v4576_v20, %v4580_v4  ;;  %v4594_v48 = vshll.u32 %v4511_v61, 16  ;;  %v4598_v40 = vshrl.u32 %v4511_v61, 16  ;;  %v4514_v63 = vsel %vm9240_vm9, %v4497_v19, 0  ;;  %vm9241_vm7 = vmmov %vm9203_vm14 }
 0x163   : > { %6401 = vmatmul.mubr.bf16.vlgmr.msra.gmra.mrb[0].mxu0 %v4557_v59  ;;  %v4618_v24 = vshll.u32 %v4514_v63, 16  ;;  %v4622_v55 = vshrl.u32 %v4514_v63, 16  ;;  %v4500_v59 = vld [vmem:[#allocation2 + $0x80] sm:$0xff]  ;;  %vm9242_vm14 = vmmov %vm9211_vm15  ;;  %v4640_v20 = vor.u32 %v4638_v50, %v4636_v1 }
 0x164   : > { %6404 = vmatprep.mubr.bf16.mxu0 %v4565_v16  ;;  %v4596_v11 = vrot.slane %v4594_v48, 1 }
 0x165   : > { %v4620_v56 = vrot.slane %v4618_v24, 1 }
 0x166   : > { %v4600_v21 = vor.u32 %v4598_v40, %v4596_v11 }
 0x167   : > { %v4624_v16 = vor.u32 %v4622_v55, %v4620_v56 }
 0x168   : > { %v4605_v49 = vsel %vm1159_vm6, %v4600_v21, %v4604_v47 }
 0x169   : > { %6189 = vmatmul.mubr.bf16.gmra.mrb[28].mxu1 %v8667_v25  ;;  %v4513_v25 = vsel %vm9239_vm4, %v4496_v46, 0 }
 0x16a   : > { %6224 = vmatprep.mubr.bf16.mxu1 %v8286_v10  ;;  %v4597_v10 = vsel %vm1159_vm6, %v4592_v38, %v4596_v11  ;;  %v4610_v32 = vshll.u32 %v4513_v25, 16  ;;  %v4614_v14 = vshrl.u32 %v4513_v25, 16 }
 0x16b   : > { %6405 = vmatmul.mubr.bf16.gmra.mrb[4].mxu0 %v4573_v57  ;;  %v4654_v57 = vshrl.u32 %v4518_v7, 16 }
 0x16c   : > { %6408 = vmatprep.mubr.bf16.mxu0 %v4581_v5  ;;  %v4612_v18 = vrot.slane %v4610_v32, 1  ;;  %v4503_v5 = vld [vmem:[#allocation2 + $0x98] sm:$0x1] }
 0x16d   : > { %v4656_v48 = vor.u32 %v4654_v57, %v4652_v53  ;;  %v4520_v60 = vsel %vm9243_vm0, %v4503_v5, 0 }
 0x16e   : > { %v4616_v58 = vor.u32 %v4614_v14, %v4612_v18  ;;  %v4666_v46 = vshll.u32 %v4520_v60, 16 }
 0x170   : > { %v4621_v15 = vsel %vm1159_vm6, %v4616_v58, %v4620_v56  ;;  %v4668_v52 = vrot.slane %v4666_v46, 1 }
 0x171   : > { %6225 = vmatmul.mubr.bf16.vlgmr.msra.gmra.mrb[16].mxu1 %v8326_v51  ;;  %v4515_v51 = vsel %vm9241_vm7, %v4498_v3, 0 }
 0x172   : > { %6228 = vmatprep.mubr.bf16.mxu1 %v9201_v6  ;;  %v4613_v6 = vsel %vm1159_vm6, %v4608_v12, %v4612_v18  ;;  %v4626_v37 = vshll.u32 %v4515_v51, 16  ;;  %v4630_v27 = vshrl.u32 %v4515_v51, 16 }
 0x173   : > { %6409 = vmatmul.mubr.bf16.gmra.mrb[8].mxu0 %v4589_v39 }
 0x174   : > { %6412 = vmatprep.mubr.bf16.mxu0 %v4597_v10  ;;  %v4628_v13 = vrot.slane %v4626_v37, 1 }
 0x176   : > { %v4632_v62 = vor.u32 %v4630_v27, %v4628_v13 }
 0x178   : > { %v4637_v61 = vsel %vm1159_vm6, %v4632_v62, %v4636_v1 }
 0x179   : > { %6229 = vmatmul.mubr.bf16.gmra.mrb[20].mxu1 %v9208_v44  ;;  %v4517_v44 = vsel %vm9242_vm14, %v4500_v59, 0 }
 0x17a   : > { %6232 = vmatprep.mubr.bf16.mxu1 %v8661_v22  ;;  %v4629_v22 = vsel %vm1159_vm6, %v4624_v16, %v4628_v13  ;;  %v4642_v26 = vshll.u32 %v4517_v44, 16  ;;  %v4646_v2 = vshrl.u32 %v4517_v44, 16 }
 0x17b   : > { %6413 = vmatmul.mubr.bf16.gmra.mrb[12].mxu0 %v4605_v49 }
 0x17c   : > { %6416 = vmatprep.mubr.bf16.mxu0 %v4613_v6  ;;  %v4644_v4 = vrot.slane %v4642_v26, 1 }
 0x17e   : > { %v4648_v34 = vor.u32 %v4646_v2, %v4644_v4 }
 0x181   : > { %6233 = vmatmul.mubr.bf16.gmra.mrb[24].mxu1 %v8683_v17  ;;  %v4519_v17 = vsel %vm2256_vm3, %v8789_v28, 0  ;;  %v4653_v28 = vsel %vm1159_vm6, %v4648_v34, %v4652_v53 }
 0x182   : > { %6236 = vmatprep.mubr.bf16.mxu1 %v8688_v33  ;;  %v4645_v33 = vsel %vm1159_vm6, %v4640_v20, %v4644_v4  ;;  %v4658_v31 = vshll.u32 %v4519_v17, 16  ;;  %v4662_v23 = vshrl.u32 %v4519_v17, 16 }
 0x183   : > { %6417 = vmatmul.mubr.bf16.gmra.mrb[16].mxu0 %v4621_v15 }
 0x184   : > { %6420 = vmatprep.mubr.bf16.mxu0 %v4629_v22  ;;  %v4660_v0 = vrot.slane %v4658_v31, 1 }
 0x186   : > { %v4664_v42 = vor.u32 %v4662_v23, %v4660_v0 }
 0x188   : > { %v4669_v36 = vsel %vm1159_vm6, %v4664_v42, %v4668_v52 }
 0x189   : > { %6237 = vmatmul.mubr.bf16.gmra.mrb[28].mxu1 %v8781_v41  ;;  %v4661_v41 = vsel %vm1159_vm6, %v4656_v48, %v4660_v0 }
 0x18b   : > { %6421 = vmatmul.mubr.bf16.gmra.mrb[20].mxu0 %v4637_v61 }
 0x18c   : > { %6424 = vmatprep.mubr.bf16.mxu0 %v4645_v33 }
 0x193   : > { %6425 = vmatmul.mubr.bf16.gmra.mrb[24].mxu0 %v4653_v28 }
 0x194   : > { %6428 = vmatprep.mubr.bf16.mxu0 %v4661_v41 }
 0x19b   : > { %6429 = vmatmul.mubr.bf16.gmra.mrb[28].mxu0 %v4669_v36 }
 0x204   : > { %v6162_v38 = vpop.f32.mrb[0].mxu1 }
 0x205   : > { %v2947_v11 = vpop.f32.mrb[1].mxu1 }
 0x206   : > { %v6163_v25 = vpop.f32.mrb[2].mxu1 }
 0x207   : > { %v2950_v30 = vpop.f32.mrb[3].mxu1 }
 0x20c   : > { %v6166_v39 = vpop.f32.mrb[4].mxu1 }
 0x20d   : > { %v2963_v9 = vpop.f32.mrb[5].mxu1 }
 0x20e   : > { %v6167_v40 = vpop.f32.mrb[6].mxu1 }
 0x20f   : > { %v2966_v10 = vpop.f32.mrb[7].mxu1 }
 0x214   : > { %v6170_v8 = vpop.f32.mrb[8].mxu1 }
 0x215   : > { %v2979_v32 = vpop.f32.mrb[9].mxu1 }
 0x216   : > { %v6171_v19 = vpop.f32.mrb[10].mxu1 }
 0x217   : > { %v8845_v47 = vpop.f32.mrb[11].mxu1 }
 0x21c   : > { %v8847_v3 = vpop.f32.mrb[12].mxu1 }
 0x21d   : > { %v8849_v21 = vpop.f32.mrb[13].mxu1 }
 0x21e   : > { %v8851_v63 = vpop.f32.mrb[14].mxu1 }
 0x21f   : > { %v8853_v12 = vpop.f32.mrb[15].mxu1 }
 0x236   : > { %v6402_v18 = vpop.f32.mrb[0].mxu0 }
 0x237   : > { %v6448_v51 = vadd.f32 %v6402_v18, %v6162_v38  ;;  %v4768_v24 = vpop.f32.mrb[1].mxu0 }
 0x238   : > { %v6449_v49 = vadd.f32 %v4768_v24, %v2947_v11  ;;  %v6403_v14 = vpop.f32.mrb[2].mxu0 }
 0x239   : > { %v6450_v6 = vadd.f32 %v6403_v14, %v6163_v25  ;;  %v4771_v55 = vpop.f32.mrb[3].mxu0  ;;  %v5127_v16 = vmul.f32 %v6448_v51, %v6448_v51 }
 0x23a   : > { %v6451_v37 = vadd.f32 %v4771_v55, %v2950_v30  ;;  %v5125_v56 = vmul.f32 %v6449_v49, %v6449_v49 }
 0x23b   : > { %v5682_v43 = vpack.c.bf16 %v6450_v6, %v6448_v51  ;;  %v5128_v22 = vmul.f32 %v6450_v6, %v6450_v6 }
 0x23c   : > { %v5677_v59 = vpack.c.bf16 %v6451_v37, %v6449_v49  ;;  %v5087_v58 = vadd.f32 %v6451_v37, %v6449_v49  ;;  %v5126_v54 = vmul.f32 %v6451_v37, %v6451_v37 }
 0x23d   : > { %5769 = vst [vmem:[%s8860_s27 + $0x8] sm:$0xff] %v5682_v43  }
 0x23e   : > { %5678 = vst [vmem:[%s8860_s27] sm:$0xff] %v5677_v59   ;;  %v5088_v13 = vadd.f32 %v6448_v51, %v5087_v58  ;;  %v5157_v44 = vadd.f32 %v5126_v54, %v5125_v56  ;;  %v6406_v35 = vpop.f32.mrb[4].mxu0 }
 0x23f   : > { %v6452_v15 = vadd.f32 %v6406_v35, %v6166_v39  ;;  %v4784_v27 = vpop.f32.mrb[5].mxu0 }
 0x240   : > { %v5158_v50 = vadd.f32 %v5157_v44, %v5127_v16  ;;  %v6453_v26 = vadd.f32 %v4784_v27, %v2963_v9  ;;  %v5089_v45 = vadd.f32 %v6450_v6, %v5088_v13  ;;  %v6407_v1 = vpop.f32.mrb[6].mxu0 }
 0x241   : > { %v6454_v62 = vadd.f32 %v6407_v1, %v6167_v40  ;;  %v4787_v7 = vpop.f32.mrb[7].mxu0  ;;  %v5131_v48 = vmul.f32 %v6452_v15, %v6452_v15 }
 0x242   : > { %v5090_v20 = vadd.f32 %v6453_v26, %v5089_v45  ;;  %v5129_v4 = vmul.f32 %v6453_v26, %v6453_v26  ;;  %v5159_v17 = vadd.f32 %v5158_v50, %v5128_v22  ;;  %v6455_v29 = vadd.f32 %v4787_v7, %v2966_v10 }
 0x243   : > { %v5692_v61 = vpack.c.bf16 %v6454_v62, %v6452_v15  ;;  %v5132_v42 = vmul.f32 %v6454_v62, %v6454_v62 }
 0x244   : > { %v8864_v2 = vpop.f32.mrb[16].mxu1  ;;  %v5160_v33 = vadd.f32 %v5159_v17, %v5129_v4  ;;  %v5687_v57 = vpack.c.bf16 %v6455_v29, %v6453_v26  ;;  %v5091_v31 = vadd.f32 %v6455_v29, %v5090_v20  ;;  %v5130_v5 = vmul.f32 %v6455_v29, %v6455_v29 }
 0x245   : > { %v8866_v53 = vpop.f32.mrb[17].mxu1  ;;  %5771 = vst [vmem:[%s8860_s27 + $0x18] sm:$0xff] %v5692_v61  }
 0x246   : > { %v8869_v34 = vpop.f32.mrb[18].mxu1  ;;  %5770 = vst [vmem:[%s8860_s27 + $0x10] sm:$0xff] %v5687_v57   ;;  %v5092_v0 = vadd.f32 %v6452_v15, %v5091_v31  ;;  %v5161_v60 = vadd.f32 %v5160_v33, %v5130_v5  ;;  %v6410_v28 = vpop.f32.mrb[8].mxu0 }
 0x247   : > { %v8872_v23 = vpop.f32.mrb[19].mxu1  ;;  %v6456_v46 = vadd.f32 %v6410_v28, %v6170_v8  ;;  %v4800_v41 = vpop.f32.mrb[9].mxu0 }
 0x248   : > { %v5162_v52 = vadd.f32 %v5161_v60, %v5131_v48  ;;  %v6457_v36 = vadd.f32 %v4800_v41, %v2979_v32  ;;  %v5093_v38 = vadd.f32 %v6454_v62, %v5092_v0  ;;  %v6411_v11 = vpop.f32.mrb[10].mxu0 }
 0x249   : > { %v6458_v25 = vadd.f32 %v6411_v11, %v6171_v19  ;;  %v4803_v30 = vpop.f32.mrb[11].mxu0  ;;  %v5135_v19 = vmul.f32 %v6456_v46, %v6456_v46 }
 0x24a   : > { %v5094_v39 = vadd.f32 %v6457_v36, %v5093_v38  ;;  %v5133_v9 = vmul.f32 %v6457_v36, %v6457_v36  ;;  %v5163_v40 = vadd.f32 %v5162_v52, %v5132_v42  ;;  %v6459_v10 = vadd.f32 %v4803_v30, %v8845_v47 }
 0x24b   : > { %v5702_v18 = vpack.c.bf16 %v6458_v25, %v6456_v46  ;;  %v5136_v58 = vmul.f32 %v6458_v25, %v6458_v25 }
 0x24c   : > { %v8875_v51 = vpop.f32.mrb[20].mxu1  ;;  %v5164_v24 = vadd.f32 %v5163_v40, %v5133_v9  ;;  %v5697_v8 = vpack.c.bf16 %v6459_v10, %v6457_v36  ;;  %v5095_v49 = vadd.f32 %v6459_v10, %v5094_v39  ;;  %v5134_v14 = vmul.f32 %v6459_v10, %v6459_v10 }
 0x24d   : > { %v8877_v6 = vpop.f32.mrb[21].mxu1  ;;  %5773 = vst [vmem:[%s8860_s27 + $0x28] sm:$0xff] %v5702_v18  }
 0x24e   : > { %v8880_v32 = vpop.f32.mrb[22].mxu1  ;;  %5772 = vst [vmem:[%s8860_s27 + $0x20] sm:$0xff] %v5697_v8   ;;  %v5096_v55 = vadd.f32 %v6456_v46, %v5095_v49  ;;  %v5165_v37 = vadd.f32 %v5164_v24, %v5134_v14  ;;  %v6414_v43 = vpop.f32.mrb[12].mxu0 }
 0x24f   : > { %v8883_v56 = vpop.f32.mrb[23].mxu1  ;;  %v6460_v47 = vadd.f32 %v6414_v43, %v8847_v3  ;;  %v4816_v59 = vpop.f32.mrb[13].mxu0 }
 0x250   : > { %v5166_v54 = vadd.f32 %v5165_v37, %v5135_v19  ;;  %v6461_v16 = vadd.f32 %v4816_v59, %v8849_v21  ;;  %v5097_v13 = vadd.f32 %v6458_v25, %v5096_v55  ;;  %v6415_v44 = vpop.f32.mrb[14].mxu0 }
 0x251   : > { %v6462_v35 = vadd.f32 %v6415_v44, %v8851_v63  ;;  %v4819_v15 = vpop.f32.mrb[15].mxu0  ;;  %v5139_v63 = vmul.f32 %v6460_v47, %v6460_v47 }
 0x252   : > { %v5098_v27 = vadd.f32 %v6461_v16, %v5097_v13  ;;  %v5137_v22 = vmul.f32 %v6461_v16, %v6461_v16  ;;  %v5167_v50 = vadd.f32 %v5166_v54, %v5136_v58  ;;  %v6463_v26 = vadd.f32 %v4819_v15, %v8853_v12 }
 0x253   : > { %v5712_v45 = vpack.c.bf16 %v6462_v35, %v6460_v47  ;;  %v5140_v31 = vmul.f32 %v6462_v35, %v6462_v35 }
 0x254   : > { %v8889_v1 = vpop.f32.mrb[24].mxu1  ;;  %v5168_v3 = vadd.f32 %v5167_v50, %v5137_v22  ;;  %v5707_v62 = vpack.c.bf16 %v6463_v26, %v6461_v16  ;;  %v5099_v7 = vadd.f32 %v6463_v26, %v5098_v27  ;;  %v5138_v20 = vmul.f32 %v6463_v26, %v6463_v26 }
 0x255   : > { %v8891_v21 = vpop.f32.mrb[25].mxu1  ;;  %5775 = vst [vmem:[%s8860_s27 + $0x38] sm:$0xff] %v5712_v45  }
 0x256   : > { %v8894_v4 = vpop.f32.mrb[26].mxu1  ;;  %5774 = vst [vmem:[%s8860_s27 + $0x30] sm:$0xff] %v5707_v62   ;;  %v5100_v17 = vadd.f32 %v6460_v47, %v5099_v7  ;;  %v5169_v29 = vadd.f32 %v5168_v3, %v5138_v20  ;;  %v6418_v61 = vpop.f32.mrb[16].mxu0 }
 0x257   : > { %v8897_v33 = vpop.f32.mrb[27].mxu1  ;;  %v6464_v12 = vadd.f32 %v6418_v61, %v8864_v2  ;;  %v4832_v57 = vpop.f32.mrb[17].mxu0 }
 0x258   : > { %v5170_v5 = vadd.f32 %v5169_v29, %v5139_v63  ;;  %v6465_v48 = vadd.f32 %v4832_v57, %v8866_v53  ;;  %v5101_v0 = vadd.f32 %v6462_v35, %v5100_v17  ;;  %v6419_v60 = vpop.f32.mrb[18].mxu0 }
 0x259   : > { %v6466_v28 = vadd.f32 %v6419_v60, %v8869_v34  ;;  %v4835_v46 = vpop.f32.mrb[19].mxu0  ;;  %v5143_v40 = vmul.f32 %v6464_v12, %v6464_v12 }
 0x25a   : > { %v5102_v41 = vadd.f32 %v6465_v48, %v5101_v0  ;;  %v5141_v42 = vmul.f32 %v6465_v48, %v6465_v48  ;;  %v5171_v52 = vadd.f32 %v5170_v5, %v5140_v31  ;;  %v6467_v36 = vadd.f32 %v4835_v46, %v8872_v23 }
 0x25b   : > { %v5722_v38 = vpack.c.bf16 %v6466_v28, %v6464_v12  ;;  %v5144_v14 = vmul.f32 %v6466_v28, %v6466_v28 }
 0x25c   : > { %v6238_v11 = vpop.f32.mrb[28].mxu1  ;;  %v5172_v2 = vadd.f32 %v5171_v52, %v5141_v42  ;;  %v5717_v25 = vpack.c.bf16 %v6467_v36, %v6465_v48  ;;  %v5103_v30 = vadd.f32 %v6467_v36, %v5102_v41  ;;  %v5142_v39 = vmul.f32 %v6467_v36, %v6467_v36 }
 0x25d   : > { %v3317_v9 = vpop.f32.mrb[29].mxu1  ;;  %5777 = vst [vmem:[%s8860_s27 + $0x48] sm:$0xff] %v5722_v38  }
 0x25e   : > { %v6239_v53 = vpop.f32.mrb[30].mxu1  ;;  %5776 = vst [vmem:[%s8860_s27 + $0x40] sm:$0xff] %v5717_v25   ;;  %v5104_v10 = vadd.f32 %v6464_v12, %v5103_v30  ;;  %v5173_v34 = vadd.f32 %v5172_v2, %v5142_v39  ;;  %v6422_v18 = vpop.f32.mrb[20].mxu0 }
 0x25f   : > { %v3320_v24 = vpop.f32.mrb[31].mxu1  ;;  %v6468_v8 = vadd.f32 %v6422_v18, %v8875_v51  ;;  %v4848_v49 = vpop.f32.mrb[21].mxu0 }
 0x260   : > { %v5174_v23 = vadd.f32 %v5173_v34, %v5143_v40  ;;  %v6469_v19 = vadd.f32 %v4848_v49, %v8877_v6  ;;  %v5105_v55 = vadd.f32 %v6466_v28, %v5104_v10  ;;  %v6423_v37 = vpop.f32.mrb[22].mxu0 }
 0x261   : > { %v6470_v43 = vadd.f32 %v6423_v37, %v8880_v32  ;;  %v4851_v47 = vpop.f32.mrb[23].mxu0  ;;  %v5147_v27 = vmul.f32 %v6468_v8, %v6468_v8 }
 0x262   : > { %v5106_v59 = vadd.f32 %v6469_v19, %v5105_v55  ;;  %v5145_v58 = vmul.f32 %v6469_v19, %v6469_v19  ;;  %v5175_v54 = vadd.f32 %v5174_v23, %v5144_v14  ;;  %v6471_v16 = vadd.f32 %v4851_v47, %v8883_v56 }
 0x263   : > { %v5732_v13 = vpack.c.bf16 %v6470_v43, %v6468_v8  ;;  %v5148_v45 = vmul.f32 %v6470_v43, %v6470_v43 }
 0x264   : > { %v5176_v44 = vadd.f32 %v5175_v54, %v5145_v58  ;;  %v5727_v51 = vpack.c.bf16 %v6471_v16, %v6469_v19  ;;  %v5107_v35 = vadd.f32 %v6471_v16, %v5106_v59  ;;  %v5146_v15 = vmul.f32 %v6471_v16, %v6471_v16 }
 0x265   : > { %5779 = vst [vmem:[%s8860_s27 + $0x58] sm:$0xff] %v5732_v13  }
 0x266   : > { %5778 = vst [vmem:[%s8860_s27 + $0x50] sm:$0xff] %v5727_v51   ;;  %v5108_v6 = vadd.f32 %v6468_v8, %v5107_v35  ;;  %v5177_v22 = vadd.f32 %v5176_v44, %v5146_v15  ;;  %v6426_v50 = vpop.f32.mrb[24].mxu0 }
 0x267   : > { %v6472_v26 = vadd.f32 %v6426_v50, %v8889_v1  ;;  %v4864_v32 = vpop.f32.mrb[25].mxu0 }
 0x268   : > { %v5178_v3 = vadd.f32 %v5177_v22, %v5147_v27  ;;  %v6473_v62 = vadd.f32 %v4864_v32, %v8891_v21  ;;  %v5109_v56 = vadd.f32 %v6470_v43, %v5108_v6  ;;  %v6427_v7 = vpop.f32.mrb[26].mxu0 }
 0x269   : > { %v6474_v20 = vadd.f32 %v6427_v7, %v8894_v4  ;;  %v4867_v63 = vpop.f32.mrb[27].mxu0  ;;  %v5151_v0 = vmul.f32 %v6472_v26, %v6472_v26 }
 0x26a   : > { %v5110_v17 = vadd.f32 %v6473_v62, %v5109_v56  ;;  %v5149_v29 = vmul.f32 %v6473_v62, %v6473_v62  ;;  %v5179_v61 = vadd.f32 %v5178_v3, %v5148_v45  ;;  %v6475_v12 = vadd.f32 %v4867_v63, %v8897_v33 }
 0x26b   : > { %v5742_v57 = vpack.c.bf16 %v6474_v20, %v6472_v26  ;;  %v5152_v4 = vmul.f32 %v6474_v20, %v6474_v20 }
 0x26c   : > { %v5180_v31 = vadd.f32 %v5179_v61, %v5149_v29  ;;  %v5737_v1 = vpack.c.bf16 %v6475_v12, %v6473_v62  ;;  %v5111_v5 = vadd.f32 %v6475_v12, %v5110_v17  ;;  %v5150_v48 = vmul.f32 %v6475_v12, %v6475_v12 }
 0x26d   : > { %5781 = vst [vmem:[%s8860_s27 + $0x68] sm:$0xff] %v5742_v57  }
 0x26e   : > { %5780 = vst [vmem:[%s8860_s27 + $0x60] sm:$0xff] %v5737_v1   ;;  %v5112_v21 = vadd.f32 %v6472_v26, %v5111_v5  ;;  %v5181_v60 = vadd.f32 %v5180_v31, %v5150_v48  ;;  %v6430_v28 = vpop.f32.mrb[28].mxu0 }
 0x26f   : > { %v6476_v46 = vadd.f32 %v6430_v28, %v6238_v11  ;;  %v4880_v41 = vpop.f32.mrb[29].mxu0 }
 0x270   : > { %v5182_v42 = vadd.f32 %v5181_v60, %v5151_v0  ;;  %v6477_v52 = vadd.f32 %v4880_v41, %v3317_v9  ;;  %v5113_v36 = vadd.f32 %v6474_v20, %v5112_v21  ;;  %v6431_v33 = vpop.f32.mrb[30].mxu0 }
 0x271   : > { %v6478_v38 = vadd.f32 %v6431_v33, %v6239_v53  ;;  %v4883_v2 = vpop.f32.mrb[31].mxu0  ;;  %v5155_v49 = vmul.f32 %v6476_v46, %v6476_v46 }
 0x272   : > { %v5114_v25 = vadd.f32 %v6477_v52, %v5113_v36  ;;  %v5153_v30 = vmul.f32 %v6477_v52, %v6477_v52  ;;  %v5183_v39 = vadd.f32 %v5182_v42, %v5152_v4  ;;  %v6479_v40 = vadd.f32 %v4883_v2, %v3320_v24 }
 0x273   : > { %v5752_v10 = vpack.c.bf16 %v6478_v38, %v6476_v46  ;;  %v5156_v23 = vmul.f32 %v6478_v38, %v6478_v38 }
 0x274   : > { %v5184_v34 = vadd.f32 %v5183_v39, %v5153_v30  ;;  %v5747_v18 = vpack.c.bf16 %v6479_v40, %v6477_v52  ;;  %v5115_v8 = vadd.f32 %v6479_v40, %v5114_v25  ;;  %v5154_v11 = vmul.f32 %v6479_v40, %v6479_v40 }
 0x275   : > { %5783 = vst [vmem:[%s8860_s27 + $0x78] sm:$0xff] %v5752_v10  }
 0x276   : > { %5782 = vst [vmem:[%s8860_s27 + $0x70] sm:$0xff] %v5747_v18   ;;  %v5116_v9 = vadd.f32 %v6476_v46, %v5115_v8  ;;  %v5185_v14 = vadd.f32 %v5184_v34, %v5154_v11 }
 0x278   : > { %v5117_v19 = vadd.f32 %v6478_v38, %v5116_v9  ;;  %v5186_v53 = vadd.f32 %v5185_v14, %v5155_v49 }
 0x27a   : > { %v5118_v55 = vrot.slane %v5117_v19, 4  ;;  %v5187_v37 = vadd.f32 %v5186_v53, %v5156_v23 }
 0x27c   : > { %v5119_v43 = vadd.f32 %v5118_v55, %v5117_v19  ;;  %v5188_v24 = vrot.slane %v5187_v37, 4 }
 0x27e   : > { %v5120_v47 = vrot.slane %v5119_v43, 2  ;;  %v5189_v59 = vadd.f32 %v5188_v24, %v5187_v37 }
 0x280   : > { %v5121_v58 = vadd.f32 %v5120_v47, %v5119_v43  ;;  %v5190_v54 = vrot.slane %v5189_v59, 2 }
 0x282   : > { %v5122_v16 = vrot.slane %v5121_v58, 1  ;;  %v5191_v13 = vadd.f32 %v5190_v54, %v5189_v59 }
 0x284   : > { %v5123_v44 = vadd.f32 %v5122_v16, %v5121_v58  ;;  %v5192_v51 = vrot.slane %v5191_v13, 1 }
 0x286   : > { %5124 = vst [vmem:[%s268_s20] sm:$0x1] %v5123_v44  ;;  %v5193_v35 = vadd.f32 %v5192_v51, %v5191_v13 }
 0x288   : > { %5194 = vst [vmem:[%s271_s26] sm:$0x1] %v5193_v35 }
 0x289 PF: > { %s17_s21 = sadd.s32 1, %s6821_s21  }
 0x28a   : > { %p14_p5 = scmp.ge.s32.totalorder %s17_s21, 4  }
 0x28c   :  { %16 = sbr.rel (!%p14_p5) target bundleno = 1 (0x1), region = 98 }

// kernel: residual_block_forward.3
= control target key start
LH: loop header
LB: loop body
LE: loop exit
PB: predicated region body
PF: predicated region fallthrough
CT: control target
= control target key end

     0   :  { %s7443_s15 = smov 0   ;;  %s9529_s0 = inlined_call_operand.vmem [shape: bf16[2,320,4], index: 0, kind: input, shape index: {}]   ;;  %s9530_s1 = inlined_call_operand.vmem [shape: bf16[9,4,128], index: 1, kind: input, shape index: {}]   ;;  %s9531_s2 = inlined_call_operand.vmem [shape: bf16[512,128], index: 2, kind: output, shape index: {0}]   ;;  %s9532_s3 = inlined_call_operand.vmem [shape: f32[2,1,128], index: 3, kind: output, shape index: {1}]   ;;  %s9533_s4 = inlined_call_operand.vmem [shape: f32[2,1,128], index: 4, kind: output, shape index: {2}]  }
   0x1 LB: > { %s7449_s16 = sadd.s32 4294967295, %s7414_s15   ;;  %p6151_p0 = scmp.ge.s32.totalorder %s7414_s15, 1  ;;  %s7414_s15 = sphi %s7443_s15, %s15_s15  }
   0x2   : > { %p167_p1 = scmp.lt.s32.totalorder %s7414_s15, 3 }
   0x4   : > { %p168_p2 = pnand %p6151_p0, %p167_p1 }
   0x6   : > { %171 = sbr.rel (%p168_p2) target bundleno = 695 (0x2b7), region = 28 }
   0xd   : > { %v6155_v0 = vld [vmem:[%s9530_s1 + $0x2] sm:$0x3]  ;;  %vm9542_vm0 = vcmask 1041408   ;;  %v6289_v1 = vld [vmem:[%s9530_s1 + $0x8] sm:$0x3]  ;;  %p199_p3 = scmp.lt.s32.totalorder %s7449_s16, 1  ;;  %v219_v2 = vlaneseq }
   0xe   : > { %7335 = vmatprep.subr.msk.bf16.mxu1 %vm9542_vm0, %v6155_v0  ;;  %7339 = vmatprep.subr.msk.bf16.mxu0 %vm9542_vm0, %v6289_v1  ;;  %v1383_v3 = vsel %vm9542_vm0, %v6155_v0, 0  ;;  %v7464_v4 = vsel %vm9542_vm0, %v6289_v1, 0  ;;  %v1249_v5 = vld [vmem:[%s9530_s1] sm:$0x3]  ;;  %vm7416_vm1 = vmmov 1   ;;  %v9535_v7 = vmov 0  }
   0xf   : > { %9714 = vst [vmem:[#allocation2_spill] sm:$0xff] %v7464_v4  ;;  %6772 = vmatpush3.bf16.msra.mxu1 %v1383_v3  ;;  %6908 = vmatpush3.bf16.msra.mxu0 %v7464_v4  ;;  %s7471_s23 = scalar_select %p199_p3, %s7449_s16, 1  ;;  %v7473_v6 = vshrl.u32 %v219_v2, 7  ;;  %vm798_vm2 = vmpackc.low %vm7416_vm1, %vm7416_vm1  ;;  %v6322_v9 = vld [vmem:[%s9530_s1 + $0xa] sm:$0x3]  ;;  %vm9541_vm6 = vcmask 31744  }
  0x10   : > { %v7476_v8 = vsel %vm798_vm2, 65537, %v9535_v7  ;;  %7336 = vmatprep.subr.msk.bf16.mxu1 %vm9542_vm0, %v1249_v5  ;;  %7341 = vmatprep.subr.msk.bf16.mxu0 %vm9542_vm0, %v6322_v9  ;;  %vm861_vm3 = vsmask.f32 3328  ;;  %vm862_vm4 = vsmask.f32 7440  ;;  %v7508_v22 = vsel %vm9542_vm0, %v1249_v5, 0 }
  0x11   : > { %s7345_s26 = smul.u32 160, %s7471_s23  ;;  %v222_v10 = vadd.s32 16, %v7473_v6  ;;  %v256_v11 = vand.u32 15, %v7473_v6  ;;  %v874_v12 = vshll.u32 %v7476_v8, 16  ;;  %v878_v13 = vshrl.u32 %v7476_v8, 16  ;;  %vm7528_vm10 = vmor %vm861_vm3, %vm862_vm4  ;;  %s6153_s18 = sshll.u32 %s7449_s16, 5 }
  0x12   : > { %v224_v14 = vadd.s32 32, %v7473_v6  ;;  %v7512_v25 = vsel %vm9542_vm0, %v6322_v9, 0  ;;  %v226_v26 = vadd.s32 48, %v7473_v6  ;;  %p205_p4 = scmp.lt.s32.totalorder %s6153_s18, 63  ;;  %s212_s25 = scalar_lea.vmem %s9532_s3, %s7471_s23 }
  0x13   : > { %s7492_s29 = scalar_lea.vmem %s9529_s0, %s7345_s26  ;;  %v270_v15 = vand.u32 15, %v222_v10  ;;  %vm636_vm5 = vcmp.gt.s32.totalorder %v256_v11, 0  ;;  %v7496_v16 = vrot.slane %v874_v12, 5  ;;  %v880_v17 = vrot.slane %v878_v13, 4  ;;  %s215_s28 = scalar_lea.vmem %s9533_s4, %s7471_s23 }
  0x14   : > { %v7499_v18 = vld [vmem:[%s7492_s29 + $0x8] sm:$0xf]  ;;  %v7502_v19 = vld [vmem:[%s7492_s29 + $0xc] sm:$0xf]  ;;  %vm797_vm8 = vmpackc.low %vm636_vm5, %vm636_vm5  ;;  %v284_v24 = vand.u32 15, %v224_v14  ;;  %v7542_v49 = vrot.slane %v878_v13, 7 }
  0x15   : > { %vm638_vm7 = vcmp.gt.s32.totalorder %v270_v15, 0  ;;  %v881_v20 = vor.u32 %v880_v17, %v7496_v16  ;;  %v6156_v21 = vcombine.low %v7499_v18, %v7502_v19  ;;  %v829_v23 = vsel %vm797_vm8, 65537, %v9535_v7  ;;  %v700_v27 = vld [vmem:[%s7492_s29 + $0x4] sm:$0x8]  ;;  %v7521_v34 = vld [vmem:[%s7492_s29 + $0x20] sm:$0xf] }
  0x16   : > { %vm799_vm9 = vmpackc.low %vm638_vm7, %vm638_vm7  ;;  %v865_v29 = vshll.u32 %v829_v23, 16  ;;  %v868_v30 = vshrl.u32 %v829_v23, 16  ;;  %9716 = vst [vmem:[#allocation4_spill] sm:$0xff] %v7521_v34  ;;  %v7524_v35 = vld [vmem:[%s7492_s29 + $0x24] sm:$0xf]  ;;  %vm7538_vm11 = vcmp.gt.s32.totalorder %v284_v24, 0 }
  0x17   : > { %v831_v28 = vsel %vm799_vm9, 65537, %v9535_v7  ;;  %v7517_v31 = vrot.slane %v881_v20, 4  ;;  %6773 = vmatprep.mubr.msk.bf16.mxu1 %vm9541_vm6, %v6156_v21  ;;  %9717 = vst [vmem:[#allocation5_spill] sm:$0xff] %v7524_v35  ;;  %v2974_v40 = vld [vmem:[%s7492_s29 + $0x10] sm:$0xf]  ;;  %vm801_vm13 = vmpackc.low %vm7538_vm11, %vm7538_vm11  ;;  %v298_v57 = vand.u32 15, %v226_v26 }
  0x18   : > { %v884_v32 = vshll.u32 %v831_v28, 16  ;;  %v888_v33 = vshrl.u32 %v831_v28, 16  ;;  %v867_v37 = vrot.slane %v865_v29, 5  ;;  %v870_v38 = vrot.slane %v868_v30, 4  ;;  %v2975_v41 = vld [vmem:[%s7492_s29 + $0x14] sm:$0xf] }
  0x19   : > { %9715 = vst [vmem:[#allocation3_spill] sm:$0xff] %v7517_v31  ;;  %v703_v42 = vld [vmem:[%s7492_s29 + $0x10] sm:$0xf]  ;;  %v4373_v45 = vld [vmem:[%s7492_s29 + $0x14] sm:$0x8]  ;;  %v6290_v46 = vcombine.low %v2974_v40, %v2975_v41  ;;  %v7564_v61 = vsel %vm801_vm13, 65537, %v9535_v7 }
  0x1a   : > { %v886_v43 = vrot.slane %v884_v32, 5  ;;  %v890_v44 = vrot.slane %v888_v33, 4  ;;  %v871_v48 = vor.u32 %v870_v38, %v867_v37  ;;  %vm1183_vm12 = vcmp.ne.s16.totalorder %v867_v37, 0  ;;  %v4375_v50 = vld [vmem:[%s7492_s29 + $0x1c] sm:$0xf]  ;;  %s10290_s18 = smov (!%p205_p4, %s6153_s18), 63 }
  0x1b   : > { %v2973_v51 = vld [vmem:[%s7492_s29 + $0xc] sm:$0x8]  ;;  %v1216_v54 = vsel %vm1183_vm12, %v700_v27, 0  ;;  %v2976_v55 = vld [vmem:[%s7492_s29 + $0x18] sm:$0xf]  ;;  %6909 = vmatprep.mubr.msk.bf16.mxu0 %vm9541_vm6, %v6290_v46  ;;  %v4406_v60 = vsel %vm1183_vm12, %v4373_v45, 0 }
  0x1c   : > { %v887_v52 = vsel %vm7528_vm10, %v7517_v31, %v886_v43  ;;  %v891_v53 = vor.u32 %v890_v44, %v886_v43  ;;  %v7556_v56 = vld [vmem:[%s7492_s29 + $0x14] sm:$0xf]  ;;  %v872_v58 = vrot.slane %v871_v48, 4  ;;  %v7567_v62 = vld [vmem:[%s7492_s29 + $0x1c] sm:$0xf]  ;;  %v3006_v2 = vsel %vm1183_vm12, %v2973_v51, 0 }
  0x1d   : > { %vm7558_vm14 = vcmp.ne.s16.totalorder %v887_v52, 0  ;;  %v4374_v1 = vld [vmem:[%s7492_s29 + $0x18] sm:$0xf]  ;;  %v904_v10 = vshll.u32 %v7564_v61, 16  ;;  %v6157_v11 = vcombine.low %v703_v42, %v7556_v56  ;;  %v6291_v15 = vcombine.low %v2976_v55, %v7567_v62  ;;  %v7610_v24 = vld [vmem:[%s9530_s1 + $0xc] sm:$0x3] }
  0x1e   : > { %v892_v63 = vrot.slane %v891_v53, 4  ;;  %v1218_v0 = vsel %vm7558_vm14, %v7502_v19, 0  ;;  %v3008_v3 = vsel %vm7558_vm14, %v2975_v41, 0  ;;  %v877_v5 = vsel %vm7528_vm10, %v872_v58, %v7496_v16  ;;  %v7636_v45 = vld [vmem:[%s7492_s29 + $0x1c] sm:$0xf]  ;;  %s6154_s19 = sshll.u32 %s10290_s18, 2 }
  0x1f   : > { %v4408_v9 = vsel %vm7558_vm14, %v4375_v50, 0  ;;  %vm7586_vm15 = vcmp.ne.s16.totalorder %v877_v5, 0  ;;  %vm7591_vm1 = vcmp.gt.s32.totalorder %v298_v57, 0  ;;  %6774 = vmatmul.mubr.msk.bf16.vlgmr.msra.gmra.mrb[0].mxu1 %vm9541_vm6, %v6157_v11  ;;  %6910 = vmatmul.mubr.msk.bf16.vlgmr.msra.gmra.mrb[0].mxu0 %vm9541_vm6, %v6291_v15  ;;  %v908_v44 = vshrl.u32 %v7564_v61, 16  ;;  %v7643_v50 = vld [vmem:[%s7492_s29 + $0x20] sm:$0xf]  ;;  %s9495_s22 = scalar_lea.vmem %s9531_s2, %s6154_s19 }
  0x20   : > { %v897_v13 = vsel %vm7528_vm10, %v892_v63, %v7496_v16  ;;  %v1217_v20 = vsel %vm7586_vm15, %v7499_v18, 0  ;;  %v4407_v21 = vsel %vm7586_vm15, %v4374_v1, 0  ;;  %v3007_v23 = vsel %vm7586_vm15, %v2974_v40, 0  ;;  %6806 = vmatpush3.bf16.msra.mxu1 %v7508_v22  ;;  %6942 = vmatpush3.bf16.msra.mxu0 %v7512_v25  ;;  %v7633_v25 = vld [vmem:[%s7492_s29 + $0x18] sm:$0xf]  ;;  %vm803_vm3 = vmpackc.low %vm7591_vm1, %vm7591_vm1 }
  0x21   : > { %vm7595_vm2 = vcmp.ne.s16.totalorder %v897_v13, 0  ;;  %v6188_v27 = vcombine.low %v1216_v54, %v1217_v20  ;;  %v7617_v28 = vcombine.low %v4406_v60, %v4407_v21  ;;  %v6256_v33 = vcombine.low %v3006_v2, %v3007_v23  ;;  %7342 = vmatprep.subr.msk.bf16.mxu0 %vm9542_vm0, %v7610_v24  ;;  %v7646_v51 = vld [vmem:[%s7492_s29 + $0x24] sm:$0xf]  ;;  %v7661_v58 = vld [vmem:[%s7492_s29 + $0x20] sm:$0xf] }
  0x22   : > { %v1219_v26 = vsel %vm7595_vm2, %v703_v42, 0  ;;  %v4409_v18 = vsel %vm7595_vm2, %v7521_v34, 0  ;;  %v3009_v32 = vsel %vm7595_vm2, %v2976_v55, 0  ;;  %v228_v22 = vadd.s32 64, %v7473_v6  ;;  %v7664_v59 = vld [vmem:[%s7492_s29 + $0x24] sm:$0xf] }
  0x23   : > { %v6189_v29 = vcombine.low %v1218_v0, %v1219_v26  ;;  %v7621_v30 = vcombine.low %v4408_v9, %v4409_v18  ;;  %v1631_v37 = vshrl.u32 %v6188_v27, 16  ;;  %v1634_v38 = vshll.u32 %v6188_v27, 16  ;;  %v7667_v60 = vld [vmem:[%s7492_s29 + $0x28] sm:$0xf]  ;;  %v7683_v0 = vld [vmem:[%s7492_s29 + $0x2c] sm:$0xf] }
  0x24   : > { %v7626_v40 = vcombine.low %v3008_v3, %v3009_v32  ;;  %v3125_v43 = vshrl.u32 %v6256_v33, 16  ;;  %v3128_v46 = vshll.u32 %v6256_v33, 16  ;;  %v906_v48 = vrot.slane %v904_v10, 5  ;;  %v7690_v9 = vld [vmem:[%s7492_s29 + $0x28] sm:$0xf] }
  0x25   : > { %v1639_v41 = vshrl.u32 %v6189_v29, 16  ;;  %v1642_v42 = vshll.u32 %v6189_v29, 16  ;;  %v7651_v52 = vor.u32 %v7542_v49, %v874_v12  ;;  %v7653_v53 = vrot.slane %v1631_v37, 3  ;;  %v7702_v15 = vld [vmem:[%s7492_s29 + $0x2c] sm:$0xf] }
  0x26   : > { %v3133_v47 = vshrl.u32 %v7626_v40, 16  ;;  %v7655_v54 = vrot.slane %v1634_v38, 4  ;;  %v3136_v57 = vshll.u32 %v7626_v40, 16  ;;  %v7671_v12 = vrot.slane %v3125_v43, 3  ;;  %v7707_v23 = vld [vmem:[%s7492_s29 + $0x30] sm:$0xf] }
  0x27   : > { %9730 = vst [vmem:[#allocation6_spill] sm:$0xff] %v7651_v52  ;;  %v7657_v55 = vrot.slane %v1639_v41, 3  ;;  %v7669_v8 = vrot.slane %v1642_v42, 4  ;;  %v907_v61 = vsel %vm7528_vm10, %v7517_v31, %v906_v48  ;;  %v835_v63 = vsel %vm803_vm3, 65537, %v9535_v7  ;;  %v7710_v26 = vld [vmem:[%s7492_s29 + $0x34] sm:$0xf] }
  0x28   : > { %9731 = vst [vmem:[#allocation7_spill] sm:$0xff] %v7671_v12  ;;  %vm7685_vm4 = vcmp.ne.s16.totalorder %v907_v61, 0  ;;  %v910_v2 = vrot.slane %v908_v44, 4  ;;  %v924_v3 = vshll.u32 %v835_v63, 16  ;;  %v928_v5 = vshrl.u32 %v835_v63, 16 }
  0x29   : > { %v7692_v10 = vrot.slane %v3128_v46, 4  ;;  %v7694_v11 = vrot.slane %v3133_v47, 3  ;;  %v3010_v13 = vsel %vm7685_vm4, %v7567_v62, 0  ;;  %v6158_v14 = vcombine.low %v7633_v25, %v7636_v45  ;;  %v4378_v40 = vld [vmem:[%s7492_s29 + $0x28] sm:$0xf] }
  0x2a   : > { %v911_v17 = vor.u32 %v910_v2, %v906_v48  ;;  %v926_v19 = vrot.slane %v924_v3, 5  ;;  %v6292_v20 = vcombine.low %v7643_v50, %v7646_v51  ;;  %v312_v21 = vand.u32 15, %v228_v22  ;;  %v3848_v12 = vld [vmem:[%s7492_s29 + $0x18] sm:$0xf] }
  0x2b   : > { %9734 = vst [vmem:[#allocation8_spill] sm:$0xff] %v7692_v10  ;;  %9735 = vst [vmem:[#allocation9_spill] sm:$0xff] %v7694_v11  ;;  %6777 = vmatprep.mubr.msk.bf16.mxu1 %vm9541_vm6, %v6158_v14  ;;  %v930_v27 = vrot.slane %v928_v5, 4  ;;  %v6159_v62 = vcombine.low %v7661_v58, %v7664_v59  ;;  %v6293_v18 = vcombine.low %v7667_v60, %v7683_v0  ;;  %v230_v29 = vadd.s32 80, %v7473_v6 }
  0x2c   : > { %v912_v32 = vrot.slane %v911_v17, 4  ;;  %v927_v33 = vsel %vm7528_vm10, %v7517_v31, %v926_v19  ;;  %6913 = vmatprep.mubr.msk.bf16.mxu0 %vm9541_vm6, %v6292_v20  ;;  %vm644_vm5 = vcmp.gt.s32.totalorder %v312_v21, 0  ;;  %v6160_v37 = vcombine.low %v7690_v9, %v7702_v15 }
  0x2d   : > { %v1220_v38 = vsel %vm7685_vm4, %v7556_v56, 0  ;;  %vm805_vm7 = vmpackc.low %vm644_vm5, %vm644_vm5  ;;  %v931_v22 = vor.u32 %v930_v27, %v926_v19  ;;  %6778 = vmatmul.mubr.msk.bf16.gmra.mrb[4].mxu1 %vm9541_vm6, %v6159_v62  ;;  %6914 = vmatmul.mubr.msk.bf16.gmra.mrb[4].mxu0 %vm9541_vm6, %v6293_v18  ;;  %v326_v41 = vand.u32 15, %v230_v29  ;;  %v6294_v42 = vcombine.low %v7707_v23, %v7710_v26  ;;  %v7771_v62 = vld [vmem:[%s7492_s29 + $0x30] sm:$0xf] }
  0x2e   : > { %v4410_v43 = vsel %vm7685_vm4, %v7524_v35, 0  ;;  %v917_v44 = vsel %vm7528_vm10, %v912_v32, %v7496_v16  ;;  %vm7738_vm8 = vcmp.ne.s16.totalorder %v927_v33, 0  ;;  %v837_v46 = vsel %vm805_vm7, 65537, %v9535_v7  ;;  %6781 = vmatprep.mubr.msk.bf16.mxu1 %vm9541_vm6, %v6160_v37  ;;  %v7783_v33 = vld [vmem:[%s7492_s29 + $0x34] sm:$0xf] }
  0x2f   : > { %vm1188_vm9 = vcmp.ne.s16.totalorder %v917_v44, 0  ;;  %v932_v47 = vrot.slane %v931_v22, 4  ;;  %v944_v48 = vshll.u32 %v837_v46, 16  ;;  %v948_v61 = vshrl.u32 %v837_v46, 16  ;;  %6917 = vmatprep.mubr.msk.bf16.mxu0 %vm9541_vm6, %v6294_v42  ;;  %v7805_v44 = vld [vmem:[%s7492_s29 + $0x38] sm:$0xf] }
  0x30   : > { %v1221_v63 = vsel %vm1188_vm9, %v7633_v25, 0  ;;  %v4411_v1 = vsel %vm1188_vm9, %v4378_v40, 0  ;;  %v3011_v2 = vsel %vm1188_vm9, %v7643_v50, 0  ;;  %vm646_vm11 = vcmp.gt.s32.totalorder %v326_v41, 0  ;;  %v3847_v35 = vld [vmem:[%s7492_s29 + $0x14] sm:$0xf] }
  0x31   : > { %v7747_v3 = vcombine.low %v1220_v38, %v1221_v63  ;;  %v7749_v5 = vcombine.low %v4410_v43, %v4411_v1  ;;  %v7751_v14 = vcombine.low %v3010_v13, %v3011_v2  ;;  %v937_v17 = vsel %vm7528_vm10, %v932_v47, %v7496_v16  ;;  %vm807_vm12 = vmpackc.low %vm646_vm11, %vm646_vm11  ;;  %v7814_v63 = vld [vmem:[%s7492_s29 + $0x3c] sm:$0xf] }
  0x32   : > { %v7756_v19 = vrot.slane %v3136_v57, 4  ;;  %v946_v25 = vrot.slane %v944_v48, 5  ;;  %vm7758_vm13 = vcmp.ne.s16.totalorder %v937_v17, 0  ;;  %v950_v50 = vrot.slane %v948_v61, 4 }
  0x33   : > { %v1222_v13 = vsel %vm7738_vm8, %v7636_v45, 0  ;;  %v1648_v21 = vshrl.u32 %v7747_v3, 16  ;;  %v3012_v27 = vsel %vm7738_vm8, %v7646_v51, 0  ;;  %v839_v57 = vsel %vm807_vm12, 65537, %v9535_v7  ;;  %v7786_v51 = vld [vmem:[%s7492_s29 + $0x38] sm:$0xf] }
  0x34   : > { %9738 = vst [vmem:[#allocation10_spill] sm:$0xff] %v7756_v19  ;;  %v947_v18 = vsel %vm7528_vm10, %v7517_v31, %v946_v25  ;;  %v1223_v29 = vsel %vm7758_vm13, %v7661_v58, 0  ;;  %v3013_v45 = vsel %vm7758_vm13, %v7667_v60, 0  ;;  %v951_v32 = vor.u32 %v950_v50, %v946_v25  ;;  %v7794_v58 = vld [vmem:[%s7492_s29 + $0x3c] sm:$0xf] }
  0x35   : > { %v7788_v37 = vrot.slane %v1648_v21, 3  ;;  %vm7796_vm14 = vcmp.ne.s16.totalorder %v947_v18, 0  ;;  %v7800_v60 = vcombine.low %v1222_v13, %v1223_v29  ;;  %v7802_v42 = vcombine.low %v3012_v27, %v3013_v45  ;;  %v7825_v25 = vld [vmem:[%s7492_s29 + $0x40] sm:$0xf]  ;;  %v7833_v27 = vld [vmem:[%s7492_s29 + $0x44] sm:$0xf] }
  0x36   : > { %v952_v43 = vrot.slane %v951_v32, 4  ;;  %v1224_v46 = vsel %vm7796_vm14, %v7664_v59, 0  ;;  %v3014_v47 = vsel %vm7796_vm14, %v7683_v0, 0  ;;  %v964_v48 = vshll.u32 %v839_v57, 16  ;;  %v7846_v32 = vld [vmem:[%s7492_s29 + $0x40] sm:$0xf] }
  0x37   : > { %9743 = vst [vmem:[#allocation11_spill] sm:$0xff] %v7802_v42  ;;  %v968_v61 = vshrl.u32 %v839_v57, 16  ;;  %v232_v2 = vadd.s32 96, %v7473_v6  ;;  %v6161_v17 = vcombine.low %v7771_v62, %v7783_v33  ;;  %v6295_v59 = vcombine.low %v7786_v51, %v7794_v58 }
  0x38   : > { %v957_v1 = vsel %vm7528_vm10, %v952_v43, %v7496_v16  ;;  %v966_v0 = vrot.slane %v964_v48, 5  ;;  %v234_v21 = vadd.s32 112, %v7473_v6  ;;  %v6162_v45 = vcombine.low %v7805_v44, %v7814_v63 }
  0x39   : > { %vm7827_vm15 = vcmp.ne.s16.totalorder %v957_v1, 0  ;;  %v970_v13 = vrot.slane %v968_v61, 4  ;;  %v340_v29 = vand.u32 15, %v232_v2  ;;  %6782 = vmatmul.mubr.msk.bf16.gmra.mrb[8].mxu1 %vm9541_vm6, %v6161_v17  ;;  %6918 = vmatmul.mubr.msk.bf16.gmra.mrb[8].mxu0 %vm9541_vm6, %v6295_v59  ;;  %v7856_v61 = vld [vmem:[%s7492_s29 + $0x44] sm:$0xf] }
  0x3a   : > { %v1225_v57 = vsel %vm7827_vm15, %v7690_v9, 0  ;;  %v3015_v18 = vsel %vm7827_vm15, %v7707_v23, 0  ;;  %v967_v43 = vsel %vm7528_vm10, %v7517_v31, %v966_v0  ;;  %v7859_v1 = vld [vmem:[%s7492_s29 + $0x48] sm:$0xf]  ;;  %v7862_v2 = vld [vmem:[%s7492_s29 + $0x4c] sm:$0xf]  ;;  %6785 = vmatprep.mubr.msk.bf16.mxu1 %vm9541_vm6, %v6162_v45  ;;  %v6163_v45 = vcombine.low %v7846_v32, %v7856_v61 }
  0x3b   : > { %v7851_v9 = vcombine.low %v1224_v46, %v1225_v57  ;;  %v7853_v48 = vcombine.low %v3014_v47, %v3015_v18  ;;  %v971_v23 = vor.u32 %v970_v13, %v966_v0  ;;  %9747 = vst [vmem:[#allocation13_spill] sm:$0xff] %v7862_v2  ;;  %vm7864_vm1 = vcmp.ne.s16.totalorder %v967_v43, 0  ;;  %v7872_v47 = vld [vmem:[%s7492_s29 + $0x48] sm:$0xf] }
  0x3c   : > { %vm648_vm2 = vcmp.gt.s32.totalorder %v340_v29, 0  ;;  %v354_v59 = vand.u32 15, %v234_v21  ;;  %v6296_v46 = vcombine.low %v7825_v25, %v7833_v27  ;;  %v1226_v0 = vsel %vm7864_vm1, %v7702_v15, 0  ;;  %v7882_v21 = vld [vmem:[%s7492_s29 + $0x4c] sm:$0xf] }
  0x3d   : > { %9746 = vst [vmem:[#allocation12_spill] sm:$0xff] %v7853_v48  ;;  %v3016_v13 = vsel %vm7864_vm1, %v7710_v26, 0  ;;  %vm809_vm3 = vmpackc.low %vm648_vm2, %vm648_vm2  ;;  %v972_v57 = vrot.slane %v971_v23, 4  ;;  %v236_v18 = vadd.s32 128, %v7473_v6  ;;  %v6297_v15 = vcombine.low %v7859_v1, %v7862_v2 }
  0x3e   : > { %v841_v29 = vsel %vm809_vm3, 65537, %v9535_v7  ;;  %vm650_vm4 = vcmp.gt.s32.totalorder %v354_v59, 0  ;;  %6921 = vmatprep.mubr.msk.bf16.mxu0 %vm9541_vm6, %v6296_v46  ;;  %v238_v46 = vadd.s32 144, %v7473_v6  ;;  %v6164_v40 = vcombine.low %v7872_v47, %v7882_v21 }
  0x3f   : > { %v977_v26 = vsel %vm7528_vm10, %v972_v57, %v7496_v16  ;;  %v984_v43 = vshll.u32 %v841_v29, 16  ;;  %v988_v23 = vshrl.u32 %v841_v29, 16  ;;  %vm811_vm5 = vmpackc.low %vm650_vm4, %vm650_vm4  ;;  %v368_v39 = vand.u32 15, %v236_v18 }
  0x40   : > { %vm7893_vm7 = vcmp.ne.s16.totalorder %v977_v26, 0  ;;  %v843_v59 = vsel %vm811_vm5, 65537, %v9535_v7  ;;  %v382_v42 = vand.u32 15, %v238_v46 }
  0x41   : > { %v986_v38 = vrot.slane %v984_v43, 5  ;;  %v1227_v57 = vsel %vm7893_vm7, %v7771_v62, 0  ;;  %v3017_v18 = vsel %vm7893_vm7, %v7786_v51, 0  ;;  %v990_v29 = vrot.slane %v988_v23, 4  ;;  %6786 = vmatmul.mubr.msk.bf16.gmra.mrb[12].mxu1 %vm9541_vm6, %v6163_v45  ;;  %6922 = vmatmul.mubr.msk.bf16.gmra.mrb[12].mxu0 %vm9541_vm6, %v6297_v15 }
  0x42   : > { %v7907_v26 = vcombine.low %v1226_v0, %v1227_v57  ;;  %v7909_v4 = vcombine.low %v3016_v13, %v3017_v18  ;;  %v1004_v7 = vshll.u32 %v843_v59, 16  ;;  %v1008_v48 = vshrl.u32 %v843_v59, 16  ;;  %6789 = vmatprep.mubr.msk.bf16.mxu1 %vm9541_vm6, %v6164_v40  ;;  %v7932_v59 = vld [vmem:[%s9530_s1 + $0x4] sm:$0x3] }
  0x43   : > { %v987_v43 = vsel %vm7528_vm10, %v7517_v31, %v986_v38  ;;  %v991_v62 = vor.u32 %v990_v29, %v986_v38  ;;  %vm652_vm9 = vcmp.gt.s32.totalorder %v368_v39, 0  ;;  %v9753_v51 = vmov 0  ;;  %7337 = vmatprep.subr.msk.bf16.mxu1 %vm9542_vm0, %v7932_v59 }
  0x44   : > { %9752 = vst [vmem:[#allocation14_spill] sm:$0xff] %v7909_v4  ;;  %vm7917_vm11 = vcmp.ne.s16.totalorder %v987_v43, 0  ;;  %v1006_v0 = vrot.slane %v1004_v7, 5  ;;  %vm813_vm12 = vmpackc.low %vm652_vm9, %vm652_vm9  ;;  %v1010_v13 = vrot.slane %v1008_v48, 4  ;;  %v221_v45 = vadd.s32 8, %v7473_v6 }
  0x45   : > { %v9754_v51 = vsel %vm7917_vm11, 4294967295, %v9753_v51  ;;  %v1228_v15 = vsel %vm7917_vm11, %v7783_v33, 0  ;;  %v3018_v39 = vsel %vm7917_vm11, %v7794_v58, 0  ;;  %v992_v38 = vrot.slane %v991_v62, 4 }
  0x46   : > { %v9755_v23 = vmov 0   ;;  %v1007_v7 = vsel %vm7528_vm10, %v7517_v31, %v1006_v0  ;;  %v1011_v48 = vor.u32 %v1010_v13, %v1006_v0  ;;  %v9756_v58 = vmov 0 }
  0x47   : > { %v845_v40 = vsel %vm813_vm12, 65537, %v9755_v23  ;;  %v997_v33 = vsel %vm7528_vm10, %v992_v38, %v7496_v16  ;;  %vm7942_vm2 = vcmp.ne.s16.totalorder %v1007_v7, 0  ;;  %vm654_vm3 = vcmp.gt.s32.totalorder %v382_v42, 0 }
  0x48   : > { %v1024_v46 = vshll.u32 %v845_v40, 16  ;;  %v1028_v57 = vshrl.u32 %v845_v40, 16  ;;  %v9757_v58 = vsel %vm7942_vm2, 4294967295, %v9756_v58  ;;  %v223_v18 = vadd.s32 24, %v7473_v6  ;;  %vm815_vm5 = vmpackc.low %vm654_vm3, %vm654_vm3 }
  0x49   : > { %9758 = vst [vmem:[#allocation15_spill] sm:$0xff] %v9757_v58  ;;  %vm7947_vm4 = vcmp.ne.s16.totalorder %v997_v33, 0  ;;  %v9759_v29 = vmov 0  ;;  %v1230_v43 = vsel %vm7942_vm2, %v7814_v63, 0  ;;  %v3020_v62 = vsel %vm7942_vm2, %v7833_v27, 0 }
  0x4a   : > { %v9760_v29 = vsel %vm7947_vm4, 4294967295, %v9759_v29  ;;  %v1012_v0 = vrot.slane %v1011_v48, 4  ;;  %v1229_v42 = vsel %vm7947_vm4, %v7805_v44, 0  ;;  %v3019_v13 = vsel %vm7947_vm4, %v7825_v25, 0 }
  0x4b   : > { %9761 = vst [vmem:[#allocation16_spill] sm:$0xff] %v9760_v29  ;;  %v1026_v38 = vrot.slane %v1024_v46, 5  ;;  %v1030_v40 = vrot.slane %v1028_v57, 4  ;;  %v7963_v7 = vcombine.low %v1228_v15, %v1229_v42  ;;  %v7965_v33 = vcombine.low %v3018_v39, %v3019_v13 }
  0x4c   : > { %v1017_v63 = vsel %vm7528_vm10, %v1012_v0, %v7496_v16  ;;  %v847_v27 = vsel %vm815_vm5, 65537, %v9755_v23  ;;  %v9763_v4 = vmov 0  ;;  %v9766_v15 = vshll.u32 %v7747_v3, 16 }
  0x4d   : > { %9762 = vst [vmem:[#allocation17_spill] sm:$0xff] %v7965_v33  ;;  %v1027_v44 = vsel %vm7528_vm10, %v7517_v31, %v1026_v38  ;;  %v1031_v48 = vor.u32 %v1030_v40, %v1026_v38  ;;  %vm7974_vm9 = vcmp.ne.s16.totalorder %v1017_v63, 0  ;;  %v1044_v25 = vshll.u32 %v847_v27, 16 }
  0x4e   : > { %v9764_v4 = vsel %vm7974_vm9, 4294967295, %v9763_v4  ;;  %v7980_v39 = vrot.slane %v9766_v15, 4  ;;  %vm7982_vm12 = vcmp.ne.s16.totalorder %v1027_v44, 0  ;;  %v9767_v46 = vmov 0 }
  0x4f   : > { %9765 = vst [vmem:[#allocation18_spill] sm:$0xff] %v9764_v4  ;;  %v9768_v46 = vsel %vm7982_vm12, 4294967295, %v9767_v46  ;;  %v1231_v57 = vsel %vm7974_vm9, %v7846_v32, 0  ;;  %v3021_v0 = vsel %vm7974_vm9, %v7859_v1, 0  ;;  %v9770_v42 = vshrl.u32 %v7751_v14, 16 }
  0x50   : > { %9769 = vst [vmem:[#allocation19_spill] sm:$0xff] %v9768_v46  ;;  %v9772_v3 = vshll.u32 %v7751_v14, 16  ;;  %v8000_v40 = vcombine.low %v1230_v43, %v1231_v57  ;;  %v1032_v63 = vrot.slane %v1031_v48, 4  ;;  %v8002_v44 = vcombine.low %v3020_v62, %v3021_v0  ;;  %v3846_v57 = vld [vmem:[%s7492_s29 + $0x10] sm:$0xf] }
  0x51   : > { %v7994_v13 = vrot.slane %v9770_v42, 3  ;;  %v1046_v15 = vrot.slane %v1044_v25, 5  ;;  %v263_v32 = vand.u32 15, %v221_v45  ;;  %v277_v33 = vand.u32 15, %v223_v18  ;;  %v8039_v0 = vld [vmem:[%s7492_s29 + $0x54] sm:$0xf] }
  0x52   : > { %v7998_v38 = vrot.slane %v9772_v3, 4  ;;  %9774 = vst [vmem:[#allocation22_spill] sm:$0xff] %v8002_v44  ;;  %v1232_v1 = vsel %vm7982_vm12, %v7856_v61, 0  ;;  %v1037_v42 = vsel %vm7528_vm10, %v1032_v63, %v7496_v16  ;;  %v1048_v43 = vshrl.u32 %v847_v27, 16  ;;  %v8022_v61 = vld [vmem:[%s7492_s29 + $0x50] sm:$0xf] }
  0x53   : > { %9771 = vst [vmem:[#allocation20_spill] sm:$0xff] %v7994_v13  ;;  %vm8014_vm3 = vcmp.ne.s16.totalorder %v1037_v42, 0  ;;  %v9775_v62 = vmov 0  ;;  %v1047_v45 = vsel %vm7528_vm10, %v7517_v31, %v1046_v15  ;;  %vm669_vm5 = vcmp.lt.s32.totalorder %v263_v32, 15 }
  0x54   : > { %9773 = vst [vmem:[#allocation21_spill] sm:$0xff] %v7998_v38  ;;  %v9776_v62 = vsel %vm8014_vm3, 4294967295, %v9775_v62  ;;  %vm671_vm6 = vcmp.lt.s32.totalorder %v277_v33, 15  ;;  %vm8024_vm0 = vcmp.ne.s16.totalorder %v1047_v45, 0  ;;  %v9778_v18 = vmov 0  ;;  %vm2092_vm12 = vmpackc.low %vm669_vm5, %vm669_vm5 }
  0x55   : > { %9777 = vst [vmem:[#allocation23_spill] sm:$0xff] %v9776_v62  ;;  %v9779_v18 = vsel %vm8024_vm0, 4294967295, %v9778_v18  ;;  %v1233_v27 = vsel %vm8014_vm3, %v7872_v47, 0  ;;  %vm2155_vm9 = vsmask.f32 256  ;;  %vm9552_vm2 = vcmp.ne.s16.totalorder %v7651_v52, 0  ;;  %vm2094_vm4 = vmpackc.low %vm671_vm6, %vm671_vm6 }
  0x56   : > { %9780 = vst [vmem:[#allocation24_spill] sm:$0xff] %v9779_v18  ;;  %v8032_v48 = vcombine.low %v1232_v1, %v1233_v27  ;;  %v2124_v25 = vsel %vm2092_vm12, 65537, %v9755_v23  ;;  %vm2156_vm11 = vsmask.f32 4368  ;;  %v8036_v33 = vrot.slane %v7542_v49, 4 }
  0x57   : > { %v1234_v3 = vsel %vm8024_vm0, %v7882_v21, 0  ;;  %v2126_v47 = vsel %vm2094_vm4, 65537, %v9755_v23  ;;  %v2167_v63 = vshrl.u32 %v2124_v25, 16  ;;  %v2170_v32 = vshll.u32 %v2124_v25, 16  ;;  %vm8053_vm6 = vmor %vm2155_vm9, %vm2156_vm11 }
  0x58   : > { %v2185_v1 = vshrl.u32 %v2126_v47, 16  ;;  %v2188_v42 = vshll.u32 %v2126_v47, 16  ;;  %v3879_v45 = vsel %vm9552_vm2, %v3846_v57, 0  ;;  %v240_v27 = vadd.s32 160, %v7473_v6 }
  0x59   : > { %v2169_v49 = vrot.slane %v2167_v63, 7  ;;  %v1050_v14 = vrot.slane %v1048_v43, 4  ;;  %v6165_v44 = vcombine.low %v8022_v61, %v8039_v0  ;;  %v225_v21 = vadd.s32 40, %v7473_v6 }
  0x5a   : > { %v2187_v47 = vrot.slane %v2185_v1, 7  ;;  %v396_v38 = vand.u32 15, %v240_v27  ;;  %vm9783_vm4 = vcmask 1041408   ;;  %v242_v43 = vadd.s32 176, %v7473_v6 }
  0x5b   : > { %v8059_v57 = vsel %vm9783_vm4, %v7610_v24, 0  ;;  %v2172_v63 = vor.u32 %v2170_v32, %v2169_v49  ;;  %v2174_v13 = vrot.slane %v2169_v49, 4  ;;  %v1051_v34 = vor.u32 %v1050_v14, %v1046_v15  ;;  %v3849_v32 = vld [vmem:[%s7492_s29 + $0x1c] sm:$0xf] }
  0x5c   : > { %vm9784_vm12 = vcmask 31744   ;;  %v291_v19 = vand.u32 15, %v225_v21  ;;  %v2190_v11 = vor.u32 %v2188_v42, %v2187_v47  ;;  %v2192_v10 = vrot.slane %v2187_v47, 4 }
  0x5d   : > { %6790 = vmatmul.mubr.msk.bf16.gmra.mrb[16].mxu1 %vm9784_vm12, %v6165_v44  ;;  %vm656_vm11 = vcmp.gt.s32.totalorder %v396_v38, 0  ;;  %v410_v1 = vand.u32 15, %v242_v43  ;;  %v2173_v24 = vsel %vm8053_vm6, %v8036_v33, %v2172_v63  ;;  %v8071_v27 = vsel %vm8053_vm6, %v2174_v13, %v7651_v52 }
  0x5e   : > { %9785 = vst [vmem:[#allocation25_spill] sm:$0xff] %v8071_v27  ;;  %vm817_vm5 = vmpackc.low %vm656_vm11, %vm656_vm11  ;;  %v1052_v15 = vrot.slane %v1051_v34, 4  ;;  %vm8074_vm4 = vcmp.lt.s32.totalorder %v291_v19, 15  ;;  %v2191_v38 = vsel %vm8053_vm6, %v8036_v33, %v2190_v11  ;;  %vm8081_vm12 = vcmp.ne.s16.totalorder %v2173_v24, 0 }
  0x5f   : > { %v9788_v14 = vmov 0  ;;  %vm9556_vm2 = vcmp.ne.s16.totalorder %v8071_v27, 0  ;;  %v849_v13 = vsel %vm817_vm5, 65537, %v9755_v23  ;;  %vm2096_vm11 = vmpackc.low %vm8074_vm4, %vm8074_vm4  ;;  %vm8090_vm9 = vcmp.ne.s16.totalorder %v2191_v38, 0  ;;  %v3850_v38 = vld [vmem:[%s7492_s29 + $0x20] sm:$0xf] }
  0x60   : > { %v9789_v14 = vsel %vm8081_vm12, 4294967295, %v9788_v14  ;;  %v9791_v34 = vmov 0  ;;  %v3880_v11 = vsel %vm8081_vm12, %v3847_v35, 0  ;;  %v3881_v19 = vsel %vm9556_vm2, %v3848_v12, 0  ;;  %v3851_v27 = vld [vmem:[%s7492_s29 + $0x24] sm:$0xf] }
  0x61   : > { %9790 = vst [vmem:[#allocation26_spill] sm:$0xff] %v9789_v14  ;;  %v9792_v34 = vsel %vm8090_vm9, 4294967295, %v9791_v34  ;;  %v1057_v42 = vsel %vm7528_vm10, %v1052_v15, %v7496_v16  ;;  %v3882_v49 = vsel %vm8090_vm9, %v3849_v32, 0  ;;  %v6323_v21 = vcombine.low %v3879_v45, %v3880_v11 }
  0x62   : > { %9793 = vst [vmem:[#allocation27_spill] sm:$0xff] %v9792_v34  ;;  %v1064_v47 = vshll.u32 %v849_v13, 16  ;;  %v1068_v43 = vshrl.u32 %v849_v13, 16  ;;  %v6324_v63 = vcombine.low %v3881_v19, %v3882_v49  ;;  %vm8103_vm5 = vcmp.ne.s16.totalorder %v1057_v42, 0  ;;  %v721_v49 = vld [vmem:[%s7492_s29 + $0x58] sm:$0xf] }
  0x63   : > { %v9794_v24 = vmov 0  ;;  %v2128_v35 = vsel %vm2096_vm11, 65537, %v9755_v23  ;;  %v8111_v12 = vsel %vm8053_vm6, %v2192_v10, %v7651_v52  ;;  %v3998_v15 = vshrl.u32 %v6323_v21, 16 }
  0x64   : > { %v9795_v24 = vsel %vm8103_vm5, 4294967295, %v9794_v24  ;;  %9797 = vst [vmem:[#allocation29_spill] sm:$0xff] %v8111_v12  ;;  %v4000_v44 = vshll.u32 %v6323_v21, 16  ;;  %v1066_v32 = vrot.slane %v1064_v47, 5  ;;  %v1235_v45 = vsel %vm8103_vm5, %v8022_v61, 0 }
  0x65   : > { %9796 = vst [vmem:[#allocation28_spill] sm:$0xff] %v9795_v24  ;;  %v4005_v13 = vshll.u32 %v6324_v63, 16  ;;  %v4009_v11 = vshrl.u32 %v6324_v63, 16  ;;  %v8117_v19 = vcombine.low %v1234_v3, %v1235_v45  ;;  %v2203_v42 = vshrl.u32 %v2128_v35, 16  ;;  %v8125_v21 = vld [vmem:[%s7492_s29 + $0x5c] sm:$0xf] }
  0x66   : > { %v4002_v2 = vrot.slane %v4000_v44, 1  ;;  %v1067_v10 = vsel %vm7528_vm10, %v7517_v31, %v1066_v32  ;;  %v2206_v18 = vshll.u32 %v2128_v35, 16  ;;  %vm9567_vm4 = vcmp.ne.s16.totalorder %v8111_v12, 0 }
  0x67   : > { %v4007_v47 = vrot.slane %v4005_v13, 1  ;;  %vm8127_vm11 = vcmp.ne.s16.totalorder %v1067_v10, 0  ;;  %v9798_v61 = vmov 0  ;;  %v2205_v3 = vrot.slane %v2203_v42, 7 }
  0x68   : > { %v9799_v61 = vsel %vm8127_vm11, 4294967295, %v9798_v61  ;;  %v3883_v63 = vsel %vm9567_vm4, %v3850_v38, 0  ;;  %v4003_v44 = vor.u32 %v4002_v2, %v3998_v15  ;;  %v1236_v45 = vsel %vm8127_vm11, %v8039_v0, 0 }
  0x69   : > { %9800 = vst [vmem:[#allocation30_spill] sm:$0xff] %v9799_v61  ;;  %vm658_vm2 = vcmp.gt.s32.totalorder %v410_v1, 0  ;;  %v1070_v35 = vrot.slane %v1068_v43, 4  ;;  %v4011_v24 = vor.u32 %v4009_v11, %v4007_v47  ;;  %v2208_v34 = vor.u32 %v2206_v18, %v2205_v3  ;;  %v3852_v11 = vld [vmem:[%s7492_s29 + $0x28] sm:$0xf] }
  0x6a   : > { %vm819_vm5 = vmpackc.low %vm658_vm2, %vm658_vm2  ;;  %v6166_v13 = vcombine.low %v721_v49, %v8125_v21  ;;  %v227_v10 = vadd.s32 56, %v7473_v6  ;;  %vm9801_vm0 = vsmask.f32 7424  ;;  %v2210_v15 = vrot.slane %v2205_v3, 4 }
  0x6b   : > { %v4008_v42 = vsel %vm9801_vm0, %v4003_v44, %v4007_v47  ;;  %v851_v38 = vsel %vm819_vm5, 65537, %v9755_v23  ;;  %v1071_v2 = vor.u32 %v1070_v35, %v1066_v32  ;;  %vm9802_vm4 = vcmask 31744  }
  0x6c   : > { %6943 = vmatprep.mubr.msk.bf16.mxu0 %vm9802_vm4, %v4008_v42  ;;  %v2209_v0 = vsel %vm8053_vm6, %v8036_v33, %v2208_v34  ;;  %v1084_v1 = vshll.u32 %v851_v38, 16  ;;  %v1088_v18 = vshrl.u32 %v851_v38, 16  ;;  %vm9803_vm2 = vmmov %vm9802_vm4  ;;  %v305_v43 = vand.u32 15, %v227_v10 }
  0x6d   : > { %6793 = vmatprep.mubr.msk.bf16.mxu1 %vm9803_vm2, %v6166_v13  ;;  %vm8147_vm0 = vcmp.ne.s16.totalorder %v2209_v0, 0  ;;  %v9804_v47 = vmov 0  ;;  %v1072_v32 = vrot.slane %v1071_v2, 4  ;;  %v8154_v3 = vsel %vm8053_vm6, %v2210_v15, %v7651_v52  ;;  %v723_v2 = vld [vmem:[%s7492_s29 + $0x60] sm:$0xf] }
  0x6e   : > { %v9805_v47 = vsel %vm8147_vm0, 4294967295, %v9804_v47  ;;  %9807 = vst [vmem:[#allocation32_spill] sm:$0xff] %v8154_v3  ;;  %v244_v34 = vadd.s32 192, %v7473_v6  ;;  %v3884_v44 = vsel %vm8147_vm0, %v3851_v27, 0  ;;  %v1086_v35 = vrot.slane %v1084_v1, 5 }
  0x6f   : > { %9806 = vst [vmem:[#allocation31_spill] sm:$0xff] %v9805_v47  ;;  %vm675_vm5 = vcmp.lt.s32.totalorder %v305_v43, 15  ;;  %vm9580_vm4 = vcmp.ne.s16.totalorder %v8154_v3, 0  ;;  %v6325_v13 = vcombine.low %v3883_v63, %v3884_v44  ;;  %v1077_v10 = vsel %vm7528_vm10, %v1072_v32, %v7496_v16  ;;  %v8167_v15 = vld [vmem:[%s7492_s29 + $0x64] sm:$0xf] }
  0x70   : > { %vm2098_vm2 = vmpackc.low %vm675_vm5, %vm675_vm5  ;;  %v3885_v42 = vsel %vm9580_vm4, %v3852_v11, 0  ;;  %v424_v38 = vand.u32 15, %v244_v34  ;;  %v1087_v27 = vsel %vm7528_vm10, %v7517_v31, %v1086_v35  ;;  %vm8172_vm11 = vcmp.ne.s16.totalorder %v1077_v10, 0  ;;  %v8178_v43 = vld [vmem:[%s7492_s29 + $0x68] sm:$0xf] }
  0x71   : > { %v9808_v0 = vmov 0  ;;  %v2130_v63 = vsel %vm2098_vm2, 65537, %v9755_v23  ;;  %v1090_v1 = vrot.slane %v1088_v18, 4  ;;  %v4013_v32 = vshll.u32 %v6325_v13, 16  ;;  %v8187_v3 = vld [vmem:[%s7492_s29 + $0x6c] sm:$0xf] }
  0x72   : > { %v9809_v0 = vsel %vm8172_vm11, 4294967295, %v9808_v0  ;;  %vm8180_vm5 = vcmp.ne.s16.totalorder %v1087_v27, 0  ;;  %v9811_v11 = vmov 0  ;;  %v1237_v34 = vsel %vm8172_vm11, %v721_v49, 0 }
  0x73   : > { %9810 = vst [vmem:[#allocation33_spill] sm:$0xff] %v9809_v0  ;;  %v9812_v11 = vsel %vm8180_vm5, 4294967295, %v9811_v11  ;;  %v2221_v44 = vshrl.u32 %v2130_v63, 16  ;;  %v1238_v10 = vsel %vm8180_vm5, %v8125_v21, 0  ;;  %v8192_v61 = vcombine.low %v1236_v45, %v1237_v34 }
  0x74   : > { %9813 = vst [vmem:[#allocation34_spill] sm:$0xff] %v9812_v11  ;;  %v2224_v18 = vshll.u32 %v2130_v63, 16  ;;  %v4017_v47 = vshrl.u32 %v6325_v13, 16  ;;  %v4015_v12 = vrot.slane %v4013_v32, 1  ;;  %vm660_vm2 = vcmp.gt.s32.totalorder %v424_v38, 0 }
  0x75   : > { %v2223_v27 = vrot.slane %v2221_v44, 7  ;;  %v1091_v14 = vor.u32 %v1090_v1, %v1086_v35  ;;  %vm821_vm4 = vmpackc.low %vm660_vm2, %vm660_vm2  ;;  %v6167_v0 = vcombine.low %v723_v2, %v8167_v15  ;;  %v229_v49 = vadd.s32 72, %v7473_v6  ;;  %v8204_v35 = vld [vmem:[%s9530_s1 + $0xe] sm:$0x3] }
  0x76   : > { %v246_v62 = vadd.s32 208, %v7473_v6  ;;  %v6168_v11 = vcombine.low %v8178_v43, %v8187_v3  ;;  %vm9814_vm5 = vsmask.f32 7424  ;;  %v4019_v63 = vor.u32 %v4017_v47, %v4015_v12  ;;  %v3853_v38 = vld [vmem:[%s7492_s29 + $0x2c] sm:$0xf] }
  0x77   : > { %v4016_v21 = vsel %vm9814_vm5, %v4011_v24, %v4015_v12  ;;  %v2226_v45 = vor.u32 %v2224_v18, %v2223_v27  ;;  %v853_v13 = vsel %vm821_vm4, 65537, %v9755_v23  ;;  %vm9815_vm2 = vcmask 31744  }
  0x78   : > { %6944 = vmatmul.mubr.msk.bf16.vlgmr.msra.gmra.mrb[0].mxu0 %vm9815_vm2, %v4016_v21  ;;  %v1092_v1 = vrot.slane %v1091_v14, 4  ;;  %v1104_v32 = vshll.u32 %v853_v13, 16  ;;  %v1108_v34 = vshrl.u32 %v853_v13, 16  ;;  %vm9816_vm11 = vmmov %vm9815_vm2  ;;  %v319_v44 = vand.u32 15, %v229_v49 }
  0x79   : > { %6794 = vmatmul.mubr.msk.bf16.gmra.mrb[20].mxu1 %vm9816_vm11, %v6167_v0  ;;  %6976 = vmatpush3.bf16.msra.mxu0 %v8059_v57  ;;  %v2227_v24 = vsel %vm8053_vm6, %v8036_v33, %v2226_v45  ;;  %v2228_v12 = vrot.slane %v2223_v27, 4  ;;  %v438_v47 = vand.u32 15, %v246_v62  ;;  %vm9817_vm4 = vmmov %vm9815_vm2  ;;  %v231_v18 = vadd.s32 88, %v7473_v6 }
  0x7a   : > { %6797 = vmatprep.mubr.msk.bf16.mxu1 %vm9817_vm4, %v6168_v11  ;;  %vm8215_vm5 = vcmp.ne.s16.totalorder %v2227_v24, 0  ;;  %v9818_v14 = vmov 0  ;;  %v1097_v0 = vsel %vm7528_vm10, %v1092_v1, %v7496_v16  ;;  %v1106_v57 = vrot.slane %v1104_v32, 5  ;;  %v3854_v1 = vld [vmem:[%s7492_s29 + $0x30] sm:$0xf] }
  0x7b   : > { %v9819_v14 = vsel %vm8215_vm5, 4294967295, %v9818_v14  ;;  %vm677_vm11 = vcmp.lt.s32.totalorder %v319_v44, 15  ;;  %vm9821_vm2 = vcmask 1041408   ;;  %v3886_v62 = vsel %vm8215_vm5, %v3853_v38, 0 }
  0x7c   : > { %9820 = vst [vmem:[#allocation35_spill] sm:$0xff] %v9819_v14  ;;  %7343 = vmatprep.subr.msk.bf16.mxu0 %vm9821_vm2, %v8204_v35  ;;  %vm8226_vm4 = vcmp.ne.s16.totalorder %v1097_v0, 0  ;;  %v9822_v11 = vmov 0  ;;  %vm2100_vm0 = vmpackc.low %vm677_vm11, %vm677_vm11  ;;  %v8233_v27 = vsel %vm8053_vm6, %v2228_v12, %v7651_v52  ;;  %vm8235_vm9 = vcmp.gt.s32.totalorder %v438_v47, 0 }
  0x7d   : > { %v9823_v11 = vsel %vm8226_vm4, 4294967295, %v9822_v11  ;;  %9825 = vst [vmem:[#allocation37_spill] sm:$0xff] %v8233_v27  ;;  %v6326_v21 = vcombine.low %v3885_v42, %v3886_v62  ;;  %v1107_v45 = vsel %vm7528_vm10, %v7517_v31, %v1106_v57  ;;  %v1239_v13 = vsel %vm8226_vm4, %v723_v2, 0  ;;  %vm823_vm11 = vmpackc.low %vm8235_vm9, %vm8235_vm9 }
  0x7e   : > { %9824 = vst [vmem:[#allocation36_spill] sm:$0xff] %v9823_v11  ;;  %v2132_v38 = vsel %vm2100_vm0, 65537, %v9755_v23  ;;  %vm8249_vm2 = vcmp.ne.s16.totalorder %v1107_v45, 0  ;;  %v9828_v32 = vmov 0  ;;  %v8253_v44 = vcombine.low %v1238_v10, %v1239_v13 }
  0x7f   : > { %v9829_v32 = vsel %vm8249_vm2, 4294967295, %v9828_v32  ;;  %v2239_v42 = vshrl.u32 %v2132_v38, 16  ;;  %v2242_v24 = vshll.u32 %v2132_v38, 16  ;;  %v4021_v12 = vshll.u32 %v6326_v21, 16 }
  0x80   : > { %9830 = vst [vmem:[#allocation38_spill] sm:$0xff] %v9829_v32  ;;  %v1240_v2 = vsel %vm8249_vm2, %v8167_v15, 0  ;;  %vm9607_vm0 = vcmp.ne.s16.totalorder %v8233_v27, 0  ;;  %v4025_v47 = vshrl.u32 %v6326_v21, 16  ;;  %v855_v49 = vsel %vm823_vm11, 65537, %v9755_v23 }
  0x81   : > { %v2241_v0 = vrot.slane %v2239_v42, 7  ;;  %v3887_v62 = vsel %vm9607_vm0, %v3854_v1, 0  ;;  %v1110_v45 = vrot.slane %v1108_v34, 4  ;;  %v4023_v10 = vrot.slane %v4021_v12, 1  ;;  %v3855_v21 = vld [vmem:[%s7492_s29 + $0x34] sm:$0xf] }
  0x82   : > { %v1124_v13 = vshll.u32 %v855_v49, 16  ;;  %v1128_v11 = vshrl.u32 %v855_v49, 16  ;;  %v333_v38 = vand.u32 15, %v231_v18  ;;  %v248_v15 = vadd.s32 224, %v7473_v6 }
  0x83   : > { %v2244_v14 = vor.u32 %v2242_v24, %v2241_v0  ;;  %v1111_v46 = vor.u32 %v1110_v45, %v1106_v57  ;;  %v2246_v4 = vrot.slane %v2241_v0, 4  ;;  %vm9831_vm9 = vsmask.f32 7424  ;;  %v727_v0 = vld [vmem:[%s7492_s29 + $0x70] sm:$0xf] }
  0x84   : > { %v4024_v32 = vsel %vm9831_vm9, %v4019_v63, %v4023_v10  ;;  %v4027_v42 = vor.u32 %v4025_v47, %v4023_v10  ;;  %v1126_v58 = vrot.slane %v1124_v13, 5  ;;  %vm679_vm2 = vcmp.lt.s32.totalorder %v333_v38, 15  ;;  %v8302_v38 = vld [vmem:[%s7492_s29 + $0x74] sm:$0xf] }
  0x85   : > { %vm9832_vm0 = vcmask 31744   ;;  %v2245_v34 = vsel %vm8053_vm6, %v8036_v33, %v2244_v14  ;;  %v1112_v18 = vrot.slane %v1111_v46, 4  ;;  %vm2102_vm11 = vmpackc.low %vm679_vm2, %vm679_vm2  ;;  %v8272_v57 = vsel %vm8053_vm6, %v2246_v4, %v7651_v52  ;;  %v3856_v46 = vld [vmem:[%s7492_s29 + $0x38] sm:$0xf] }
  0x86   : > { %6947 = vmatprep.mubr.msk.bf16.mxu0 %vm9832_vm0, %v4024_v32  ;;  %9833 = vst [vmem:[#allocation39_spill] sm:$0xff] %v8272_v57  ;;  %v452_v63 = vand.u32 15, %v248_v15  ;;  %vm8274_vm9 = vcmp.ne.s16.totalorder %v2245_v34, 0  ;;  %v9834_v1 = vmov 0  ;;  %v1127_v32 = vsel %vm7528_vm10, %v7517_v31, %v1126_v58 }
  0x87   : > { %v9835_v1 = vsel %vm8274_vm9, 4294967295, %v9834_v1  ;;  %v2134_v24 = vsel %vm2102_vm11, 65537, %v9755_v23  ;;  %vm9618_vm0 = vcmp.ne.s16.totalorder %v8272_v57, 0  ;;  %v3888_v14 = vsel %vm8274_vm9, %v3855_v21, 0 }
  0x88   : > { %9836 = vst [vmem:[#allocation40_spill] sm:$0xff] %v9835_v1  ;;  %v1117_v4 = vsel %vm7528_vm10, %v1112_v18, %v7496_v16  ;;  %vm8289_vm2 = vcmp.ne.s16.totalorder %v1127_v32, 0  ;;  %v9837_v12 = vmov 0  ;;  %v2257_v47 = vshrl.u32 %v2134_v24, 16 }
  0x89   : > { %v9838_v12 = vsel %vm8289_vm2, 4294967295, %v9837_v12  ;;  %v6327_v49 = vcombine.low %v3887_v62, %v3888_v14  ;;  %vm8294_vm4 = vcmp.ne.s16.totalorder %v1117_v4, 0  ;;  %v9840_v45 = vmov 0 }
  0x8a   : > { %9839 = vst [vmem:[#allocation41_spill] sm:$0xff] %v9838_v12  ;;  %v9841_v45 = vsel %vm8294_vm4, 4294967295, %v9840_v45  ;;  %v1242_v10 = vsel %vm8289_vm2, %v8187_v3, 0  ;;  %v2260_v13 = vshll.u32 %v2134_v24, 16  ;;  %v1241_v15 = vsel %vm8294_vm4, %v8178_v43, 0 }
  0x8b   : > { %9842 = vst [vmem:[#allocation42_spill] sm:$0xff] %v9841_v45  ;;  %v2259_v21 = vrot.slane %v2257_v47, 7  ;;  %v3889_v62 = vsel %vm9618_vm0, %v3856_v46, 0  ;;  %vm664_vm11 = vcmp.gt.s32.totalorder %v452_v63, 0  ;;  %v4029_v34 = vshll.u32 %v6327_v49, 16 }
  0x8c   : > { %v8309_v18 = vcombine.low %v1240_v2, %v1241_v15  ;;  %v4033_v32 = vshrl.u32 %v6327_v49, 16  ;;  %vm825_vm9 = vmpackc.low %vm664_vm11, %vm664_vm11  ;;  %v1130_v14 = vrot.slane %v1128_v11, 4  ;;  %v6169_v4 = vcombine.low %v727_v0, %v8302_v38  ;;  %v3857_v47 = vld [vmem:[%s7492_s29 + $0x3c] sm:$0xf] }
  0x8d   : > { %v2262_v3 = vor.u32 %v2260_v13, %v2259_v21  ;;  %v857_v24 = vsel %vm825_vm9, 65537, %v9755_v23  ;;  %v233_v12 = vadd.s32 104, %v7473_v6  ;;  %v4031_v43 = vrot.slane %v4029_v34, 1 }
  0x8e   : > { %v1131_v45 = vor.u32 %v1130_v14, %v1126_v58  ;;  %v1144_v57 = vshll.u32 %v857_v24, 16  ;;  %v1148_v46 = vshrl.u32 %v857_v24, 16  ;;  %vm9843_vm0 = vcmask 31744   ;;  %v3858_v14 = vld [vmem:[%s7492_s29 + $0x40] sm:$0xf] }
  0x8f   : > { %v2263_v2 = vsel %vm8053_vm6, %v8036_v33, %v2262_v3  ;;  %6798 = vmatmul.mubr.msk.bf16.gmra.mrb[24].mxu1 %vm9843_vm0, %v6169_v4  ;;  %v347_v11 = vand.u32 15, %v233_v12  ;;  %v2264_v63 = vrot.slane %v2259_v21, 4  ;;  %v250_v49 = vadd.s32 240, %v7473_v6  ;;  %vm9848_vm2 = vmmov %vm9843_vm0  ;;  %v8339_v24 = vld [vmem:[%s7492_s29 + $0x78] sm:$0xf] }
  0x90   : > { %vm9844_vm9 = vsmask.f32 7424  ;;  %vm8321_vm11 = vcmp.ne.s16.totalorder %v2263_v2, 0  ;;  %v9845_v15 = vmov 0  ;;  %v4035_v58 = vor.u32 %v4033_v32, %v4031_v43  ;;  %v8342_v4 = vld [vmem:[%s7492_s29 + $0x7c] sm:$0xf] }
  0x91   : > { %v4032_v13 = vsel %vm9844_vm9, %v4027_v42, %v4031_v43  ;;  %v9846_v15 = vsel %vm8321_vm11, 4294967295, %v9845_v15  ;;  %v1132_v34 = vrot.slane %v1131_v45, 4  ;;  %v3890_v12 = vsel %vm8321_vm11, %v3857_v47, 0  ;;  %v8355_v2 = vld [vmem:[%s7492_s29 + $0x80] sm:$0xf] }
  0x92   : > { %9847 = vst [vmem:[#allocation43_spill] sm:$0xff] %v9846_v15  ;;  %6948 = vmatmul.mubr.msk.bf16.gmra.mrb[4].mxu0 %vm9848_vm2, %v4032_v13  ;;  %v1146_v21 = vrot.slane %v1144_v57, 5  ;;  %vm681_vm0 = vcmp.lt.s32.totalorder %v347_v11, 15  ;;  %v8332_v42 = vsel %vm8053_vm6, %v2264_v63, %v7651_v52  ;;  %v6328_v3 = vcombine.low %v3889_v62, %v3890_v12 }
  0x93   : > { %9849 = vst [vmem:[#allocation44_spill] sm:$0xff] %v8332_v42  ;;  %v1137_v45 = vsel %vm7528_vm10, %v1132_v34, %v7496_v16  ;;  %vm2104_vm9 = vmpackc.low %vm681_vm0, %vm681_vm0  ;;  %vm9629_vm2 = vcmp.ne.s16.totalorder %v8332_v42, 0  ;;  %v466_v32 = vand.u32 15, %v250_v49  ;;  %v9850_v43 = vmov 0  ;;  %v732_v34 = vld [vmem:[%s7492_s29 + $0x84] sm:$0xf] }
  0x94   : > { %v1147_v57 = vsel %vm7528_vm10, %v7517_v31, %v1146_v21  ;;  %vm8347_vm11 = vcmp.ne.s16.totalorder %v1137_v45, 0  ;;  %v2136_v62 = vsel %vm2104_vm9, 65537, %v9755_v23  ;;  %v3891_v47 = vsel %vm9629_vm2, %v3858_v14, 0 }
  0x95   : > { %v9851_v43 = vsel %vm8347_vm11, 4294967295, %v9850_v43  ;;  %v4037_v11 = vshll.u32 %v6328_v3, 16  ;;  %vm8357_vm0 = vcmp.ne.s16.totalorder %v1147_v57, 0  ;;  %v9853_v63 = vmov 0 }
  0x96   : > { %9852 = vst [vmem:[#allocation45_spill] sm:$0xff] %v9851_v43  ;;  %v9854_v63 = vsel %vm8357_vm0, 4294967295, %v9853_v63  ;;  %v1243_v49 = vsel %vm8347_vm11, %v727_v0, 0  ;;  %v2275_v13 = vshrl.u32 %v2136_v62, 16  ;;  %v1244_v12 = vsel %vm8357_vm0, %v8302_v38, 0 }
  0x97   : > { %9855 = vst [vmem:[#allocation46_spill] sm:$0xff] %v9854_v63  ;;  %v8367_v45 = vcombine.low %v1242_v10, %v1243_v49  ;;  %v2278_v42 = vshll.u32 %v2136_v62, 16  ;;  %v4041_v14 = vshrl.u32 %v6328_v3, 16  ;;  %v4039_v15 = vrot.slane %v4037_v11, 1 }
  0x98   : > { %v2277_v1 = vrot.slane %v2275_v13, 7  ;;  %vm666_vm9 = vcmp.gt.s32.totalorder %v466_v32, 0  ;;  %v1150_v57 = vrot.slane %v1148_v46, 4  ;;  %v6170_v43 = vcombine.low %v8339_v24, %v8342_v4  ;;  %v3859_v32 = vld [vmem:[%s7492_s29 + $0x44] sm:$0xf] }
  0x99   : > { %vm827_vm2 = vmpackc.low %vm666_vm9, %vm666_vm9  ;;  %v235_v0 = vadd.s32 120, %v7473_v6  ;;  %vm9643_vm11 = vcmp.ne.s16.totalorder %v7517_v31, 0  ;;  %v6171_v63 = vcombine.low %v8355_v2, %v732_v34  ;;  %vm9856_vm0 = vsmask.f32 7424 }
  0x9a   : > { %v4040_v10 = vsel %vm9856_vm0, %v4035_v58, %v4039_v15  ;;  %v2280_v38 = vor.u32 %v2278_v42, %v2277_v1  ;;  %v4043_v62 = vor.u32 %v4041_v14, %v4039_v15  ;;  %v859_v3 = vsel %vm827_vm2, 65537, %v9755_v23 }
  0x9b   : > { %vm9857_vm4 = vcmask 31744   ;;  %v1151_v46 = vor.u32 %v1150_v57, %v1146_v21  ;;  %v1164_v11 = vshll.u32 %v859_v3, 16  ;;  %v1168_v49 = vshrl.u32 %v859_v3, 16 }
  0x9c   : > { %6951 = vmatprep.mubr.msk.bf16.mxu0 %vm9857_vm4, %v4040_v10  ;;  %vm9858_vm9 = vmmov %vm9857_vm4  ;;  %v361_v13 = vand.u32 15, %v235_v0  ;;  %v2281_v27 = vsel %vm8053_vm6, %v8036_v33, %v2280_v38  ;;  %v2282_v29 = vrot.slane %v2277_v1, 4  ;;  %v1248_v58 = vsel %vm9643_vm11, %v732_v34, 0  ;;  %v3860_v38 = vld [vmem:[%s7492_s29 + $0x48] sm:$0xf] }
  0x9d   : > { %6801 = vmatprep.mubr.msk.bf16.mxu1 %vm9858_vm9, %v6170_v43  ;;  %vm9859_vm0 = vmmov %vm9857_vm4  ;;  %v237_v15 = vadd.s32 136, %v7473_v6  ;;  %vm8386_vm4 = vcmp.ne.s16.totalorder %v2281_v27, 0  ;;  %v9860_v21 = vmov 0  ;;  %v1152_v42 = vrot.slane %v1151_v46, 4 }
  0x9e   : > { %6802 = vmatmul.mubr.msk.bf16.gmra.mrb[28].mxu1 %vm9859_vm0, %v6171_v63  ;;  %v9861_v21 = vsel %vm8386_vm4, 4294967295, %v9860_v21  ;;  %v1166_v43 = vrot.slane %v1164_v11, 5  ;;  %vm683_vm2 = vcmp.lt.s32.totalorder %v361_v13, 15  ;;  %v3892_v14 = vsel %vm8386_vm4, %v3859_v32, 0 }
  0x9f   : > { %9862 = vst [vmem:[#allocation47_spill] sm:$0xff] %v9861_v21  ;;  %vm2106_vm9 = vmpackc.low %vm683_vm2, %vm683_vm2  ;;  %v8395_v1 = vsel %vm8053_vm6, %v2282_v29, %v7651_v52  ;;  %v1170_v34 = vrot.slane %v1168_v49, 4  ;;  %v8397_v63 = vcombine.low %v1248_v58, %v1248_v58  ;;  %v6329_v57 = vcombine.low %v3891_v47, %v3892_v14 }
  0xa0   : > { %9863 = vst [vmem:[#allocation48_spill] sm:$0xff] %v8395_v1  ;;  %v1157_v27 = vsel %vm7528_vm10, %v1152_v42, %v7496_v16  ;;  %v1167_v0 = vsel %vm7528_vm10, %v7517_v31, %v1166_v43  ;;  %v2138_v10 = vsel %vm2106_vm9, 65537, %v9755_v23  ;;  %v9864_v3 = vmov 0 }
  0xa1   : > { %vm8407_vm0 = vcmp.ne.s16.totalorder %v1157_v27, 0  ;;  %vm8411_vm2 = vcmp.ne.s16.totalorder %v1167_v0, 0  ;;  %v9867_v29 = vmov 0  ;;  %v2293_v47 = vshrl.u32 %v2138_v10, 16 }
  0xa2   : > { %v9865_v3 = vsel %vm8407_vm0, 4294967295, %v9864_v3  ;;  %v9868_v29 = vsel %vm8411_vm2, 4294967295, %v9867_v29  ;;  %v2296_v32 = vshll.u32 %v2138_v10, 16  ;;  %v4045_v46 = vshll.u32 %v6329_v57, 16 }
  0xa3   : > { %9866 = vst [vmem:[#allocation49_spill] sm:$0xff] %v9865_v3  ;;  %9869 = vst [vmem:[#allocation50_spill] sm:$0xff] %v9868_v29  ;;  %v1245_v11 = vsel %vm8407_vm0, %v8339_v24, 0  ;;  %v1246_v49 = vsel %vm8411_vm2, %v8342_v4, 0  ;;  %vm9652_vm9 = vcmp.ne.s16.totalorder %v8395_v1, 0  ;;  %v2295_v58 = vrot.slane %v2293_v47, 7 }
  0xa4   : > { %v8422_v13 = vcombine.low %v1244_v12, %v1245_v11  ;;  %v3893_v42 = vsel %vm9652_vm9, %v3860_v38, 0  ;;  %v4049_v14 = vshrl.u32 %v6329_v57, 16  ;;  %v4047_v27 = vrot.slane %v4045_v46, 1  ;;  %v3861_v47 = vld [vmem:[%s7492_s29 + $0x4c] sm:$0xf] }
  0xa5   : > { %v1171_v0 = vor.u32 %v1170_v34, %v1166_v43  ;;  %v375_v10 = vand.u32 15, %v237_v15  ;;  %v2298_v24 = vor.u32 %v2296_v32, %v2295_v58  ;;  %v2300_v31 = vrot.slane %v2295_v58, 4 }
  0xa6   : > { %v1637_v29 = vor.u32 %v7655_v54, %v7653_v53  ;;  %v1645_v4 = vor.u32 %v7669_v8, %v7657_v55  ;;  %vm9870_vm2 = vsmask.f32 7424  ;;  %v4051_v11 = vor.u32 %v4049_v14, %v4047_v27  ;;  %v3862_v54 = vld [vmem:[%s7492_s29 + $0x50] sm:$0xf] }
  0xa7   : > { %v4048_v12 = vsel %vm9870_vm2, %v4043_v62, %v4047_v27  ;;  %v1172_v1 = vrot.slane %v1171_v0, 4  ;;  %vm685_vm9 = vcmp.lt.s32.totalorder %v375_v10, 15  ;;  %vm9871_vm0 = vcmask 31744  }
  0xa8   : > { %6952 = vmatmul.mubr.msk.bf16.gmra.mrb[8].mxu0 %vm9871_vm0, %v4048_v12  ;;  %v2299_v15 = vsel %vm8053_vm6, %v8036_v33, %v2298_v24  ;;  %vm2108_vm11 = vmpackc.low %vm685_vm9, %vm685_vm9  ;;  %v8439_v53 = vsel %vm8053_vm6, %v2300_v31, %v7651_v52  ;;  %vm9872_vm4 = vsmask.f32 4352  ;;  %v239_v8 = vadd.s32 152, %v7473_v6  ;;  %v3863_v24 = vld [vmem:[%s7492_s29 + $0x54] sm:$0xf] }
  0xa9   : > { %v1646_v55 = vsel %vm9872_vm4, %v1637_v29, %v1645_v4  ;;  %vm8444_vm2 = vcmp.ne.s16.totalorder %v2299_v15, 0  ;;  %v9873_v62 = vmov 0  ;;  %v1177_v43 = vsel %vm7528_vm10, %v1172_v1, %v7496_v16  ;;  %v3864_v15 = vld [vmem:[%s7492_s29 + $0x58] sm:$0xf] }
  0xaa   : > { %v9874_v62 = vsel %vm8444_vm2, 4294967295, %v9873_v62  ;;  %v2140_v34 = vsel %vm2108_vm11, 65537, %v9755_v23  ;;  %vm9657_vm0 = vcmp.ne.s16.totalorder %v8439_v53, 0  ;;  %vm9876_vm9 = vcmask 31744  }
  0xab   : > { %9875 = vst [vmem:[#allocation51_spill] sm:$0xff] %v9874_v62  ;;  %6807 = vmatprep.mubr.msk.bf16.mxu1 %vm9876_vm9, %v1646_v55  ;;  %v3894_v31 = vsel %vm8444_vm2, %v3861_v47, 0  ;;  %vm8456_vm4 = vcmp.ne.s16.totalorder %v1177_v43, 0  ;;  %v9877_v57 = vmov 0  ;;  %v2311_v38 = vshrl.u32 %v2140_v34, 16 }
  0xac   : > { %v9878_v57 = vsel %vm8456_vm4, 4294967295, %v9877_v57  ;;  %v2314_v29 = vshll.u32 %v2140_v34, 16  ;;  %v6330_v32 = vcombine.low %v3893_v42, %v3894_v31  ;;  %v1247_v16 = vsel %vm8456_vm4, %v8355_v2, 0 }
  0xad   : > { %9879 = vst [vmem:[#allocation52_spill] sm:$0xff] %v9878_v57  ;;  %v3895_v36 = vsel %vm9657_vm0, %v3862_v54, 0  ;;  %v389_v1 = vand.u32 15, %v239_v8  ;;  %v8465_v46 = vcombine.low %v1246_v49, %v1247_v16  ;;  %v2313_v58 = vrot.slane %v2311_v38, 7 }
  0xae   : > { %v1654_v14 = vor.u32 %v7980_v39, %v7788_v37  ;;  %vm9880_vm10 = vcmask 1041408   ;;  %v4053_v0 = vshll.u32 %v6330_v32, 16  ;;  %v4057_v42 = vshrl.u32 %v6330_v32, 16  ;;  %v8478_v37 = vld [vmem:[%s9530_s1 + $0x6] sm:$0x3] }
  0xaf   : > { %v2778_v27 = vsel %vm9880_vm10, %v7932_v59, 0  ;;  %vm687_vm11 = vcmp.lt.s32.totalorder %v389_v1, 15  ;;  %v241_v10 = vadd.s32 168, %v7473_v6  ;;  %v2316_v2 = vor.u32 %v2314_v29, %v2313_v58 }
  0xb0   : > { %vm2110_vm9 = vmpackc.low %vm687_vm11, %vm687_vm11  ;;  %v2318_v12 = vrot.slane %v2313_v58, 4  ;;  %vm9881_vm0 = vsmask.f32 4352  ;;  %v1657_v47 = vshrl.u32 %v7800_v60, 16  ;;  %v4055_v39 = vrot.slane %v4053_v0, 1 }
  0xb1   : > { %v1655_v49 = vsel %vm9881_vm0, %v1645_v4, %v1654_v14  ;;  %v2142_v59 = vsel %vm2110_vm9, 65537, %v9755_v23  ;;  %vm9882_vm10 = vcmask 31744   ;;  %v403_v54 = vand.u32 15, %v241_v10 }
  0xb2   : > { %6808 = vmatmul.mubr.msk.bf16.vlgmr.msra.gmra.mrb[0].mxu1 %vm9882_vm10, %v1655_v49  ;;  %v1660_v55 = vshll.u32 %v7800_v60, 16  ;;  %v2317_v4 = vsel %vm8053_vm6, %v8036_v33, %v2316_v2  ;;  %v8490_v8 = vsel %vm8053_vm6, %v2318_v12, %v7651_v52  ;;  %v2329_v43 = vshrl.u32 %v2142_v59, 16 }
  0xb3   : > { %9883 = vst [vmem:[#allocation53_spill] sm:$0xff] %v8490_v8  ;;  %v2332_v34 = vshll.u32 %v2142_v59, 16  ;;  %6840 = vmatpush3.bf16.msra.mxu1 %v2778_v27  ;;  %vm9884_vm0 = vsmask.f32 7424  ;;  %vm8493_vm11 = vcmp.ne.s16.totalorder %v2317_v4, 0  ;;  %v9885_v38 = vmov 0 }
  0xb4   : > { %v4056_v31 = vsel %vm9884_vm0, %v4051_v11, %v4055_v39  ;;  %v9886_v38 = vsel %vm8493_vm11, 4294967295, %v9885_v38  ;;  %v4059_v60 = vor.u32 %v4057_v42, %v4055_v39  ;;  %vm9662_vm9 = vcmp.ne.s16.totalorder %v8490_v8, 0  ;;  %v3865_v42 = vld [vmem:[%s7492_s29 + $0x5c] sm:$0xf] }
  0xb5   : > { %9887 = vst [vmem:[#allocation54_spill] sm:$0xff] %v9886_v38  ;;  %vm9888_vm10 = vcmask 1041408   ;;  %vm9889_vm4 = vcmask 31744   ;;  %v3896_v29 = vsel %vm8493_vm11, %v3863_v24, 0  ;;  %v2331_v32 = vrot.slane %v2329_v43, 7 }
  0xb6   : > { %7338 = vmatprep.subr.msk.bf16.mxu1 %vm9888_vm10, %v8478_v37  ;;  %6955 = vmatprep.mubr.msk.bf16.mxu0 %vm9889_vm4, %v4056_v31  ;;  %v3897_v11 = vsel %vm9662_vm9, %v3864_v15, 0  ;;  %vm689_vm0 = vcmp.lt.s32.totalorder %v403_v54, 15  ;;  %v6331_v16 = vcombine.low %v3895_v36, %v3896_v29  ;;  %v1659_v1 = vrot.slane %v1657_v47, 3  ;;  %v3866_v15 = vld [vmem:[%s7492_s29 + $0x60] sm:$0xf] }
  0xb7   : > { %vm2112_vm2 = vmpackc.low %vm689_vm0, %vm689_vm0  ;;  %v1662_v58 = vrot.slane %v1660_v55, 4  ;;  %v243_v27 = vadd.s32 184, %v7473_v6  ;;  %v2334_v0 = vor.u32 %v2332_v34, %v2331_v32  ;;  %v2336_v2 = vrot.slane %v2331_v32, 4 }
  0xb8   : > { %v2144_v10 = vsel %vm2112_vm2, 65537, %v9755_v23  ;;  %v1666_v12 = vshrl.u32 %v7851_v9, 16  ;;  %v4061_v24 = vshll.u32 %v6331_v16, 16  ;;  %v4065_v49 = vshrl.u32 %v6331_v16, 16 }
  0xb9   : > { %v2347_v39 = vshrl.u32 %v2144_v10, 16  ;;  %v2350_v59 = vshll.u32 %v2144_v10, 16  ;;  %v2335_v36 = vsel %vm8053_vm6, %v8036_v33, %v2334_v0  ;;  %v8516_v47 = vsel %vm8053_vm6, %v2336_v2, %v7651_v52  ;;  %v3867_v0 = vld [vmem:[%s7492_s29 + $0x64] sm:$0xf] }
  0xba   : > { %v1663_v54 = vor.u32 %v1662_v58, %v1659_v1  ;;  %v417_v55 = vand.u32 15, %v243_v27  ;;  %v4063_v4 = vrot.slane %v4061_v24, 1  ;;  %vm8518_vm2 = vcmp.ne.s16.totalorder %v2335_v36, 0 }
  0xbb   : > { %v2349_v34 = vrot.slane %v2347_v39, 7  ;;  %vm9670_vm4 = vcmp.ne.s16.totalorder %v8516_v47, 0  ;;  %v3898_v31 = vsel %vm8518_vm2, %v3865_v42, 0  ;;  %vm9892_vm10 = vsmask.f32 4352 }
  0xbc   : > { %v3899_v29 = vsel %vm9670_vm4, %v3866_v15, 0  ;;  %v1664_v32 = vsel %vm9892_vm10, %v1654_v14, %v1663_v54  ;;  %vm691_vm0 = vcmp.lt.s32.totalorder %v417_v55, 15  ;;  %vm9893_vm9 = vsmask.f32 7424  ;;  %v3868_v39 = vld [vmem:[%s7492_s29 + $0x68] sm:$0xf] }
  0xbd   : > { %v4064_v16 = vsel %vm9893_vm9, %v4059_v60, %v4063_v4  ;;  %v6332_v1 = vcombine.low %v3897_v11, %v3898_v31  ;;  %v4067_v58 = vor.u32 %v4065_v49, %v4063_v4  ;;  %v2352_v27 = vor.u32 %v2350_v59, %v2349_v34  ;;  %vm2114_vm5 = vmpackc.low %vm691_vm0, %vm691_vm0 }
  0xbe   : > { %vm9894_vm11 = vcmask 31744   ;;  %v2146_v42 = vsel %vm2114_vm5, 65537, %v9755_v23  ;;  %v2354_v10 = vrot.slane %v2349_v34, 4  ;;  %v1668_v2 = vrot.slane %v1666_v12, 3  ;;  %vm9898_vm5 = vmmov %vm9893_vm9 }
  0xbf   : > { %6811 = vmatprep.mubr.msk.bf16.mxu1 %vm9894_vm11, %v1664_v32  ;;  %vm9895_vm12 = vmmov %vm9894_vm11  ;;  %v1669_v24 = vshll.u32 %v7851_v9, 16  ;;  %v4069_v14 = vshll.u32 %v6332_v1, 16  ;;  %v2353_v60 = vsel %vm8053_vm6, %v8036_v33, %v2352_v27  ;;  %v4073_v11 = vshrl.u32 %v6332_v1, 16 }
  0xc0   : > { %6956 = vmatmul.mubr.msk.bf16.gmra.mrb[12].mxu0 %vm9895_vm12, %v4064_v16  ;;  %v2365_v49 = vshrl.u32 %v2146_v42, 16  ;;  %vm8538_vm11 = vcmp.ne.s16.totalorder %v2353_v60, 0  ;;  %v9896_v59 = vmov 0  ;;  %v8545_v15 = vsel %vm8053_vm6, %v2354_v10, %v7651_v52  ;;  %v3869_v10 = vld [vmem:[%s7492_s29 + $0x6c] sm:$0xf] }
  0xc1   : > { %v9897_v59 = vsel %vm8538_vm11, 4294967295, %v9896_v59  ;;  %v2368_v12 = vshll.u32 %v2146_v42, 16  ;;  %v1671_v9 = vrot.slane %v1669_v24, 4  ;;  %v4071_v36 = vrot.slane %v4069_v14, 1 }
  0xc2   : > { %v3900_v55 = vsel %vm8538_vm11, %v3867_v0, 0  ;;  %v2367_v4 = vrot.slane %v2365_v49, 7  ;;  %vm9669_vm12 = vcmp.ne.s16.totalorder %v8545_v15, 0  ;;  %v245_v16 = vadd.s32 200, %v7473_v6 }
  0xc3   : > { %v6333_v34 = vcombine.low %v3899_v29, %v3900_v55  ;;  %v3901_v31 = vsel %vm9669_vm12, %v3868_v39, 0  ;;  %v1672_v32 = vor.u32 %v1671_v9, %v1668_v2  ;;  %v4072_v1 = vsel %vm9898_vm5, %v4067_v58, %v4071_v36  ;;  %v3870_v29 = vld [vmem:[%s7492_s29 + $0x70] sm:$0xf] }
  0xc4   : > { %v4075_v27 = vor.u32 %v4073_v11, %v4071_v36  ;;  %v2370_v42 = vor.u32 %v2368_v12, %v2367_v4  ;;  %v2372_v24 = vrot.slane %v2367_v4, 4  ;;  %vm9899_vm9 = vcmask 31744  }
  0xc5   : > { %6959 = vmatprep.mubr.msk.bf16.mxu0 %vm9899_vm9, %v4072_v1  ;;  %v4077_v0 = vshll.u32 %v6333_v34, 16  ;;  %v4081_v14 = vshrl.u32 %v6333_v34, 16  ;;  %v1673_v60 = vsel %vm9892_vm10, %v1663_v54, %v1672_v32  ;;  %v431_v49 = vand.u32 15, %v245_v16  ;;  %vm9900_vm0 = vmmov %vm9899_vm9 }
  0xc6   : > { %v2371_v2 = vsel %vm8053_vm6, %v8036_v33, %v2370_v42  ;;  %6812 = vmatmul.mubr.msk.bf16.gmra.mrb[4].mxu1 %vm9900_vm0, %v1673_v60  ;;  %v8565_v58 = vsel %vm8053_vm6, %v2372_v24, %v7651_v52  ;;  %v1675_v11 = vshrl.u32 %v7907_v26, 16  ;;  %v1678_v39 = vshll.u32 %v7907_v26, 16 }
  0xc7   : > { %9901 = vst [vmem:[#allocation55_spill] sm:$0xff] %v8565_v58  ;;  %v4079_v12 = vrot.slane %v4077_v0, 1  ;;  %vm8569_vm5 = vcmp.ne.s16.totalorder %v2371_v2, 0  ;;  %v9902_v54 = vmov 0  ;;  %vm693_vm9 = vcmp.lt.s32.totalorder %v431_v49, 15 }
  0xc8   : > { %v9903_v54 = vsel %vm8569_vm5, 4294967295, %v9902_v54  ;;  %vm9673_vm10 = vcmp.ne.s16.totalorder %v8565_v58, 0  ;;  %v3902_v9 = vsel %vm8569_vm5, %v3869_v10, 0  ;;  %vm2116_vm0 = vmpackc.low %vm693_vm9, %vm693_vm9  ;;  %v1677_v55 = vrot.slane %v1675_v11, 3 }
  0xc9   : > { %v3903_v36 = vsel %vm9673_vm10, %v3870_v29, 0  ;;  %v1680_v4 = vrot.slane %v1678_v39, 4  ;;  %vm9904_vm12 = vsmask.f32 7424  ;;  %v6334_v26 = vcombine.low %v3901_v31, %v3902_v9 }
  0xca   : > { %v4080_v34 = vsel %vm9904_vm12, %v4075_v27, %v4079_v12  ;;  %v4083_v16 = vor.u32 %v4081_v14, %v4079_v12  ;;  %v2148_v1 = vsel %vm2116_vm0, 65537, %v9755_v23  ;;  %vm9905_vm4 = vcmask 31744  }
  0xcb   : > { %6960 = vmatmul.mubr.msk.bf16.gmra.mrb[16].mxu0 %vm9905_vm4, %v4080_v34  ;;  %v2383_v42 = vshrl.u32 %v2148_v1, 16  ;;  %v2386_v24 = vshll.u32 %v2148_v1, 16  ;;  %v1681_v0 = vor.u32 %v1680_v4, %v1677_v55  ;;  %v247_v60 = vadd.s32 216, %v7473_v6  ;;  %v3871_v1 = vld [vmem:[%s7492_s29 + $0x74] sm:$0xf]  ;;  %vm9908_vm10 = vmmov %vm9905_vm4 }
  0xcc   : > { %v4085_v10 = vshll.u32 %v6334_v26, 16  ;;  %v4089_v49 = vshrl.u32 %v6334_v26, 16  ;;  %v1684_v2 = vshrl.u32 %v7963_v7, 16  ;;  %v1687_v29 = vshll.u32 %v7963_v7, 16 }
  0xcd   : > { %v2385_v11 = vrot.slane %v2383_v42, 7  ;;  %vm9906_vm12 = vsmask.f32 4352  ;;  %v445_v27 = vand.u32 15, %v247_v60  ;;  %v249_v14 = vadd.s32 232, %v7473_v6 }
  0xce   : > { %v1682_v31 = vsel %vm9906_vm12, %v1672_v32, %v1681_v0  ;;  %v4087_v39 = vrot.slane %v4085_v10, 1  ;;  %v1686_v12 = vrot.slane %v1684_v2, 3  ;;  %v1689_v9 = vrot.slane %v1687_v29, 4  ;;  %v3872_v32 = vld [vmem:[%s7492_s29 + $0x78] sm:$0xf] }
  0xcf   : > { %6815 = vmatprep.mubr.msk.bf16.mxu1 %vm9905_vm4, %v1682_v31  ;;  %v1693_v55 = vshrl.u32 %v8000_v40, 16  ;;  %v2388_v4 = vor.u32 %v2386_v24, %v2385_v11  ;;  %vm695_vm9 = vcmp.lt.s32.totalorder %v445_v27, 15  ;;  %v2390_v34 = vrot.slane %v2385_v11, 4 }
  0xd0   : > { %v459_v26 = vand.u32 15, %v249_v14  ;;  %vm9907_vm0 = vsmask.f32 7424  ;;  %v4091_v42 = vor.u32 %v4089_v49, %v4087_v39  ;;  %vm2118_vm12 = vmpackc.low %vm695_vm9, %vm695_vm9  ;;  %v1690_v60 = vor.u32 %v1689_v9, %v1686_v12 }
  0xd1   : > { %v4088_v7 = vsel %vm9907_vm0, %v4083_v16, %v4087_v39  ;;  %v1695_v58 = vrot.slane %v1693_v55, 3  ;;  %v2389_v10 = vsel %vm8053_vm6, %v8036_v33, %v2388_v4  ;;  %v2150_v2 = vsel %vm2118_vm12, 65537, %v9755_v23 }
  0xd2   : > { %6963 = vmatprep.mubr.msk.bf16.mxu0 %vm9908_vm10, %v4088_v7  ;;  %v8599_v24 = vsel %vm8053_vm6, %v2390_v34, %v7651_v52  ;;  %vm697_vm4 = vcmp.lt.s32.totalorder %v459_v26, 15  ;;  %vm8601_vm0 = vcmp.ne.s16.totalorder %v2389_v10, 0  ;;  %v9910_v16 = vmov 0 }
  0xd3   : > { %9909 = vst [vmem:[#allocation56_spill] sm:$0xff] %v8599_v24  ;;  %v9911_v16 = vsel %vm8601_vm0, 4294967295, %v9910_v16  ;;  %v2401_v49 = vshrl.u32 %v2150_v2, 16  ;;  %v2404_v29 = vshll.u32 %v2150_v2, 16  ;;  %vm9678_vm10 = vcmp.ne.s16.totalorder %v8599_v24, 0  ;;  %vm2120_vm9 = vmpackc.low %vm697_vm4, %vm697_vm4 }
  0xd4   : > { %v3904_v11 = vsel %vm8601_vm0, %v3871_v1, 0  ;;  %v3905_v31 = vsel %vm9678_vm10, %v3872_v32, 0  ;;  %vm9912_vm12 = vsmask.f32 4352  ;;  %v2152_v14 = vsel %vm2120_vm9, 65537, %v9755_v23 }
  0xd5   : > { %v1691_v27 = vsel %vm9912_vm12, %v1681_v0, %v1690_v60  ;;  %v6335_v39 = vcombine.low %v3903_v36, %v3904_v11  ;;  %v2403_v12 = vrot.slane %v2401_v49, 7  ;;  %vm9913_vm5 = vcmask 31744   ;;  %v3873_v0 = vld [vmem:[%s7492_s29 + $0x7c] sm:$0xf]  ;;  %v3874_v36 = vld [vmem:[%s7492_s29 + $0x80] sm:$0xf] }
  0xd6   : > { %6816 = vmatmul.mubr.msk.bf16.gmra.mrb[8].mxu1 %vm9913_vm5, %v1691_v27  ;;  %v2419_v9 = vshrl.u32 %v2152_v14, 16  ;;  %v2422_v55 = vshll.u32 %v2152_v14, 16  ;;  %v1696_v4 = vshll.u32 %v8000_v40, 16  ;;  %v251_v34 = vadd.s32 248, %v7473_v6 }
  0xd7   : > { %v1702_v26 = vshrl.u32 %v8032_v48, 16  ;;  %v1705_v7 = vshll.u32 %v8032_v48, 16  ;;  %v4093_v1 = vshll.u32 %v6335_v39, 16  ;;  %v2406_v32 = vor.u32 %v2404_v29, %v2403_v12 }
  0xd8   : > { %v4097_v10 = vshrl.u32 %v6335_v39, 16  ;;  %v2408_v2 = vrot.slane %v2403_v12, 4  ;;  %v2421_v24 = vrot.slane %v2419_v9, 7  ;;  %v1698_v49 = vrot.slane %v1696_v4, 4 }
  0xd9   : > { %v473_v11 = vand.u32 15, %v251_v34  ;;  %v1704_v27 = vrot.slane %v1702_v26, 3  ;;  %v4095_v14 = vrot.slane %v4093_v1, 1  ;;  %v2407_v6 = vsel %vm8053_vm6, %v8036_v33, %v2406_v32  ;;  %v3875_v26 = vld [vmem:[%s7492_s29 + $0x84] sm:$0xf] }
  0xda   : > { %v8625_v40 = vsel %vm8053_vm6, %v2408_v2, %v7651_v52  ;;  %v1707_v48 = vrot.slane %v1705_v7, 4  ;;  %vm8627_vm5 = vcmp.ne.s16.totalorder %v2407_v6, 0  ;;  %v9915_v29 = vmov 0 }
  0xdb   : > { %9914 = vst [vmem:[#allocation57_spill] sm:$0xff] %v8625_v40  ;;  %v9916_v29 = vsel %vm8627_vm5, 4294967295, %v9915_v29  ;;  %v2424_v39 = vor.u32 %v2422_v55, %v2421_v24  ;;  %vm9687_vm4 = vcmp.ne.s16.totalorder %v8625_v40, 0  ;;  %v1699_v12 = vor.u32 %v1698_v49, %v1695_v58 }
  0xdc   : > { %9917 = vst [vmem:[#allocation58_spill] sm:$0xff] %v9916_v29  ;;  %vm9918_vm9 = vsmask.f32 7424  ;;  %v3906_v4 = vsel %vm8627_vm5, %v3873_v0, 0  ;;  %v4099_v34 = vor.u32 %v4097_v10, %v4095_v14  ;;  %v3907_v1 = vsel %vm9687_vm4, %v3874_v36, 0 }
  0xdd   : > { %v4096_v9 = vsel %vm9918_vm9, %v4091_v42, %v4095_v14  ;;  %vm9919_vm12 = vcmask 31744   ;;  %v6336_v7 = vcombine.low %v3905_v31, %v3906_v4  ;;  %v2425_v55 = vsel %vm8053_vm6, %v8036_v33, %v2424_v39 }
  0xde   : > { %6964 = vmatmul.mubr.msk.bf16.gmra.mrb[20].mxu0 %vm9919_vm12, %v4096_v9  ;;  %vm9920_vm10 = vsmask.f32 4352  ;;  %vm699_vm0 = vcmp.lt.s32.totalorder %v473_v11, 15  ;;  %vm8643_vm9 = vcmp.ne.s16.totalorder %v2425_v55, 0  ;;  %v9921_v42 = vmov 0  ;;  %vm9924_vm5 = vmmov %vm9919_vm12 }
  0xdf   : > { %v1700_v58 = vsel %vm9920_vm10, %v1690_v60, %v1699_v12  ;;  %v9922_v42 = vsel %vm8643_vm9, 4294967295, %v9921_v42  ;;  %vm2122_vm11 = vmpackc.low %vm699_vm0, %vm699_vm0  ;;  %v2426_v32 = vrot.slane %v2421_v24, 4  ;;  %v1708_v0 = vor.u32 %v1707_v48, %v1704_v27  ;;  %v3876_v60 = vld [vmem:[%s7492_s29 + $0x88] sm:$0xf] }
  0xe0   : > { %9923 = vst [vmem:[#allocation59_spill] sm:$0xff] %v9922_v42  ;;  %6819 = vmatprep.mubr.msk.bf16.mxu1 %vm9924_vm5, %v1700_v58  ;;  %v1711_v10 = vshrl.u32 %v8117_v19, 16  ;;  %v4101_v2 = vshll.u32 %v6336_v7, 16  ;;  %v3908_v31 = vsel %vm8643_vm9, %v3875_v26, 0  ;;  %v4105_v36 = vshrl.u32 %v6336_v7, 16 }
  0xe1   : > { %v2154_v49 = vsel %vm2122_vm11, 65537, %v9755_v23  ;;  %v6337_v11 = vcombine.low %v3907_v1, %v3908_v31  ;;  %v8656_v14 = vsel %vm8053_vm6, %v2426_v32, %v7651_v52  ;;  %v1709_v27 = vsel %vm9920_vm10, %v1699_v12, %v1708_v0  ;;  %vm9926_vm11 = vmmov %vm9924_vm5 }
  0xe2   : > { %9925 = vst [vmem:[#allocation60_spill] sm:$0xff] %v8656_v14  ;;  %v2437_v6 = vshrl.u32 %v2154_v49, 16  ;;  %v2440_v39 = vshll.u32 %v2154_v49, 16  ;;  %v4103_v24 = vrot.slane %v4101_v2, 1  ;;  %vm9686_vm0 = vcmp.ne.s16.totalorder %v8656_v14, 0  ;;  %6820 = vmatmul.mubr.msk.bf16.gmra.mrb[12].mxu1 %vm9926_vm11, %v1709_v27  ;;  %vm9928_vm12 = vmmov %vm9926_vm11 }
  0xe3   : > { %v1713_v48 = vrot.slane %v1711_v10, 3  ;;  %v4109_v9 = vshll.u32 %v6337_v11, 16  ;;  %v3909_v23 = vsel %vm9686_vm0, %v3876_v60, 0  ;;  %v4113_v26 = vshrl.u32 %v6337_v11, 16  ;;  %v3878_v2 = vld [vmem:[%s7492_s29 + $0x90] sm:$0x1] }
  0xe4   : > { %v2439_v4 = vrot.slane %v2437_v6, 7  ;;  %vm9927_vm5 = vsmask.f32 7424  ;;  %v4107_v7 = vor.u32 %v4105_v36, %v4103_v24  ;;  %v1714_v55 = vshll.u32 %v8117_v19, 16  ;;  %v3877_v49 = vld [vmem:[%s7492_s29 + $0x8c] sm:$0xf] }
  0xe5   : > { %v4104_v1 = vsel %vm9927_vm5, %v4099_v34, %v4103_v24  ;;  %v4525_v58 = vshrl.u32 %v7617_v28, 16  ;;  %v4111_v12 = vrot.slane %v4109_v9, 1  ;;  %v4528_v31 = vshll.u32 %v7617_v28, 16  ;;  %vm9929_vm10 = vmmov %vm9927_vm5 }
  0xe6   : > { %6967 = vmatprep.mubr.msk.bf16.mxu0 %vm9928_vm12, %v4104_v1  ;;  %v2442_v32 = vor.u32 %v2440_v39, %v2439_v4  ;;  %v2444_v10 = vrot.slane %v2439_v4, 4  ;;  %v1716_v60 = vrot.slane %v1714_v55, 4  ;;  %v4533_v6 = vshrl.u32 %v7621_v30, 16  ;;  %vm9933_vm5 = vmmov %vm9928_vm12 }
  0xe7   : > { %v4527_v11 = vrot.slane %v4525_v58, 3  ;;  %v4536_v34 = vshll.u32 %v7621_v30, 16  ;;  %v4112_v36 = vsel %vm9929_vm10, %v4107_v7, %v4111_v12  ;;  %v4115_v24 = vor.u32 %v4113_v26, %v4111_v12  ;;  %vm9938_vm10 = vmmov %vm9933_vm5 }
  0xe8   : > { %v2443_v19 = vsel %vm8053_vm6, %v8036_v33, %v2442_v32  ;;  %vm8676_vm11 = vcmp.ne.s16.totalorder %v2444_v10, 0  ;;  %v9930_v39 = vmov 0  ;;  %6968 = vmatmul.mubr.msk.bf16.gmra.mrb[24].mxu0 %vm9933_vm5, %v4112_v36  ;;  %v9934_v28 = vmov 0 }
  0xe9   : > { %v9931_v39 = vsel %vm8676_vm11, 4294967295, %v9930_v39  ;;  %vm8681_vm12 = vcmp.ne.s16.totalorder %v2443_v19, 0  ;;  %v3911_v30 = vsel %vm8676_vm11, %v3878_v2, 0  ;;  %v1717_v27 = vor.u32 %v1716_v60, %v1713_v48  ;;  %v8695_v2 = vld [vmem:[%s7492_s29 + $0x2c] sm:$0xf] }
  0xea   : > { %9932 = vst [vmem:[#allocation61_spill] sm:$0xff] %v9931_v39  ;;  %v9935_v28 = vsel %vm8681_vm12, 4294967295, %v9934_v28  ;;  %v4530_v9 = vrot.slane %v4528_v31, 4  ;;  %v3910_v33 = vsel %vm8681_vm12, %v3877_v49, 0  ;;  %v6339_v25 = vcombine.low %v3911_v30, %v3911_v30  ;;  %v10103_v39 = vld [vmem:[#allocation4_spill] sm:$0xff] }
  0xeb   : > { %9936 = vst [vmem:[#allocation62_spill] sm:$0xff] %v9935_v28  ;;  %v4535_v4 = vrot.slane %v4533_v6, 3  ;;  %v4538_v26 = vrot.slane %v4536_v34, 4  ;;  %v6338_v1 = vcombine.low %v3909_v23, %v3910_v33  ;;  %vm9937_vm6 = vsmask.f32 4352 }
  0xec   : > { %v1718_v7 = vsel %vm9937_vm6, %v1708_v0, %v1717_v27  ;;  %v4531_v55 = vor.u32 %v4530_v9, %v4527_v11  ;;  %v1720_v58 = vshrl.u32 %v8192_v61, 16  ;;  %v4125_v12 = vshll.u32 %v6339_v25, 16  ;;  %v8699_v0 = vld [vmem:[%s7492_s29 + $0x30] sm:$0xf]  ;;  %vm9939_vm5 = vmmov %vm9937_vm6 }
  0xed   : > { %6823 = vmatprep.mubr.msk.bf16.mxu1 %vm9938_vm10, %v1718_v7  ;;  %v4539_v32 = vor.u32 %v4538_v26, %v4535_v4  ;;  %v1723_v48 = vshll.u32 %v8192_v61, 16  ;;  %v4542_v10 = vshrl.u32 %v7749_v5, 16  ;;  %v4117_v31 = vshll.u32 %v6338_v1, 16  ;;  %v8715_v26 = vld [vmem:[%s7492_s29 + $0x34] sm:$0xf] }
  0xee   : > { %v4121_v49 = vshrl.u32 %v6338_v1, 16  ;;  %v1722_v60 = vrot.slane %v1720_v58, 3  ;;  %v4545_v23 = vshll.u32 %v7749_v5, 16  ;;  %v4127_v11 = vrot.slane %v4125_v12, 1 }
  0xef   : > { %v4540_v6 = vsel %vm9939_vm5, %v4531_v55, %v4539_v32  ;;  %v1725_v34 = vrot.slane %v1723_v48, 4  ;;  %v4544_v36 = vrot.slane %v4542_v10, 3  ;;  %v4119_v19 = vrot.slane %v4117_v31, 1  ;;  %v8722_v48 = vld [vmem:[%s7492_s29 + $0x38] sm:$0xf] }
  0xf0   : > { %v4547_v30 = vrot.slane %v4545_v23, 4  ;;  %vm9940_vm6 = vcmask 1041408   ;;  %v1729_v9 = vshrl.u32 %v8253_v44, 16  ;;  %v1732_v25 = vshll.u32 %v8253_v44, 16 }
  0xf1   : > { %v8704_v61 = vsel %vm9940_vm6, %v8204_v35, 0  ;;  %v1726_v33 = vor.u32 %v1725_v34, %v1722_v60  ;;  %v4412_v5 = vsel %vm7738_vm8, %v8695_v2, 0  ;;  %v4413_v4 = vsel %vm7758_vm13, %v8699_v0, 0  ;;  %v8733_v34 = vld [vmem:[%s7492_s29 + $0x3c] sm:$0xf] }
  0xf2   : > { %vm9941_vm10 = vsmask.f32 7424  ;;  %v4123_v35 = vor.u32 %v4121_v49, %v4119_v19  ;;  %v4548_v7 = vor.u32 %v4547_v30, %v4544_v36  ;;  %v1731_v55 = vrot.slane %v1729_v9, 3  ;;  %v8742_v36 = vld [vmem:[%s7492_s29 + $0x40] sm:$0xf] }
  0xf3   : > { %v4120_v1 = vsel %vm9941_vm10, %v4115_v24, %v4119_v19  ;;  %vm9942_vm5 = vcmask 31744   ;;  %vm9943_vm6 = vsmask.f32 4352  ;;  %v1734_v58 = vrot.slane %v1732_v25, 4  ;;  %vm9944_vm8 = vmmov %vm9941_vm10 }
  0xf4   : > { %6971 = vmatprep.mubr.msk.bf16.mxu0 %vm9942_vm5, %v4120_v1  ;;  %v1727_v44 = vsel %vm9943_vm6, %v1717_v27, %v1726_v33  ;;  %v6360_v12 = vcombine.low %v4412_v5, %v4413_v4  ;;  %v1738_v56 = vshrl.u32 %v8309_v18, 16  ;;  %v4128_v20 = vsel %vm9944_vm8, %v4123_v35, %v4127_v11  ;;  %vm9945_vm13 = vmmov %vm9942_vm5 }
  0xf5   : > { %6824 = vmatmul.mubr.msk.bf16.gmra.mrb[16].mxu1 %vm9945_vm13, %v1727_v44  ;;  %vm9946_vm10 = vmmov %vm9943_vm6  ;;  %v1741_v10 = vshll.u32 %v8309_v18, 16  ;;  %v4414_v31 = vsel %vm7796_vm14, %v8715_v26, 0  ;;  %6972 = vmatmul.mubr.msk.bf16.gmra.mrb[28].mxu0 %vm9942_vm5, %v4128_v20  ;;  %v1735_v27 = vor.u32 %v1734_v58, %v1731_v55  ;;  %v1747_v18 = vshrl.u32 %v8367_v45, 16  ;;  %v8758_v20 = vld [vmem:[%s7492_s29 + $0x48] sm:$0xf] }
  0xf6   : > { %v4549_v24 = vsel %vm9946_vm10, %v4539_v32, %v4548_v7  ;;  %v4551_v49 = vshrl.u32 %v6360_v12, 16  ;;  %v4554_v60 = vshll.u32 %v6360_v12, 16  ;;  %v1740_v23 = vrot.slane %v1738_v56, 3  ;;  %vm9947_vm6 = vmmov %vm9942_vm5  ;;  %v8755_v56 = vld [vmem:[%s7492_s29 + $0x44] sm:$0xf] }
  0xf7   : > { %6977 = vmatprep.mubr.msk.bf16.mxu0 %vm9947_vm6, %v4540_v6  ;;  %v1743_v11 = vrot.slane %v1741_v10, 4  ;;  %v4415_v32 = vsel %vm7827_vm15, %v8722_v48, 0  ;;  %v1750_v41 = vshll.u32 %v8367_v45, 16  ;;  %vm9948_vm14 = vmmov %vm9946_vm10  ;;  %v1749_v5 = vrot.slane %v1747_v18, 3 }
  0xf8   : > { %v1736_v19 = vsel %vm9948_vm14, %v1726_v33, %v1735_v27  ;;  %v4553_v30 = vrot.slane %v4551_v49, 3  ;;  %v4556_v9 = vrot.slane %v4554_v60, 4  ;;  %v6361_v25 = vcombine.low %v4414_v31, %v4415_v32  ;;  %vm9949_vm8 = vmmov %vm9942_vm5  ;;  %v8763_v60 = vld [vmem:[%s7492_s29 + $0x4c] sm:$0xf]  ;;  %v8770_v32 = vld [vmem:[%s9530_s1 + $0x10] sm:$0x3] }
  0xf9   : > { %6827 = vmatprep.mubr.msk.bf16.mxu1 %vm9949_vm8, %v1736_v19  ;;  %v1744_v6 = vor.u32 %v1743_v11, %v1740_v23  ;;  %v1752_v4 = vrot.slane %v1750_v41, 4  ;;  %v4416_v50 = vsel %vm7864_vm1, %v8733_v34, 0  ;;  %v4417_v33 = vsel %vm7893_vm7, %v8742_v36, 0  ;;  %vm9950_vm15 = vmmov %vm9946_vm10  ;;  %v9957_v41 = vld [vmem:[#allocation16_spill] sm:$0xff] }
  0xfa   : > { %v4557_v45 = vor.u32 %v4556_v9, %v4553_v30  ;;  %v4560_v1 = vshrl.u32 %v6361_v25, 16  ;;  %v4563_v35 = vshll.u32 %v6361_v25, 16  ;;  %v6362_v58 = vcombine.low %v4416_v50, %v4417_v33  ;;  %vm9951_vm13 = vmmov %vm9946_vm10  ;;  %v9961_v50 = vld [vmem:[#allocation15_spill] sm:$0xff] }
  0xfb   : > { %v1745_v55 = vsel %vm9950_vm15, %v1735_v27, %v1744_v6  ;;  %v1753_v44 = vor.u32 %v1752_v4, %v1749_v5  ;;  %v1756_v12 = vshrl.u32 %v8422_v13, 16  ;;  %v1759_v49 = vshll.u32 %v8422_v13, 16  ;;  %vm9952_vm1 = vmmov %vm9942_vm5 }
  0xfc   : > { %v4558_v17 = vsel %vm9951_vm13, %v4548_v7, %v4557_v45  ;;  %v4562_v10 = vrot.slane %v4560_v1, 3  ;;  %v4565_v31 = vrot.slane %v4563_v35, 4  ;;  %vm9953_vm7 = vmmov %vm9946_vm10  ;;  %v4569_v27 = vshrl.u32 %v6362_v58, 16 }
  0xfd   : > { %6828 = vmatmul.mubr.msk.bf16.gmra.mrb[20].mxu1 %vm9952_vm1, %v1745_v55  ;;  %v1754_v22 = vsel %vm9953_vm7, %v1744_v6, %v1753_v44  ;;  %v4572_v23 = vshll.u32 %v6362_v58, 16  ;;  %v1758_v11 = vrot.slane %v1756_v12, 3  ;;  %vm9954_vm10 = vmmov %vm9952_vm1  ;;  %v1761_v13 = vrot.slane %v1759_v49, 4  ;;  %v8784_v6 = vld [vmem:[%s7492_s29 + $0x50] sm:$0xf] }
  0xfe   : > { %6978 = vmatmul.mubr.msk.bf16.vlgmr.msra.gmra.mrb[0].mxu0 %vm9954_vm10, %v4549_v24  ;;  %v4566_v7 = vor.u32 %v4565_v31, %v4562_v10  ;;  %vm9955_vm5 = vmmov %vm9952_vm1  ;;  %vm9956_vm6 = vnez %v9754_v51  ;;  %vm9958_vm14 = vnez %v9957_v41  ;;  %v4571_v30 = vrot.slane %v4569_v27, 3  ;;  %v8794_v58 = vld [vmem:[%s7492_s29 + $0x54] sm:$0xf]  ;;  %v8802_v31 = vld [vmem:[%s7492_s29 + $0x58] sm:$0xf] }
  0xff   : > { %6831 = vmatprep.mubr.msk.bf16.mxu1 %vm9955_vm5, %v1754_v22  ;;  %v4418_v18 = vsel %vm9956_vm6, %v8755_v56, 0  ;;  %v4419_v19 = vsel %vm9958_vm14, %v8758_v20, 0  ;;  %7010 = vmatpush3.bf16.msra.mxu0 %v8704_v61  ;;  %vm9959_vm8 = vmmov %vm9952_vm1  ;;  %v4574_v9 = vrot.slane %v4572_v23, 4  ;;  %v1765_v25 = vshrl.u32 %v8465_v46, 16  ;;  %v9967_v41 = vld [vmem:[#allocation19_spill] sm:$0xff] }
 0x100   : > { %6981 = vmatprep.mubr.msk.bf16.mxu0 %vm9959_vm8, %v4558_v17  ;;  %v6363_v24 = vcombine.low %v4418_v18, %v4419_v19  ;;  %vm9960_vm15 = vmmov %vm9953_vm7  ;;  %v1762_v5 = vor.u32 %v1761_v13, %v1758_v11  ;;  %v1768_v4 = vshll.u32 %v8465_v46, 16  ;;  %vm9962_vm13 = vnez %v9961_v50  ;;  %v9964_v46 = vld [vmem:[#allocation18_spill] sm:$0xff]  ;;  %v1994_v11 = vld [vmem:[%s7492_s29 + $0x8] sm:$0xf] }
 0x101   : > { %v4567_v51 = vsel %vm9960_vm15, %v4557_v45, %v4566_v7  ;;  %v4420_v61 = vsel %vm9962_vm13, %v8763_v60, 0  ;;  %vm9963_vm1 = vcmask 1041408   ;;  %v4575_v1 = vor.u32 %v4574_v9, %v4571_v30  ;;  %vm9966_vm5 = vmmov %vm9953_vm7  ;;  %v1995_v30 = vld [vmem:[%s7492_s29 + $0xc] sm:$0xf]  ;;  %v1996_v50 = vld [vmem:[%s7492_s29 + $0x10] sm:$0xf] }
 0x102   : > { %7344 = vmatprep.subr.msk.bf16.mxu0 %vm9963_vm1, %v8770_v32  ;;  %v4578_v35 = vshrl.u32 %v6363_v24, 16  ;;  %v4581_v33 = vshll.u32 %v6363_v24, 16  ;;  %v1767_v55 = vrot.slane %v1765_v25, 3  ;;  %v1763_v45 = vsel %vm9953_vm7, %v1753_v44, %v1762_v5  ;;  %vm9969_vm14 = vmmov %vm9959_vm8 }
 0x103   : > { %v1770_v12 = vrot.slane %v1768_v4, 4  ;;  %vm9965_vm10 = vnez %v9964_v46  ;;  %v1774_v10 = vshrl.u32 %v8397_v63, 16  ;;  %v4576_v49 = vsel %vm9966_vm5, %v4566_v7, %v4575_v1  ;;  %vm9971_vm15 = vmmov %vm9966_vm5 }
 0x104   : > { %v4421_v17 = vsel %vm9965_vm10, %v8784_v6, 0  ;;  %v4580_v22 = vrot.slane %v4578_v35, 3  ;;  %v4583_v27 = vrot.slane %v4581_v33, 4  ;;  %v1777_v44 = vshll.u32 %v8397_v63, 16  ;;  %v1997_v33 = vld [vmem:[%s7492_s29 + $0x14] sm:$0xf]  ;;  %vm9973_vm1 = vmmov %vm9959_vm8 }
 0x105   : > { %v6364_v23 = vcombine.low %v4420_v61, %v4421_v17  ;;  %v1771_v13 = vor.u32 %v1770_v12, %v1767_v55  ;;  %v1776_v18 = vrot.slane %v1774_v10, 3  ;;  %vm9968_vm6 = vnez %v9967_v41  ;;  %6832 = vmatmul.mubr.msk.bf16.gmra.mrb[24].mxu1 %vm9969_vm14, %v1763_v45  ;;  %v8822_v45 = vld [vmem:[%s7492_s29 + $0x5c] sm:$0xf]  ;;  %vm9974_vm7 = vmmov %vm9966_vm5  ;;  %v9976_v17 = vld [vmem:[#allocation26_spill] sm:$0xff] }
 0x106   : > { %v4422_v19 = vsel %vm9968_vm6, %v8794_v58, 0  ;;  %v4584_v9 = vor.u32 %v4583_v27, %v4580_v22  ;;  %v4423_v4 = vsel %vm8014_vm3, %v8802_v31, 0  ;;  %6982 = vmatmul.mubr.msk.bf16.gmra.mrb[4].mxu0 %vm9959_vm8, %v4567_v51  ;;  %v1779_v63 = vrot.slane %v1777_v44, 4  ;;  %vm9975_vm10 = vmmov %vm9973_vm1  ;;  %v8832_v44 = vld [vmem:[%s7492_s29 + $0x60] sm:$0xf] }
 0x107   : > { %v4587_v24 = vshrl.u32 %v6364_v23, 16  ;;  %v4590_v7 = vshll.u32 %v6364_v23, 16  ;;  %v1772_v61 = vsel %vm9971_vm15, %v1762_v5, %v1771_v13  ;;  %v6365_v35 = vcombine.low %v4422_v19, %v4423_v4  ;;  %6985 = vmatprep.mubr.msk.bf16.mxu0 %vm9973_vm1, %v4576_v49  ;;  %v9978_v23 = vld [vmem:[#allocation25_spill] sm:$0xff]  ;;  %9980 = vst [vmem:[#allocation16_spill] sm:$0xff] %v8832_v44  ;;  %v9981_v19 = vld [vmem:[#allocation27_spill] sm:$0xff]  ;;  %vm9986_vm1 = vmmov %vm9974_vm7 }
 0x108   : > { %vm9972_vm13 = vcmp.ne.s16.totalorder %v7651_v52, 0  ;;  %v4585_v12 = vsel %vm9974_vm7, %v4575_v1, %v4584_v9  ;;  %6835 = vmatprep.mubr.msk.bf16.mxu1 %vm9975_vm10, %v1772_v61  ;;  %vm9977_vm5 = vnez %v9976_v17  ;;  %v1780_v10 = vor.u32 %v1779_v63, %v1776_v18  ;;  %vm9995_vm0 = vmmov %vm9975_vm10 }
 0x109   : > { %v2478_v55 = vsel %vm9972_vm13, %v1994_v11, 0  ;;  %v4589_v46 = vrot.slane %v4587_v24, 3  ;;  %v4592_v51 = vrot.slane %v4590_v7, 4  ;;  %v2479_v5 = vsel %vm9977_vm5, %v1995_v30, 0  ;;  %v9983_v24 = vld [vmem:[#allocation24_spill] sm:$0xff]  ;;  %vm9985_vm13 = vmmov %vm9974_vm7 }
 0x10a   : > { %v4596_v22 = vshrl.u32 %v6365_v35, 16  ;;  %v4599_v27 = vshll.u32 %v6365_v35, 16  ;;  %vm9979_vm14 = vcmp.ne.s16.totalorder %v9978_v23, 0  ;;  %vm9982_vm8 = vnez %v9981_v19  ;;  %v1998_v35 = vld [vmem:[%s7492_s29 + $0x18] sm:$0xf] }
 0x10b   : > { %v2480_v11 = vsel %vm9979_vm14, %v1996_v50, 0  ;;  %v4593_v49 = vor.u32 %v4592_v51, %v4589_v46  ;;  %v2481_v1 = vsel %vm9982_vm8, %v1997_v33, 0  ;;  %v6222_v4 = vcombine.low %v2478_v55, %v2479_v5  ;;  %v1999_v50 = vld [vmem:[%s7492_s29 + $0x1c] sm:$0xf]  ;;  %v9987_v33 = vld [vmem:[#allocation28_spill] sm:$0xff] }
 0x10c   : > { %vm9984_vm15 = vnez %v9983_v24  ;;  %v1781_v18 = vsel %vm9985_vm13, %v1771_v13, %v1780_v10  ;;  %v4598_v30 = vrot.slane %v4596_v22, 3  ;;  %v4601_v61 = vrot.slane %v4599_v27, 4  ;;  %v8847_v13 = vld [vmem:[%s7492_s29 + $0x64] sm:$0xf]  ;;  %v8850_v10 = vld [vmem:[%s7492_s29 + $0x68] sm:$0xf] }
 0x10d   : > { %v4424_v7 = vsel %vm9984_vm15, %v8822_v45, 0  ;;  %v6223_v63 = vcombine.low %v2480_v11, %v2481_v1  ;;  %v4594_v46 = vsel %vm9986_vm1, %v4584_v9, %v4593_v49  ;;  %v2598_v51 = vshrl.u32 %v6222_v4, 16  ;;  %9989 = vst [vmem:[#allocation15_spill] sm:$0xff] %v8850_v10  ;;  %6836 = vmatmul.mubr.msk.bf16.gmra.mrb[28].mxu1 %vm9975_vm10, %v1781_v18  ;;  %v9990_v27 = vld [vmem:[#allocation29_spill] sm:$0xff]  ;;  %v9992_v11 = vld [vmem:[#allocation31_spill] sm:$0xff]  ;;  %vm9997_vm10 = vmmov %vm9995_vm0 }
 0x10e   : > { %v2600_v19 = vshll.u32 %v6222_v4, 16  ;;  %vm9988_vm7 = vnez %v9987_v33  ;;  %v4602_v5 = vor.u32 %v4601_v61, %v4598_v30  ;;  %vm9991_vm14 = vcmp.ne.s16.totalorder %v9990_v27, 0  ;;  %v2000_v30 = vld [vmem:[%s7492_s29 + $0x20] sm:$0xf]  ;;  %6986 = vmatmul.mubr.msk.bf16.gmra.mrb[8].mxu0 %vm9995_vm0, %v4585_v12  ;;  %v8871_v24 = vld [vmem:[%s7492_s29 + $0x6c] sm:$0xf] }
 0x10f   : > { %v4425_v55 = vsel %vm9988_vm7, %v8832_v44, 0  ;;  %v2605_v23 = vshll.u32 %v6223_v63, 16  ;;  %v2609_v17 = vshrl.u32 %v6223_v63, 16  ;;  %v2482_v9 = vsel %vm9991_vm14, %v1998_v35, 0  ;;  %6989 = vmatprep.mubr.msk.bf16.mxu0 %vm9997_vm10, %v4594_v46  ;;  %10002 = vst [vmem:[#allocation18_spill] sm:$0xff] %v8871_v24 }
 0x110   : > { %v6366_v52 = vcombine.low %v4424_v7, %v4425_v55  ;;  %v2602_v22 = vrot.slane %v2600_v19, 1  ;;  %vm9993_vm13 = vnez %v9992_v11  ;;  %vm9994_vm1 = vcmask 1041408   ;;  %v2001_v19 = vld [vmem:[%s7492_s29 + $0x24] sm:$0xf] }
 0x111   : > { %v2483_v1 = vsel %vm9993_vm13, %v1999_v50, 0  ;;  %v3325_v4 = vsel %vm9994_vm1, %v8478_v37, 0  ;;  %vm9996_vm4 = vsmask.f32 4352  ;;  %v2607_v61 = vrot.slane %v2605_v23, 1  ;;  %v9998_v50 = vld [vmem:[#allocation30_spill] sm:$0xff] }
 0x112   : > { %v4603_v7 = vsel %vm9996_vm4, %v4593_v49, %v4602_v5  ;;  %v4605_v63 = vshrl.u32 %v6366_v52, 16  ;;  %v4608_v18 = vshll.u32 %v6366_v52, 16  ;;  %v2603_v35 = vor.u32 %v2602_v22, %v2598_v51  ;;  %v10000_v37 = vld [vmem:[#allocation33_spill] sm:$0xff]  ;;  %v8874_v52 = vld [vmem:[%s7492_s29 + $0x70] sm:$0xf] }
 0x113   : > { %v6224_v55 = vcombine.low %v2482_v9, %v2483_v1  ;;  %vm9999_vm14 = vnez %v9998_v50  ;;  %vm10001_vm1 = vnez %v10000_v37  ;;  %v2611_v12 = vor.u32 %v2609_v17, %v2607_v61  ;;  %10003 = vst [vmem:[#allocation19_spill] sm:$0xff] %v8874_v52  ;;  %v10005_v22 = vld [vmem:[#allocation32_spill] sm:$0xff]  ;;  %v10007_v1 = vld [vmem:[#allocation35_spill] sm:$0xff] }
 0x114   : > { %v4426_v11 = vsel %vm9999_vm14, %v8847_v13, 0  ;;  %v4427_v27 = vsel %vm10001_vm1, %v8850_v10, 0  ;;  %v4607_v33 = vrot.slane %v4605_v63, 3  ;;  %v4610_v49 = vrot.slane %v4608_v18, 4  ;;  %v2002_v18 = vld [vmem:[%s7492_s29 + $0x28] sm:$0xf] }
 0x115   : > { %v6367_v23 = vcombine.low %v4426_v11, %v4427_v27  ;;  %vm10004_vm4 = vsmask.f32 7424  ;;  %v2613_v51 = vshll.u32 %v6224_v55, 16  ;;  %vm10006_vm0 = vcmp.ne.s16.totalorder %v10005_v22, 0  ;;  %v10017_v22 = vld [vmem:[#allocation37_spill] sm:$0xff] }
 0x116   : > { %v2608_v46 = vsel %vm10004_vm4, %v2603_v35, %v2607_v61  ;;  %v2484_v9 = vsel %vm10006_vm0, %v2000_v30, 0  ;;  %vm10008_vm10 = vnez %v10007_v1  ;;  %vm10009_vm13 = vcmask 31744   ;;  %v10010_v61 = vld [vmem:[#allocation34_spill] sm:$0xff]  ;;  %v10012_v30 = vld [vmem:[#allocation36_spill] sm:$0xff]  ;;  %v2003_v1 = vld [vmem:[%s7492_s29 + $0x2c] sm:$0xf] }
 0x117   : > { %v2485_v37 = vsel %vm10008_vm10, %v2001_v19, 0  ;;  %6841 = vmatprep.mubr.msk.bf16.mxu1 %vm10009_vm13, %v2608_v46  ;;  %v4611_v17 = vor.u32 %v4610_v49, %v4607_v33  ;;  %v4614_v63 = vshrl.u32 %v6367_v23, 16  ;;  %v4617_v27 = vshll.u32 %v6367_v23, 16  ;;  %v8892_v23 = vld [vmem:[%s7492_s29 + $0x74] sm:$0xf] }
 0x118   : > { %v6225_v11 = vcombine.low %v2484_v9, %v2485_v37  ;;  %v2615_v50 = vrot.slane %v2613_v51, 1  ;;  %v2617_v10 = vshrl.u32 %v6224_v55, 16  ;;  %vm10011_vm4 = vnez %v10010_v61  ;;  %10015 = vst [vmem:[#allocation23_spill] sm:$0xff] %v8892_v23 }
 0x119   : > { %v4428_v35 = vsel %vm10011_vm4, %v8871_v24, 0  ;;  %vm10013_vm0 = vnez %v10012_v30  ;;  %vm10014_vm10 = vsmask.f32 4352  ;;  %v4616_v33 = vrot.slane %v4614_v63, 3  ;;  %v8898_v24 = vld [vmem:[%s7492_s29 + $0x78] sm:$0xf] }
 0x11a   : > { %v4429_v19 = vsel %vm10013_vm0, %v8874_v52, 0  ;;  %v4612_v46 = vsel %vm10014_vm10, %v4602_v5, %v4611_v17  ;;  %v4619_v49 = vrot.slane %v4617_v27, 4  ;;  %v2621_v37 = vshll.u32 %v6225_v11, 16  ;;  %10019 = vst [vmem:[#allocation63_spill] sm:$0xff] %v8898_v24  ;;  %v8901_v30 = vld [vmem:[%s7492_s29 + $0x7c] sm:$0xf] }
 0x11b   : > { %vm10016_vm13 = vsmask.f32 7424  ;;  %v2619_v55 = vor.u32 %v2617_v10, %v2615_v50  ;;  %v6368_v9 = vcombine.low %v4428_v35, %v4429_v19  ;;  %vm10018_vm1 = vcmp.ne.s16.totalorder %v10017_v22, 0  ;;  %v10022_v27 = vld [vmem:[#allocation40_spill] sm:$0xff]  ;;  %v10025_v22 = vld [vmem:[#allocation38_spill] sm:$0xff]  ;;  %v10037_v52 = vld [vmem:[#allocation41_spill] sm:$0xff] }
 0x11c   : > { %v2616_v51 = vsel %vm10016_vm13, %v2611_v12, %v2615_v50  ;;  %v2486_v61 = vsel %vm10018_vm1, %v2002_v18, 0  ;;  %vm10020_vm0 = vcmask 31744   ;;  %v4620_v5 = vor.u32 %v4619_v49, %v4616_v33  ;;  %v2004_v12 = vld [vmem:[%s7492_s29 + $0x30] sm:$0xf]  ;;  %v2005_v33 = vld [vmem:[%s7492_s29 + $0x34] sm:$0xf] }
 0x11d   : > { %6990 = vmatmul.mubr.msk.bf16.gmra.mrb[12].mxu0 %vm10020_vm0, %v4603_v7  ;;  %vm10021_vm10 = vmmov %vm10020_vm0  ;;  %v2623_v63 = vrot.slane %v2621_v37, 1  ;;  %vm10023_vm4 = vnez %v10022_v27  ;;  %v2625_v50 = vshrl.u32 %v6225_v11, 16  ;;  %v4623_v18 = vshrl.u32 %v6368_v9, 16 }
 0x11e   : > { %6842 = vmatmul.mubr.msk.bf16.vlgmr.msra.gmra.mrb[0].mxu1 %vm10021_vm10, %v2616_v51  ;;  %v2487_v10 = vsel %vm10023_vm4, %v2003_v1, 0  ;;  %vm10024_vm13 = vmmov %vm10020_vm0  ;;  %v4626_v35 = vshll.u32 %v6368_v9, 16  ;;  %vm10026_vm1 = vnez %v10025_v22  ;;  %vm10027_vm0 = vsmask.f32 4352  ;;  %v10029_v1 = vld [vmem:[#allocation42_spill] sm:$0xff] }
 0x11f   : > { %6993 = vmatprep.mubr.msk.bf16.mxu0 %vm10024_vm13, %v4612_v46  ;;  %6874 = vmatpush3.bf16.msra.mxu1 %v3325_v4  ;;  %v6226_v19 = vcombine.low %v2486_v61, %v2487_v10  ;;  %v4430_v7 = vsel %vm10026_vm1, %v8892_v23, 0  ;;  %v4621_v49 = vsel %vm10027_vm0, %v4611_v17, %v4620_v5  ;;  %vm10028_vm10 = vsmask.f32 7424  ;;  %v8919_v46 = vld [vmem:[%s7492_s29 + $0x80] sm:$0xf] }
 0x120   : > { %v2624_v37 = vsel %vm10028_vm10, %v2619_v55, %v2623_v63  ;;  %v2627_v51 = vor.u32 %v2625_v50, %v2623_v63  ;;  %vm10030_vm4 = vnez %v10029_v1  ;;  %v2006_v4 = vld [vmem:[%s7492_s29 + $0x38] sm:$0xf]  ;;  %v7404_v61 = vld [vmem:[%s9530_s1 + $0x8] sm:$0x3]  ;;  %vm10031_vm13 = vcmask 1041408  }
 0x121   : > { %v4431_v11 = vsel %vm10030_vm4, %v8898_v24, 0  ;;  %7340 = vmatprep.subr.msk.bf16.mxu1 %vm10031_vm13, %v7404_v61  ;;  %vm10032_vm1 = vcmask 31744   ;;  %v4625_v17 = vrot.slane %v4623_v18, 3  ;;  %v4628_v9 = vrot.slane %v4626_v35, 4  ;;  %v2007_v10 = vld [vmem:[%s7492_s29 + $0x3c] sm:$0xf] }
 0x122   : > { %6845 = vmatprep.mubr.msk.bf16.mxu1 %vm10032_vm1, %v2624_v37  ;;  %v2629_v55 = vshll.u32 %v6226_v19, 16  ;;  %v6369_v63 = vcombine.low %v4430_v7, %v4431_v11  ;;  %v10033_v50 = vld [vmem:[#allocation39_spill] sm:$0xff]  ;;  %v2633_v24 = vshrl.u32 %v6226_v19, 16  ;;  %vm10038_vm4 = vnez %v10037_v52  ;;  %v8936_v35 = vld [vmem:[%s7492_s29 + $0x84] sm:$0xf]  ;;  %v10039_v11 = vld [vmem:[#allocation45_spill] sm:$0xff] }
 0x123   : > { %vm10034_vm0 = vcmp.ne.s16.totalorder %v10033_v50, 0  ;;  %v10035_v1 = vld [vmem:[#allocation43_spill] sm:$0xff]  ;;  %v4432_v23 = vsel %vm10038_vm4, %v8901_v30, 0  ;;  %v4629_v61 = vor.u32 %v4628_v9, %v4625_v17  ;;  %vm10040_vm1 = vnez %v10039_v11 }
 0x124   : > { %v2488_v27 = vsel %vm10034_vm0, %v2004_v12, 0  ;;  %vm10036_vm10 = vnez %v10035_v1  ;;  %v2631_v44 = vrot.slane %v2629_v55, 1  ;;  %v4632_v37 = vshrl.u32 %v6369_v63, 16  ;;  %v10041_v1 = vld [vmem:[#allocation44_spill] sm:$0xff]  ;;  %v8946_v50 = vld [vmem:[%s7492_s29 + $0x88] sm:$0xf] }
 0x125   : > { %v2489_v22 = vsel %vm10036_vm10, %v2005_v33, 0  ;;  %v4635_v18 = vshll.u32 %v6369_v63, 16  ;;  %v4433_v12 = vsel %vm10040_vm1, %v8919_v46, 0  ;;  %vm10042_vm13 = vcmp.ne.s16.totalorder %v10041_v1, 0 }
 0x126   : > { %v6227_v7 = vcombine.low %v2488_v27, %v2489_v22  ;;  %v2490_v19 = vsel %vm10042_vm13, %v2006_v4, 0  ;;  %vm10043_vm0 = vnez %v9861_v21  ;;  %vm10044_vm10 = vsmask.f32 4352  ;;  %v2008_v4 = vld [vmem:[%s7492_s29 + $0x40] sm:$0xf] }
 0x127   : > { %v2491_v33 = vsel %vm10043_vm0, %v2007_v10, 0  ;;  %v4630_v17 = vsel %vm10044_vm10, %v4620_v5, %v4629_v61  ;;  %vm10045_vm4 = vsmask.f32 7424  ;;  %v4634_v55 = vrot.slane %v4632_v37, 3  ;;  %v2009_v10 = vld [vmem:[%s7492_s29 + $0x44] sm:$0xf] }
 0x128   : > { %v2632_v9 = vsel %vm10045_vm4, %v2627_v51, %v2631_v44  ;;  %v4637_v63 = vrot.slane %v4635_v18, 4  ;;  %vm10046_vm14 = vcmask 31744   ;;  %v2635_v22 = vor.u32 %v2633_v24, %v2631_v44  ;;  %v10049_v51 = vld [vmem:[#allocation46_spill] sm:$0xff] }
 0x129   : > { %6994 = vmatmul.mubr.msk.bf16.gmra.mrb[16].mxu0 %vm10046_vm14, %v4621_v49  ;;  %vm10047_vm8 = vmmov %vm10046_vm14  ;;  %v2637_v27 = vshll.u32 %v6227_v7, 16  ;;  %v6370_v11 = vcombine.low %v4432_v23, %v4433_v12  ;;  %v6228_v1 = vcombine.low %v2490_v19, %v2491_v33  ;;  %v2641_v5 = vshrl.u32 %v6227_v7, 16  ;;  %v10053_v33 = vld [vmem:[#allocation48_spill] sm:$0xff] }
 0x12a   : > { %6846 = vmatmul.mubr.msk.bf16.gmra.mrb[4].mxu1 %vm10047_vm8, %v2632_v9  ;;  %vm10048_vm13 = vmmov %vm10047_vm8  ;;  %v4638_v21 = vor.u32 %v4637_v63, %v4634_v55  ;;  %vm10050_vm4 = vnez %v10049_v51  ;;  %vm10051_vm14 = vnez %v9865_v3  ;;  %v8967_v9 = vld [vmem:[%s7492_s29 + $0x8c] sm:$0xf]  ;;  %v8970_v55 = vld [vmem:[%s7492_s29 + $0x90] sm:$0xf]  ;;  %vm10056_vm0 = vsmask.f32 7424 }
 0x12b   : > { %6997 = vmatprep.mubr.msk.bf16.mxu0 %vm10048_vm13, %v4630_v17  ;;  %v4434_v37 = vsel %vm10050_vm4, %v8936_v35, 0  ;;  %v4435_v49 = vsel %vm10051_vm14, %v8946_v50, 0  ;;  %v2639_v44 = vrot.slane %v2637_v27, 1  ;;  %v4641_v24 = vshrl.u32 %v6370_v11, 16  ;;  %vm10052_vm8 = vmmov %vm10044_vm10  ;;  %v10058_v51 = vld [vmem:[#allocation50_spill] sm:$0xff] }
 0x12c   : > { %v4644_v23 = vshll.u32 %v6370_v11, 16  ;;  %v2645_v18 = vshll.u32 %v6228_v1, 16  ;;  %v4639_v12 = vsel %vm10052_vm8, %v4629_v61, %v4638_v21  ;;  %v6371_v19 = vcombine.low %v4434_v37, %v4435_v49 }
 0x12d   : > { %vm10054_vm10 = vcmp.ne.s16.totalorder %v10053_v33, 0  ;;  %vm10055_vm13 = vnez %v9874_v62  ;;  %v2640_v63 = vsel %vm10056_vm0, %v2635_v22, %v2639_v44  ;;  %v4643_v27 = vrot.slane %v4641_v24, 3  ;;  %v2010_v33 = vld [vmem:[%s7492_s29 + $0x48] sm:$0xf]  ;;  %v2011_v24 = vld [vmem:[%s7492_s29 + $0x4c] sm:$0xf] }
 0x12e   : > { %v2492_v17 = vsel %vm10054_vm10, %v2008_v4, 0  ;;  %v2493_v7 = vsel %vm10055_vm13, %v2009_v10, 0  ;;  %v4646_v11 = vrot.slane %v4644_v23, 4  ;;  %v2643_v3 = vor.u32 %v2641_v5, %v2639_v44 }
 0x12f   : > { %vm10057_vm14 = vcmask 31744   ;;  %v2647_v61 = vrot.slane %v2645_v18, 1  ;;  %v4650_v37 = vshrl.u32 %v6371_v19, 16  ;;  %v4653_v49 = vshll.u32 %v6371_v19, 16  ;;  %v8984_v19 = vld [vmem:[%s7492_s29 + $0x94] sm:$0xf] }
 0x130   : > { %6849 = vmatprep.mubr.msk.bf16.mxu1 %vm10057_vm14, %v2640_v63  ;;  %v6229_v4 = vcombine.low %v2492_v17, %v2493_v7  ;;  %v4647_v62 = vor.u32 %v4646_v11, %v4643_v27  ;;  %v2649_v10 = vshrl.u32 %v6228_v1, 16  ;;  %vm10059_vm8 = vnez %v10058_v51  ;;  %vm10063_vm4 = vmmov %vm10057_vm14 }
 0x131   : > { %v4436_v52 = vsel %vm10059_vm8, %v8967_v9, 0  ;;  %vm10060_vm0 = vnez %v9878_v57  ;;  %vm10061_vm10 = vsmask.f32 7424  ;;  %v4652_v44 = vrot.slane %v4650_v37, 3  ;;  %6998 = vmatmul.mubr.msk.bf16.gmra.mrb[20].mxu0 %vm10057_vm14, %v4639_v12  ;;  %v2012_v37 = vld [vmem:[%s7492_s29 + $0x50] sm:$0xf] }
 0x132   : > { %v4437_v22 = vsel %vm10060_vm0, %v8970_v55, 0  ;;  %v2648_v5 = vsel %vm10061_vm10, %v2643_v3, %v2647_v61  ;;  %v4655_v23 = vrot.slane %v4653_v49, 4  ;;  %v2653_v18 = vshll.u32 %v6229_v4, 16  ;;  %vm10065_vm10 = vmmov %vm10063_vm4 }
 0x133   : > { %vm10062_vm13 = vsmask.f32 4352  ;;  %6850 = vmatmul.mubr.msk.bf16.gmra.mrb[8].mxu1 %vm10063_vm4, %v2648_v5  ;;  %v2651_v17 = vor.u32 %v2649_v10, %v2647_v61  ;;  %v6372_v7 = vcombine.low %v4436_v52, %v4437_v22  ;;  %vm10064_vm0 = vcmp.ne.s16.totalorder %v8439_v53, 0  ;;  %v10067_v61 = vld [vmem:[#allocation3_spill] sm:$0xff]  ;;  %v2013_v10 = vld [vmem:[%s7492_s29 + $0x54] sm:$0xf]  ;;  %vm10070_vm14 = vmmov %vm10065_vm10 }
 0x134   : > { %v4648_v1 = vsel %vm10062_vm13, %v4638_v21, %v4647_v62  ;;  %v2494_v63 = vsel %vm10064_vm0, %v2010_v33, 0  ;;  %v4656_v3 = vor.u32 %v4655_v23, %v4652_v44  ;;  %v2655_v27 = vrot.slane %v2653_v18, 1  ;;  %v9000_v33 = vld [vmem:[%s7492_s29 + $0x50] sm:$0xf] }
 0x135   : > { %7001 = vmatprep.mubr.msk.bf16.mxu0 %vm10065_vm10, %v4648_v1  ;;  %vm10066_vm8 = vnez %v9886_v38  ;;  %v2657_v12 = vshrl.u32 %v6229_v4, 16  ;;  %v4659_v49 = vshrl.u32 %v6372_v7, 16  ;;  %v4662_v21 = vshll.u32 %v6372_v7, 16  ;;  %v2014_v4 = vld [vmem:[%s7492_s29 + $0x58] sm:$0xf] }
 0x136   : > { %v2495_v11 = vsel %vm10066_vm8, %v2011_v24, 0  ;;  %vm10068_vm4 = vcmp.ne.s16.totalorder %v10067_v61, 0  ;;  %v4657_v22 = vsel %vm10062_vm13, %v4647_v62, %v4656_v3  ;;  %vm10069_vm0 = vsmask.f32 7424 }
 0x137   : > { %v6230_v57 = vcombine.low %v2494_v63, %v2495_v11  ;;  %v4438_v52 = vsel %vm10068_vm4, %v8984_v19, 0  ;;  %v2656_v5 = vsel %vm10069_vm0, %v2651_v17, %v2655_v27  ;;  %v2659_v44 = vor.u32 %v2657_v12, %v2655_v27  ;;  %v2015_v63 = vld [vmem:[%s7492_s29 + $0x5c] sm:$0xf]  ;;  %vm10074_vm0 = vmmov %vm10070_vm14 }
 0x138   : > { %v6373_v23 = vcombine.low %v4438_v52, %v4438_v52  ;;  %6853 = vmatprep.mubr.msk.bf16.mxu1 %vm10070_vm14, %v2656_v5  ;;  %v4661_v24 = vrot.slane %v4659_v49, 3  ;;  %v4664_v18 = vrot.slane %v4662_v21, 4  ;;  %vm10071_vm10 = vcmp.ne.s16.totalorder %v8490_v8, 0  ;;  %v2016_v21 = vld [vmem:[%s7492_s29 + $0x60] sm:$0xf] }
 0x139   : > { %v2661_v1 = vshll.u32 %v6230_v57, 16  ;;  %v2496_v7 = vsel %vm10071_vm10, %v2012_v37, 0  ;;  %v2497_v62 = vsel %vm8518_vm2, %v2013_v10, 0  ;;  %v2665_v17 = vshrl.u32 %v6230_v57, 16  ;;  %v2017_v57 = vld [vmem:[%s7492_s29 + $0x64] sm:$0xf]  ;;  %7002 = vmatmul.mubr.msk.bf16.gmra.mrb[24].mxu0 %vm10074_vm0, %v4657_v22  ;;  %vm10079_vm10 = vmmov %vm10074_vm0 }
 0x13a   : > { %v4668_v11 = vshrl.u32 %v6373_v23, 16  ;;  %v4671_v38 = vshll.u32 %v6373_v23, 16  ;;  %v3023_v27 = vsel %vm8014_vm3, %v9000_v33, 0  ;;  %v4665_v12 = vor.u32 %v4664_v18, %v4661_v24 }
 0x13b   : > { %v2663_v52 = vrot.slane %v2661_v1, 1  ;;  %v6231_v49 = vcombine.low %v2496_v7, %v2497_v62  ;;  %vm10072_vm4 = vcmp.ne.s16.totalorder %v8516_v47, 0  ;;  %vm10073_vm13 = vnez %v9897_v59  ;;  %v7405_v62 = vld [vmem:[%s7492_s29 + $0x1c] sm:$0xf] }
 0x13c   : > { %v4670_v5 = vrot.slane %v4668_v11, 3  ;;  %v4673_v8 = vrot.slane %v4671_v38, 4  ;;  %v2498_v37 = vsel %vm10072_vm4, %v2014_v4, 0  ;;  %v2499_v23 = vsel %vm10073_vm13, %v2015_v63, 0  ;;  %v10077_v38 = vld [vmem:[#allocation13_spill] sm:$0xff]  ;;  %vm10080_vm4 = vmmov %vm10074_vm0 }
 0x13d   : > { %vm10075_vm3 = vsmask.f32 4352  ;;  %vm10076_vm14 = vsmask.f32 7424  ;;  %v2667_v24 = vor.u32 %v2665_v17, %v2663_v52  ;;  %v2669_v18 = vshll.u32 %v6231_v49, 16 }
 0x13e   : > { %v4666_v25 = vsel %vm10075_vm3, %v4656_v3, %v4665_v12  ;;  %v2664_v10 = vsel %vm10076_vm14, %v2659_v44, %v2663_v52  ;;  %v10078_v1 = vsel %vm9968_vm6, %v10077_v38, 0  ;;  %v4674_v7 = vor.u32 %v4673_v8, %v4670_v5  ;;  %v2018_v3 = vld [vmem:[%s7492_s29 + $0x68] sm:$0xf]  ;;  %v2019_v11 = vld [vmem:[%s7492_s29 + $0x6c] sm:$0xf] }
 0x13f   : > { %v9027_v4 = vcombine.low %v10078_v1, %v3023_v27  ;;  %7005 = vmatprep.mubr.msk.bf16.mxu0 %vm10079_vm10, %v4666_v25  ;;  %6854 = vmatmul.mubr.msk.bf16.gmra.mrb[12].mxu1 %vm10080_vm4, %v2664_v10  ;;  %v6232_v22 = vcombine.low %v2498_v37, %v2499_v23  ;;  %v2673_v63 = vshrl.u32 %v6231_v49, 16  ;;  %v2671_v44 = vrot.slane %v2669_v18, 1  ;;  %v7406_v17 = vld [vmem:[%s7492_s29 + $0x18] sm:$0xf]  ;;  %v2020_v25 = vld [vmem:[%s7492_s29 + $0x70] sm:$0xf] }
 0x140   : > { %v6391_v52 = vcombine.low %v7406_v17, %v7405_v62  ;;  %vm10081_vm0 = vcmp.ne.s16.totalorder %v8545_v15, 0  ;;  %vm10082_vm6 = vnez %v9903_v54  ;;  %vm10083_vm3 = vcmask 1041408   ;;  %v2021_v37 = vld [vmem:[%s7492_s29 + $0x74] sm:$0xf]  ;;  %v10084_v38 = vld [vmem:[#allocation55_spill] sm:$0xff] }
 0x141   : > { %v2500_v41 = vsel %vm10081_vm0, %v2016_v21, 0  ;;  %v2501_v27 = vsel %vm10082_vm6, %v2017_v57, 0  ;;  %v2677_v10 = vshll.u32 %v6232_v22, 16  ;;  %v9042_v8 = vsel %vm10083_vm3, %v8770_v32, 0 }
 0x142   : > { %v6233_v49 = vcombine.low %v2500_v41, %v2501_v27  ;;  %v2681_v5 = vshrl.u32 %v6232_v22, 16  ;;  %v2672_v23 = vsel %vm10076_vm14, %v2667_v24, %v2671_v44  ;;  %v2675_v18 = vor.u32 %v2673_v63, %v2671_v44  ;;  %v2022_v41 = vld [vmem:[%s7492_s29 + $0x78] sm:$0xf]  ;;  %v2023_v22 = vld [vmem:[%s7492_s29 + $0x7c] sm:$0xf]  ;;  %v10089_v24 = vld [vmem:[#allocation56_spill] sm:$0xff] }
 0x143   : > { %vm10085_vm10 = vcmp.ne.s16.totalorder %v10084_v38, 0  ;;  %vm10086_vm4 = vnez %v9911_v16  ;;  %vm10087_vm0 = vsmask.f32 4352  ;;  %vm10088_vm6 = vcmask 31744  }
 0x144   : > { %v2502_v21 = vsel %vm10085_vm10, %v2018_v3, 0  ;;  %v2503_v57 = vsel %vm10086_vm4, %v2019_v11, 0  ;;  %v4675_v1 = vsel %vm10087_vm0, %v4665_v12, %v4674_v7  ;;  %6857 = vmatprep.mubr.msk.bf16.mxu1 %vm10088_vm6, %v2672_v23  ;;  %v2679_v62 = vrot.slane %v2677_v10, 1  ;;  %v2024_v23 = vld [vmem:[%s7492_s29 + $0x80] sm:$0xf] }
 0x145   : > { %v2685_v32 = vshll.u32 %v6233_v49, 16  ;;  %v6234_v17 = vcombine.low %v2502_v21, %v2503_v57  ;;  %v2689_v27 = vshrl.u32 %v6233_v49, 16  ;;  %vm10090_vm3 = vcmp.ne.s16.totalorder %v10089_v24, 0  ;;  %7006 = vmatmul.mubr.msk.bf16.gmra.mrb[28].mxu0 %vm10088_vm6, %v4675_v1  ;;  %v2025_v57 = vld [vmem:[%s7492_s29 + $0x84] sm:$0xf] }
 0x146   : > { %v2504_v63 = vsel %vm10090_vm3, %v2020_v25, 0  ;;  %vm10091_vm14 = vnez %v9916_v29  ;;  %vm10092_vm10 = vsmask.f32 7424  ;;  %v2683_v7 = vor.u32 %v2681_v5, %v2679_v62  ;;  %vm10094_vm3 = vmmov %vm10088_vm6  ;;  %v10126_v29 = vld [vmem:[#allocation22_spill] sm:$0xff] }
 0x147   : > { %v2505_v3 = vsel %vm10091_vm14, %v2021_v37, 0  ;;  %v2680_v12 = vsel %vm10092_vm10, %v2675_v18, %v2679_v62  ;;  %v2687_v44 = vrot.slane %v2685_v32, 1  ;;  %v2693_v10 = vshll.u32 %v6234_v17, 16  ;;  %7011 = vmatprep.mubr.msk.bf16.mxu0 %vm10094_vm3, %v6391_v52  ;;  %vm10095_vm14 = vmmov %vm10094_vm3  ;;  %v7407_v18 = vld [vmem:[%s7492_s29 + $0x28] sm:$0xf] }
 0x148   : > { %v6235_v21 = vcombine.low %v2504_v63, %v2505_v3  ;;  %v2697_v49 = vshrl.u32 %v6234_v17, 16  ;;  %vm10093_vm0 = vcmp.ne.s16.totalorder %v8625_v40, 0  ;;  %v2507_v37 = vsel %vm8643_vm9, %v2023_v22, 0  ;;  %6858 = vmatmul.mubr.msk.bf16.gmra.mrb[16].mxu1 %vm10095_vm14, %v2680_v12  ;;  %vm10096_vm6 = vmmov %vm10094_vm3  ;;  %v2026_v52 = vld [vmem:[%s7492_s29 + $0x88] sm:$0x1] }
 0x149   : > { %v2506_v25 = vsel %vm10093_vm0, %v2022_v41, 0  ;;  %v2688_v5 = vsel %vm10092_vm10, %v2683_v7, %v2687_v44  ;;  %v6393_v62 = vcombine.low %v7407_v18, %v8695_v2  ;;  %v2695_v1 = vrot.slane %v2693_v10, 1  ;;  %v10098_v18 = vld [vmem:[#allocation7_spill] sm:$0xff]  ;;  %vm10100_vm14 = vmmov %vm10092_vm10 }
 0x14a   : > { %v6236_v32 = vcombine.low %v2506_v25, %v2507_v37  ;;  %6861 = vmatprep.mubr.msk.bf16.mxu1 %vm10096_vm6, %v2688_v5  ;;  %v2701_v17 = vshll.u32 %v6235_v21, 16  ;;  %v2705_v63 = vshrl.u32 %v6235_v21, 16  ;;  %vm10097_vm0 = vcmp.ne.s16.totalorder %v8656_v14, 0  ;;  %v10101_v37 = vld [vmem:[#allocation9_spill] sm:$0xff]  ;;  %vm10108_vm6 = vmmov %vm10094_vm3 }
 0x14b   : > { %v2508_v22 = vsel %vm10097_vm0, %v2024_v23, 0  ;;  %v2691_v3 = vor.u32 %v2689_v27, %v2687_v44  ;;  %v2699_v12 = vor.u32 %v2697_v49, %v2695_v1  ;;  %v2509_v7 = vsel %vm8681_vm12, %v2025_v57, 0  ;;  %v10099_v27 = vld [vmem:[#allocation8_spill] sm:$0xff]  ;;  %v10104_v23 = vld [vmem:[#allocation5_spill] sm:$0xff]  ;;  %vm10116_vm12 = vmmov %vm10108_vm6 }
 0x14c   : > { %v2709_v11 = vshll.u32 %v6236_v32, 16  ;;  %v2703_v2 = vrot.slane %v2701_v17, 1  ;;  %v6237_v10 = vcombine.low %v2508_v22, %v2509_v7  ;;  %v2713_v25 = vshrl.u32 %v6236_v32, 16 }
 0x14d   : > { %v2510_v5 = vsel %vm8676_vm11, %v2026_v52, 0  ;;  %v3131_v44 = vor.u32 %v10099_v27, %v10098_v18  ;;  %v6394_v49 = vcombine.low %v8699_v0, %v8715_v26  ;;  %v2696_v32 = vsel %vm10100_vm14, %v2691_v3, %v2695_v1  ;;  %v10110_v3 = vld [vmem:[#allocation16_spill] sm:$0xff]  ;;  %vm10112_vm14 = vmmov %vm10094_vm3  ;;  %v10121_v52 = vld [vmem:[#allocation19_spill] sm:$0xff] }
 0x14e   : > { %v2711_v21 = vrot.slane %v2709_v11, 1  ;;  %v2707_v57 = vor.u32 %v2705_v63, %v2703_v2  ;;  %v2717_v17 = vshll.u32 %v6237_v10, 16  ;;  %v6238_v22 = vcombine.low %v2510_v5, %v2510_v5  ;;  %v10102_v11 = vld [vmem:[#allocation10_spill] sm:$0xff]  ;;  %v10106_v63 = vld [vmem:[#allocation20_spill] sm:$0xff]  ;;  %v10107_v5 = vld [vmem:[#allocation21_spill] sm:$0xff] }
 0x14f   : > { %v3139_v41 = vor.u32 %v10102_v11, %v10101_v37  ;;  %v10105_v28 = vcombine.low %v10103_v39, %v10104_v23  ;;  %v2704_v18 = vsel %vm10092_vm10, %v2699_v12, %v2703_v2  ;;  %v2721_v26 = vshrl.u32 %v6237_v10, 16  ;;  %v10111_v37 = vld [vmem:[#allocation11_spill] sm:$0xff]  ;;  %v10124_v11 = vld [vmem:[#allocation17_spill] sm:$0xff] }
 0x150   : > { %v2715_v7 = vor.u32 %v2713_v25, %v2711_v21  ;;  %v2719_v0 = vrot.slane %v2717_v17, 1  ;;  %v3148_v27 = vor.u32 %v10107_v5, %v10106_v63  ;;  %vm10109_vm0 = vsmask.f32 4352  ;;  %6862 = vmatmul.mubr.msk.bf16.gmra.mrb[20].mxu1 %vm10112_vm14, %v2696_v32  ;;  %v10118_v17 = vld [vmem:[#allocation15_spill] sm:$0xff]  ;;  %v10119_v63 = vld [vmem:[#allocation12_spill] sm:$0xff] }
 0x151   : > { %7012 = vmatmul.mubr.msk.bf16.vlgmr.msra.gmra.mrb[0].mxu0 %vm10094_vm3, %v10105_v28  ;;  %v3140_v1 = vsel %vm10109_vm0, %v3131_v44, %v3139_v41  ;;  %v3151_v39 = vshrl.u32 %v10111_v37, 16  ;;  %v3154_v28 = vshll.u32 %v10111_v37, 16  ;;  %vm10113_vm3 = vmmov %vm10092_vm10  ;;  %v2725_v10 = vshll.u32 %v6238_v22, 16  ;;  %6865 = vmatprep.mubr.msk.bf16.mxu1 %vm10116_vm12, %v2704_v18  ;;  %v10117_v44 = vld [vmem:[#allocation18_spill] sm:$0xff]  ;;  %v10120_v32 = vld [vmem:[#allocation23_spill] sm:$0xff] }
 0x152   : > { %7044 = vmatpush3.bf16.msra.mxu0 %v9042_v8  ;;  %7015 = vmatprep.mubr.msk.bf16.mxu0 %vm10108_vm6, %v6393_v62  ;;  %v2712_v12 = vsel %vm10113_vm3, %v2707_v57, %v2711_v21  ;;  %vm10114_vm10 = vmmov %vm10113_vm3  ;;  %v3160_v5 = vshrl.u32 %v10119_v63, 16  ;;  %v2723_v25 = vor.u32 %v2721_v26, %v2719_v0  ;;  %v3163_v37 = vshll.u32 %v10119_v63, 16  ;;  %v10122_v57 = vld [vmem:[#allocation14_spill] sm:$0xff]  ;;  %v10123_v18 = vld [vmem:[#allocation63_spill] sm:$0xff] }
 0x153   : > { %v2720_v2 = vsel %vm10114_vm10, %v2715_v7, %v2719_v0  ;;  %vm10115_vm11 = vmmov %vm10109_vm0  ;;  %v3153_v62 = vrot.slane %v3151_v39, 3  ;;  %v3156_v23 = vrot.slane %v3154_v28, 4  ;;  %v3169_v7 = vshrl.u32 %v10122_v57, 16 }
 0x154   : > { %v3149_v8 = vsel %vm10115_vm11, %v3139_v41, %v3148_v27  ;;  %v3162_v14 = vrot.slane %v3160_v5, 3  ;;  %v3172_v41 = vshll.u32 %v10122_v57, 16  ;;  %v6403_v39 = vcombine.low %v10123_v18, %v8901_v30  ;;  %vm10125_vm11 = vmmov %vm10109_vm0 }
 0x155   : > { %v3157_v22 = vor.u32 %v3156_v23, %v3153_v62  ;;  %v3165_v28 = vrot.slane %v3163_v37, 4  ;;  %v3171_v42 = vrot.slane %v3169_v7, 3  ;;  %v3178_v40 = vshrl.u32 %v10124_v11, 16  ;;  %vm10127_vm12 = vmmov %vm10108_vm6 }
 0x156   : > { %v3181_v0 = vshll.u32 %v10124_v11, 16  ;;  %v3174_v63 = vrot.slane %v3172_v41, 4  ;;  %v3187_v62 = vshrl.u32 %v10126_v29, 16  ;;  %v3190_v37 = vshll.u32 %v10126_v29, 16  ;;  %vm10129_vm0 = vmmov %vm10108_vm6 }
 0x157   : > { %v3158_v26 = vsel %vm10125_vm11, %v3148_v27, %v3157_v22  ;;  %v3166_v23 = vor.u32 %v3165_v28, %v3162_v14  ;;  %v3180_v5 = vrot.slane %v3178_v40, 3  ;;  %v10128_v7 = vcombine.low %v8722_v48, %v8733_v34  ;;  %vm10130_vm14 = vmmov %vm10125_vm11 }
 0x158   : > { %v3183_v57 = vrot.slane %v3181_v0, 4  ;;  %v3175_v11 = vor.u32 %v3174_v63, %v3171_v42  ;;  %v3189_v27 = vrot.slane %v3187_v62, 3  ;;  %v6405_v41 = vcombine.low %v8946_v50, %v8967_v9  ;;  %6866 = vmatmul.mubr.msk.bf16.gmra.mrb[24].mxu1 %vm10129_vm0, %v2712_v12  ;;  %vm10131_vm3 = vmmov %vm10129_vm0  ;;  %v10196_v9 = vld [vmem:[#allocation37_spill] sm:$0xff] }
 0x159   : > { %7016 = vmatmul.mubr.msk.bf16.gmra.mrb[4].mxu0 %vm10127_vm12, %v6394_v49  ;;  %v3196_v21 = vshrl.u32 %v9027_v4, 16  ;;  %v3167_v14 = vsel %vm10130_vm14, %v3157_v22, %v3166_v23  ;;  %v3192_v49 = vrot.slane %v3190_v37, 4  ;;  %v3199_v29 = vshll.u32 %v9027_v4, 16  ;;  %6869 = vmatprep.mubr.msk.bf16.mxu1 %vm10131_vm3, %v2720_v2  ;;  %vm10132_vm10 = vmmov %vm10125_vm11 }
 0x15a   : > { %7019 = vmatprep.mubr.msk.bf16.mxu0 %vm10108_vm6, %v10128_v7  ;;  %v3184_v40 = vor.u32 %v3183_v57, %v3180_v5  ;;  %v2727_v48 = vrot.slane %v2725_v10, 1  ;;  %v3176_v34 = vsel %vm10132_vm10, %v3166_v23, %v3175_v11  ;;  %v6406_v28 = vcombine.low %v8970_v55, %v8984_v19  ;;  %vm10133_vm11 = vmmov %vm10132_vm10  ;;  %v10150_v23 = vld [vmem:[#allocation6_spill] sm:$0xff] }
 0x15b   : > { %v3198_v42 = vrot.slane %v3196_v21, 3  ;;  %v3193_v12 = vor.u32 %v3192_v49, %v3189_v27  ;;  %v3201_v63 = vrot.slane %v3199_v29, 4  ;;  %vm10134_vm12 = vmmov %vm10132_vm10  ;;  %vm10135_vm6 = vsmask.f32 7424  ;;  %v5248_v7 = vld [vmem:[%s7492_s29 + $0x20] sm:$0xf] }
 0x15c   : > { %v3185_v0 = vsel %vm10133_vm11, %v3175_v11, %v3184_v40  ;;  %v2728_v2 = vsel %vm10135_vm6, %v2723_v25, %v2727_v48  ;;  %v10136_v10 = vcombine.low %v8742_v36, %v8755_v56  ;;  %vm10137_vm14 = vmmov %vm10132_vm10  ;;  %v10138_v62 = vcombine.low %v8758_v20, %v8763_v60  ;;  %v9176_v20 = vld [vmem:[%s7492_s29 + $0x54] sm:$0xf]  ;;  %v9179_v60 = vld [vmem:[%s7492_s29 + $0x58] sm:$0xf] }
 0x15d   : > { %v3194_v22 = vsel %vm10134_vm12, %v3184_v40, %v3193_v12  ;;  %v9149_v4 = vor.u32 %v3201_v63, %v3198_v42  ;;  %vm10139_vm3 = vmmov %vm10129_vm0  ;;  %v10142_v36 = vcombine.low %v8784_v6, %v8794_v58  ;;  %v10144_v56 = vcombine.low %v8802_v31, %v8822_v45  ;;  %v10146_v25 = vld [vmem:[#allocation2_spill] sm:$0xff]  ;;  %v5246_v6 = vld [vmem:[%s7492_s29 + $0x18] sm:$0xf] }
 0x15e   : > { %vm10140_vm10 = vmmov %vm10129_vm0  ;;  %v5247_v58 = vld [vmem:[%s7492_s29 + $0x1c] sm:$0xf]  ;;  %v3024_v31 = vsel %vm9984_vm15, %v9176_v20, 0  ;;  %v10153_v11 = vcombine.low %v10110_v3, %v8847_v13  ;;  %v10155_v40 = vcombine.low %v10118_v17, %v10117_v44  ;;  %v9209_v48 = vld [vmem:[%s7492_s29 + $0x60] sm:$0xf] }
 0x15f   : > { %v9158_v21 = vsel %vm10137_vm14, %v3193_v12, %v9149_v4  ;;  %vm10141_vm11 = vmmov %vm10129_vm0  ;;  %v5280_v37 = vsel %vm9977_vm5, %v5247_v58, 0  ;;  %v9206_v29 = vld [vmem:[%s7492_s29 + $0x5c] sm:$0xf]  ;;  %v10160_v3 = vld [vmem:[#allocation27_spill] sm:$0xff] }
 0x160   : > { %6870 = vmatmul.mubr.msk.bf16.gmra.mrb[28].mxu1 %vm10140_vm10, %v2728_v2  ;;  %vm10143_vm12 = vmmov %vm10129_vm0  ;;  %v10158_v42 = vld [vmem:[#allocation25_spill] sm:$0xff]  ;;  %v9217_v63 = vld [vmem:[%s7492_s29 + $0x64] sm:$0xf] }
 0x161   : > { %7020 = vmatmul.mubr.msk.bf16.gmra.mrb[8].mxu0 %vm10129_vm0, %v10136_v10  ;;  %6875 = vmatprep.mubr.msk.bf16.mxu1 %vm10141_vm11, %v3140_v1  ;;  %vm10145_vm6 = vmmov %vm10129_vm0  ;;  %vm10159_vm5 = vcmp.ne.s16.totalorder %v10158_v42, 0  ;;  %vm10161_vm11 = vnez %v10160_v3  ;;  %v9220_v44 = vld [vmem:[%s7492_s29 + $0x68] sm:$0xf]  ;;  %v10163_v10 = vld [vmem:[#allocation30_spill] sm:$0xff] }
 0x162   : > { %7023 = vmatprep.mubr.msk.bf16.mxu0 %vm10139_vm3, %v10138_v62  ;;  %vm10147_vm14 = vmmov %vm10129_vm0  ;;  %vm10151_vm3 = vcmp.ne.s16.totalorder %v10150_v23, 0  ;;  %v5281_v13 = vsel %vm10159_vm5, %v5248_v7, 0  ;;  %v10165_v62 = vld [vmem:[#allocation33_spill] sm:$0xff]  ;;  %v5250_v45 = vld [vmem:[%s7492_s29 + $0x28] sm:$0xf]  ;;  %v10171_v23 = vcombine.low %v10121_v52, %v10120_v32 }
 0x163   : > { %v5279_v5 = vsel %vm10151_vm3, %v5246_v6, 0  ;;  %vm10154_vm10 = vmmov %vm10129_vm0  ;;  %v10167_v6 = vld [vmem:[#allocation34_spill] sm:$0xff]  ;;  %v9242_v7 = vld [vmem:[%s7492_s29 + $0x6c] sm:$0xf] }
 0x164   : > { %vm10156_vm15 = vmmov %vm10129_vm0  ;;  %v6424_v49 = vcombine.low %v5279_v5, %v5280_v37  ;;  %v5252_v52 = vld [vmem:[%s7492_s29 + $0x30] sm:$0xf]  ;;  %v10174_v32 = vld [vmem:[#allocation29_spill] sm:$0xff] }
 0x165   : > { %vm10175_vm5 = vcmp.ne.s16.totalorder %v10174_v32, 0 }
 0x166   : > { %v5283_v42 = vsel %vm10175_vm5, %v5250_v45, 0 }
 0x168   : > { %6876 = vmatmul.mubr.msk.bf16.vlgmr.msra.gmra.mrb[0].mxu1 %vm10129_vm0, %v3149_v8  ;;  %v3025_v8 = vsel %vm9988_vm7, %v9179_v60, 0  ;;  %vm10157_vm7 = vmmov %vm10129_vm0 }
 0x169   : > { %7024 = vmatmul.mubr.msk.bf16.gmra.mrb[12].mxu0 %vm10143_vm12, %v10142_v36  ;;  %7078 = vmatpush3.bf16.msra.mxu1 %v10146_v25  ;;  %v6265_v27 = vcombine.low %v3024_v31, %v3025_v8  ;;  %vm10162_vm12 = vmmov %vm10129_vm0  ;;  %vm10166_vm0 = vnez %v10165_v62  ;;  %v5400_v25 = vshll.u32 %v6424_v49, 16  ;;  %v5251_v8 = vld [vmem:[%s7492_s29 + $0x2c] sm:$0xf] }
 0x16a   : > { %7027 = vmatprep.mubr.msk.bf16.mxu0 %vm10145_vm6, %v10144_v56  ;;  %6879 = vmatprep.mubr.msk.bf16.mxu1 %vm10147_vm14, %v3158_v26  ;;  %v5249_v26 = vld [vmem:[%s7492_s29 + $0x24] sm:$0xf]  ;;  %vm10164_vm6 = vnez %v10163_v10  ;;  %v3027_v36 = vsel %vm10166_vm0, %v9209_v48, 0  ;;  %vm10168_vm14 = vnez %v10167_v6  ;;  %vm10193_vm5 = vmmov %vm10157_vm7 }
 0x16b   : > { %v5282_v12 = vsel %vm10161_vm11, %v5249_v26, 0  ;;  %v3205_v17 = vshrl.u32 %v6265_v27, 16  ;;  %v3208_v2 = vshll.u32 %v6265_v27, 16  ;;  %v3028_v58 = vsel %vm10168_vm14, %v9217_v63, 0  ;;  %v9245_v26 = vld [vmem:[%s7492_s29 + $0x70] sm:$0xf] }
 0x16c   : > { %v6425_v56 = vcombine.low %v5281_v13, %v5282_v12  ;;  %v5402_v27 = vrot.slane %v5400_v25, 1  ;;  %v10176_v13 = vld [vmem:[#allocation31_spill] sm:$0xff]  ;;  %v9258_v12 = vld [vmem:[%s7492_s29 + $0x74] sm:$0xf] }
 0x16d   : > { %v3207_v5 = vrot.slane %v3205_v17, 3  ;;  %v3210_v57 = vrot.slane %v3208_v2, 4  ;;  %vm10177_vm11 = vnez %v10176_v13  ;;  %v9261_v17 = vld [vmem:[%s7492_s29 + $0x78] sm:$0xf] }
 0x16e   : > { %v5284_v3 = vsel %vm10177_vm11, %v5251_v8, 0  ;;  %v5409_v62 = vshrl.u32 %v6425_v56, 16  ;;  %v10186_v8 = vld [vmem:[#allocation32_spill] sm:$0xff]  ;;  %vm10194_vm11 = vsmask.f32 7424 }
 0x16f   : > { %v6426_v45 = vcombine.low %v5283_v42, %v5284_v3  ;;  %v9289_v3 = vld [vmem:[%s7492_s29 + $0x7c] sm:$0xf] }
 0x170   : > { %6880 = vmatmul.mubr.msk.bf16.gmra.mrb[4].mxu1 %vm10157_vm7, %v3167_v14  ;;  %v3026_v14 = vsel %vm10164_vm6, %v9206_v29, 0 }
 0x171   : > { %7028 = vmatmul.mubr.msk.bf16.gmra.mrb[16].mxu0 %vm10154_vm10, %v10153_v11  ;;  %6883 = vmatprep.mubr.msk.bf16.mxu1 %vm10162_vm12, %v3176_v34  ;;  %v10169_v34 = vld [vmem:[#allocation36_spill] sm:$0xff]  ;;  %v6266_v31 = vcombine.low %v3026_v14, %v3027_v36  ;;  %vm10172_vm10 = vmmov %vm10157_vm7  ;;  %v5398_v11 = vshrl.u32 %v6424_v49, 16  ;;  %v10179_v49 = vld [vmem:[#allocation38_spill] sm:$0xff]  ;;  %v3211_v14 = vor.u32 %v3210_v57, %v3207_v5 }
 0x172   : > { %7031 = vmatprep.mubr.msk.bf16.mxu0 %vm10156_vm15, %v10155_v40  ;;  %vm10170_vm3 = vnez %v10169_v34  ;;  %vm10173_vm15 = vmmov %vm10157_vm7  ;;  %v5405_v40 = vshll.u32 %v6425_v56, 16  ;;  %vm10180_vm6 = vnez %v10179_v49  ;;  %v10188_v5 = vld [vmem:[#allocation35_spill] sm:$0xff]  ;;  %v5413_v49 = vshll.u32 %v6426_v45, 16 }
 0x173   : > { %v3029_v1 = vsel %vm10170_vm3, %v9220_v44, 0  ;;  %vm10178_vm12 = vmmov %vm10157_vm7  ;;  %v3214_v30 = vshrl.u32 %v6266_v31, 16  ;;  %v3217_v18 = vshll.u32 %v6266_v31, 16  ;;  %v3030_v2 = vsel %vm10180_vm6, %v9242_v7, 0 }
 0x174   : > { %v6267_v37 = vcombine.low %v3028_v58, %v3029_v1  ;;  %v5403_v6 = vor.u32 %v5402_v27, %v5398_v11  ;;  %v5407_v58 = vrot.slane %v5405_v40, 1  ;;  %v3033_v31 = vsel %vm10040_vm1, %v9261_v17, 0  ;;  %v5254_v27 = vld [vmem:[%s7492_s29 + $0x38] sm:$0xf] }
 0x175   : > { %vm10187_vm3 = vcmp.ne.s16.totalorder %v10186_v8, 0  ;;  %v3219_v11 = vrot.slane %v3217_v18, 4  ;;  %v10190_v40 = vcombine.low %v8919_v46, %v8936_v35  ;;  %vm10192_vm1 = vsmask.f32 4352  ;;  %v9302_v18 = vld [vmem:[%s7492_s29 + $0x84] sm:$0xf] }
 0x176   : > { %v3223_v36 = vshrl.u32 %v6267_v37, 16  ;;  %v3226_v25 = vshll.u32 %v6267_v37, 16  ;;  %v3216_v37 = vrot.slane %v3214_v30, 3  ;;  %v3212_v32 = vsel %vm10192_vm1, %v9149_v4, %v3211_v14  ;;  %v5255_v30 = vld [vmem:[%s7492_s29 + $0x3c] sm:$0xf] }
 0x177   : > { %v5411_v46 = vor.u32 %v5409_v62, %v5407_v58  ;;  %v5408_v4 = vsel %vm10194_vm11, %v5403_v6, %v5407_v58  ;;  %vm10197_vm6 = vcmp.ne.s16.totalorder %v10196_v9, 0  ;;  %v5256_v62 = vld [vmem:[%s7492_s29 + $0x40] sm:$0xf]  ;;  %v5257_v8 = vld [vmem:[%s7492_s29 + $0x44] sm:$0xf] }
 0x178   : > { %6884 = vmatmul.mubr.msk.bf16.gmra.mrb[8].mxu1 %vm10157_vm7, %v3185_v0  ;;  %v10181_v0 = vld [vmem:[#allocation42_spill] sm:$0xff]  ;;  %v3225_v42 = vrot.slane %v3223_v36, 3  ;;  %v3220_v50 = vor.u32 %v3219_v11, %v3216_v37  ;;  %v5415_v11 = vrot.slane %v5413_v49, 1 }
 0x179   : > { %7032 = vmatmul.mubr.msk.bf16.gmra.mrb[20].mxu0 %vm10172_vm10, %v10171_v23  ;;  %6887 = vmatprep.mubr.msk.bf16.mxu1 %vm10178_vm12, %v3194_v22  ;;  %vm10182_vm0 = vnez %v10181_v0  ;;  %v10183_v22 = vld [vmem:[#allocation41_spill] sm:$0xff]  ;;  %v5285_v23 = vsel %vm10187_vm3, %v5252_v52, 0  ;;  %vm10189_vm10 = vnez %v10188_v5  ;;  %v3228_v52 = vrot.slane %v3226_v25, 4  ;;  %vm10195_vm12 = vmmov %vm10193_vm5  ;;  %v10198_v36 = vld [vmem:[#allocation46_spill] sm:$0xff] }
 0x17a   : > { %7035 = vmatprep.mubr.msk.bf16.mxu0 %vm10173_vm15, %v6403_v39  ;;  %v5253_v39 = vld [vmem:[%s7492_s29 + $0x34] sm:$0xf]  ;;  %v3031_v10 = vsel %vm10182_vm0, %v9245_v26, 0  ;;  %vm10184_vm14 = vnez %v10183_v22  ;;  %vm10191_vm15 = vmmov %vm10157_vm7  ;;  %vm10199_vm0 = vnez %v10198_v36 }
 0x17b   : > { %v3032_v34 = vsel %vm10184_vm14, %v9258_v12, 0  ;;  %v5286_v56 = vsel %vm10189_vm10, %v5253_v39, 0  ;;  %v6268_v57 = vcombine.low %v3030_v2, %v3031_v10  ;;  %v9292_v39 = vld [vmem:[%s7492_s29 + $0x80] sm:$0xf]  ;;  %v9308_v10 = vld [vmem:[%s7492_s29 + $0x88] sm:$0xf]  ;;  %v3229_v58 = vor.u32 %v3228_v52, %v3225_v42  ;;  %vm10211_vm11 = vmmov %vm10195_vm12 }
 0x17c   : > { %v6269_v13 = vcombine.low %v3032_v34, %v3033_v31  ;;  %v9298_v35 = vcombine.low %v5285_v23, %v5286_v56  ;;  %v3034_v25 = vsel %vm10199_vm0, %v9289_v3, 0  ;;  %v10202_v22 = vld [vmem:[#allocation40_spill] sm:$0xff]  ;;  %v5417_v23 = vshrl.u32 %v6426_v45, 16 }
 0x17d   : > { %v3232_v2 = vshrl.u32 %v6268_v57, 16  ;;  %v3235_v0 = vshll.u32 %v6268_v57, 16  ;;  %vm10203_vm3 = vnez %v10202_v22  ;;  %vm10204_vm10 = vnez %v10058_v51  ;;  %v10205_v57 = vld [vmem:[#allocation52_spill] sm:$0xff] }
 0x17e   : > { %v5288_v34 = vsel %vm10203_vm3, %v5255_v30, 0  ;;  %v3241_v1 = vshrl.u32 %v6269_v13, 16  ;;  %v3244_v31 = vshll.u32 %v6269_v13, 16  ;;  %v5421_v5 = vshll.u32 %v9298_v35, 16  ;;  %v10207_v13 = vld [vmem:[#allocation39_spill] sm:$0xff] }
 0x17f   : > { %v3036_v56 = vsel %vm10204_vm10, %v9302_v18, 0  ;;  %v3221_v42 = vsel %vm10192_vm1, %v3211_v14, %v3220_v50  ;;  %v10209_v30 = vld [vmem:[#allocation43_spill] sm:$0xff]  ;;  %v5419_v14 = vor.u32 %v5417_v23, %v5415_v11  ;;  %v5260_v22 = vld [vmem:[%s7492_s29 + $0x50] sm:$0xf]  ;;  %vm10217_vm10 = vcmp.ne.s16.totalorder %v10067_v61, 0 }
 0x180   : > { %6888 = vmatmul.mubr.msk.bf16.gmra.mrb[12].mxu1 %vm10193_vm5, %v9158_v21  ;;  %v10200_v21 = vld [vmem:[#allocation49_spill] sm:$0xff]  ;;  %vm10210_vm5 = vnez %v10209_v30 }
 0x181   : > { %7036 = vmatmul.mubr.msk.bf16.gmra.mrb[24].mxu0 %vm10191_vm15, %v10190_v40  ;;  %6891 = vmatprep.mubr.msk.bf16.mxu1 %vm10195_vm12, %v3212_v32  ;;  %vm10201_vm14 = vnez %v10200_v21  ;;  %vm10206_vm15 = vnez %v10205_v57  ;;  %v3237_v40 = vrot.slane %v3235_v0, 4  ;;  %v5290_v51 = vsel %vm10210_vm5, %v5257_v8, 0  ;;  %vm10212_vm12 = vmmov %vm10192_vm1  ;;  %v5261_v8 = vld [vmem:[%s7492_s29 + $0x54] sm:$0xf] }
 0x182   : > { %7039 = vmatprep.mubr.msk.bf16.mxu0 %vm10157_vm7, %v6405_v41  ;;  %v5287_v41 = vsel %vm10197_vm6, %v5254_v27, 0  ;;  %v3035_v6 = vsel %vm10201_vm14, %v9292_v39, 0  ;;  %v3037_v37 = vsel %vm10206_vm15, %v9308_v10, 0  ;;  %v3234_v27 = vrot.slane %v3232_v2, 3  ;;  %vm10213_vm6 = vmmov %vm10211_vm11  ;;  %v10219_v57 = vld [vmem:[#allocation44_spill] sm:$0xff] }
 0x183   : > { %v6270_v32 = vcombine.low %v3034_v25, %v3035_v6  ;;  %v6428_v52 = vcombine.low %v5287_v41, %v5288_v34  ;;  %vm10208_vm7 = vcmp.ne.s16.totalorder %v10207_v13, 0  ;;  %v3230_v49 = vsel %vm10212_vm12, %v3220_v50, %v3229_v58  ;;  %vm10214_vm0 = vmmov %vm10213_vm6  ;;  %v5258_v25 = vld [vmem:[%s7492_s29 + $0x48] sm:$0xf]  ;;  %v5259_v50 = vld [vmem:[%s7492_s29 + $0x4c] sm:$0xf] }
 0x184   : > { %v5289_v45 = vsel %vm10208_vm7, %v5256_v62, 0  ;;  %v3243_v2 = vrot.slane %v3241_v1, 3  ;;  %v3246_v0 = vrot.slane %v3244_v31, 4  ;;  %v6271_v9 = vcombine.low %v3036_v56, %v3037_v37  ;;  %v9342_v62 = vld [vmem:[%s7492_s29 + $0x8c] sm:$0xf]  ;;  %vm10216_vm3 = vmmov %vm10214_vm0  ;;  %v10224_v13 = vld [vmem:[#allocation48_spill] sm:$0xff] }
 0x185   : > { %v5423_v41 = vrot.slane %v5421_v5, 1  ;;  %v3238_v36 = vor.u32 %v3237_v40, %v3234_v27  ;;  %v9345_v55 = vcombine.low %v5289_v45, %v5290_v51  ;;  %v3250_v19 = vshrl.u32 %v6270_v32, 16  ;;  %v10221_v37 = vld [vmem:[#allocation47_spill] sm:$0xff]  ;;  %vm10223_vm5 = vmmov %vm10212_vm12 }
 0x186   : > { %vm10215_vm14 = vsmask.f32 7424  ;;  %v5429_v6 = vshll.u32 %v6428_v52, 16  ;;  %v3247_v34 = vor.u32 %v3246_v0, %v3243_v2  ;;  %v3259_v1 = vshrl.u32 %v6271_v9, 16  ;;  %v10226_v45 = vld [vmem:[#allocation51_spill] sm:$0xff] }
 0x187   : > { %v5416_v21 = vsel %vm10215_vm14, %v5411_v46, %v5415_v11  ;;  %v3262_v31 = vshll.u32 %v6271_v9, 16  ;;  %v3038_v23 = vsel %vm10217_vm10, %v9342_v62, 0  ;;  %vm10218_vm15 = vmmov %vm10215_vm14  ;;  %v5433_v56 = vshrl.u32 %v6428_v52, 16 }
 0x188   : > { %6892 = vmatmul.mubr.msk.bf16.gmra.mrb[16].mxu1 %vm10214_vm0, %v3221_v42  ;;  %v5424_v5 = vsel %vm10218_vm15, %v5419_v14, %v5423_v41  ;;  %vm10220_vm1 = vcmp.ne.s16.totalorder %v10219_v57, 0  ;;  %vm10222_vm7 = vnez %v10221_v37  ;;  %v5437_v27 = vshll.u32 %v9345_v55, 16  ;;  %vm10230_vm14 = vmmov %vm10216_vm3 }
 0x189   : > { %7040 = vmatmul.mubr.msk.bf16.gmra.mrb[28].mxu0 %vm10211_vm11, %v6406_v28  ;;  %v3253_v28 = vshll.u32 %v6270_v32, 16  ;;  %6895 = vmatprep.mubr.msk.bf16.mxu1 %vm10216_vm3, %v3230_v49  ;;  %v5291_v46 = vsel %vm10220_vm1, %v5258_v25, 0  ;;  %v5292_v11 = vsel %vm10222_vm7, %v5259_v50, 0  ;;  %v3252_v40 = vrot.slane %v3250_v19, 3  ;;  %v5262_v25 = vld [vmem:[%s7492_s29 + $0x58] sm:$0xf]  ;;  %vm10231_vm10 = vmmov %vm10216_vm3 }
 0x18a   : > { %7045 = vmatprep.mubr.msk.bf16.mxu0 %vm10213_vm6, %v5408_v4  ;;  %v5425_v4 = vshrl.u32 %v9298_v35, 16  ;;  %v3239_v35 = vsel %vm10223_vm5, %v3229_v58, %v3238_v36  ;;  %v5431_v42 = vrot.slane %v5429_v6, 1  ;;  %vm10225_vm11 = vcmp.ne.s16.totalorder %v10224_v13, 0  ;;  %vm10228_vm6 = vmmov %vm10214_vm0  ;;  %v5263_v50 = vld [vmem:[%s7492_s29 + $0x5c] sm:$0xf] }
 0x18b   : > { %v3255_v32 = vrot.slane %v3253_v28, 4  ;;  %v5293_v61 = vsel %vm10225_vm11, %v5260_v22, 0  ;;  %vm10227_vm12 = vnez %v10226_v45  ;;  %v6272_v30 = vcombine.low %v3038_v23, %v3038_v23  ;;  %vm10229_vm0 = vmmov %vm10223_vm5 }
 0x18c   : > { %v5294_v52 = vsel %vm10227_vm12, %v5261_v8, 0  ;;  %v3248_v51 = vsel %vm10229_vm0, %v3238_v36, %v3247_v34  ;;  %v6430_v49 = vcombine.low %v5291_v46, %v5292_v11  ;;  %v3261_v58 = vrot.slane %v3259_v1, 3  ;;  %v5264_v1 = vld [vmem:[%s7492_s29 + $0x60] sm:$0xf]  ;;  %vm10234_vm7 = vmmov %vm10218_vm15 }
 0x18d   : > { %v3264_v2 = vrot.slane %v3262_v31, 4  ;;  %v5427_v0 = vor.u32 %v5425_v4, %v5423_v41  ;;  %v5435_v9 = vor.u32 %v5433_v56, %v5431_v42  ;;  %v5439_v14 = vrot.slane %v5437_v27, 1  ;;  %v5265_v31 = vld [vmem:[%s7492_s29 + $0x64] sm:$0xf]  ;;  %vm10235_vm5 = vmmov %vm10229_vm0  ;;  %v10236_v27 = vld [vmem:[#allocation53_spill] sm:$0xff] }
 0x18e   : > { %v3256_v19 = vor.u32 %v3255_v32, %v3252_v40  ;;  %v6431_v28 = vcombine.low %v5293_v61, %v5294_v52  ;;  %v3271_v36 = vshll.u32 %v6272_v30, 16  ;;  %v5445_v6 = vshll.u32 %v6430_v49, 16  ;;  %vm10238_vm12 = vmmov %vm10216_vm3  ;;  %v5266_v52 = vld [vmem:[%s7492_s29 + $0x68] sm:$0xf] }
 0x18f   : > { %v3265_v22 = vor.u32 %v3264_v2, %v3261_v58  ;;  %v5432_v8 = vsel %vm10218_vm15, %v5427_v0, %v5431_v42  ;;  %v5441_v41 = vshrl.u32 %v9345_v55, 16  ;;  %vm10232_vm1 = vcmp.ne.s16.totalorder %v8439_v53, 0  ;;  %v5269_v58 = vld [vmem:[%s7492_s29 + $0x74] sm:$0xf]  ;;  %vm10246_vm15 = vmmov %vm10235_vm5 }
 0x190   : > { %6896 = vmatmul.mubr.msk.bf16.gmra.mrb[20].mxu1 %vm10216_vm3, %v3239_v35  ;;  %v5295_v4 = vsel %vm10232_vm1, %v5262_v25, 0  ;;  %v5440_v56 = vsel %vm10234_vm7, %v5435_v9, %v5439_v14  ;;  %v3257_v57 = vsel %vm10235_vm5, %v3247_v34, %v3256_v19  ;;  %v5449_v46 = vshrl.u32 %v6430_v49, 16  ;;  %v5268_v49 = vld [vmem:[%s7492_s29 + $0x70] sm:$0xf] }
 0x191   : > { %7046 = vmatmul.mubr.msk.bf16.vlgmr.msra.gmra.mrb[0].mxu0 %vm10228_vm6, %v5416_v21  ;;  %6899 = vmatprep.mubr.msk.bf16.mxu1 %vm10231_vm10, %v3248_v51  ;;  %v3268_v21 = vshrl.u32 %v6272_v30, 16  ;;  %v5453_v37 = vshll.u32 %v6431_v28, 16  ;;  %v3273_v35 = vrot.slane %v3271_v36, 4  ;;  %vm10237_vm11 = vcmp.ne.s16.totalorder %v10236_v27, 0  ;;  %vm10240_vm6 = vmmov %vm10216_vm3  ;;  %v5267_v30 = vld [vmem:[%s7492_s29 + $0x6c] sm:$0xf] }
 0x192   : > { %7049 = vmatprep.mubr.msk.bf16.mxu0 %vm10230_vm14, %v5424_v5  ;;  %v5296_v5 = vsel %vm10066_vm8, %v5263_v50, 0  ;;  %v5297_v40 = vsel %vm10237_vm11, %v5264_v1, 0  ;;  %v5298_v53 = vsel %vm8518_vm2, %v5265_v31, 0  ;;  %v5447_v55 = vrot.slane %v5445_v6, 1  ;;  %vm10239_vm8 = vmmov %vm10229_vm0  ;;  %v10257_v27 = vld [vmem:[#allocation58_spill] sm:$0xff] }
 0x193   : > { %v3270_v11 = vrot.slane %v3268_v21, 3  ;;  %v3266_v32 = vsel %vm10239_vm8, %v3256_v19, %v3265_v22  ;;  %v6432_v34 = vcombine.low %v5295_v4, %v5296_v5  ;;  %v5443_v42 = vor.u32 %v5441_v41, %v5439_v14  ;;  %vm10241_vm0 = vmmov %vm10216_vm3  ;;  %v5273_v41 = vld [vmem:[%s7492_s29 + $0x84] sm:$0xf] }
 0x194   : > { %v5451_v13 = vor.u32 %v5449_v46, %v5447_v55  ;;  %v5455_v61 = vrot.slane %v5453_v37, 1  ;;  %v6433_v45 = vcombine.low %v5297_v40, %v5298_v53  ;;  %vm10242_vm14 = vmmov %vm10241_vm0  ;;  %v5457_v0 = vshrl.u32 %v6431_v28, 16 }
 0x195   : > { %v3274_v43 = vor.u32 %v3273_v35, %v3270_v11  ;;  %v5461_v51 = vshll.u32 %v6432_v34, 16  ;;  %vm10243_vm2 = vmmov %vm10234_vm7  ;;  %vm10244_vm3 = vcmp.ne.s16.totalorder %v8516_v47, 0  ;;  %v5300_v14 = vsel %vm10073_vm13, %v5267_v30, 0 }
 0x196   : > { %v5448_v2 = vsel %vm10243_vm2, %v5443_v42, %v5447_v55  ;;  %v5299_v9 = vsel %vm10244_vm3, %v5266_v52, 0  ;;  %vm10245_vm10 = vmmov %vm10243_vm2  ;;  %v5465_v25 = vshrl.u32 %v6432_v34, 16  ;;  %v5469_v50 = vshll.u32 %v6433_v45, 16  ;;  %v5276_v34 = vld [vmem:[%s7492_s29 + $0x90] sm:$0xf] }
 0x197   : > { %v5456_v19 = vsel %vm10245_vm10, %v5451_v13, %v5455_v61  ;;  %v3275_v21 = vsel %vm10246_vm15, %v3265_v22, %v3274_v43  ;;  %v6298_v36 = vcombine.low %v9000_v33, %v9176_v20  ;;  %vm10247_vm1 = vcmp.ne.s16.totalorder %v8545_v15, 0  ;;  %vm10249_vm13 = vmmov %vm10241_vm0  ;;  %v5270_v20 = vld [vmem:[%s7492_s29 + $0x78] sm:$0xf]  ;;  %v5271_v15 = vld [vmem:[%s7492_s29 + $0x7c] sm:$0xf] }
 0x198   : > { %6900 = vmatmul.mubr.msk.bf16.gmra.mrb[24].mxu1 %vm10241_vm0, %v3257_v57  ;;  %v5301_v28 = vsel %vm10247_vm1, %v5268_v49, 0  ;;  %vm10248_vm7 = vnez %v9903_v54  ;;  %v5463_v59 = vrot.slane %v5461_v51, 1  ;;  %v6434_v6 = vcombine.low %v5299_v9, %v5300_v14  ;;  %vm10250_vm5 = vmmov %vm10241_vm0  ;;  %v5272_v54 = vld [vmem:[%s7492_s29 + $0x80] sm:$0xf]  ;;  %v5277_v42 = vld [vmem:[%s7492_s29 + $0x94] sm:$0xf] }
 0x199   : > { %7050 = vmatmul.mubr.msk.bf16.gmra.mrb[4].mxu0 %vm10238_vm12, %v5432_v8  ;;  %6903 = vmatprep.mubr.msk.bf16.mxu1 %vm10242_vm14, %v3266_v32  ;;  %v5302_v47 = vsel %vm10248_vm7, %v5269_v58, 0  ;;  %v5459_v1 = vor.u32 %v5457_v0, %v5455_v61  ;;  %vm10251_vm11 = vmmov %vm10241_vm0  ;;  %v5471_v31 = vrot.slane %v5469_v50, 1  ;;  %v5473_v23 = vshrl.u32 %v6433_v45, 16  ;;  %v10264_v45 = vld [vmem:[#allocation57_spill] sm:$0xff]  ;;  %v10268_v9 = vld [vmem:[#allocation60_spill] sm:$0xff] }
 0x19a   : > { %7053 = vmatprep.mubr.msk.bf16.mxu0 %vm10240_vm6, %v5440_v56  ;;  %v5467_v22 = vor.u32 %v5465_v25, %v5463_v59  ;;  %v6435_v33 = vcombine.low %v5301_v28, %v5302_v47  ;;  %vm10252_vm12 = vmmov %vm10241_vm0  ;;  %v5477_v8 = vshll.u32 %v6434_v6, 16  ;;  %vm10254_vm6 = vcmp.ne.s16.totalorder %v10084_v38, 0 }
 0x19b   : > { %vm10253_vm8 = vmmov %vm10243_vm2  ;;  %v5303_v5 = vsel %vm10254_vm6, %v5270_v20, 0  ;;  %v5304_v56 = vsel %vm10086_vm4, %v5271_v15, 0  ;;  %v6299_v57 = vcombine.low %v9179_v60, %v9206_v29  ;;  %v5481_v37 = vshrl.u32 %v6434_v6, 16 }
 0x19c   : > { %v5464_v4 = vsel %vm10253_vm8, %v5459_v1, %v5463_v59  ;;  %vm10255_vm0 = vmmov %vm10243_vm2  ;;  %v5485_v11 = vshll.u32 %v6435_v33, 16  ;;  %v6300_v35 = vcombine.low %v9209_v48, %v9217_v63  ;;  %vm10256_vm14 = vcmp.ne.s16.totalorder %v10089_v24, 0  ;;  %v5274_v63 = vld [vmem:[%s7492_s29 + $0x88] sm:$0xf]  ;;  %v5275_v24 = vld [vmem:[%s7492_s29 + $0x8c] sm:$0xf] }
 0x19d   : > { %v5472_v46 = vsel %vm10255_vm0, %v5467_v22, %v5471_v31  ;;  %v5305_v38 = vsel %vm10256_vm14, %v5272_v54, 0  ;;  %vm10258_vm2 = vnez %v10257_v27  ;;  %vm10259_vm4 = vmmov %vm10250_vm5  ;;  %v5479_v60 = vrot.slane %v5477_v8, 1 }
 0x19e   : > { %v5306_v16 = vsel %vm10258_vm2, %v5273_v41, 0  ;;  %v6436_v29 = vcombine.low %v5303_v5, %v5304_v56  ;;  %vm10260_vm3 = vmmov %vm10259_vm4  ;;  %v5475_v40 = vor.u32 %v5473_v23, %v5471_v31  ;;  %v5487_v55 = vrot.slane %v5485_v11, 1 }
 0x19f   : > { %vm10261_vm10 = vmmov %vm10260_vm3  ;;  %v5483_v53 = vor.u32 %v5481_v37, %v5479_v60  ;;  %v6437_v48 = vcombine.low %v5305_v38, %v5306_v16  ;;  %v5489_v61 = vshrl.u32 %v6435_v33, 16  ;;  %vm10265_vm7 = vcmp.ne.s16.totalorder %v10264_v45, 0  ;;  %v10277_v33 = vld [vmem:[#allocation61_spill] sm:$0xff] }
 0x1a0   : > { %6904 = vmatmul.mubr.msk.bf16.gmra.mrb[28].mxu1 %vm10251_vm11, %v3275_v21  ;;  %vm10262_vm15 = vmmov %vm10260_vm3  ;;  %v5493_v32 = vshll.u32 %v6436_v29, 16  ;;  %v5307_v52 = vsel %vm10265_vm7, %v5274_v63, 0  ;;  %v5308_v43 = vsel %vm8643_vm9, %v5275_v24, 0  ;;  %v6301_v49 = vcombine.low %v9220_v44, %v9242_v7 }
 0x1a1   : > { %7054 = vmatmul.mubr.msk.bf16.gmra.mrb[8].mxu0 %vm10249_vm13, %v5448_v2  ;;  %6925 = vmatprep.mubr.msk.bf16.mxu1 %vm10252_vm12, %v6298_v36  ;;  %vm10263_vm1 = vmmov %vm10255_vm0  ;;  %v5497_v58 = vshrl.u32 %v6436_v29, 16  ;;  %v5501_v2 = vshll.u32 %v6437_v48, 16  ;;  %v6302_v0 = vcombine.low %v9245_v26, %v9258_v12  ;;  %v6438_v21 = vcombine.low %v5307_v52, %v5308_v43  ;;  %v5278_v26 = vld [vmem:[%s7492_s29 + $0x98] sm:$0x1] }
 0x1a2   : > { %7057 = vmatprep.mubr.msk.bf16.mxu0 %vm10250_vm5, %v5456_v19  ;;  %v5480_v13 = vsel %vm10263_vm1, %v5475_v40, %v5479_v60  ;;  %vm10267_vm13 = vmmov %vm10255_vm0  ;;  %vm10269_vm5 = vcmp.ne.s16.totalorder %v10268_v9, 0  ;;  %v10270_v19 = vld [vmem:[#allocation62_spill] sm:$0xff]  ;;  %v5495_v50 = vrot.slane %v5493_v32, 1  ;;  %v5491_v36 = vor.u32 %v5489_v61, %v5487_v55 }
 0x1a3   : > { %v5488_v51 = vsel %vm10267_vm13, %v5483_v53, %v5487_v55  ;;  %v5309_v14 = vsel %vm10269_vm5, %v5276_v34, 0  ;;  %vm10271_vm11 = vnez %v10270_v19  ;;  %vm10272_vm12 = vmmov %vm10260_vm3  ;;  %v5503_v7 = vrot.slane %v5501_v2, 1 }
 0x1a4   : > { %v5310_v25 = vsel %vm10271_vm11, %v5277_v42, 0  ;;  %vm10273_vm9 = vmmov %vm10260_vm3  ;;  %v5499_v44 = vor.u32 %v5497_v58, %v5495_v50  ;;  %v5509_v12 = vshll.u32 %v6438_v21, 16  ;;  %v5496_v47 = vsel %vm10255_vm0, %v5491_v36, %v5495_v50 }
 0x1a5   : > { %vm10274_vm8 = vmmov %vm10260_vm3  ;;  %v6439_v28 = vcombine.low %v5309_v14, %v5310_v25  ;;  %v6303_v59 = vcombine.low %v9261_v17, %v9289_v3  ;;  %v5505_v6 = vshrl.u32 %v6437_v48, 16  ;;  %v5513_v22 = vshrl.u32 %v6438_v21, 16 }
 0x1a6   : > { %vm10275_vm6 = vmmov %vm10260_vm3  ;;  %vm10278_vm2 = vnez %v10277_v33  ;;  %v6304_v15 = vcombine.low %v9292_v39, %v9302_v18  ;;  %v5511_v8 = vrot.slane %v5509_v12, 1  ;;  %v6305_v39 = vcombine.low %v9308_v10, %v9342_v62 }
 0x1a7   : > { %vm10276_vm14 = vmmov %vm10255_vm0  ;;  %v5517_v31 = vshll.u32 %v6439_v28, 16  ;;  %v5311_v20 = vsel %vm10278_vm2, %v5278_v26, 0  ;;  %v5507_v54 = vor.u32 %v5505_v6, %v5503_v7  ;;  %v5521_v23 = vshrl.u32 %v6439_v28, 16 }
 0x1a8   : > { %6926 = vmatmul.mubr.msk.bf16.vlgmr.msra.gmra.mrb[16].mxu1 %vm10261_vm10, %v6299_v57  ;;  %v5504_v1 = vsel %vm10276_vm14, %v5499_v44, %v5503_v7  ;;  %v6440_v41 = vcombine.low %v5311_v20, %v5311_v20  ;;  %vm10280_vm10 = vmmov %vm10260_vm3  ;;  %v5515_v17 = vor.u32 %v5513_v22, %v5511_v8 }
 0x1a9   : > { %7058 = vmatmul.mubr.msk.bf16.gmra.mrb[12].mxu0 %vm10259_vm4, %v5464_v4  ;;  %6929 = vmatprep.mubr.msk.bf16.mxu1 %vm10262_vm15, %v6300_v35  ;;  %vm10279_vm4 = vmmov %vm10260_vm3  ;;  %v5519_v3 = vrot.slane %v5517_v31, 1 }
 0x1aa   : > { %7061 = vmatprep.mubr.msk.bf16.mxu0 %vm10260_vm3, %v5472_v46  ;;  %vm10281_vm15 = vmmov %vm10260_vm3  ;;  %v5525_v5 = vshll.u32 %v6440_v41, 16 }
 0x1ab   : > { %vm10282_vm1 = vmmov %vm10255_vm0  ;;  %v5523_v18 = vor.u32 %v5521_v23, %v5519_v3 }
 0x1ac   : > { %v5512_v4 = vsel %vm10282_vm1, %v5507_v54, %v5511_v8  ;;  %vm10283_vm7 = vmmov %vm10255_vm0  ;;  %v5527_v57 = vrot.slane %v5525_v5, 1 }
 0x1ad   : > { %v5520_v56 = vsel %vm10283_vm7, %v5515_v17, %v5519_v3  ;;  %vm10284_vm13 = vmmov %vm10260_vm3 }
 0x1ae   : > { %vm10285_vm5 = vmmov %vm10260_vm3 }
 0x1af   : > { %vm10286_vm11 = vmmov %vm10260_vm3 }
 0x1b0   : > { %6930 = vmatmul.mubr.msk.bf16.gmra.mrb[20].mxu1 %vm10274_vm8, %v6301_v49 }
 0x1b1   : > { %7062 = vmatmul.mubr.msk.bf16.gmra.mrb[16].mxu0 %vm10272_vm12, %v5480_v13  ;;  %6933 = vmatprep.mubr.msk.bf16.mxu1 %vm10275_vm6, %v6302_v0  ;;  %vm10287_vm12 = vmmov %vm10255_vm0 }
 0x1b2   : > { %7065 = vmatprep.mubr.msk.bf16.mxu0 %vm10273_vm9, %v5488_v51  ;;  %v5528_v46 = vsel %vm10287_vm12, %v5523_v18, %v5527_v57  ;;  %vm10288_vm9 = vmmov %vm10260_vm3 }
 0x1b8   : > { %6934 = vmatmul.mubr.msk.bf16.gmra.mrb[24].mxu1 %vm10280_vm10, %v6303_v59 }
 0x1b9   : > { %7066 = vmatmul.mubr.msk.bf16.gmra.mrb[20].mxu0 %vm10279_vm4, %v5496_v47  ;;  %6937 = vmatprep.mubr.msk.bf16.mxu1 %vm10281_vm15, %v6304_v15 }
 0x1ba   : > { %7069 = vmatprep.mubr.msk.bf16.mxu0 %vm10260_vm3, %v5504_v1 }
 0x1c0   : > { %6938 = vmatmul.mubr.msk.bf16.gmra.mrb[28].mxu1 %vm10286_vm11, %v6305_v39 }
 0x1c1   : > { %7070 = vmatmul.mubr.msk.bf16.gmra.mrb[24].mxu0 %vm10284_vm13, %v5512_v4 }
 0x1c2   : > { %7073 = vmatprep.mubr.msk.bf16.mxu0 %vm10285_vm5, %v5520_v56 }
 0x1c9   : > { %7074 = vmatmul.mubr.msk.bf16.gmra.mrb[28].mxu0 %vm10288_vm9, %v5528_v46 }
 0x23b   : > { %v6877_v37 = vpop.f32.mrb[0].mxu1 }
 0x23c   : > { %v3361_v11 = vpop.f32.mrb[1].mxu1 }
 0x23d   : > { %v6878_v35 = vpop.f32.mrb[2].mxu1 }
 0x23e   : > { %v3364_v38 = vpop.f32.mrb[3].mxu1 }
 0x243   : > { %v6881_v27 = vpop.f32.mrb[4].mxu1 }
 0x244   : > { %v3377_v16 = vpop.f32.mrb[5].mxu1 }
 0x245   : > { %v6882_v10 = vpop.f32.mrb[6].mxu1 }
 0x246   : > { %v3380_v62 = vpop.f32.mrb[7].mxu1 }
 0x24b   : > { %v6885_v60 = vpop.f32.mrb[8].mxu1 }
 0x24c   : > { %v3393_v29 = vpop.f32.mrb[9].mxu1 }
 0x24d   : > { %v6886_v40 = vpop.f32.mrb[10].mxu1 }
 0x24e   : > { %v9481_v53 = vpop.f32.mrb[11].mxu1 }
 0x253   : > { %v9483_v55 = vpop.f32.mrb[12].mxu1 }
 0x254   : > { %v9485_v48 = vpop.f32.mrb[13].mxu1 }
 0x255   : > { %v9487_v63 = vpop.f32.mrb[14].mxu1 }
 0x256   : > { %v9489_v24 = vpop.f32.mrb[15].mxu1 }
 0x264   : > { %v7047_v32 = vpop.f32.mrb[0].mxu0 }
 0x265   : > { %v7079_v34 = vadd.f32 %v7047_v32, %v6877_v37  ;;  %v5614_v42 = vpop.f32.mrb[1].mxu0 }
 0x266   : > { %v7080_v13 = vadd.f32 %v5614_v42, %v3361_v11  ;;  %v7048_v61 = vpop.f32.mrb[2].mxu0 }
 0x267   : > { %v7081_v45 = vadd.f32 %v7048_v61, %v6878_v35  ;;  %v5617_v52 = vpop.f32.mrb[3].mxu0  ;;  %v5973_v0 = vmul.f32 %v7079_v34, %v7079_v34 }
 0x268   : > { %v7082_v30 = vadd.f32 %v5617_v52, %v3364_v38  ;;  %v5971_v51 = vmul.f32 %v7080_v13, %v7080_v13 }
 0x269   : > { %v6531_v43 = vpack.c.bf16 %v7081_v45, %v7079_v34  ;;  %v5974_v21 = vmul.f32 %v7081_v45, %v7081_v45 }
 0x26a   : > { %v6526_v49 = vpack.c.bf16 %v7082_v30, %v7080_v13  ;;  %v5933_v58 = vadd.f32 %v7082_v30, %v7080_v13  ;;  %v5972_v2 = vmul.f32 %v7082_v30, %v7082_v30 }
 0x26b   : > { %6603 = vst [vmem:[%s9495_s22 + $0x8] sm:$0xff] %v6531_v43  }
 0x26c   : > { %6527 = vst [vmem:[%s9495_s22] sm:$0xff] %v6526_v49   ;;  %v5934_v9 = vadd.f32 %v7079_v34, %v5933_v58  ;;  %v6003_v14 = vadd.f32 %v5972_v2, %v5971_v51  ;;  %v7051_v19 = vpop.f32.mrb[4].mxu0 }
 0x26d   : > { %v7083_v25 = vadd.f32 %v7051_v19, %v6881_v27  ;;  %v5630_v50 = vpop.f32.mrb[5].mxu0 }
 0x26e   : > { %v6004_v36 = vadd.f32 %v6003_v14, %v5973_v0  ;;  %v7084_v44 = vadd.f32 %v5630_v50, %v3377_v16  ;;  %v5935_v7 = vadd.f32 %v7081_v45, %v5934_v9  ;;  %v7052_v28 = vpop.f32.mrb[6].mxu0 }
 0x26f   : > { %v7085_v26 = vadd.f32 %v7052_v28, %v6882_v10  ;;  %v5633_v12 = vpop.f32.mrb[7].mxu0  ;;  %v5977_v8 = vmul.f32 %v7083_v25, %v7083_v25 }
 0x270   : > { %v5936_v47 = vadd.f32 %v7084_v44, %v5935_v7  ;;  %v5975_v59 = vmul.f32 %v7084_v44, %v7084_v44  ;;  %v6005_v6 = vadd.f32 %v6004_v36, %v5974_v21  ;;  %v7086_v1 = vadd.f32 %v5633_v12, %v3380_v62 }
 0x271   : > { %v6541_v22 = vpack.c.bf16 %v7085_v26, %v7083_v25  ;;  %v5978_v23 = vmul.f32 %v7085_v26, %v7085_v26 }
 0x272   : > { %v6006_v31 = vadd.f32 %v6005_v6, %v5975_v59  ;;  %v6536_v33 = vpack.c.bf16 %v7086_v1, %v7084_v44  ;;  %v5937_v20 = vadd.f32 %v7086_v1, %v5936_v47  ;;  %v5976_v15 = vmul.f32 %v7086_v1, %v7086_v1 }
 0x273   : > { %6605 = vst [vmem:[%s9495_s22 + $0x18] sm:$0xff] %v6541_v22  }
 0x274   : > { %6604 = vst [vmem:[%s9495_s22 + $0x10] sm:$0xff] %v6536_v33   ;;  %v5938_v54 = vadd.f32 %v7083_v25, %v5937_v20  ;;  %v6007_v41 = vadd.f32 %v6006_v31, %v5976_v15  ;;  %v7055_v17 = vpop.f32.mrb[8].mxu0 }
 0x275   : > { %v7087_v3 = vadd.f32 %v7055_v17, %v6885_v60  ;;  %v5646_v4 = vpop.f32.mrb[9].mxu0 }
 0x276   : > { %v6008_v5 = vadd.f32 %v6007_v41, %v5977_v8  ;;  %v7088_v56 = vadd.f32 %v5646_v4, %v3393_v29  ;;  %v5939_v39 = vadd.f32 %v7085_v26, %v5938_v54  ;;  %v7056_v18 = vpop.f32.mrb[10].mxu0 }
 0x277   : > { %v7089_v57 = vadd.f32 %v7056_v18, %v6886_v40  ;;  %v5649_v46 = vpop.f32.mrb[11].mxu0  ;;  %v5981_v32 = vmul.f32 %v7087_v3, %v7087_v3 }
 0x278   : > { %v5940_v37 = vadd.f32 %v7088_v56, %v5939_v39  ;;  %v5979_v11 = vmul.f32 %v7088_v56, %v7088_v56  ;;  %v6009_v35 = vadd.f32 %v6008_v5, %v5978_v23  ;;  %v7090_v38 = vadd.f32 %v5649_v46, %v9481_v53 }
 0x279   : > { %v6551_v27 = vpack.c.bf16 %v7089_v57, %v7087_v3  ;;  %v5982_v61 = vmul.f32 %v7089_v57, %v7089_v57 }
 0x27a   : > { %v6010_v16 = vadd.f32 %v6009_v35, %v5979_v11  ;;  %v6546_v10 = vpack.c.bf16 %v7090_v38, %v7088_v56  ;;  %v5941_v62 = vadd.f32 %v7090_v38, %v5940_v37  ;;  %v5980_v60 = vmul.f32 %v7090_v38, %v7090_v38 }
 0x27b   : > { %6607 = vst [vmem:[%s9495_s22 + $0x28] sm:$0xff] %v6551_v27   ;;  %v6927_v43 = vpop.f32.mrb[16].mxu1 }
 0x27c   : > { %6606 = vst [vmem:[%s9495_s22 + $0x20] sm:$0xff] %v6546_v10   ;;  %v5942_v34 = vadd.f32 %v7087_v3, %v5941_v62  ;;  %v6011_v29 = vadd.f32 %v6010_v16, %v5980_v60  ;;  %v7059_v42 = vpop.f32.mrb[12].mxu0  ;;  %v3751_v58 = vpop.f32.mrb[17].mxu1 }
 0x27d   : > { %v7091_v13 = vadd.f32 %v7059_v42, %v9483_v55  ;;  %v5662_v40 = vpop.f32.mrb[13].mxu0  ;;  %v6928_v55 = vpop.f32.mrb[18].mxu1 }
 0x27e   : > { %v6012_v45 = vadd.f32 %v6011_v29, %v5981_v32  ;;  %v7092_v52 = vadd.f32 %v5662_v40, %v9485_v48  ;;  %v5943_v30 = vadd.f32 %v7089_v57, %v5942_v34  ;;  %v7060_v53 = vpop.f32.mrb[14].mxu0  ;;  %v3754_v25 = vpop.f32.mrb[19].mxu1 }
 0x27f   : > { %v7093_v51 = vadd.f32 %v7060_v53, %v9487_v63  ;;  %v5665_v49 = vpop.f32.mrb[15].mxu0  ;;  %v5985_v44 = vmul.f32 %v7091_v13, %v7091_v13 }
 0x280   : > { %v5944_v2 = vadd.f32 %v7092_v52, %v5943_v30  ;;  %v5983_v0 = vmul.f32 %v7092_v52, %v7092_v52  ;;  %v6013_v9 = vadd.f32 %v6012_v45, %v5982_v61  ;;  %v7094_v14 = vadd.f32 %v5665_v49, %v9489_v24 }
 0x281   : > { %v6561_v19 = vpack.c.bf16 %v7093_v51, %v7091_v13  ;;  %v5986_v47 = vmul.f32 %v7093_v51, %v7093_v51 }
 0x282   : > { %v6014_v50 = vadd.f32 %v6013_v9, %v5983_v0  ;;  %v6556_v21 = vpack.c.bf16 %v7094_v14, %v7092_v52  ;;  %v5945_v48 = vadd.f32 %v7094_v14, %v5944_v2  ;;  %v5984_v36 = vmul.f32 %v7094_v14, %v7094_v14 }
 0x283   : > { %6609 = vst [vmem:[%s9495_s22 + $0x38] sm:$0xff] %v6561_v19   ;;  %v6931_v22 = vpop.f32.mrb[20].mxu1 }
 0x284   : > { %6608 = vst [vmem:[%s9495_s22 + $0x30] sm:$0xff] %v6556_v21   ;;  %v5946_v7 = vadd.f32 %v7091_v13, %v5945_v48  ;;  %v6015_v63 = vadd.f32 %v6014_v50, %v5984_v36  ;;  %v7063_v28 = vpop.f32.mrb[16].mxu0  ;;  %v3767_v20 = vpop.f32.mrb[21].mxu1 }
 0x285   : > { %v7095_v26 = vadd.f32 %v7063_v28, %v6927_v43  ;;  %v5678_v12 = vpop.f32.mrb[17].mxu0  ;;  %v6932_v17 = vpop.f32.mrb[22].mxu1 }
 0x286   : > { %v6016_v59 = vadd.f32 %v6015_v63, %v5985_v44  ;;  %v7096_v6 = vadd.f32 %v5678_v12, %v3751_v58  ;;  %v5947_v1 = vadd.f32 %v7093_v51, %v5946_v7  ;;  %v7064_v24 = vpop.f32.mrb[18].mxu0  ;;  %v3770_v4 = vpop.f32.mrb[23].mxu1 }
 0x287   : > { %v7097_v31 = vadd.f32 %v7064_v24, %v6928_v55  ;;  %v5681_v33 = vpop.f32.mrb[19].mxu0  ;;  %v5989_v18 = vmul.f32 %v7095_v26, %v7095_v26 }
 0x288   : > { %v5948_v15 = vadd.f32 %v7096_v6, %v5947_v1  ;;  %v5987_v8 = vmul.f32 %v7096_v6, %v7096_v6  ;;  %v6017_v54 = vadd.f32 %v6016_v59, %v5986_v47  ;;  %v7098_v41 = vadd.f32 %v5681_v33, %v3754_v25 }
 0x289   : > { %v6571_v3 = vpack.c.bf16 %v7097_v31, %v7095_v26  ;;  %v5990_v38 = vmul.f32 %v7097_v31, %v7097_v31 }
 0x28a   : > { %v6018_v23 = vadd.f32 %v6017_v54, %v5987_v8  ;;  %v6566_v5 = vpack.c.bf16 %v7098_v41, %v7096_v6  ;;  %v5949_v56 = vadd.f32 %v7098_v41, %v5948_v15  ;;  %v5988_v39 = vmul.f32 %v7098_v41, %v7098_v41 }
 0x28b   : > { %6611 = vst [vmem:[%s9495_s22 + $0x48] sm:$0xff] %v6571_v3   ;;  %v6935_v60 = vpop.f32.mrb[24].mxu1 }
 0x28c   : > { %6610 = vst [vmem:[%s9495_s22 + $0x40] sm:$0xff] %v6566_v5   ;;  %v5950_v57 = vadd.f32 %v7095_v26, %v5949_v56  ;;  %v6019_v46 = vadd.f32 %v6018_v23, %v5988_v39  ;;  %v7067_v37 = vpop.f32.mrb[20].mxu0  ;;  %v3783_v29 = vpop.f32.mrb[25].mxu1 }
 0x28d   : > { %v7099_v11 = vadd.f32 %v7067_v37, %v6931_v22  ;;  %v5694_v35 = vpop.f32.mrb[21].mxu0  ;;  %v6936_v45 = vpop.f32.mrb[26].mxu1 }
 0x28e   : > { %v6020_v27 = vadd.f32 %v6019_v46, %v5989_v18  ;;  %v7100_v16 = vadd.f32 %v5694_v35, %v3767_v20  ;;  %v5951_v10 = vadd.f32 %v7097_v31, %v5950_v57  ;;  %v7068_v62 = vpop.f32.mrb[22].mxu0  ;;  %v3786_v30 = vpop.f32.mrb[27].mxu1 }
 0x28f   : > { %v7101_v32 = vadd.f32 %v7068_v62, %v6932_v17  ;;  %v5697_v34 = vpop.f32.mrb[23].mxu0  ;;  %v5993_v58 = vmul.f32 %v7099_v11, %v7099_v11 }
 0x290   : > { %v5952_v42 = vadd.f32 %v7100_v16, %v5951_v10  ;;  %v5991_v13 = vmul.f32 %v7100_v16, %v7100_v16  ;;  %v6021_v40 = vadd.f32 %v6020_v27, %v5990_v38  ;;  %v7102_v61 = vadd.f32 %v5697_v34, %v3770_v4 }
 0x291   : > { %v6581_v52 = vpack.c.bf16 %v7101_v32, %v7099_v11  ;;  %v5994_v19 = vmul.f32 %v7101_v32, %v7101_v32 }
 0x292   : > { %v6022_v53 = vadd.f32 %v6021_v40, %v5991_v13  ;;  %v6576_v43 = vpack.c.bf16 %v7102_v61, %v7100_v16  ;;  %v5953_v51 = vadd.f32 %v7102_v61, %v5952_v42  ;;  %v5992_v49 = vmul.f32 %v7102_v61, %v7102_v61 }
 0x293   : > { %6613 = vst [vmem:[%s9495_s22 + $0x58] sm:$0xff] %v6581_v52   ;;  %v6939_v36 = vpop.f32.mrb[28].mxu1 }
 0x294   : > { %6612 = vst [vmem:[%s9495_s22 + $0x50] sm:$0xff] %v6576_v43   ;;  %v5954_v2 = vadd.f32 %v7099_v11, %v5953_v51  ;;  %v6023_v0 = vadd.f32 %v6022_v53, %v5992_v49  ;;  %v7071_v9 = vpop.f32.mrb[24].mxu0  ;;  %v3799_v63 = vpop.f32.mrb[29].mxu1 }
 0x295   : > { %v7103_v14 = vadd.f32 %v7071_v9, %v6935_v60  ;;  %v5710_v55 = vpop.f32.mrb[25].mxu0  ;;  %v6940_v59 = vpop.f32.mrb[30].mxu1 }
 0x296   : > { %v6024_v25 = vadd.f32 %v6023_v0, %v5993_v58  ;;  %v7104_v50 = vadd.f32 %v5710_v55, %v3783_v29  ;;  %v5955_v21 = vadd.f32 %v7101_v32, %v5954_v2  ;;  %v7072_v48 = vpop.f32.mrb[26].mxu0  ;;  %v3802_v1 = vpop.f32.mrb[31].mxu1 }
 0x297   : > { %v7105_v44 = vadd.f32 %v7072_v48, %v6936_v45  ;;  %v5713_v7 = vpop.f32.mrb[27].mxu0  ;;  %v5997_v20 = vmul.f32 %v7103_v14, %v7103_v14 }
 0x298   : > { %v5956_v28 = vadd.f32 %v7104_v50, %v5955_v21  ;;  %v5995_v26 = vmul.f32 %v7104_v50, %v7104_v50  ;;  %v6025_v12 = vadd.f32 %v6024_v25, %v5994_v19  ;;  %v7106_v47 = vadd.f32 %v5713_v7, %v3786_v30 }
 0x299   : > { %v6591_v6 = vpack.c.bf16 %v7105_v44, %v7103_v14  ;;  %v5998_v3 = vmul.f32 %v7105_v44, %v7105_v44 }
 0x29a   : > { %v6026_v24 = vadd.f32 %v6025_v12, %v5995_v26  ;;  %v6586_v22 = vpack.c.bf16 %v7106_v47, %v7104_v50  ;;  %v5957_v31 = vadd.f32 %v7106_v47, %v5956_v28  ;;  %v5996_v33 = vmul.f32 %v7106_v47, %v7106_v47 }
 0x29b   : > { %6615 = vst [vmem:[%s9495_s22 + $0x68] sm:$0xff] %v6591_v6  }
 0x29c   : > { %6614 = vst [vmem:[%s9495_s22 + $0x60] sm:$0xff] %v6586_v22   ;;  %v5958_v15 = vadd.f32 %v7103_v14, %v5957_v31  ;;  %v6027_v8 = vadd.f32 %v6026_v24, %v5996_v33  ;;  %v7075_v54 = vpop.f32.mrb[28].mxu0 }
 0x29d   : > { %v7107_v41 = vadd.f32 %v7075_v54, %v6939_v36  ;;  %v5726_v17 = vpop.f32.mrb[29].mxu0 }
 0x29e   : > { %v6028_v4 = vadd.f32 %v6027_v8, %v5997_v20  ;;  %v7108_v23 = vadd.f32 %v5726_v17, %v3799_v63  ;;  %v5959_v5 = vadd.f32 %v7105_v44, %v5958_v15  ;;  %v7076_v56 = vpop.f32.mrb[30].mxu0 }
 0x29f   : > { %v7109_v39 = vadd.f32 %v7076_v56, %v6940_v59  ;;  %v5729_v18 = vpop.f32.mrb[31].mxu0  ;;  %v6001_v62 = vmul.f32 %v7107_v41, %v7107_v41 }
 0x2a0   : > { %v5960_v57 = vadd.f32 %v7108_v23, %v5959_v5  ;;  %v5999_v46 = vmul.f32 %v7108_v23, %v7108_v23  ;;  %v6029_v37 = vadd.f32 %v6028_v4, %v5998_v3  ;;  %v7110_v11 = vadd.f32 %v5729_v18, %v3802_v1 }
 0x2a1   : > { %v6601_v35 = vpack.c.bf16 %v7109_v39, %v7107_v41  ;;  %v6002_v34 = vmul.f32 %v7109_v39, %v7109_v39 }
 0x2a2   : > { %v6030_v38 = vadd.f32 %v6029_v37, %v5999_v46  ;;  %v6596_v27 = vpack.c.bf16 %v7110_v11, %v7108_v23  ;;  %v5961_v16 = vadd.f32 %v7110_v11, %v5960_v57  ;;  %v6000_v10 = vmul.f32 %v7110_v11, %v7110_v11 }
 0x2a3   : > { %6617 = vst [vmem:[%s9495_s22 + $0x78] sm:$0xff] %v6601_v35  }
 0x2a4   : > { %6616 = vst [vmem:[%s9495_s22 + $0x70] sm:$0xff] %v6596_v27   ;;  %v5962_v60 = vadd.f32 %v7107_v41, %v5961_v16  ;;  %v6031_v32 = vadd.f32 %v6030_v38, %v6000_v10 }
 0x2a6   : > { %v5963_v29 = vadd.f32 %v7109_v39, %v5962_v60  ;;  %v6032_v42 = vadd.f32 %v6031_v32, %v6001_v62 }
 0x2a8   : > { %v5964_v13 = vrot.slane %v5963_v29, 4  ;;  %v6033_v40 = vadd.f32 %v6032_v42, %v6002_v34 }
 0x2aa   : > { %v5965_v61 = vadd.f32 %v5964_v13, %v5963_v29  ;;  %v6034_v45 = vrot.slane %v6033_v40, 4 }
 0x2ac   : > { %v5966_v52 = vrot.slane %v5965_v61, 2  ;;  %v6035_v30 = vadd.f32 %v6034_v45, %v6033_v40 }
 0x2ae   : > { %v5967_v53 = vadd.f32 %v5966_v52, %v5965_v61  ;;  %v6036_v43 = vrot.slane %v6035_v30, 2 }
 0x2b0   : > { %v5968_v51 = vrot.slane %v5967_v53, 1  ;;  %v6037_v49 = vadd.f32 %v6036_v43, %v6035_v30 }
 0x2b2   : > { %v5969_v58 = vadd.f32 %v5968_v51, %v5967_v53  ;;  %v6038_v2 = vrot.slane %v6037_v49, 1 }
 0x2b4   : > { %5970 = vst [vmem:[%s212_s25] sm:$0x1] %v5969_v58  ;;  %v6039_v0 = vadd.f32 %v6038_v2, %v6037_v49 }
 0x2b6   : > { %6040 = vst [vmem:[%s215_s28] sm:$0x1] %v6039_v0 }
 0x2b7 PF: > { %s15_s15 = sadd.s32 1, %s7414_s15  }
 0x2b8   : > { %p12_p5 = scmp.ge.s32.totalorder %s15_s15, 4  }
 0x2ba   :  { %14 = sbr.rel (!%p12_p5) target bundleno = 1 (0x1), region = 90 }

</bundles_post_ra>
